<compile_context>
chip_gen: v7x
topology: tpu7x:2x2x1
jax: 0.10.0
libtpu: 0.0.40
codegen_flags: <defaults>
</compile_context>

<pallas_src>
import jax
import jax.numpy as jnp
import numpy as np
from jax.experimental import pallas as pl
from jax.experimental.pallas import tpu as pltpu

beta = 0.95
threshold = 1.0
num_inputs = 28 * 28      # 784
num_hidden = 1000
num_outputs = 10
num_steps = 25

# Lane/sublane-aligned padded sizes used inside the kernel.
IN_P = 896                # 784  -> next multiple of 128
HID_P = 1024              # 1000 -> next multiple of 128
OUT_P = 128               # 10   -> one full lane width
MAX_B_TILE = 256          # batch rows per grid step for large batches


def _round_up(x, m):
    return (x + m - 1) // m * m


def snn_kernel(x_ref, w1_ref, b1_ref, w2_ref, b2_ref, mem_ref):
    """One batch-tile of the whole SNN forward.

    x_ref : (Bt, IN_P)      bf16  (zero-padded flattened input tile)
    w1_ref: (IN_P, HID_P)   bf16  b1_ref: (1, HID_P) f32
    w2_ref: (HID_P, OUT_P)  bf16  b2_ref: (1, OUT_P) f32
    mem_ref: (num_steps, Bt, OUT_P) f32 output block (lif2 membrane record)
    """
    Bt = x_ref.shape[0]

    # ---- hoisted: cur1 = fc1(x) is identical for every time step ----
    cur1 = jnp.dot(x_ref[...], w1_ref[...],
                   preferred_element_type=jnp.float32) + b1_ref[...]

    # ---- hoisted loads / broadcasts for the per-step fc2 ----
    w2 = w2_ref[...]
    b2 = b2_ref[...]

    mem1 = jnp.zeros((Bt, HID_P), jnp.float32)
    mem2 = jnp.zeros((Bt, OUT_P), jnp.float32)
    # reset_t == spk_{t-1}; initial membranes are 0 so initial resets are 0.
    spk1 = jnp.zeros((Bt, HID_P), jnp.float32)
    spk2 = jnp.zeros((Bt, OUT_P), jnp.float32)

    # Fully unrolled static time loop; fine at small batch tiles.
    # TODO(synk): switch to lax.fori_loop(unroll=2-4) if B_tile is enlarged a
    # lot, to bound live ranges (per perf review); negligible at Bt=8.
    for t in range(num_steps):
        # lif1 (subtract reset, reset driven by previous spike/membrane)
        mem1 = beta * mem1 + cur1 - spk1 * threshold
        spk1 = (mem1 > threshold).astype(jnp.float32)

        # fc2 on the MXU: 0/1 spikes are exact in bf16, accumulate in f32.
        cur2 = jnp.dot(spk1.astype(jnp.bfloat16), w2,
                       preferred_element_type=jnp.float32) + b2

        # lif2
        mem2 = beta * mem2 + cur2 - spk2 * threshold
        spk2 = (mem2 > threshold).astype(jnp.float32)

        # Record only the membrane; spikes are recovered exactly outside.
        mem_ref[t, :, :] = mem2


def prepare_params(w1, b1, w2, b2):
    """Pad + cast parameters ONCE (outside the jitted forward).

    Zero padding is exact: padded input columns / weight rows contribute 0 to
    the matmuls and padded hidden/output lanes never cross threshold.
    """
    w1p = jnp.zeros((IN_P, HID_P), jnp.bfloat16).at[
        :num_inputs, :num_hidden].set(w1.astype(jnp.bfloat16))
    b1p = jnp.zeros((1, HID_P), jnp.float32).at[0, :num_hidden].set(b1)
    w2p = jnp.zeros((HID_P, OUT_P), jnp.bfloat16).at[
        :num_hidden, :num_outputs].set(w2.astype(jnp.bfloat16))
    b2p = jnp.zeros((1, OUT_P), jnp.float32).at[0, :num_outputs].set(b2)
    return w1p, b1p, w2p, b2p


@jax.jit
def snn_forward(x_nchw, w1p, b1p, w2p, b2p):
    B = x_nchw.shape[0]

    # Batch tiling: single tile for small batches, 256-row tiles (grid,
    # "parallel" -> megacore-shardable on v7x) for large batches.
    if B <= MAX_B_TILE:
        b_tile = _round_up(max(B, 8), 8)
        B_P = b_tile
    else:
        b_tile = MAX_B_TILE
        B_P = _round_up(B, b_tile)
    grid = (B_P // b_tile,)

    # Per-call input pad + cast (tiny: B_P x 896 bf16).
    x = x_nchw.reshape(B, -1)
    xp = jnp.zeros((B_P, IN_P), jnp.bfloat16).at[
        :B, :num_inputs].set(x.astype(jnp.bfloat16))

    mem_slab = pl.pallas_call(
        snn_kernel,
        out_shape=jax.ShapeDtypeStruct((num_steps, B_P, OUT_P), jnp.float32),
        grid_spec=pltpu.PrefetchScalarGridSpec(
            num_scalar_prefetch=0,
            grid=grid,
            in_specs=[
                pl.BlockSpec((b_tile, IN_P), lambda i: (i, 0)),     # x tile
                pl.BlockSpec((IN_P, HID_P), lambda i: (0, 0)),      # w1 (resident)
                pl.BlockSpec((1, HID_P), lambda i: (0, 0)),         # b1 (resident)
                pl.BlockSpec((HID_P, OUT_P), lambda i: (0, 0)),     # w2 (resident)
                pl.BlockSpec((1, OUT_P), lambda i: (0, 0)),         # b2 (resident)
            ],
            out_specs=pl.BlockSpec((num_steps, b_tile, OUT_P),
                                   lambda i: (0, i, 0)),
        ),
        compiler_params=pltpu.CompilerParams(
            dimension_semantics=("parallel",)),
    )(xp, w1p, b1p, w2p, b2p)

    mem = mem_slab[:, :B, :num_outputs]
    # Exact identity: spk2_t = Heaviside(mem2_t - threshold).
    spk = (mem > threshold).astype(jnp.float32)
    return spk, mem


def ref_forward(x_nchw, w1, b1, w2, b2):
    """Pure-JAX reference matching the kernel's precision choices
    (bf16 MXU operands, f32 accumulation and f32 LIF state)."""
    B = x_nchw.shape[0]
    x = x_nchw.reshape(B, -1).astype(jnp.bfloat16)
    w1b = w1.astype(jnp.bfloat16)
    w2b = w2.astype(jnp.bfloat16)
    mem1 = jnp.zeros((B, num_hidden), jnp.float32)
    mem2 = jnp.zeros((B, num_outputs), jnp.float32)
    spk1 = jnp.zeros((B, num_hidden), jnp.float32)
    spk2 = jnp.zeros((B, num_outputs), jnp.float32)
    cur1 = jnp.dot(x, w1b, preferred_element_type=jnp.float32) + b1
    spks, mems = [], []
    for _ in range(num_steps):
        mem1 = beta * mem1 + cur1 - spk1 * threshold
        spk1 = (mem1 > threshold).astype(jnp.float32)
        cur2 = jnp.dot(spk1.astype(jnp.bfloat16), w2b,
                       preferred_element_type=jnp.float32) + b2
        mem2 = beta * mem2 + cur2 - spk2 * threshold
        spk2 = (mem2 > threshold).astype(jnp.float32)
        spks.append(spk2)
        mems.append(mem2)
    return jnp.stack(spks, axis=0), jnp.stack(mems, axis=0)


if __name__ == "__main__":
    key = jax.random.PRNGKey(0)
    k1, k2, k3, k4, kx = jax.random.split(key, 5)

    # Deterministic parameter init, mimicking nn.Linear: U(-1/sqrt(fan_in), +).
    lim1 = 1.0 / float(np.sqrt(num_inputs))
    lim2 = 1.0 / float(np.sqrt(num_hidden))
    w1 = jax.random.uniform(k1, (num_inputs, num_hidden), jnp.float32, -lim1, lim1)
    b1 = jax.random.uniform(k2, (num_hidden,), jnp.float32, -lim1, lim1)
    w2 = jax.random.uniform(k3, (num_hidden, num_outputs), jnp.float32, -lim2, lim2)
    b2 = jax.random.uniform(k4, (num_outputs,), jnp.float32, -lim2, lim2)

    batch = 2
    x = jax.random.normal(kx, (batch, 1, 28, 28), jnp.float32)  # NCHW

    # Pad / cast weights once (cached outside the jitted forward).
    w1p, b1p, w2p, b2p = jax.block_until_ready(prepare_params(w1, b1, w2, b2))

    spk2_rec, mem2_rec = snn_forward(x, w1p, b1p, w2p, b2p)
    spk2_rec, mem2_rec = jax.block_until_ready((spk2_rec, mem2_rec))

    # Sanity checks against the matched-precision pure-JAX reference
    # (tolerant to rare spike flips from differing matmul accumulation order
    # near threshold).
    spk_r, mem_r = ref_forward(x, w1, b1, w2, b2)
    assert spk2_rec.shape == (num_steps, batch, num_outputs)
    assert mem2_rec.shape == (num_steps, batch, num_outputs)
    assert bool(jnp.all(jnp.isfinite(mem2_rec)))
    spike_mismatch = float(jnp.mean(jnp.abs(spk2_rec - spk_r)))
    mem_err = float(jnp.mean(jnp.abs(mem2_rec - mem_r)))
    assert spike_mismatch < 0.05, f"spike mismatch fraction {spike_mismatch}"
    assert mem_err < 0.05, f"mem mean abs error {mem_err}"

    print("KERNEL_OK")
</pallas_src>

<mosaic_0001>
module attributes {stable_mosaic.version = 11 : i64} {
  func.func @snn_kernel(%arg0: i32, %arg1: memref<8x896xbf16, #tpu.memory_space<vmem>>, %arg2: memref<896x1024xbf16, #tpu.memory_space<vmem>>, %arg3: memref<1x1024xf32, #tpu.memory_space<vmem>>, %arg4: memref<1024x128xbf16, #tpu.memory_space<vmem>>, %arg5: memref<1x128xf32, #tpu.memory_space<vmem>>, %arg6: memref<25x8x128xf32, #tpu.memory_space<vmem>>) attributes {dimension_semantics = [#tpu.dimension_semantics<parallel>], iteration_bounds = array<i64: 1>, scalar_prefetch = 0 : i64, scratch_operands = 0 : i64, tpu.core_type = #tpu.core_type<tc>, window_params = [{transform_indices = @transform_0, window_bounds = array<i64: 8, 896>}, {pipeline_mode = #tpu.pipeline_mode<synchronous>, transform_indices = @transform_1, window_bounds = array<i64: 896, 1024>}, {pipeline_mode = #tpu.pipeline_mode<synchronous>, transform_indices = @transform_2, window_bounds = array<i64: 1, 1024>}, {pipeline_mode = #tpu.pipeline_mode<synchronous>, transform_indices = @transform_3, window_bounds = array<i64: 1024, 128>}, {pipeline_mode = #tpu.pipeline_mode<synchronous>, transform_indices = @transform_4, window_bounds = array<i64: 1, 128>}, {transform_indices = @transform_5, window_bounds = array<i64: 25, 8, 128>}]} {
    %c0 = arith.constant 0 : index
    %c0_0 = arith.constant 0 : index
    %0 = vector.load %arg1[%c0, %c0_0] : memref<8x896xbf16, #tpu.memory_space<vmem>>, vector<8x896xbf16>
    %c0_1 = arith.constant 0 : index
    %c0_2 = arith.constant 0 : index
    %1 = vector.load %arg2[%c0_1, %c0_2] : memref<896x1024xbf16, #tpu.memory_space<vmem>>, vector<896x1024xbf16>
    %cst = arith.constant dense<0.000000e+00> : vector<8x1024xf32>
    %2 = tpu.matmul %0, %1, %cst {dimension_numbers = #tpu.dot_dimension_numbers<[1], [0], [0], [1], [0, 0, 1, 1], [], []>} : vector<8x896xbf16>, vector<896x1024xbf16>, vector<8x1024xf32> -> vector<8x1024xf32>
    %c0_3 = arith.constant 0 : index
    %c0_4 = arith.constant 0 : index
    %3 = vector.load %arg3[%c0_3, %c0_4] : memref<1x1024xf32, #tpu.memory_space<vmem>>, vector<1x1024xf32>
    %4 = vector.broadcast %3 : vector<1x1024xf32> to vector<8x1024xf32>
    %5 = arith.addf %2, %4 : vector<8x1024xf32>
    %c0_5 = arith.constant 0 : index
    %c0_6 = arith.constant 0 : index
    %6 = vector.load %arg4[%c0_5, %c0_6] : memref<1024x128xbf16, #tpu.memory_space<vmem>>, vector<1024x128xbf16>
    %c0_7 = arith.constant 0 : index
    %c0_8 = arith.constant 0 : index
    %7 = vector.load %arg5[%c0_7, %c0_8] : memref<1x128xf32, #tpu.memory_space<vmem>>, vector<1x128xf32>
    %cst_9 = arith.constant 0.000000e+00 : f32
    %8 = vector.broadcast %cst_9 : f32 to vector<8x1024xf32>
    %cst_10 = arith.constant 0.000000e+00 : f32
    %9 = vector.broadcast %cst_10 : f32 to vector<8x128xf32>
    %cst_11 = arith.constant 0.000000e+00 : f32
    %10 = vector.broadcast %cst_11 : f32 to vector<8x1024xf32>
    %cst_12 = arith.constant 0.000000e+00 : f32
    %11 = vector.broadcast %cst_12 : f32 to vector<8x128xf32>
    %cst_13 = arith.constant 0.949999988 : f32
    %12 = vector.broadcast %cst_13 : f32 to vector<8x1024xf32>
    %13 = arith.mulf %12, %8 : vector<8x1024xf32>
    %14 = arith.addf %13, %5 : vector<8x1024xf32>
    %cst_14 = arith.constant 1.000000e+00 : f32
    %15 = vector.broadcast %cst_14 : f32 to vector<8x1024xf32>
    %16 = arith.mulf %10, %15 : vector<8x1024xf32>
    %17 = arith.subf %14, %16 : vector<8x1024xf32>
    %cst_15 = arith.constant 1.000000e+00 : f32
    %18 = vector.broadcast %cst_15 : f32 to vector<8x1024xf32>
    %19 = arith.cmpf ogt, %17, %18 : vector<8x1024xf32>
    %20 = arith.extui %19 : vector<8x1024xi1> to vector<8x1024xi32>
    %21 = arith.sitofp %20 : vector<8x1024xi32> to vector<8x1024xf32>
    %22 = arith.truncf %21 : vector<8x1024xf32> to vector<8x1024xbf16>
    %cst_16 = arith.constant dense<0.000000e+00> : vector<8x128xf32>
    %23 = tpu.matmul %22, %6, %cst_16 {dimension_numbers = #tpu.dot_dimension_numbers<[1], [0], [0], [1], [0, 0, 1, 1], [], []>} : vector<8x1024xbf16>, vector<1024x128xbf16>, vector<8x128xf32> -> vector<8x128xf32>
    %24 = vector.broadcast %7 : vector<1x128xf32> to vector<8x128xf32>
    %25 = arith.addf %23, %24 : vector<8x128xf32>
    %cst_17 = arith.constant 0.949999988 : f32
    %26 = vector.broadcast %cst_17 : f32 to vector<8x128xf32>
    %27 = arith.mulf %26, %9 : vector<8x128xf32>
    %28 = arith.addf %27, %25 : vector<8x128xf32>
    %cst_18 = arith.constant 1.000000e+00 : f32
    %29 = vector.broadcast %cst_18 : f32 to vector<8x128xf32>
    %30 = arith.mulf %11, %29 : vector<8x128xf32>
    %31 = arith.subf %28, %30 : vector<8x128xf32>
    %cst_19 = arith.constant 1.000000e+00 : f32
    %32 = vector.broadcast %cst_19 : f32 to vector<8x128xf32>
    %33 = arith.cmpf ogt, %31, %32 : vector<8x128xf32>
    %34 = arith.extui %33 : vector<8x128xi1> to vector<8x128xi32>
    %35 = arith.sitofp %34 : vector<8x128xi32> to vector<8x128xf32>
    %c0_20 = arith.constant 0 : index
    %c0_21 = arith.constant 0 : index
    %c0_22 = arith.constant 0 : index
    %36 = vector.load %arg6[%c0_20, %c0_21, %c0_22] : memref<25x8x128xf32, #tpu.memory_space<vmem>>, vector<1x8x128xf32>
    %37 = vector.shape_cast %36 : vector<1x8x128xf32> to vector<8x128xf32>
    %38 = vector.shape_cast %31 : vector<8x128xf32> to vector<1x8x128xf32>
    tpu.vector_store %arg6[%c0_20, %c0_21, %c0_22], %38 {strides = array<i32>} : memref<25x8x128xf32, #tpu.memory_space<vmem>>, vector<1x8x128xf32>,
    %cst_23 = arith.constant 0.949999988 : f32
    %39 = vector.broadcast %cst_23 : f32 to vector<8x1024xf32>
    %40 = arith.mulf %39, %17 : vector<8x1024xf32>
    %41 = arith.addf %40, %5 : vector<8x1024xf32>
    %cst_24 = arith.constant 1.000000e+00 : f32
    %42 = vector.broadcast %cst_24 : f32 to vector<8x1024xf32>
    %43 = arith.mulf %21, %42 : vector<8x1024xf32>
    %44 = arith.subf %41, %43 : vector<8x1024xf32>
    %cst_25 = arith.constant 1.000000e+00 : f32
    %45 = vector.broadcast %cst_25 : f32 to vector<8x1024xf32>
    %46 = arith.cmpf ogt, %44, %45 : vector<8x1024xf32>
    %47 = arith.extui %46 : vector<8x1024xi1> to vector<8x1024xi32>
    %48 = arith.sitofp %47 : vector<8x1024xi32> to vector<8x1024xf32>
    %49 = arith.truncf %48 : vector<8x1024xf32> to vector<8x1024xbf16>
    %cst_26 = arith.constant dense<0.000000e+00> : vector<8x128xf32>
    %50 = tpu.matmul %49, %6, %cst_26 {dimension_numbers = #tpu.dot_dimension_numbers<[1], [0], [0], [1], [0, 0, 1, 1], [], []>} : vector<8x1024xbf16>, vector<1024x128xbf16>, vector<8x128xf32> -> vector<8x128xf32>
    %51 = vector.broadcast %7 : vector<1x128xf32> to vector<8x128xf32>
    %52 = arith.addf %50, %51 : vector<8x128xf32>
    %cst_27 = arith.constant 0.949999988 : f32
    %53 = vector.broadcast %cst_27 : f32 to vector<8x128xf32>
    %54 = arith.mulf %53, %31 : vector<8x128xf32>
    %55 = arith.addf %54, %52 : vector<8x128xf32>
    %cst_28 = arith.constant 1.000000e+00 : f32
    %56 = vector.broadcast %cst_28 : f32 to vector<8x128xf32>
    %57 = arith.mulf %35, %56 : vector<8x128xf32>
    %58 = arith.subf %55, %57 : vector<8x128xf32>
    %cst_29 = arith.constant 1.000000e+00 : f32
    %59 = vector.broadcast %cst_29 : f32 to vector<8x128xf32>
    %60 = arith.cmpf ogt, %58, %59 : vector<8x128xf32>
    %61 = arith.extui %60 : vector<8x128xi1> to vector<8x128xi32>
    %62 = arith.sitofp %61 : vector<8x128xi32> to vector<8x128xf32>
    %c1 = arith.constant 1 : index
    %c0_30 = arith.constant 0 : index
    %c0_31 = arith.constant 0 : index
    %63 = vector.load %arg6[%c1, %c0_30, %c0_31] : memref<25x8x128xf32, #tpu.memory_space<vmem>>, vector<1x8x128xf32>
    %64 = vector.shape_cast %63 : vector<1x8x128xf32> to vector<8x128xf32>
    %65 = vector.shape_cast %58 : vector<8x128xf32> to vector<1x8x128xf32>
    tpu.vector_store %arg6[%c1, %c0_30, %c0_31], %65 {strides = array<i32>} : memref<25x8x128xf32, #tpu.memory_space<vmem>>, vector<1x8x128xf32>,
    %cst_32 = arith.constant 0.949999988 : f32
    %66 = vector.broadcast %cst_32 : f32 to vector<8x1024xf32>
    %67 = arith.mulf %66, %44 : vector<8x1024xf32>
    %68 = arith.addf %67, %5 : vector<8x1024xf32>
    %cst_33 = arith.constant 1.000000e+00 : f32
    %69 = vector.broadcast %cst_33 : f32 to vector<8x1024xf32>
    %70 = arith.mulf %48, %69 : vector<8x1024xf32>
    %71 = arith.subf %68, %70 : vector<8x1024xf32>
    %cst_34 = arith.constant 1.000000e+00 : f32
    %72 = vector.broadcast %cst_34 : f32 to vector<8x1024xf32>
    %73 = arith.cmpf ogt, %71, %72 : vector<8x1024xf32>
    %74 = arith.extui %73 : vector<8x1024xi1> to vector<8x1024xi32>
    %75 = arith.sitofp %74 : vector<8x1024xi32> to vector<8x1024xf32>
    %76 = arith.truncf %75 : vector<8x1024xf32> to vector<8x1024xbf16>
    %cst_35 = arith.constant dense<0.000000e+00> : vector<8x128xf32>
    %77 = tpu.matmul %76, %6, %cst_35 {dimension_numbers = #tpu.dot_dimension_numbers<[1], [0], [0], [1], [0, 0, 1, 1], [], []>} : vector<8x1024xbf16>, vector<1024x128xbf16>, vector<8x128xf32> -> vector<8x128xf32>
    %78 = vector.broadcast %7 : vector<1x128xf32> to vector<8x128xf32>
    %79 = arith.addf %77, %78 : vector<8x128xf32>
    %cst_36 = arith.constant 0.949999988 : f32
    %80 = vector.broadcast %cst_36 : f32 to vector<8x128xf32>
    %81 = arith.mulf %80, %58 : vector<8x128xf32>
    %82 = arith.addf %81, %79 : vector<8x128xf32>
    %cst_37 = arith.constant 1.000000e+00 : f32
    %83 = vector.broadcast %cst_37 : f32 to vector<8x128xf32>
    %84 = arith.mulf %62, %83 : vector<8x128xf32>
    %85 = arith.subf %82, %84 : vector<8x128xf32>
    %cst_38 = arith.constant 1.000000e+00 : f32
    %86 = vector.broadcast %cst_38 : f32 to vector<8x128xf32>
    %87 = arith.cmpf ogt, %85, %86 : vector<8x128xf32>
    %88 = arith.extui %87 : vector<8x128xi1> to vector<8x128xi32>
    %89 = arith.sitofp %88 : vector<8x128xi32> to vector<8x128xf32>
    %c2 = arith.constant 2 : index
    %c0_39 = arith.constant 0 : index
    %c0_40 = arith.constant 0 : index
    %90 = vector.load %arg6[%c2, %c0_39, %c0_40] : memref<25x8x128xf32, #tpu.memory_space<vmem>>, vector<1x8x128xf32>
    %91 = vector.shape_cast %90 : vector<1x8x128xf32> to vector<8x128xf32>
    %92 = vector.shape_cast %85 : vector<8x128xf32> to vector<1x8x128xf32>
    tpu.vector_store %arg6[%c2, %c0_39, %c0_40], %92 {strides = array<i32>} : memref<25x8x128xf32, #tpu.memory_space<vmem>>, vector<1x8x128xf32>,
    %cst_41 = arith.constant 0.949999988 : f32
    %93 = vector.broadcast %cst_41 : f32 to vector<8x1024xf32>
    %94 = arith.mulf %93, %71 : vector<8x1024xf32>
    %95 = arith.addf %94, %5 : vector<8x1024xf32>
    %cst_42 = arith.constant 1.000000e+00 : f32
    %96 = vector.broadcast %cst_42 : f32 to vector<8x1024xf32>
    %97 = arith.mulf %75, %96 : vector<8x1024xf32>
    %98 = arith.subf %95, %97 : vector<8x1024xf32>
    %cst_43 = arith.constant 1.000000e+00 : f32
    %99 = vector.broadcast %cst_43 : f32 to vector<8x1024xf32>
    %100 = arith.cmpf ogt, %98, %99 : vector<8x1024xf32>
    %101 = arith.extui %100 : vector<8x1024xi1> to vector<8x1024xi32>
    %102 = arith.sitofp %101 : vector<8x1024xi32> to vector<8x1024xf32>
    %103 = arith.truncf %102 : vector<8x1024xf32> to vector<8x1024xbf16>
    %cst_44 = arith.constant dense<0.000000e+00> : vector<8x128xf32>
    %104 = tpu.matmul %103, %6, %cst_44 {dimension_numbers = #tpu.dot_dimension_numbers<[1], [0], [0], [1], [0, 0, 1, 1], [], []>} : vector<8x1024xbf16>, vector<1024x128xbf16>, vector<8x128xf32> -> vector<8x128xf32>
    %105 = vector.broadcast %7 : vector<1x128xf32> to vector<8x128xf32>
    %106 = arith.addf %104, %105 : vector<8x128xf32>
    %cst_45 = arith.constant 0.949999988 : f32
    %107 = vector.broadcast %cst_45 : f32 to vector<8x128xf32>
    %108 = arith.mulf %107, %85 : vector<8x128xf32>
    %109 = arith.addf %108, %106 : vector<8x128xf32>
    %cst_46 = arith.constant 1.000000e+00 : f32
    %110 = vector.broadcast %cst_46 : f32 to vector<8x128xf32>
    %111 = arith.mulf %89, %110 : vector<8x128xf32>
    %112 = arith.subf %109, %111 : vector<8x128xf32>
    %cst_47 = arith.constant 1.000000e+00 : f32
    %113 = vector.broadcast %cst_47 : f32 to vector<8x128xf32>
    %114 = arith.cmpf ogt, %112, %113 : vector<8x128xf32>
    %115 = arith.extui %114 : vector<8x128xi1> to vector<8x128xi32>
    %116 = arith.sitofp %115 : vector<8x128xi32> to vector<8x128xf32>
    %c3 = arith.constant 3 : index
    %c0_48 = arith.constant 0 : index
    %c0_49 = arith.constant 0 : index
    %117 = vector.load %arg6[%c3, %c0_48, %c0_49] : memref<25x8x128xf32, #tpu.memory_space<vmem>>, vector<1x8x128xf32>
    %118 = vector.shape_cast %117 : vector<1x8x128xf32> to vector<8x128xf32>
    %119 = vector.shape_cast %112 : vector<8x128xf32> to vector<1x8x128xf32>
    tpu.vector_store %arg6[%c3, %c0_48, %c0_49], %119 {strides = array<i32>} : memref<25x8x128xf32, #tpu.memory_space<vmem>>, vector<1x8x128xf32>,
    %cst_50 = arith.constant 0.949999988 : f32
    %120 = vector.broadcast %cst_50 : f32 to vector<8x1024xf32>
    %121 = arith.mulf %120, %98 : vector<8x1024xf32>
    %122 = arith.addf %121, %5 : vector<8x1024xf32>
    %cst_51 = arith.constant 1.000000e+00 : f32
    %123 = vector.broadcast %cst_51 : f32 to vector<8x1024xf32>
    %124 = arith.mulf %102, %123 : vector<8x1024xf32>
    %125 = arith.subf %122, %124 : vector<8x1024xf32>
    %cst_52 = arith.constant 1.000000e+00 : f32
    %126 = vector.broadcast %cst_52 : f32 to vector<8x1024xf32>
    %127 = arith.cmpf ogt, %125, %126 : vector<8x1024xf32>
    %128 = arith.extui %127 : vector<8x1024xi1> to vector<8x1024xi32>
    %129 = arith.sitofp %128 : vector<8x1024xi32> to vector<8x1024xf32>
    %130 = arith.truncf %129 : vector<8x1024xf32> to vector<8x1024xbf16>
    %cst_53 = arith.constant dense<0.000000e+00> : vector<8x128xf32>
    %131 = tpu.matmul %130, %6, %cst_53 {dimension_numbers = #tpu.dot_dimension_numbers<[1], [0], [0], [1], [0, 0, 1, 1], [], []>} : vector<8x1024xbf16>, vector<1024x128xbf16>, vector<8x128xf32> -> vector<8x128xf32>
    %132 = vector.broadcast %7 : vector<1x128xf32> to vector<8x128xf32>
    %133 = arith.addf %131, %132 : vector<8x128xf32>
    %cst_54 = arith.constant 0.949999988 : f32
    %134 = vector.broadcast %cst_54 : f32 to vector<8x128xf32>
    %135 = arith.mulf %134, %112 : vector<8x128xf32>
    %136 = arith.addf %135, %133 : vector<8x128xf32>
    %cst_55 = arith.constant 1.000000e+00 : f32
    %137 = vector.broadcast %cst_55 : f32 to vector<8x128xf32>
    %138 = arith.mulf %116, %137 : vector<8x128xf32>
    %139 = arith.subf %136, %138 : vector<8x128xf32>
    %cst_56 = arith.constant 1.000000e+00 : f32
    %140 = vector.broadcast %cst_56 : f32 to vector<8x128xf32>
    %141 = arith.cmpf ogt, %139, %140 : vector<8x128xf32>
    %142 = arith.extui %141 : vector<8x128xi1> to vector<8x128xi32>
    %143 = arith.sitofp %142 : vector<8x128xi32> to vector<8x128xf32>
    %c4 = arith.constant 4 : index
    %c0_57 = arith.constant 0 : index
    %c0_58 = arith.constant 0 : index
    %144 = vector.load %arg6[%c4, %c0_57, %c0_58] : memref<25x8x128xf32, #tpu.memory_space<vmem>>, vector<1x8x128xf32>
    %145 = vector.shape_cast %144 : vector<1x8x128xf32> to vector<8x128xf32>
    %146 = vector.shape_cast %139 : vector<8x128xf32> to vector<1x8x128xf32>
    tpu.vector_store %arg6[%c4, %c0_57, %c0_58], %146 {strides = array<i32>} : memref<25x8x128xf32, #tpu.memory_space<vmem>>, vector<1x8x128xf32>,
    %cst_59 = arith.constant 0.949999988 : f32
    %147 = vector.broadcast %cst_59 : f32 to vector<8x1024xf32>
    %148 = arith.mulf %147, %125 : vector<8x1024xf32>
    %149 = arith.addf %148, %5 : vector<8x1024xf32>
    %cst_60 = arith.constant 1.000000e+00 : f32
    %150 = vector.broadcast %cst_60 : f32 to vector<8x1024xf32>
    %151 = arith.mulf %129, %150 : vector<8x1024xf32>
    %152 = arith.subf %149, %151 : vector<8x1024xf32>
    %cst_61 = arith.constant 1.000000e+00 : f32
    %153 = vector.broadcast %cst_61 : f32 to vector<8x1024xf32>
    %154 = arith.cmpf ogt, %152, %153 : vector<8x1024xf32>
    %155 = arith.extui %154 : vector<8x1024xi1> to vector<8x1024xi32>
    %156 = arith.sitofp %155 : vector<8x1024xi32> to vector<8x1024xf32>
    %157 = arith.truncf %156 : vector<8x1024xf32> to vector<8x1024xbf16>
    %cst_62 = arith.constant dense<0.000000e+00> : vector<8x128xf32>
    %158 = tpu.matmul %157, %6, %cst_62 {dimension_numbers = #tpu.dot_dimension_numbers<[1], [0], [0], [1], [0, 0, 1, 1], [], []>} : vector<8x1024xbf16>, vector<1024x128xbf16>, vector<8x128xf32> -> vector<8x128xf32>
    %159 = vector.broadcast %7 : vector<1x128xf32> to vector<8x128xf32>
    %160 = arith.addf %158, %159 : vector<8x128xf32>
    %cst_63 = arith.constant 0.949999988 : f32
    %161 = vector.broadcast %cst_63 : f32 to vector<8x128xf32>
    %162 = arith.mulf %161, %139 : vector<8x128xf32>
    %163 = arith.addf %162, %160 : vector<8x128xf32>
    %cst_64 = arith.constant 1.000000e+00 : f32
    %164 = vector.broadcast %cst_64 : f32 to vector<8x128xf32>
    %165 = arith.mulf %143, %164 : vector<8x128xf32>
    %166 = arith.subf %163, %165 : vector<8x128xf32>
    %cst_65 = arith.constant 1.000000e+00 : f32
    %167 = vector.broadcast %cst_65 : f32 to vector<8x128xf32>
    %168 = arith.cmpf ogt, %166, %167 : vector<8x128xf32>
    %169 = arith.extui %168 : vector<8x128xi1> to vector<8x128xi32>
    %170 = arith.sitofp %169 : vector<8x128xi32> to vector<8x128xf32>
    %c5 = arith.constant 5 : index
    %c0_66 = arith.constant 0 : index
    %c0_67 = arith.constant 0 : index
    %171 = vector.load %arg6[%c5, %c0_66, %c0_67] : memref<25x8x128xf32, #tpu.memory_space<vmem>>, vector<1x8x128xf32>
    %172 = vector.shape_cast %171 : vector<1x8x128xf32> to vector<8x128xf32>
    %173 = vector.shape_cast %166 : vector<8x128xf32> to vector<1x8x128xf32>
    tpu.vector_store %arg6[%c5, %c0_66, %c0_67], %173 {strides = array<i32>} : memref<25x8x128xf32, #tpu.memory_space<vmem>>, vector<1x8x128xf32>,
    %cst_68 = arith.constant 0.949999988 : f32
    %174 = vector.broadcast %cst_68 : f32 to vector<8x1024xf32>
    %175 = arith.mulf %174, %152 : vector<8x1024xf32>
    %176 = arith.addf %175, %5 : vector<8x1024xf32>
    %cst_69 = arith.constant 1.000000e+00 : f32
    %177 = vector.broadcast %cst_69 : f32 to vector<8x1024xf32>
    %178 = arith.mulf %156, %177 : vector<8x1024xf32>
    %179 = arith.subf %176, %178 : vector<8x1024xf32>
    %cst_70 = arith.constant 1.000000e+00 : f32
    %180 = vector.broadcast %cst_70 : f32 to vector<8x1024xf32>
    %181 = arith.cmpf ogt, %179, %180 : vector<8x1024xf32>
    %182 = arith.extui %181 : vector<8x1024xi1> to vector<8x1024xi32>
    %183 = arith.sitofp %182 : vector<8x1024xi32> to vector<8x1024xf32>
    %184 = arith.truncf %183 : vector<8x1024xf32> to vector<8x1024xbf16>
    %cst_71 = arith.constant dense<0.000000e+00> : vector<8x128xf32>
    %185 = tpu.matmul %184, %6, %cst_71 {dimension_numbers = #tpu.dot_dimension_numbers<[1], [0], [0], [1], [0, 0, 1, 1], [], []>} : vector<8x1024xbf16>, vector<1024x128xbf16>, vector<8x128xf32> -> vector<8x128xf32>
    %186 = vector.broadcast %7 : vector<1x128xf32> to vector<8x128xf32>
    %187 = arith.addf %185, %186 : vector<8x128xf32>
    %cst_72 = arith.constant 0.949999988 : f32
    %188 = vector.broadcast %cst_72 : f32 to vector<8x128xf32>
    %189 = arith.mulf %188, %166 : vector<8x128xf32>
    %190 = arith.addf %189, %187 : vector<8x128xf32>
    %cst_73 = arith.constant 1.000000e+00 : f32
    %191 = vector.broadcast %cst_73 : f32 to vector<8x128xf32>
    %192 = arith.mulf %170, %191 : vector<8x128xf32>
    %193 = arith.subf %190, %192 : vector<8x128xf32>
    %cst_74 = arith.constant 1.000000e+00 : f32
    %194 = vector.broadcast %cst_74 : f32 to vector<8x128xf32>
    %195 = arith.cmpf ogt, %193, %194 : vector<8x128xf32>
    %196 = arith.extui %195 : vector<8x128xi1> to vector<8x128xi32>
    %197 = arith.sitofp %196 : vector<8x128xi32> to vector<8x128xf32>
    %c6 = arith.constant 6 : index
    %c0_75 = arith.constant 0 : index
    %c0_76 = arith.constant 0 : index
    %198 = vector.load %arg6[%c6, %c0_75, %c0_76] : memref<25x8x128xf32, #tpu.memory_space<vmem>>, vector<1x8x128xf32>
    %199 = vector.shape_cast %198 : vector<1x8x128xf32> to vector<8x128xf32>
    %200 = vector.shape_cast %193 : vector<8x128xf32> to vector<1x8x128xf32>
    tpu.vector_store %arg6[%c6, %c0_75, %c0_76], %200 {strides = array<i32>} : memref<25x8x128xf32, #tpu.memory_space<vmem>>, vector<1x8x128xf32>,
    %cst_77 = arith.constant 0.949999988 : f32
    %201 = vector.broadcast %cst_77 : f32 to vector<8x1024xf32>
    %202 = arith.mulf %201, %179 : vector<8x1024xf32>
    %203 = arith.addf %202, %5 : vector<8x1024xf32>
    %cst_78 = arith.constant 1.000000e+00 : f32
    %204 = vector.broadcast %cst_78 : f32 to vector<8x1024xf32>
    %205 = arith.mulf %183, %204 : vector<8x1024xf32>
    %206 = arith.subf %203, %205 : vector<8x1024xf32>
    %cst_79 = arith.constant 1.000000e+00 : f32
    %207 = vector.broadcast %cst_79 : f32 to vector<8x1024xf32>
    %208 = arith.cmpf ogt, %206, %207 : vector<8x1024xf32>
    %209 = arith.extui %208 : vector<8x1024xi1> to vector<8x1024xi32>
    %210 = arith.sitofp %209 : vector<8x1024xi32> to vector<8x1024xf32>
    %211 = arith.truncf %210 : vector<8x1024xf32> to vector<8x1024xbf16>
    %cst_80 = arith.constant dense<0.000000e+00> : vector<8x128xf32>
    %212 = tpu.matmul %211, %6, %cst_80 {dimension_numbers = #tpu.dot_dimension_numbers<[1], [0], [0], [1], [0, 0, 1, 1], [], []>} : vector<8x1024xbf16>, vector<1024x128xbf16>, vector<8x128xf32> -> vector<8x128xf32>
    %213 = vector.broadcast %7 : vector<1x128xf32> to vector<8x128xf32>
    %214 = arith.addf %212, %213 : vector<8x128xf32>
    %cst_81 = arith.constant 0.949999988 : f32
    %215 = vector.broadcast %cst_81 : f32 to vector<8x128xf32>
    %216 = arith.mulf %215, %193 : vector<8x128xf32>
    %217 = arith.addf %216, %214 : vector<8x128xf32>
    %cst_82 = arith.constant 1.000000e+00 : f32
    %218 = vector.broadcast %cst_82 : f32 to vector<8x128xf32>
    %219 = arith.mulf %197, %218 : vector<8x128xf32>
    %220 = arith.subf %217, %219 : vector<8x128xf32>
    %cst_83 = arith.constant 1.000000e+00 : f32
    %221 = vector.broadcast %cst_83 : f32 to vector<8x128xf32>
    %222 = arith.cmpf ogt, %220, %221 : vector<8x128xf32>
    %223 = arith.extui %222 : vector<8x128xi1> to vector<8x128xi32>
    %224 = arith.sitofp %223 : vector<8x128xi32> to vector<8x128xf32>
    %c7 = arith.constant 7 : index
    %c0_84 = arith.constant 0 : index
    %c0_85 = arith.constant 0 : index
    %225 = vector.load %arg6[%c7, %c0_84, %c0_85] : memref<25x8x128xf32, #tpu.memory_space<vmem>>, vector<1x8x128xf32>
    %226 = vector.shape_cast %225 : vector<1x8x128xf32> to vector<8x128xf32>
    %227 = vector.shape_cast %220 : vector<8x128xf32> to vector<1x8x128xf32>
    tpu.vector_store %arg6[%c7, %c0_84, %c0_85], %227 {strides = array<i32>} : memref<25x8x128xf32, #tpu.memory_space<vmem>>, vector<1x8x128xf32>,
    %cst_86 = arith.constant 0.949999988 : f32
    %228 = vector.broadcast %cst_86 : f32 to vector<8x1024xf32>
    %229 = arith.mulf %228, %206 : vector<8x1024xf32>
    %230 = arith.addf %229, %5 : vector<8x1024xf32>
    %cst_87 = arith.constant 1.000000e+00 : f32
    %231 = vector.broadcast %cst_87 : f32 to vector<8x1024xf32>
    %232 = arith.mulf %210, %231 : vector<8x1024xf32>
    %233 = arith.subf %230, %232 : vector<8x1024xf32>
    %cst_88 = arith.constant 1.000000e+00 : f32
    %234 = vector.broadcast %cst_88 : f32 to vector<8x1024xf32>
    %235 = arith.cmpf ogt, %233, %234 : vector<8x1024xf32>
    %236 = arith.extui %235 : vector<8x1024xi1> to vector<8x1024xi32>
    %237 = arith.sitofp %236 : vector<8x1024xi32> to vector<8x1024xf32>
    %238 = arith.truncf %237 : vector<8x1024xf32> to vector<8x1024xbf16>
    %cst_89 = arith.constant dense<0.000000e+00> : vector<8x128xf32>
    %239 = tpu.matmul %238, %6, %cst_89 {dimension_numbers = #tpu.dot_dimension_numbers<[1], [0], [0], [1], [0, 0, 1, 1], [], []>} : vector<8x1024xbf16>, vector<1024x128xbf16>, vector<8x128xf32> -> vector<8x128xf32>
    %240 = vector.broadcast %7 : vector<1x128xf32> to vector<8x128xf32>
    %241 = arith.addf %239, %240 : vector<8x128xf32>
    %cst_90 = arith.constant 0.949999988 : f32
    %242 = vector.broadcast %cst_90 : f32 to vector<8x128xf32>
    %243 = arith.mulf %242, %220 : vector<8x128xf32>
    %244 = arith.addf %243, %241 : vector<8x128xf32>
    %cst_91 = arith.constant 1.000000e+00 : f32
    %245 = vector.broadcast %cst_91 : f32 to vector<8x128xf32>
    %246 = arith.mulf %224, %245 : vector<8x128xf32>
    %247 = arith.subf %244, %246 : vector<8x128xf32>
    %cst_92 = arith.constant 1.000000e+00 : f32
    %248 = vector.broadcast %cst_92 : f32 to vector<8x128xf32>
    %249 = arith.cmpf ogt, %247, %248 : vector<8x128xf32>
    %250 = arith.extui %249 : vector<8x128xi1> to vector<8x128xi32>
    %251 = arith.sitofp %250 : vector<8x128xi32> to vector<8x128xf32>
    %c8 = arith.constant 8 : index
    %c0_93 = arith.constant 0 : index
    %c0_94 = arith.constant 0 : index
    %252 = vector.load %arg6[%c8, %c0_93, %c0_94] : memref<25x8x128xf32, #tpu.memory_space<vmem>>, vector<1x8x128xf32>
    %253 = vector.shape_cast %252 : vector<1x8x128xf32> to vector<8x128xf32>
    %254 = vector.shape_cast %247 : vector<8x128xf32> to vector<1x8x128xf32>
    tpu.vector_store %arg6[%c8, %c0_93, %c0_94], %254 {strides = array<i32>} : memref<25x8x128xf32, #tpu.memory_space<vmem>>, vector<1x8x128xf32>,
    %cst_95 = arith.constant 0.949999988 : f32
    %255 = vector.broadcast %cst_95 : f32 to vector<8x1024xf32>
    %256 = arith.mulf %255, %233 : vector<8x1024xf32>
    %257 = arith.addf %256, %5 : vector<8x1024xf32>
    %cst_96 = arith.constant 1.000000e+00 : f32
    %258 = vector.broadcast %cst_96 : f32 to vector<8x1024xf32>
    %259 = arith.mulf %237, %258 : vector<8x1024xf32>
    %260 = arith.subf %257, %259 : vector<8x1024xf32>
    %cst_97 = arith.constant 1.000000e+00 : f32
    %261 = vector.broadcast %cst_97 : f32 to vector<8x1024xf32>
    %262 = arith.cmpf ogt, %260, %261 : vector<8x1024xf32>
    %263 = arith.extui %262 : vector<8x1024xi1> to vector<8x1024xi32>
    %264 = arith.sitofp %263 : vector<8x1024xi32> to vector<8x1024xf32>
    %265 = arith.truncf %264 : vector<8x1024xf32> to vector<8x1024xbf16>
    %cst_98 = arith.constant dense<0.000000e+00> : vector<8x128xf32>
    %266 = tpu.matmul %265, %6, %cst_98 {dimension_numbers = #tpu.dot_dimension_numbers<[1], [0], [0], [1], [0, 0, 1, 1], [], []>} : vector<8x1024xbf16>, vector<1024x128xbf16>, vector<8x128xf32> -> vector<8x128xf32>
    %267 = vector.broadcast %7 : vector<1x128xf32> to vector<8x128xf32>
    %268 = arith.addf %266, %267 : vector<8x128xf32>
    %cst_99 = arith.constant 0.949999988 : f32
    %269 = vector.broadcast %cst_99 : f32 to vector<8x128xf32>
    %270 = arith.mulf %269, %247 : vector<8x128xf32>
    %271 = arith.addf %270, %268 : vector<8x128xf32>
    %cst_100 = arith.constant 1.000000e+00 : f32
    %272 = vector.broadcast %cst_100 : f32 to vector<8x128xf32>
    %273 = arith.mulf %251, %272 : vector<8x128xf32>
    %274 = arith.subf %271, %273 : vector<8x128xf32>
    %cst_101 = arith.constant 1.000000e+00 : f32
    %275 = vector.broadcast %cst_101 : f32 to vector<8x128xf32>
    %276 = arith.cmpf ogt, %274, %275 : vector<8x128xf32>
    %277 = arith.extui %276 : vector<8x128xi1> to vector<8x128xi32>
    %278 = arith.sitofp %277 : vector<8x128xi32> to vector<8x128xf32>
    %c9 = arith.constant 9 : index
    %c0_102 = arith.constant 0 : index
    %c0_103 = arith.constant 0 : index
    %279 = vector.load %arg6[%c9, %c0_102, %c0_103] : memref<25x8x128xf32, #tpu.memory_space<vmem>>, vector<1x8x128xf32>
    %280 = vector.shape_cast %279 : vector<1x8x128xf32> to vector<8x128xf32>
    %281 = vector.shape_cast %274 : vector<8x128xf32> to vector<1x8x128xf32>
    tpu.vector_store %arg6[%c9, %c0_102, %c0_103], %281 {strides = array<i32>} : memref<25x8x128xf32, #tpu.memory_space<vmem>>, vector<1x8x128xf32>,
    %cst_104 = arith.constant 0.949999988 : f32
    %282 = vector.broadcast %cst_104 : f32 to vector<8x1024xf32>
    %283 = arith.mulf %282, %260 : vector<8x1024xf32>
    %284 = arith.addf %283, %5 : vector<8x1024xf32>
    %cst_105 = arith.constant 1.000000e+00 : f32
    %285 = vector.broadcast %cst_105 : f32 to vector<8x1024xf32>
    %286 = arith.mulf %264, %285 : vector<8x1024xf32>
    %287 = arith.subf %284, %286 : vector<8x1024xf32>
    %cst_106 = arith.constant 1.000000e+00 : f32
    %288 = vector.broadcast %cst_106 : f32 to vector<8x1024xf32>
    %289 = arith.cmpf ogt, %287, %288 : vector<8x1024xf32>
    %290 = arith.extui %289 : vector<8x1024xi1> to vector<8x1024xi32>
    %291 = arith.sitofp %290 : vector<8x1024xi32> to vector<8x1024xf32>
    %292 = arith.truncf %291 : vector<8x1024xf32> to vector<8x1024xbf16>
    %cst_107 = arith.constant dense<0.000000e+00> : vector<8x128xf32>
    %293 = tpu.matmul %292, %6, %cst_107 {dimension_numbers = #tpu.dot_dimension_numbers<[1], [0], [0], [1], [0, 0, 1, 1], [], []>} : vector<8x1024xbf16>, vector<1024x128xbf16>, vector<8x128xf32> -> vector<8x128xf32>
    %294 = vector.broadcast %7 : vector<1x128xf32> to vector<8x128xf32>
    %295 = arith.addf %293, %294 : vector<8x128xf32>
    %cst_108 = arith.constant 0.949999988 : f32
    %296 = vector.broadcast %cst_108 : f32 to vector<8x128xf32>
    %297 = arith.mulf %296, %274 : vector<8x128xf32>
    %298 = arith.addf %297, %295 : vector<8x128xf32>
    %cst_109 = arith.constant 1.000000e+00 : f32
    %299 = vector.broadcast %cst_109 : f32 to vector<8x128xf32>
    %300 = arith.mulf %278, %299 : vector<8x128xf32>
    %301 = arith.subf %298, %300 : vector<8x128xf32>
    %cst_110 = arith.constant 1.000000e+00 : f32
    %302 = vector.broadcast %cst_110 : f32 to vector<8x128xf32>
    %303 = arith.cmpf ogt, %301, %302 : vector<8x128xf32>
    %304 = arith.extui %303 : vector<8x128xi1> to vector<8x128xi32>
    %305 = arith.sitofp %304 : vector<8x128xi32> to vector<8x128xf32>
    %c10 = arith.constant 10 : index
    %c0_111 = arith.constant 0 : index
    %c0_112 = arith.constant 0 : index
    %306 = vector.load %arg6[%c10, %c0_111, %c0_112] : memref<25x8x128xf32, #tpu.memory_space<vmem>>, vector<1x8x128xf32>
    %307 = vector.shape_cast %306 : vector<1x8x128xf32> to vector<8x128xf32>
    %308 = vector.shape_cast %301 : vector<8x128xf32> to vector<1x8x128xf32>
    tpu.vector_store %arg6[%c10, %c0_111, %c0_112], %308 {strides = array<i32>} : memref<25x8x128xf32, #tpu.memory_space<vmem>>, vector<1x8x128xf32>,
    %cst_113 = arith.constant 0.949999988 : f32
    %309 = vector.broadcast %cst_113 : f32 to vector<8x1024xf32>
    %310 = arith.mulf %309, %287 : vector<8x1024xf32>
    %311 = arith.addf %310, %5 : vector<8x1024xf32>
    %cst_114 = arith.constant 1.000000e+00 : f32
    %312 = vector.broadcast %cst_114 : f32 to vector<8x1024xf32>
    %313 = arith.mulf %291, %312 : vector<8x1024xf32>
    %314 = arith.subf %311, %313 : vector<8x1024xf32>
    %cst_115 = arith.constant 1.000000e+00 : f32
    %315 = vector.broadcast %cst_115 : f32 to vector<8x1024xf32>
    %316 = arith.cmpf ogt, %314, %315 : vector<8x1024xf32>
    %317 = arith.extui %316 : vector<8x1024xi1> to vector<8x1024xi32>
    %318 = arith.sitofp %317 : vector<8x1024xi32> to vector<8x1024xf32>
    %319 = arith.truncf %318 : vector<8x1024xf32> to vector<8x1024xbf16>
    %cst_116 = arith.constant dense<0.000000e+00> : vector<8x128xf32>
    %320 = tpu.matmul %319, %6, %cst_116 {dimension_numbers = #tpu.dot_dimension_numbers<[1], [0], [0], [1], [0, 0, 1, 1], [], []>} : vector<8x1024xbf16>, vector<1024x128xbf16>, vector<8x128xf32> -> vector<8x128xf32>
    %321 = vector.broadcast %7 : vector<1x128xf32> to vector<8x128xf32>
    %322 = arith.addf %320, %321 : vector<8x128xf32>
    %cst_117 = arith.constant 0.949999988 : f32
    %323 = vector.broadcast %cst_117 : f32 to vector<8x128xf32>
    %324 = arith.mulf %323, %301 : vector<8x128xf32>
    %325 = arith.addf %324, %322 : vector<8x128xf32>
    %cst_118 = arith.constant 1.000000e+00 : f32
    %326 = vector.broadcast %cst_118 : f32 to vector<8x128xf32>
    %327 = arith.mulf %305, %326 : vector<8x128xf32>
    %328 = arith.subf %325, %327 : vector<8x128xf32>
    %cst_119 = arith.constant 1.000000e+00 : f32
    %329 = vector.broadcast %cst_119 : f32 to vector<8x128xf32>
    %330 = arith.cmpf ogt, %328, %329 : vector<8x128xf32>
    %331 = arith.extui %330 : vector<8x128xi1> to vector<8x128xi32>
    %332 = arith.sitofp %331 : vector<8x128xi32> to vector<8x128xf32>
    %c11 = arith.constant 11 : index
    %c0_120 = arith.constant 0 : index
    %c0_121 = arith.constant 0 : index
    %333 = vector.load %arg6[%c11, %c0_120, %c0_121] : memref<25x8x128xf32, #tpu.memory_space<vmem>>, vector<1x8x128xf32>
    %334 = vector.shape_cast %333 : vector<1x8x128xf32> to vector<8x128xf32>
    %335 = vector.shape_cast %328 : vector<8x128xf32> to vector<1x8x128xf32>
    tpu.vector_store %arg6[%c11, %c0_120, %c0_121], %335 {strides = array<i32>} : memref<25x8x128xf32, #tpu.memory_space<vmem>>, vector<1x8x128xf32>,
    %cst_122 = arith.constant 0.949999988 : f32
    %336 = vector.broadcast %cst_122 : f32 to vector<8x1024xf32>
    %337 = arith.mulf %336, %314 : vector<8x1024xf32>
    %338 = arith.addf %337, %5 : vector<8x1024xf32>
    %cst_123 = arith.constant 1.000000e+00 : f32
    %339 = vector.broadcast %cst_123 : f32 to vector<8x1024xf32>
    %340 = arith.mulf %318, %339 : vector<8x1024xf32>
    %341 = arith.subf %338, %340 : vector<8x1024xf32>
    %cst_124 = arith.constant 1.000000e+00 : f32
    %342 = vector.broadcast %cst_124 : f32 to vector<8x1024xf32>
    %343 = arith.cmpf ogt, %341, %342 : vector<8x1024xf32>
    %344 = arith.extui %343 : vector<8x1024xi1> to vector<8x1024xi32>
    %345 = arith.sitofp %344 : vector<8x1024xi32> to vector<8x1024xf32>
    %346 = arith.truncf %345 : vector<8x1024xf32> to vector<8x1024xbf16>
    %cst_125 = arith.constant dense<0.000000e+00> : vector<8x128xf32>
    %347 = tpu.matmul %346, %6, %cst_125 {dimension_numbers = #tpu.dot_dimension_numbers<[1], [0], [0], [1], [0, 0, 1, 1], [], []>} : vector<8x1024xbf16>, vector<1024x128xbf16>, vector<8x128xf32> -> vector<8x128xf32>
    %348 = vector.broadcast %7 : vector<1x128xf32> to vector<8x128xf32>
    %349 = arith.addf %347, %348 : vector<8x128xf32>
    %cst_126 = arith.constant 0.949999988 : f32
    %350 = vector.broadcast %cst_126 : f32 to vector<8x128xf32>
    %351 = arith.mulf %350, %328 : vector<8x128xf32>
    %352 = arith.addf %351, %349 : vector<8x128xf32>
    %cst_127 = arith.constant 1.000000e+00 : f32
    %353 = vector.broadcast %cst_127 : f32 to vector<8x128xf32>
    %354 = arith.mulf %332, %353 : vector<8x128xf32>
    %355 = arith.subf %352, %354 : vector<8x128xf32>
    %cst_128 = arith.constant 1.000000e+00 : f32
    %356 = vector.broadcast %cst_128 : f32 to vector<8x128xf32>
    %357 = arith.cmpf ogt, %355, %356 : vector<8x128xf32>
    %358 = arith.extui %357 : vector<8x128xi1> to vector<8x128xi32>
    %359 = arith.sitofp %358 : vector<8x128xi32> to vector<8x128xf32>
    %c12 = arith.constant 12 : index
    %c0_129 = arith.constant 0 : index
    %c0_130 = arith.constant 0 : index
    %360 = vector.load %arg6[%c12, %c0_129, %c0_130] : memref<25x8x128xf32, #tpu.memory_space<vmem>>, vector<1x8x128xf32>
    %361 = vector.shape_cast %360 : vector<1x8x128xf32> to vector<8x128xf32>
    %362 = vector.shape_cast %355 : vector<8x128xf32> to vector<1x8x128xf32>
    tpu.vector_store %arg6[%c12, %c0_129, %c0_130], %362 {strides = array<i32>} : memref<25x8x128xf32, #tpu.memory_space<vmem>>, vector<1x8x128xf32>,
    %cst_131 = arith.constant 0.949999988 : f32
    %363 = vector.broadcast %cst_131 : f32 to vector<8x1024xf32>
    %364 = arith.mulf %363, %341 : vector<8x1024xf32>
    %365 = arith.addf %364, %5 : vector<8x1024xf32>
    %cst_132 = arith.constant 1.000000e+00 : f32
    %366 = vector.broadcast %cst_132 : f32 to vector<8x1024xf32>
    %367 = arith.mulf %345, %366 : vector<8x1024xf32>
    %368 = arith.subf %365, %367 : vector<8x1024xf32>
    %cst_133 = arith.constant 1.000000e+00 : f32
    %369 = vector.broadcast %cst_133 : f32 to vector<8x1024xf32>
    %370 = arith.cmpf ogt, %368, %369 : vector<8x1024xf32>
    %371 = arith.extui %370 : vector<8x1024xi1> to vector<8x1024xi32>
    %372 = arith.sitofp %371 : vector<8x1024xi32> to vector<8x1024xf32>
    %373 = arith.truncf %372 : vector<8x1024xf32> to vector<8x1024xbf16>
    %cst_134 = arith.constant dense<0.000000e+00> : vector<8x128xf32>
    %374 = tpu.matmul %373, %6, %cst_134 {dimension_numbers = #tpu.dot_dimension_numbers<[1], [0], [0], [1], [0, 0, 1, 1], [], []>} : vector<8x1024xbf16>, vector<1024x128xbf16>, vector<8x128xf32> -> vector<8x128xf32>
    %375 = vector.broadcast %7 : vector<1x128xf32> to vector<8x128xf32>
    %376 = arith.addf %374, %375 : vector<8x128xf32>
    %cst_135 = arith.constant 0.949999988 : f32
    %377 = vector.broadcast %cst_135 : f32 to vector<8x128xf32>
    %378 = arith.mulf %377, %355 : vector<8x128xf32>
    %379 = arith.addf %378, %376 : vector<8x128xf32>
    %cst_136 = arith.constant 1.000000e+00 : f32
    %380 = vector.broadcast %cst_136 : f32 to vector<8x128xf32>
    %381 = arith.mulf %359, %380 : vector<8x128xf32>
    %382 = arith.subf %379, %381 : vector<8x128xf32>
    %cst_137 = arith.constant 1.000000e+00 : f32
    %383 = vector.broadcast %cst_137 : f32 to vector<8x128xf32>
    %384 = arith.cmpf ogt, %382, %383 : vector<8x128xf32>
    %385 = arith.extui %384 : vector<8x128xi1> to vector<8x128xi32>
    %386 = arith.sitofp %385 : vector<8x128xi32> to vector<8x128xf32>
    %c13 = arith.constant 13 : index
    %c0_138 = arith.constant 0 : index
    %c0_139 = arith.constant 0 : index
    %387 = vector.load %arg6[%c13, %c0_138, %c0_139] : memref<25x8x128xf32, #tpu.memory_space<vmem>>, vector<1x8x128xf32>
    %388 = vector.shape_cast %387 : vector<1x8x128xf32> to vector<8x128xf32>
    %389 = vector.shape_cast %382 : vector<8x128xf32> to vector<1x8x128xf32>
    tpu.vector_store %arg6[%c13, %c0_138, %c0_139], %389 {strides = array<i32>} : memref<25x8x128xf32, #tpu.memory_space<vmem>>, vector<1x8x128xf32>,
    %cst_140 = arith.constant 0.949999988 : f32
    %390 = vector.broadcast %cst_140 : f32 to vector<8x1024xf32>
    %391 = arith.mulf %390, %368 : vector<8x1024xf32>
    %392 = arith.addf %391, %5 : vector<8x1024xf32>
    %cst_141 = arith.constant 1.000000e+00 : f32
    %393 = vector.broadcast %cst_141 : f32 to vector<8x1024xf32>
    %394 = arith.mulf %372, %393 : vector<8x1024xf32>
    %395 = arith.subf %392, %394 : vector<8x1024xf32>
    %cst_142 = arith.constant 1.000000e+00 : f32
    %396 = vector.broadcast %cst_142 : f32 to vector<8x1024xf32>
    %397 = arith.cmpf ogt, %395, %396 : vector<8x1024xf32>
    %398 = arith.extui %397 : vector<8x1024xi1> to vector<8x1024xi32>
    %399 = arith.sitofp %398 : vector<8x1024xi32> to vector<8x1024xf32>
    %400 = arith.truncf %399 : vector<8x1024xf32> to vector<8x1024xbf16>
    %cst_143 = arith.constant dense<0.000000e+00> : vector<8x128xf32>
    %401 = tpu.matmul %400, %6, %cst_143 {dimension_numbers = #tpu.dot_dimension_numbers<[1], [0], [0], [1], [0, 0, 1, 1], [], []>} : vector<8x1024xbf16>, vector<1024x128xbf16>, vector<8x128xf32> -> vector<8x128xf32>
    %402 = vector.broadcast %7 : vector<1x128xf32> to vector<8x128xf32>
    %403 = arith.addf %401, %402 : vector<8x128xf32>
    %cst_144 = arith.constant 0.949999988 : f32
    %404 = vector.broadcast %cst_144 : f32 to vector<8x128xf32>
    %405 = arith.mulf %404, %382 : vector<8x128xf32>
    %406 = arith.addf %405, %403 : vector<8x128xf32>
    %cst_145 = arith.constant 1.000000e+00 : f32
    %407 = vector.broadcast %cst_145 : f32 to vector<8x128xf32>
    %408 = arith.mulf %386, %407 : vector<8x128xf32>
    %409 = arith.subf %406, %408 : vector<8x128xf32>
    %cst_146 = arith.constant 1.000000e+00 : f32
    %410 = vector.broadcast %cst_146 : f32 to vector<8x128xf32>
    %411 = arith.cmpf ogt, %409, %410 : vector<8x128xf32>
    %412 = arith.extui %411 : vector<8x128xi1> to vector<8x128xi32>
    %413 = arith.sitofp %412 : vector<8x128xi32> to vector<8x128xf32>
    %c14 = arith.constant 14 : index
    %c0_147 = arith.constant 0 : index
    %c0_148 = arith.constant 0 : index
    %414 = vector.load %arg6[%c14, %c0_147, %c0_148] : memref<25x8x128xf32, #tpu.memory_space<vmem>>, vector<1x8x128xf32>
    %415 = vector.shape_cast %414 : vector<1x8x128xf32> to vector<8x128xf32>
    %416 = vector.shape_cast %409 : vector<8x128xf32> to vector<1x8x128xf32>
    tpu.vector_store %arg6[%c14, %c0_147, %c0_148], %416 {strides = array<i32>} : memref<25x8x128xf32, #tpu.memory_space<vmem>>, vector<1x8x128xf32>,
    %cst_149 = arith.constant 0.949999988 : f32
    %417 = vector.broadcast %cst_149 : f32 to vector<8x1024xf32>
    %418 = arith.mulf %417, %395 : vector<8x1024xf32>
    %419 = arith.addf %418, %5 : vector<8x1024xf32>
    %cst_150 = arith.constant 1.000000e+00 : f32
    %420 = vector.broadcast %cst_150 : f32 to vector<8x1024xf32>
    %421 = arith.mulf %399, %420 : vector<8x1024xf32>
    %422 = arith.subf %419, %421 : vector<8x1024xf32>
    %cst_151 = arith.constant 1.000000e+00 : f32
    %423 = vector.broadcast %cst_151 : f32 to vector<8x1024xf32>
    %424 = arith.cmpf ogt, %422, %423 : vector<8x1024xf32>
    %425 = arith.extui %424 : vector<8x1024xi1> to vector<8x1024xi32>
    %426 = arith.sitofp %425 : vector<8x1024xi32> to vector<8x1024xf32>
    %427 = arith.truncf %426 : vector<8x1024xf32> to vector<8x1024xbf16>
    %cst_152 = arith.constant dense<0.000000e+00> : vector<8x128xf32>
    %428 = tpu.matmul %427, %6, %cst_152 {dimension_numbers = #tpu.dot_dimension_numbers<[1], [0], [0], [1], [0, 0, 1, 1], [], []>} : vector<8x1024xbf16>, vector<1024x128xbf16>, vector<8x128xf32> -> vector<8x128xf32>
    %429 = vector.broadcast %7 : vector<1x128xf32> to vector<8x128xf32>
    %430 = arith.addf %428, %429 : vector<8x128xf32>
    %cst_153 = arith.constant 0.949999988 : f32
    %431 = vector.broadcast %cst_153 : f32 to vector<8x128xf32>
    %432 = arith.mulf %431, %409 : vector<8x128xf32>
    %433 = arith.addf %432, %430 : vector<8x128xf32>
    %cst_154 = arith.constant 1.000000e+00 : f32
    %434 = vector.broadcast %cst_154 : f32 to vector<8x128xf32>
    %435 = arith.mulf %413, %434 : vector<8x128xf32>
    %436 = arith.subf %433, %435 : vector<8x128xf32>
    %cst_155 = arith.constant 1.000000e+00 : f32
    %437 = vector.broadcast %cst_155 : f32 to vector<8x128xf32>
    %438 = arith.cmpf ogt, %436, %437 : vector<8x128xf32>
    %439 = arith.extui %438 : vector<8x128xi1> to vector<8x128xi32>
    %440 = arith.sitofp %439 : vector<8x128xi32> to vector<8x128xf32>
    %c15 = arith.constant 15 : index
    %c0_156 = arith.constant 0 : index
    %c0_157 = arith.constant 0 : index
    %441 = vector.load %arg6[%c15, %c0_156, %c0_157] : memref<25x8x128xf32, #tpu.memory_space<vmem>>, vector<1x8x128xf32>
    %442 = vector.shape_cast %441 : vector<1x8x128xf32> to vector<8x128xf32>
    %443 = vector.shape_cast %436 : vector<8x128xf32> to vector<1x8x128xf32>
    tpu.vector_store %arg6[%c15, %c0_156, %c0_157], %443 {strides = array<i32>} : memref<25x8x128xf32, #tpu.memory_space<vmem>>, vector<1x8x128xf32>,
    %cst_158 = arith.constant 0.949999988 : f32
    %444 = vector.broadcast %cst_158 : f32 to vector<8x1024xf32>
    %445 = arith.mulf %444, %422 : vector<8x1024xf32>
    %446 = arith.addf %445, %5 : vector<8x1024xf32>
    %cst_159 = arith.constant 1.000000e+00 : f32
    %447 = vector.broadcast %cst_159 : f32 to vector<8x1024xf32>
    %448 = arith.mulf %426, %447 : vector<8x1024xf32>
    %449 = arith.subf %446, %448 : vector<8x1024xf32>
    %cst_160 = arith.constant 1.000000e+00 : f32
    %450 = vector.broadcast %cst_160 : f32 to vector<8x1024xf32>
    %451 = arith.cmpf ogt, %449, %450 : vector<8x1024xf32>
    %452 = arith.extui %451 : vector<8x1024xi1> to vector<8x1024xi32>
    %453 = arith.sitofp %452 : vector<8x1024xi32> to vector<8x1024xf32>
    %454 = arith.truncf %453 : vector<8x1024xf32> to vector<8x1024xbf16>
    %cst_161 = arith.constant dense<0.000000e+00> : vector<8x128xf32>
    %455 = tpu.matmul %454, %6, %cst_161 {dimension_numbers = #tpu.dot_dimension_numbers<[1], [0], [0], [1], [0, 0, 1, 1], [], []>} : vector<8x1024xbf16>, vector<1024x128xbf16>, vector<8x128xf32> -> vector<8x128xf32>
    %456 = vector.broadcast %7 : vector<1x128xf32> to vector<8x128xf32>
    %457 = arith.addf %455, %456 : vector<8x128xf32>
    %cst_162 = arith.constant 0.949999988 : f32
    %458 = vector.broadcast %cst_162 : f32 to vector<8x128xf32>
    %459 = arith.mulf %458, %436 : vector<8x128xf32>
    %460 = arith.addf %459, %457 : vector<8x128xf32>
    %cst_163 = arith.constant 1.000000e+00 : f32
    %461 = vector.broadcast %cst_163 : f32 to vector<8x128xf32>
    %462 = arith.mulf %440, %461 : vector<8x128xf32>
    %463 = arith.subf %460, %462 : vector<8x128xf32>
    %cst_164 = arith.constant 1.000000e+00 : f32
    %464 = vector.broadcast %cst_164 : f32 to vector<8x128xf32>
    %465 = arith.cmpf ogt, %463, %464 : vector<8x128xf32>
    %466 = arith.extui %465 : vector<8x128xi1> to vector<8x128xi32>
    %467 = arith.sitofp %466 : vector<8x128xi32> to vector<8x128xf32>
    %c16 = arith.constant 16 : index
    %c0_165 = arith.constant 0 : index
    %c0_166 = arith.constant 0 : index
    %468 = vector.load %arg6[%c16, %c0_165, %c0_166] : memref<25x8x128xf32, #tpu.memory_space<vmem>>, vector<1x8x128xf32>
    %469 = vector.shape_cast %468 : vector<1x8x128xf32> to vector<8x128xf32>
    %470 = vector.shape_cast %463 : vector<8x128xf32> to vector<1x8x128xf32>
    tpu.vector_store %arg6[%c16, %c0_165, %c0_166], %470 {strides = array<i32>} : memref<25x8x128xf32, #tpu.memory_space<vmem>>, vector<1x8x128xf32>,
    %cst_167 = arith.constant 0.949999988 : f32
    %471 = vector.broadcast %cst_167 : f32 to vector<8x1024xf32>
    %472 = arith.mulf %471, %449 : vector<8x1024xf32>
    %473 = arith.addf %472, %5 : vector<8x1024xf32>
    %cst_168 = arith.constant 1.000000e+00 : f32
    %474 = vector.broadcast %cst_168 : f32 to vector<8x1024xf32>
    %475 = arith.mulf %453, %474 : vector<8x1024xf32>
    %476 = arith.subf %473, %475 : vector<8x1024xf32>
    %cst_169 = arith.constant 1.000000e+00 : f32
    %477 = vector.broadcast %cst_169 : f32 to vector<8x1024xf32>
    %478 = arith.cmpf ogt, %476, %477 : vector<8x1024xf32>
    %479 = arith.extui %478 : vector<8x1024xi1> to vector<8x1024xi32>
    %480 = arith.sitofp %479 : vector<8x1024xi32> to vector<8x1024xf32>
    %481 = arith.truncf %480 : vector<8x1024xf32> to vector<8x1024xbf16>
    %cst_170 = arith.constant dense<0.000000e+00> : vector<8x128xf32>
    %482 = tpu.matmul %481, %6, %cst_170 {dimension_numbers = #tpu.dot_dimension_numbers<[1], [0], [0], [1], [0, 0, 1, 1], [], []>} : vector<8x1024xbf16>, vector<1024x128xbf16>, vector<8x128xf32> -> vector<8x128xf32>
    %483 = vector.broadcast %7 : vector<1x128xf32> to vector<8x128xf32>
    %484 = arith.addf %482, %483 : vector<8x128xf32>
    %cst_171 = arith.constant 0.949999988 : f32
    %485 = vector.broadcast %cst_171 : f32 to vector<8x128xf32>
    %486 = arith.mulf %485, %463 : vector<8x128xf32>
    %487 = arith.addf %486, %484 : vector<8x128xf32>
    %cst_172 = arith.constant 1.000000e+00 : f32
    %488 = vector.broadcast %cst_172 : f32 to vector<8x128xf32>
    %489 = arith.mulf %467, %488 : vector<8x128xf32>
    %490 = arith.subf %487, %489 : vector<8x128xf32>
    %cst_173 = arith.constant 1.000000e+00 : f32
    %491 = vector.broadcast %cst_173 : f32 to vector<8x128xf32>
    %492 = arith.cmpf ogt, %490, %491 : vector<8x128xf32>
    %493 = arith.extui %492 : vector<8x128xi1> to vector<8x128xi32>
    %494 = arith.sitofp %493 : vector<8x128xi32> to vector<8x128xf32>
    %c17 = arith.constant 17 : index
    %c0_174 = arith.constant 0 : index
    %c0_175 = arith.constant 0 : index
    %495 = vector.load %arg6[%c17, %c0_174, %c0_175] : memref<25x8x128xf32, #tpu.memory_space<vmem>>, vector<1x8x128xf32>
    %496 = vector.shape_cast %495 : vector<1x8x128xf32> to vector<8x128xf32>
    %497 = vector.shape_cast %490 : vector<8x128xf32> to vector<1x8x128xf32>
    tpu.vector_store %arg6[%c17, %c0_174, %c0_175], %497 {strides = array<i32>} : memref<25x8x128xf32, #tpu.memory_space<vmem>>, vector<1x8x128xf32>,
    %cst_176 = arith.constant 0.949999988 : f32
    %498 = vector.broadcast %cst_176 : f32 to vector<8x1024xf32>
    %499 = arith.mulf %498, %476 : vector<8x1024xf32>
    %500 = arith.addf %499, %5 : vector<8x1024xf32>
    %cst_177 = arith.constant 1.000000e+00 : f32
    %501 = vector.broadcast %cst_177 : f32 to vector<8x1024xf32>
    %502 = arith.mulf %480, %501 : vector<8x1024xf32>
    %503 = arith.subf %500, %502 : vector<8x1024xf32>
    %cst_178 = arith.constant 1.000000e+00 : f32
    %504 = vector.broadcast %cst_178 : f32 to vector<8x1024xf32>
    %505 = arith.cmpf ogt, %503, %504 : vector<8x1024xf32>
    %506 = arith.extui %505 : vector<8x1024xi1> to vector<8x1024xi32>
    %507 = arith.sitofp %506 : vector<8x1024xi32> to vector<8x1024xf32>
    %508 = arith.truncf %507 : vector<8x1024xf32> to vector<8x1024xbf16>
    %cst_179 = arith.constant dense<0.000000e+00> : vector<8x128xf32>
    %509 = tpu.matmul %508, %6, %cst_179 {dimension_numbers = #tpu.dot_dimension_numbers<[1], [0], [0], [1], [0, 0, 1, 1], [], []>} : vector<8x1024xbf16>, vector<1024x128xbf16>, vector<8x128xf32> -> vector<8x128xf32>
    %510 = vector.broadcast %7 : vector<1x128xf32> to vector<8x128xf32>
    %511 = arith.addf %509, %510 : vector<8x128xf32>
    %cst_180 = arith.constant 0.949999988 : f32
    %512 = vector.broadcast %cst_180 : f32 to vector<8x128xf32>
    %513 = arith.mulf %512, %490 : vector<8x128xf32>
    %514 = arith.addf %513, %511 : vector<8x128xf32>
    %cst_181 = arith.constant 1.000000e+00 : f32
    %515 = vector.broadcast %cst_181 : f32 to vector<8x128xf32>
    %516 = arith.mulf %494, %515 : vector<8x128xf32>
    %517 = arith.subf %514, %516 : vector<8x128xf32>
    %cst_182 = arith.constant 1.000000e+00 : f32
    %518 = vector.broadcast %cst_182 : f32 to vector<8x128xf32>
    %519 = arith.cmpf ogt, %517, %518 : vector<8x128xf32>
    %520 = arith.extui %519 : vector<8x128xi1> to vector<8x128xi32>
    %521 = arith.sitofp %520 : vector<8x128xi32> to vector<8x128xf32>
    %c18 = arith.constant 18 : index
    %c0_183 = arith.constant 0 : index
    %c0_184 = arith.constant 0 : index
    %522 = vector.load %arg6[%c18, %c0_183, %c0_184] : memref<25x8x128xf32, #tpu.memory_space<vmem>>, vector<1x8x128xf32>
    %523 = vector.shape_cast %522 : vector<1x8x128xf32> to vector<8x128xf32>
    %524 = vector.shape_cast %517 : vector<8x128xf32> to vector<1x8x128xf32>
    tpu.vector_store %arg6[%c18, %c0_183, %c0_184], %524 {strides = array<i32>} : memref<25x8x128xf32, #tpu.memory_space<vmem>>, vector<1x8x128xf32>,
    %cst_185 = arith.constant 0.949999988 : f32
    %525 = vector.broadcast %cst_185 : f32 to vector<8x1024xf32>
    %526 = arith.mulf %525, %503 : vector<8x1024xf32>
    %527 = arith.addf %526, %5 : vector<8x1024xf32>
    %cst_186 = arith.constant 1.000000e+00 : f32
    %528 = vector.broadcast %cst_186 : f32 to vector<8x1024xf32>
    %529 = arith.mulf %507, %528 : vector<8x1024xf32>
    %530 = arith.subf %527, %529 : vector<8x1024xf32>
    %cst_187 = arith.constant 1.000000e+00 : f32
    %531 = vector.broadcast %cst_187 : f32 to vector<8x1024xf32>
    %532 = arith.cmpf ogt, %530, %531 : vector<8x1024xf32>
    %533 = arith.extui %532 : vector<8x1024xi1> to vector<8x1024xi32>
    %534 = arith.sitofp %533 : vector<8x1024xi32> to vector<8x1024xf32>
    %535 = arith.truncf %534 : vector<8x1024xf32> to vector<8x1024xbf16>
    %cst_188 = arith.constant dense<0.000000e+00> : vector<8x128xf32>
    %536 = tpu.matmul %535, %6, %cst_188 {dimension_numbers = #tpu.dot_dimension_numbers<[1], [0], [0], [1], [0, 0, 1, 1], [], []>} : vector<8x1024xbf16>, vector<1024x128xbf16>, vector<8x128xf32> -> vector<8x128xf32>
    %537 = vector.broadcast %7 : vector<1x128xf32> to vector<8x128xf32>
    %538 = arith.addf %536, %537 : vector<8x128xf32>
    %cst_189 = arith.constant 0.949999988 : f32
    %539 = vector.broadcast %cst_189 : f32 to vector<8x128xf32>
    %540 = arith.mulf %539, %517 : vector<8x128xf32>
    %541 = arith.addf %540, %538 : vector<8x128xf32>
    %cst_190 = arith.constant 1.000000e+00 : f32
    %542 = vector.broadcast %cst_190 : f32 to vector<8x128xf32>
    %543 = arith.mulf %521, %542 : vector<8x128xf32>
    %544 = arith.subf %541, %543 : vector<8x128xf32>
    %cst_191 = arith.constant 1.000000e+00 : f32
    %545 = vector.broadcast %cst_191 : f32 to vector<8x128xf32>
    %546 = arith.cmpf ogt, %544, %545 : vector<8x128xf32>
    %547 = arith.extui %546 : vector<8x128xi1> to vector<8x128xi32>
    %548 = arith.sitofp %547 : vector<8x128xi32> to vector<8x128xf32>
    %c19 = arith.constant 19 : index
    %c0_192 = arith.constant 0 : index
    %c0_193 = arith.constant 0 : index
    %549 = vector.load %arg6[%c19, %c0_192, %c0_193] : memref<25x8x128xf32, #tpu.memory_space<vmem>>, vector<1x8x128xf32>
    %550 = vector.shape_cast %549 : vector<1x8x128xf32> to vector<8x128xf32>
    %551 = vector.shape_cast %544 : vector<8x128xf32> to vector<1x8x128xf32>
    tpu.vector_store %arg6[%c19, %c0_192, %c0_193], %551 {strides = array<i32>} : memref<25x8x128xf32, #tpu.memory_space<vmem>>, vector<1x8x128xf32>,
    %cst_194 = arith.constant 0.949999988 : f32
    %552 = vector.broadcast %cst_194 : f32 to vector<8x1024xf32>
    %553 = arith.mulf %552, %530 : vector<8x1024xf32>
    %554 = arith.addf %553, %5 : vector<8x1024xf32>
    %cst_195 = arith.constant 1.000000e+00 : f32
    %555 = vector.broadcast %cst_195 : f32 to vector<8x1024xf32>
    %556 = arith.mulf %534, %555 : vector<8x1024xf32>
    %557 = arith.subf %554, %556 : vector<8x1024xf32>
    %cst_196 = arith.constant 1.000000e+00 : f32
    %558 = vector.broadcast %cst_196 : f32 to vector<8x1024xf32>
    %559 = arith.cmpf ogt, %557, %558 : vector<8x1024xf32>
    %560 = arith.extui %559 : vector<8x1024xi1> to vector<8x1024xi32>
    %561 = arith.sitofp %560 : vector<8x1024xi32> to vector<8x1024xf32>
    %562 = arith.truncf %561 : vector<8x1024xf32> to vector<8x1024xbf16>
    %cst_197 = arith.constant dense<0.000000e+00> : vector<8x128xf32>
    %563 = tpu.matmul %562, %6, %cst_197 {dimension_numbers = #tpu.dot_dimension_numbers<[1], [0], [0], [1], [0, 0, 1, 1], [], []>} : vector<8x1024xbf16>, vector<1024x128xbf16>, vector<8x128xf32> -> vector<8x128xf32>
    %564 = vector.broadcast %7 : vector<1x128xf32> to vector<8x128xf32>
    %565 = arith.addf %563, %564 : vector<8x128xf32>
    %cst_198 = arith.constant 0.949999988 : f32
    %566 = vector.broadcast %cst_198 : f32 to vector<8x128xf32>
    %567 = arith.mulf %566, %544 : vector<8x128xf32>
    %568 = arith.addf %567, %565 : vector<8x128xf32>
    %cst_199 = arith.constant 1.000000e+00 : f32
    %569 = vector.broadcast %cst_199 : f32 to vector<8x128xf32>
    %570 = arith.mulf %548, %569 : vector<8x128xf32>
    %571 = arith.subf %568, %570 : vector<8x128xf32>
    %cst_200 = arith.constant 1.000000e+00 : f32
    %572 = vector.broadcast %cst_200 : f32 to vector<8x128xf32>
    %573 = arith.cmpf ogt, %571, %572 : vector<8x128xf32>
    %574 = arith.extui %573 : vector<8x128xi1> to vector<8x128xi32>
    %575 = arith.sitofp %574 : vector<8x128xi32> to vector<8x128xf32>
    %c20 = arith.constant 20 : index
    %c0_201 = arith.constant 0 : index
    %c0_202 = arith.constant 0 : index
    %576 = vector.load %arg6[%c20, %c0_201, %c0_202] : memref<25x8x128xf32, #tpu.memory_space<vmem>>, vector<1x8x128xf32>
    %577 = vector.shape_cast %576 : vector<1x8x128xf32> to vector<8x128xf32>
    %578 = vector.shape_cast %571 : vector<8x128xf32> to vector<1x8x128xf32>
    tpu.vector_store %arg6[%c20, %c0_201, %c0_202], %578 {strides = array<i32>} : memref<25x8x128xf32, #tpu.memory_space<vmem>>, vector<1x8x128xf32>,
    %cst_203 = arith.constant 0.949999988 : f32
    %579 = vector.broadcast %cst_203 : f32 to vector<8x1024xf32>
    %580 = arith.mulf %579, %557 : vector<8x1024xf32>
    %581 = arith.addf %580, %5 : vector<8x1024xf32>
    %cst_204 = arith.constant 1.000000e+00 : f32
    %582 = vector.broadcast %cst_204 : f32 to vector<8x1024xf32>
    %583 = arith.mulf %561, %582 : vector<8x1024xf32>
    %584 = arith.subf %581, %583 : vector<8x1024xf32>
    %cst_205 = arith.constant 1.000000e+00 : f32
    %585 = vector.broadcast %cst_205 : f32 to vector<8x1024xf32>
    %586 = arith.cmpf ogt, %584, %585 : vector<8x1024xf32>
    %587 = arith.extui %586 : vector<8x1024xi1> to vector<8x1024xi32>
    %588 = arith.sitofp %587 : vector<8x1024xi32> to vector<8x1024xf32>
    %589 = arith.truncf %588 : vector<8x1024xf32> to vector<8x1024xbf16>
    %cst_206 = arith.constant dense<0.000000e+00> : vector<8x128xf32>
    %590 = tpu.matmul %589, %6, %cst_206 {dimension_numbers = #tpu.dot_dimension_numbers<[1], [0], [0], [1], [0, 0, 1, 1], [], []>} : vector<8x1024xbf16>, vector<1024x128xbf16>, vector<8x128xf32> -> vector<8x128xf32>
    %591 = vector.broadcast %7 : vector<1x128xf32> to vector<8x128xf32>
    %592 = arith.addf %590, %591 : vector<8x128xf32>
    %cst_207 = arith.constant 0.949999988 : f32
    %593 = vector.broadcast %cst_207 : f32 to vector<8x128xf32>
    %594 = arith.mulf %593, %571 : vector<8x128xf32>
    %595 = arith.addf %594, %592 : vector<8x128xf32>
    %cst_208 = arith.constant 1.000000e+00 : f32
    %596 = vector.broadcast %cst_208 : f32 to vector<8x128xf32>
    %597 = arith.mulf %575, %596 : vector<8x128xf32>
    %598 = arith.subf %595, %597 : vector<8x128xf32>
    %cst_209 = arith.constant 1.000000e+00 : f32
    %599 = vector.broadcast %cst_209 : f32 to vector<8x128xf32>
    %600 = arith.cmpf ogt, %598, %599 : vector<8x128xf32>
    %601 = arith.extui %600 : vector<8x128xi1> to vector<8x128xi32>
    %602 = arith.sitofp %601 : vector<8x128xi32> to vector<8x128xf32>
    %c21 = arith.constant 21 : index
    %c0_210 = arith.constant 0 : index
    %c0_211 = arith.constant 0 : index
    %603 = vector.load %arg6[%c21, %c0_210, %c0_211] : memref<25x8x128xf32, #tpu.memory_space<vmem>>, vector<1x8x128xf32>
    %604 = vector.shape_cast %603 : vector<1x8x128xf32> to vector<8x128xf32>
    %605 = vector.shape_cast %598 : vector<8x128xf32> to vector<1x8x128xf32>
    tpu.vector_store %arg6[%c21, %c0_210, %c0_211], %605 {strides = array<i32>} : memref<25x8x128xf32, #tpu.memory_space<vmem>>, vector<1x8x128xf32>,
    %cst_212 = arith.constant 0.949999988 : f32
    %606 = vector.broadcast %cst_212 : f32 to vector<8x1024xf32>
    %607 = arith.mulf %606, %584 : vector<8x1024xf32>
    %608 = arith.addf %607, %5 : vector<8x1024xf32>
    %cst_213 = arith.constant 1.000000e+00 : f32
    %609 = vector.broadcast %cst_213 : f32 to vector<8x1024xf32>
    %610 = arith.mulf %588, %609 : vector<8x1024xf32>
    %611 = arith.subf %608, %610 : vector<8x1024xf32>
    %cst_214 = arith.constant 1.000000e+00 : f32
    %612 = vector.broadcast %cst_214 : f32 to vector<8x1024xf32>
    %613 = arith.cmpf ogt, %611, %612 : vector<8x1024xf32>
    %614 = arith.extui %613 : vector<8x1024xi1> to vector<8x1024xi32>
    %615 = arith.sitofp %614 : vector<8x1024xi32> to vector<8x1024xf32>
    %616 = arith.truncf %615 : vector<8x1024xf32> to vector<8x1024xbf16>
    %cst_215 = arith.constant dense<0.000000e+00> : vector<8x128xf32>
    %617 = tpu.matmul %616, %6, %cst_215 {dimension_numbers = #tpu.dot_dimension_numbers<[1], [0], [0], [1], [0, 0, 1, 1], [], []>} : vector<8x1024xbf16>, vector<1024x128xbf16>, vector<8x128xf32> -> vector<8x128xf32>
    %618 = vector.broadcast %7 : vector<1x128xf32> to vector<8x128xf32>
    %619 = arith.addf %617, %618 : vector<8x128xf32>
    %cst_216 = arith.constant 0.949999988 : f32
    %620 = vector.broadcast %cst_216 : f32 to vector<8x128xf32>
    %621 = arith.mulf %620, %598 : vector<8x128xf32>
    %622 = arith.addf %621, %619 : vector<8x128xf32>
    %cst_217 = arith.constant 1.000000e+00 : f32
    %623 = vector.broadcast %cst_217 : f32 to vector<8x128xf32>
    %624 = arith.mulf %602, %623 : vector<8x128xf32>
    %625 = arith.subf %622, %624 : vector<8x128xf32>
    %cst_218 = arith.constant 1.000000e+00 : f32
    %626 = vector.broadcast %cst_218 : f32 to vector<8x128xf32>
    %627 = arith.cmpf ogt, %625, %626 : vector<8x128xf32>
    %628 = arith.extui %627 : vector<8x128xi1> to vector<8x128xi32>
    %629 = arith.sitofp %628 : vector<8x128xi32> to vector<8x128xf32>
    %c22 = arith.constant 22 : index
    %c0_219 = arith.constant 0 : index
    %c0_220 = arith.constant 0 : index
    %630 = vector.load %arg6[%c22, %c0_219, %c0_220] : memref<25x8x128xf32, #tpu.memory_space<vmem>>, vector<1x8x128xf32>
    %631 = vector.shape_cast %630 : vector<1x8x128xf32> to vector<8x128xf32>
    %632 = vector.shape_cast %625 : vector<8x128xf32> to vector<1x8x128xf32>
    tpu.vector_store %arg6[%c22, %c0_219, %c0_220], %632 {strides = array<i32>} : memref<25x8x128xf32, #tpu.memory_space<vmem>>, vector<1x8x128xf32>,
    %cst_221 = arith.constant 0.949999988 : f32
    %633 = vector.broadcast %cst_221 : f32 to vector<8x1024xf32>
    %634 = arith.mulf %633, %611 : vector<8x1024xf32>
    %635 = arith.addf %634, %5 : vector<8x1024xf32>
    %cst_222 = arith.constant 1.000000e+00 : f32
    %636 = vector.broadcast %cst_222 : f32 to vector<8x1024xf32>
    %637 = arith.mulf %615, %636 : vector<8x1024xf32>
    %638 = arith.subf %635, %637 : vector<8x1024xf32>
    %cst_223 = arith.constant 1.000000e+00 : f32
    %639 = vector.broadcast %cst_223 : f32 to vector<8x1024xf32>
    %640 = arith.cmpf ogt, %638, %639 : vector<8x1024xf32>
    %641 = arith.extui %640 : vector<8x1024xi1> to vector<8x1024xi32>
    %642 = arith.sitofp %641 : vector<8x1024xi32> to vector<8x1024xf32>
    %643 = arith.truncf %642 : vector<8x1024xf32> to vector<8x1024xbf16>
    %cst_224 = arith.constant dense<0.000000e+00> : vector<8x128xf32>
    %644 = tpu.matmul %643, %6, %cst_224 {dimension_numbers = #tpu.dot_dimension_numbers<[1], [0], [0], [1], [0, 0, 1, 1], [], []>} : vector<8x1024xbf16>, vector<1024x128xbf16>, vector<8x128xf32> -> vector<8x128xf32>
    %645 = vector.broadcast %7 : vector<1x128xf32> to vector<8x128xf32>
    %646 = arith.addf %644, %645 : vector<8x128xf32>
    %cst_225 = arith.constant 0.949999988 : f32
    %647 = vector.broadcast %cst_225 : f32 to vector<8x128xf32>
    %648 = arith.mulf %647, %625 : vector<8x128xf32>
    %649 = arith.addf %648, %646 : vector<8x128xf32>
    %cst_226 = arith.constant 1.000000e+00 : f32
    %650 = vector.broadcast %cst_226 : f32 to vector<8x128xf32>
    %651 = arith.mulf %629, %650 : vector<8x128xf32>
    %652 = arith.subf %649, %651 : vector<8x128xf32>
    %cst_227 = arith.constant 1.000000e+00 : f32
    %653 = vector.broadcast %cst_227 : f32 to vector<8x128xf32>
    %654 = arith.cmpf ogt, %652, %653 : vector<8x128xf32>
    %655 = arith.extui %654 : vector<8x128xi1> to vector<8x128xi32>
    %656 = arith.sitofp %655 : vector<8x128xi32> to vector<8x128xf32>
    %c23 = arith.constant 23 : index
    %c0_228 = arith.constant 0 : index
    %c0_229 = arith.constant 0 : index
    %657 = vector.load %arg6[%c23, %c0_228, %c0_229] : memref<25x8x128xf32, #tpu.memory_space<vmem>>, vector<1x8x128xf32>
    %658 = vector.shape_cast %657 : vector<1x8x128xf32> to vector<8x128xf32>
    %659 = vector.shape_cast %652 : vector<8x128xf32> to vector<1x8x128xf32>
    tpu.vector_store %arg6[%c23, %c0_228, %c0_229], %659 {strides = array<i32>} : memref<25x8x128xf32, #tpu.memory_space<vmem>>, vector<1x8x128xf32>,
    %cst_230 = arith.constant 0.949999988 : f32
    %660 = vector.broadcast %cst_230 : f32 to vector<8x1024xf32>
    %661 = arith.mulf %660, %638 : vector<8x1024xf32>
    %662 = arith.addf %661, %5 : vector<8x1024xf32>
    %cst_231 = arith.constant 1.000000e+00 : f32
    %663 = vector.broadcast %cst_231 : f32 to vector<8x1024xf32>
    %664 = arith.mulf %642, %663 : vector<8x1024xf32>
    %665 = arith.subf %662, %664 : vector<8x1024xf32>
    %cst_232 = arith.constant 1.000000e+00 : f32
    %666 = vector.broadcast %cst_232 : f32 to vector<8x1024xf32>
    %667 = arith.cmpf ogt, %665, %666 : vector<8x1024xf32>
    %668 = arith.extui %667 : vector<8x1024xi1> to vector<8x1024xi32>
    %669 = arith.sitofp %668 : vector<8x1024xi32> to vector<8x1024xf32>
    %670 = arith.truncf %669 : vector<8x1024xf32> to vector<8x1024xbf16>
    %cst_233 = arith.constant dense<0.000000e+00> : vector<8x128xf32>
    %671 = tpu.matmul %670, %6, %cst_233 {dimension_numbers = #tpu.dot_dimension_numbers<[1], [0], [0], [1], [0, 0, 1, 1], [], []>} : vector<8x1024xbf16>, vector<1024x128xbf16>, vector<8x128xf32> -> vector<8x128xf32>
    %672 = vector.broadcast %7 : vector<1x128xf32> to vector<8x128xf32>
    %673 = arith.addf %671, %672 : vector<8x128xf32>
    %cst_234 = arith.constant 0.949999988 : f32
    %674 = vector.broadcast %cst_234 : f32 to vector<8x128xf32>
    %675 = arith.mulf %674, %652 : vector<8x128xf32>
    %676 = arith.addf %675, %673 : vector<8x128xf32>
    %cst_235 = arith.constant 1.000000e+00 : f32
    %677 = vector.broadcast %cst_235 : f32 to vector<8x128xf32>
    %678 = arith.mulf %656, %677 : vector<8x128xf32>
    %679 = arith.subf %676, %678 : vector<8x128xf32>
    %c24 = arith.constant 24 : index
    %c0_236 = arith.constant 0 : index
    %c0_237 = arith.constant 0 : index
    %680 = vector.load %arg6[%c24, %c0_236, %c0_237] : memref<25x8x128xf32, #tpu.memory_space<vmem>>, vector<1x8x128xf32>
    %681 = vector.shape_cast %680 : vector<1x8x128xf32> to vector<8x128xf32>
    %682 = vector.shape_cast %679 : vector<8x128xf32> to vector<1x8x128xf32>
    tpu.vector_store %arg6[%c24, %c0_236, %c0_237], %682 {strides = array<i32>} : memref<25x8x128xf32, #tpu.memory_space<vmem>>, vector<1x8x128xf32>,
    return
  }
  func.func @transform_0(%arg0: i32) -> (i32, i32) {
    %c0_i32 = arith.constant 0 : i32
    %c0_i32_0 = arith.constant 0 : i32
    return %arg0, %c0_i32 : i32, i32
  }
  func.func @transform_1(%arg0: i32) -> (i32, i32) {
    %c0_i32 = arith.constant 0 : i32
    %c0_i32_0 = arith.constant 0 : i32
    %c0_i32_1 = arith.constant 0 : i32
    return %c0_i32, %c0_i32_0 : i32, i32
  }
  func.func @transform_2(%arg0: i32) -> (i32, i32) {
    %c0_i32 = arith.constant 0 : i32
    %c0_i32_0 = arith.constant 0 : i32
    %c0_i32_1 = arith.constant 0 : i32
    return %c0_i32, %c0_i32_0 : i32, i32
  }
  func.func @transform_3(%arg0: i32) -> (i32, i32) {
    %c0_i32 = arith.constant 0 : i32
    %c0_i32_0 = arith.constant 0 : i32
    %c0_i32_1 = arith.constant 0 : i32
    return %c0_i32, %c0_i32_0 : i32, i32
  }
  func.func @transform_4(%arg0: i32) -> (i32, i32) {
    %c0_i32 = arith.constant 0 : i32
    %c0_i32_0 = arith.constant 0 : i32
    %c0_i32_1 = arith.constant 0 : i32
    return %c0_i32, %c0_i32_0 : i32, i32
  }
  func.func @transform_5(%arg0: i32) -> (i32, i32, i32) {
    %c0_i32 = arith.constant 0 : i32
    %c0_i32_0 = arith.constant 0 : i32
    %c0_i32_1 = arith.constant 0 : i32
    return %c0_i32, %arg0, %c0_i32_0 : i32, i32, i32
  }
}

</mosaic_0001>

<bundles_post_ra>
// kernel: snn_forward.1
= control target key start
LH: loop header
LB: loop body
LE: loop exit
PB: predicated region body
PF: predicated region fallthrough
CT: control target
= control target key end

     0   :  { %10 = vsyncpa [#allocation3], 0  ;;  %s18708_s0 = inlined_call_operand.vmem [shape: bf16[8,896], index: 0, kind: input, shape index: {}]   ;;  %s18709_s1 = inlined_call_operand.hbm [shape: bf16[896,1024], index: 1, kind: input, shape index: {}]   ;;  %s18710_s2 = inlined_call_operand.hbm [shape: f32[1,1024], index: 2, kind: input, shape index: {}]   ;;  %s18711_s3 = inlined_call_operand.hbm [shape: bf16[1024,128], index: 3, kind: input, shape index: {}]   ;;  %s18712_s4 = inlined_call_operand.hbm [shape: f32[1,128], index: 4, kind: input, shape index: {}]   ;;  %s18713_s5 = inlined_call_operand.vmem [shape: f32[25,8,128], index: 5, kind: output, shape index: {}]  }
   0x1   :  { %11 = vsyncpa [#allocation5], 0 }
   0x2   :  { %12 = vsyncpa [#allocation8], 0  ;;  %s13582_s18 = smov [#allocation4]   ;;  %s13583_s20 = smov [#allocation2]  }
   0x3   :  { %s33_s19 = sshll.u32 %s13582_s18, 4  ;;  %s20_s21 = sshll.u32 %s13583_s20, 4  ;;  %s34_s19 = int_to_ptr.vmem [resolvable:$true] %s33_s19  ;;  %s13623_s21 = int_to_ptr.vmem [resolvable:$true] %s20_s21 }
   0x4   :  { %s13488_s24 = scalar_lea.hbm %s18710_s2, 128 }
   0x5   :  { %p13489_p0 = scmp.ne.s32.totalorder %s18710_s2, %s13488_s24  ;;  %p13492_p1 = scmp.lt.u32.totalorder %s13488_s24, %s18710_s2 }
   0x7   :  { %p13494_p2 = pnand %p13492_p1, %p13489_p0 }
   0x9   :  { %13497 = shalt.err (!%p13494_p2)
}
   0xa   :  { %s13498_s29 = scalar_lea.vmem %s34_s19, 128  ;;  %p13503_p4 = scmp.lt.s32.totalorder %s34_s19, %s34_s19 }
   0xb   :  { %p13499_p3 = scmp.ne.s32.totalorder %s34_s19, %s13498_s29  ;;  %p13504_p5 = scmp.lt.s32.totalorder %s13498_s29, %s13498_s29 }
   0xd   :  { %p13505_p6 = por %p13504_p5, %p13503_p4 }
   0xf   :  { %p13506_p7 = pnand %p13505_p6, %p13499_p3 }
  0x11   :  { %13509 = shalt.err (!%p13506_p7)
}
  0x12   :  { %36 = dma.hbm_to_vmem [thread:$0]  %s18710_s2, 128, %s34_s19, [#allocation5]  }
  0x13   :  { %s13510_s9 = scalar_lea.hbm %s18709_s1, 57344 }
  0x14   :  { %p13511_p8 = scmp.ne.s32.totalorder %s18709_s1, %s13510_s9  ;;  %p13514_p9 = scmp.lt.u32.totalorder %s13510_s9, %s18709_s1 }
  0x16   :  { %p13516_p10 = pnand %p13514_p9, %p13511_p8 }
  0x18   :  { %13519 = shalt.err (!%p13516_p10)
}
  0x19   :  { %s13520_s14 = scalar_lea.vmem %s13623_s21, 57344  ;;  %p13525_p12 = scmp.lt.s32.totalorder %s13623_s21, %s13623_s21 }
  0x1a   :  { %p13521_p11 = scmp.ne.s32.totalorder %s13623_s21, %s13520_s14  ;;  %p13526_p13 = scmp.lt.s32.totalorder %s13520_s14, %s13520_s14 }
  0x1c   :  { %p13527_p0 = por %p13526_p13, %p13525_p12 }
  0x1e   :  { %p13528_p1 = pnand %p13527_p0, %p13521_p11 }
  0x20   :  { %13531 = shalt.err (!%p13528_p1)
}
  0x21   :  { %s13584_s2 = smov 512   ;;  %s13585_s15 = smov 32  }
  0x22   :  { %26 = dma.hbm_to_vmem [thread:$0]  %s18709_s1, 57344, %s13623_s21, [#allocation3], %s13584_s2, %s13584_s2, %s13585_s15  }
  0x23   :  { %s13586_s18 = smov [#allocation6]   ;;  %s13532_s23 = scalar_lea.hbm %s18711_s3, 8192 }
  0x24   :  { %s42_s19 = sshll.u32 %s13586_s18, 4  ;;  %p13533_p2 = scmp.ne.s32.totalorder %s18711_s3, %s13532_s23  ;;  %s43_s19 = int_to_ptr.vmem [resolvable:$true] %s42_s19 }
  0x25   :  { %p13536_p3 = scmp.lt.u32.totalorder %s13532_s23, %s18711_s3 }
  0x27   :  { %p13538_p4 = pnand %p13536_p3, %p13533_p2 }
  0x29   :  { %13541 = shalt.err (!%p13538_p4)
}
  0x2a   :  { %s13542_s28 = scalar_lea.vmem %s43_s19, 8192  ;;  %p13547_p6 = scmp.lt.s32.totalorder %s43_s19, %s43_s19 }
  0x2b   :  { %p13543_p5 = scmp.ne.s32.totalorder %s43_s19, %s13542_s28  ;;  %p13548_p7 = scmp.lt.s32.totalorder %s13542_s28, %s13542_s28 }
  0x2d   :  { %p13549_p8 = por %p13548_p7, %p13547_p6 }
  0x2f   :  { %p13550_p9 = pnand %p13549_p8, %p13543_p5 }
  0x31   :  { %13553 = shalt.err (!%p13550_p9)
}
  0x32   :  { %s13587_s1 = smov 64   ;;  %s13588_s21 = smov 4  }
  0x33   :  { %48 = dma.hbm_to_vmem [thread:$0]  %s18711_s3, 8192, %s43_s19, [#allocation5], %s13587_s1, %s13587_s1, %s13588_s21  }
  0x34   :  { %s13589_s6 = smov [#allocation7]   ;;  %s13554_s10 = scalar_lea.hbm %s18712_s4, 16 }
  0x35   :  { %s55_s7 = sshll.u32 %s13589_s6, 4  ;;  %p13555_p10 = scmp.ne.s32.totalorder %s18712_s4, %s13554_s10  ;;  %s56_s7 = int_to_ptr.vmem [resolvable:$true] %s55_s7 }
  0x36   :  { %p13558_p11 = scmp.lt.u32.totalorder %s13554_s10, %s18712_s4 }
  0x38   :  { %p13560_p12 = pnand %p13558_p11, %p13555_p10 }
  0x3a   :  { %13563 = shalt.err (!%p13560_p12)
}
  0x3b   :  { %s13564_s2 = scalar_lea.vmem %s56_s7, 16  ;;  %s13568_s3 = scalar_lea.vmem %s56_s7, 32 }
  0x3c   :  { %p13565_p13 = scmp.ne.s32.totalorder %s56_s7, %s13564_s2  ;;  %p13569_p0 = scmp.lt.s32.totalorder %s56_s7, %s56_s7 }
  0x3d   :  { %p13570_p1 = scmp.lt.s32.totalorder %s13568_s3, %s13564_s2 }
  0x3f   :  { %p13571_p2 = por %p13570_p1, %p13569_p0 }
  0x41   :  { %p13572_p3 = pnand %p13571_p2, %p13565_p13 }
  0x43   :  { %13575 = shalt.err (!%p13572_p3)
}
  0x44   :  { %58 = dma.hbm_to_vmem [thread:$0]  %s18712_s4, 16, %s56_s7, [#allocation8]  }
  0x45   :  { %13576 = dma.done.wait [#allocation3], 57344  }
  0x46   :  { %13577 = vsyncadd [#allocation3], 4294909952 }
  0x47   :  { %13578 = dma.done.wait [#allocation5], 8320  }
  0x48   :  { %13579 = vsyncadd [#allocation5], 4294958976 }
  0x49   :  { %13580 = dma.done.wait [#allocation8], 16  }
  0x4a   :  { %13581 = vsyncadd [#allocation8], 4294967280  ;;  %v76_v0 = vld [vmem:[#allocation2] sm:$0xff]  ;;  %v77_v2 = vld [vmem:[#allocation2 + $0x8] sm:$0xff] }
  0x4b   :  { %v80_v1 = vld [vmem:[#allocation2 + $0x20] sm:$0xff]  ;;  %v81_v4 = vld [vmem:[#allocation2 + $0x28] sm:$0xff] }
  0x4c   :  { %v9599_v3 = vcombine.high %v76_v0, %v80_v1  ;;  %v9598_v5 = vcombine.low %v76_v0, %v80_v1  ;;  %v84_v6 = vld [vmem:[#allocation2 + $0x40] sm:$0xff]  ;;  %v9601_v8 = vcombine.high %v77_v2, %v81_v4  ;;  %v9600_v9 = vcombine.low %v77_v2, %v81_v4  ;;  %v85_v11 = vld [vmem:[#allocation2 + $0x48] sm:$0xff] }
  0x4d   :  { %v88_v7 = vld [vmem:[#allocation2 + $0x60] sm:$0xff]  ;;  %v89_v12 = vld [vmem:[#allocation2 + $0x68] sm:$0xff] }
  0x4e   :  { %v9607_v10 = vcombine.high %v84_v6, %v88_v7  ;;  %v92_v13 = vld [vmem:[#allocation2 + $0x80] sm:$0xff]  ;;  %2831 = vmatprep.subr.bf16.mxu0 %v9599_v3  ;;  %v9609_v14 = vcombine.high %v85_v11, %v89_v12  ;;  %v93_v16 = vld [vmem:[#allocation2 + $0x88] sm:$0xff]  ;;  %2995 = vmatprep.subr.bf16.mxu1 %v9601_v8  ;;  %v9606_v18 = vcombine.low %v84_v6, %v88_v7 }
  0x4f   :  { %v96_v15 = vld [vmem:[#allocation2 + $0xa0] sm:$0xff]  ;;  %v97_v17 = vld [vmem:[#allocation2 + $0xa8] sm:$0xff]  ;;  %2832 = vmatpush1.bf16.msra.mxu0 %v9598_v5  ;;  %2996 = vmatpush1.bf16.msra.mxu1 %v9600_v9  ;;  %v9608_v19 = vcombine.low %v85_v11, %v89_v12 }
  0x50   :  { %2833 = vmatprep.subr.bf16.mxu0 %v9607_v10  ;;  %v9615_v20 = vcombine.high %v92_v13, %v96_v15  ;;  %2997 = vmatprep.subr.bf16.mxu1 %v9609_v14  ;;  %v9617_v21 = vcombine.high %v93_v16, %v97_v17  ;;  %v100_v22 = vld [vmem:[#allocation2 + $0xc0] sm:$0xff]  ;;  %v101_v24 = vld [vmem:[#allocation2 + $0xc8] sm:$0xff]  ;;  %v9614_v26 = vcombine.low %v92_v13, %v96_v15 }
  0x51   :  { %v104_v23 = vld [vmem:[#allocation2 + $0xe0] sm:$0xff]  ;;  %v105_v25 = vld [vmem:[#allocation2 + $0xe8] sm:$0xff]  ;;  %v9616_v27 = vcombine.low %v93_v16, %v97_v17 }
  0x52   :  { %v9623_v28 = vcombine.high %v100_v22, %v104_v23  ;;  %v9625_v29 = vcombine.high %v101_v24, %v105_v25  ;;  %v108_v30 = vld [vmem:[#allocation2 + $0x100] sm:$0xff]  ;;  %v109_v32 = vld [vmem:[#allocation2 + $0x108] sm:$0xff]  ;;  %v9622_v34 = vcombine.low %v100_v22, %v104_v23  ;;  %v9624_v35 = vcombine.low %v101_v24, %v105_v25 }
  0x53   :  { %2834 = vmatpush1.bf16.msra.mxu0 %v9606_v18  ;;  %2998 = vmatpush1.bf16.msra.mxu1 %v9608_v19  ;;  %v112_v31 = vld [vmem:[#allocation2 + $0x120] sm:$0xff]  ;;  %v113_v33 = vld [vmem:[#allocation2 + $0x128] sm:$0xff] }
  0x54   :  { %2835 = vmatprep.subr.bf16.mxu0 %v9615_v20  ;;  %2999 = vmatprep.subr.bf16.mxu1 %v9617_v21  ;;  %v9631_v36 = vcombine.high %v108_v30, %v112_v31  ;;  %v9633_v37 = vcombine.high %v109_v32, %v113_v33  ;;  %v116_v38 = vld [vmem:[#allocation2 + $0x140] sm:$0xff]  ;;  %v117_v40 = vld [vmem:[#allocation2 + $0x148] sm:$0xff]  ;;  %v9630_v42 = vcombine.low %v108_v30, %v112_v31 }
  0x55   :  { %v120_v39 = vld [vmem:[#allocation2 + $0x160] sm:$0xff]  ;;  %v121_v41 = vld [vmem:[#allocation2 + $0x168] sm:$0xff]  ;;  %v9632_v43 = vcombine.low %v109_v32, %v113_v33 }
  0x56   :  { %v9639_v44 = vcombine.high %v116_v38, %v120_v39  ;;  %v9641_v45 = vcombine.high %v117_v40, %v121_v41  ;;  %v124_v46 = vld [vmem:[#allocation2 + $0x180] sm:$0xff]  ;;  %v125_v48 = vld [vmem:[#allocation2 + $0x188] sm:$0xff]  ;;  %v9638_v50 = vcombine.low %v116_v38, %v120_v39  ;;  %v9640_v51 = vcombine.low %v117_v40, %v121_v41 }
  0x57   :  { %2836 = vmatpush1.bf16.msra.mxu0 %v9614_v26  ;;  %3000 = vmatpush1.bf16.msra.mxu1 %v9616_v27  ;;  %v128_v47 = vld [vmem:[#allocation2 + $0x1a0] sm:$0xff]  ;;  %v129_v49 = vld [vmem:[#allocation2 + $0x1a8] sm:$0xff] }
  0x58   :  { %2837 = vmatprep.subr.bf16.mxu0 %v9623_v28  ;;  %3001 = vmatprep.subr.bf16.mxu1 %v9625_v29  ;;  %v9647_v52 = vcombine.high %v124_v46, %v128_v47  ;;  %v13681_v53 = vld [vmem:[%s18708_s0] sm:$0xff]  ;;  %v9649_v54 = vcombine.high %v125_v48, %v129_v49  ;;  %v133_v58 = vld [vmem:[#allocation2 + $0x1c8] sm:$0xff]  ;;  %v9646_v60 = vcombine.low %v124_v46, %v128_v47 }
  0x59   :  { %v132_v55 = vld [vmem:[#allocation2 + $0x1c0] sm:$0xff]  ;;  %v13685_v57 = vcombine.high %v13681_v53, %v13681_v53  ;;  %v137_v59 = vld [vmem:[#allocation2 + $0x1e8] sm:$0xff]  ;;  %v9648_v61 = vcombine.low %v125_v48, %v129_v49 }
  0x5a   :  { %v136_v56 = vld [vmem:[#allocation2 + $0x1e0] sm:$0xff]  ;;  %v9657_v63 = vcombine.high %v133_v58, %v137_v59  ;;  %v141_v2 = vld [vmem:[#allocation2 + $0x208] sm:$0xff]  ;;  %v9656_v5 = vcombine.low %v133_v58, %v137_v59 }
  0x5b   :  { %2838 = vmatpush1.bf16.msra.mxu0 %v9622_v34  ;;  %3002 = vmatpush1.bf16.msra.mxu1 %v9624_v35  ;;  %v9655_v62 = vcombine.high %v132_v55, %v136_v56  ;;  %v140_v0 = vld [vmem:[#allocation2 + $0x200] sm:$0xff]  ;;  %v145_v3 = vld [vmem:[#allocation2 + $0x228] sm:$0xff]  ;;  %v9654_v4 = vcombine.low %v132_v55, %v136_v56 }
  0x5c   :  { %2839 = vmatprep.subr.bf16.mxu0 %v9631_v36  ;;  %3003 = vmatprep.subr.bf16.mxu1 %v9633_v37  ;;  %v144_v1 = vld [vmem:[#allocation2 + $0x220] sm:$0xff]  ;;  %v9665_v7 = vcombine.high %v141_v2, %v145_v3  ;;  %v149_v10 = vld [vmem:[#allocation2 + $0x248] sm:$0xff]  ;;  %v9664_v13 = vcombine.low %v141_v2, %v145_v3 }
  0x5d   :  { %2863 = vmatprep.mubr.bf16.mxu0 %v13685_v57  ;;  %3027 = vmatprep.mubr.bf16.mxu1 %v13685_v57  ;;  %v9663_v6 = vcombine.high %v140_v0, %v144_v1  ;;  %v148_v8 = vld [vmem:[#allocation2 + $0x240] sm:$0xff]  ;;  %v153_v11 = vld [vmem:[#allocation2 + $0x268] sm:$0xff]  ;;  %v9662_v12 = vcombine.low %v140_v0, %v144_v1 }
  0x5e   :  { %v152_v9 = vld [vmem:[#allocation2 + $0x260] sm:$0xff]  ;;  %v9673_v15 = vcombine.high %v149_v10, %v153_v11  ;;  %v157_v18 = vld [vmem:[#allocation2 + $0x288] sm:$0xff]  ;;  %v9672_v21 = vcombine.low %v149_v10, %v153_v11 }
  0x5f   :  { %2840 = vmatpush1.bf16.msra.mxu0 %v9630_v42  ;;  %3004 = vmatpush1.bf16.msra.mxu1 %v9632_v43  ;;  %v9671_v14 = vcombine.high %v148_v8, %v152_v9  ;;  %v156_v16 = vld [vmem:[#allocation2 + $0x280] sm:$0xff]  ;;  %v161_v19 = vld [vmem:[#allocation2 + $0x2a8] sm:$0xff]  ;;  %v9670_v20 = vcombine.low %v148_v8, %v152_v9 }
  0x60   :  { %2841 = vmatprep.subr.bf16.mxu0 %v9639_v44  ;;  %3005 = vmatprep.subr.bf16.mxu1 %v9641_v45  ;;  %v160_v17 = vld [vmem:[#allocation2 + $0x2a0] sm:$0xff]  ;;  %v9681_v23 = vcombine.high %v157_v18, %v161_v19  ;;  %v165_v26 = vld [vmem:[#allocation2 + $0x2c8] sm:$0xff]  ;;  %v9680_v29 = vcombine.low %v157_v18, %v161_v19 }
  0x61   :  { %v9679_v22 = vcombine.high %v156_v16, %v160_v17  ;;  %v164_v24 = vld [vmem:[#allocation2 + $0x2c0] sm:$0xff]  ;;  %v169_v27 = vld [vmem:[#allocation2 + $0x2e8] sm:$0xff]  ;;  %v9678_v28 = vcombine.low %v156_v16, %v160_v17 }
  0x62   :  { %v168_v25 = vld [vmem:[#allocation2 + $0x2e0] sm:$0xff]  ;;  %v9689_v31 = vcombine.high %v165_v26, %v169_v27  ;;  %v173_v34 = vld [vmem:[#allocation2 + $0x308] sm:$0xff]  ;;  %v9688_v37 = vcombine.low %v165_v26, %v169_v27 }
  0x63   :  { %2842 = vmatpush1.bf16.msra.mxu0 %v9638_v50  ;;  %3006 = vmatpush1.bf16.msra.mxu1 %v9640_v51  ;;  %v9687_v30 = vcombine.high %v164_v24, %v168_v25  ;;  %v172_v32 = vld [vmem:[#allocation2 + $0x300] sm:$0xff]  ;;  %v177_v35 = vld [vmem:[#allocation2 + $0x328] sm:$0xff]  ;;  %v9686_v36 = vcombine.low %v164_v24, %v168_v25 }
  0x64   :  { %2843 = vmatprep.subr.bf16.mxu0 %v9647_v52  ;;  %3007 = vmatprep.subr.bf16.mxu1 %v9649_v54  ;;  %v176_v33 = vld [vmem:[#allocation2 + $0x320] sm:$0xff]  ;;  %v9697_v39 = vcombine.high %v173_v34, %v177_v35  ;;  %v181_v42 = vld [vmem:[#allocation2 + $0x348] sm:$0xff]  ;;  %v9696_v45 = vcombine.low %v173_v34, %v177_v35 }
  0x65   :  { %v9695_v38 = vcombine.high %v172_v32, %v176_v33  ;;  %v180_v40 = vld [vmem:[#allocation2 + $0x340] sm:$0xff]  ;;  %v185_v43 = vld [vmem:[#allocation2 + $0x368] sm:$0xff]  ;;  %v9694_v44 = vcombine.low %v172_v32, %v176_v33 }
  0x66   :  { %v184_v41 = vld [vmem:[#allocation2 + $0x360] sm:$0xff]  ;;  %v9705_v47 = vcombine.high %v181_v42, %v185_v43  ;;  %v189_v50 = vld [vmem:[#allocation2 + $0x388] sm:$0xff]  ;;  %v9704_v54 = vcombine.low %v181_v42, %v185_v43 }
  0x67   :  { %2844 = vmatpush1.bf16.msra.mxu0 %v9646_v60  ;;  %3008 = vmatpush1.bf16.msra.mxu1 %v9648_v61  ;;  %v9703_v46 = vcombine.high %v180_v40, %v184_v41  ;;  %v188_v48 = vld [vmem:[#allocation2 + $0x380] sm:$0xff]  ;;  %v193_v51 = vld [vmem:[#allocation2 + $0x3a8] sm:$0xff]  ;;  %v9702_v52 = vcombine.low %v180_v40, %v184_v41 }
  0x68   :  { %2845 = vmatprep.subr.bf16.mxu0 %v9655_v62  ;;  %3009 = vmatprep.subr.bf16.mxu1 %v9657_v63  ;;  %v192_v49 = vld [vmem:[#allocation2 + $0x3a0] sm:$0xff]  ;;  %v9713_v56 = vcombine.high %v189_v50, %v193_v51  ;;  %v197_v60 = vld [vmem:[#allocation2 + $0x3c8] sm:$0xff]  ;;  %v9712_v63 = vcombine.low %v189_v50, %v193_v51 }
  0x69   :  { %v9711_v55 = vcombine.high %v188_v48, %v192_v49  ;;  %v196_v58 = vld [vmem:[#allocation2 + $0x3c0] sm:$0xff]  ;;  %v201_v61 = vld [vmem:[#allocation2 + $0x3e8] sm:$0xff]  ;;  %v9710_v62 = vcombine.low %v188_v48, %v192_v49 }
  0x6a   :  { %v200_v59 = vld [vmem:[#allocation2 + $0x3e0] sm:$0xff]  ;;  %v9721_v1 = vcombine.high %v197_v60, %v201_v61 }
  0x6b   :  { %2846 = vmatpush1.bf16.msra.mxu0 %v9654_v4  ;;  %3010 = vmatpush1.bf16.msra.mxu1 %v9656_v5  ;;  %v9719_v0 = vcombine.high %v196_v58, %v200_v59  ;;  %v204_v2 = vld [vmem:[#allocation2 + $0x400] sm:$0xff]  ;;  %v205_v4 = vld [vmem:[#allocation2 + $0x408] sm:$0xff] }
  0x6c   :  { %2847 = vmatprep.subr.bf16.mxu0 %v9663_v6  ;;  %3011 = vmatprep.subr.bf16.mxu1 %v9665_v7  ;;  %v208_v3 = vld [vmem:[#allocation2 + $0x420] sm:$0xff]  ;;  %v209_v5 = vld [vmem:[#allocation2 + $0x428] sm:$0xff]  ;;  %v9718_v6 = vcombine.low %v196_v58, %v200_v59  ;;  %v9720_v7 = vcombine.low %v197_v60, %v201_v61 }
  0x6d   :  { %v9727_v8 = vcombine.high %v204_v2, %v208_v3  ;;  %v9729_v9 = vcombine.high %v205_v4, %v209_v5  ;;  %v212_v10 = vld [vmem:[#allocation2 + $0x440] sm:$0xff]  ;;  %v9726_v16 = vcombine.low %v204_v2, %v208_v3  ;;  %v9728_v17 = vcombine.low %v205_v4, %v209_v5 }
  0x6e   :  { %v216_v11 = vld [vmem:[#allocation2 + $0x460] sm:$0xff] }
  0x6f   :  { %2848 = vmatpush1.bf16.msra.mxu0 %v9662_v12  ;;  %3012 = vmatpush1.bf16.msra.mxu1 %v9664_v13  ;;  %v13691_v12 = vcombine.low %v13681_v53, %v13681_v53  ;;  %v213_v13 = vld [vmem:[#allocation2 + $0x448] sm:$0xff]  ;;  %v9735_v18 = vcombine.high %v212_v10, %v216_v11  ;;  %v220_v19 = vld [vmem:[#allocation2 + $0x480] sm:$0xff]  ;;  %v9734_v24 = vcombine.low %v212_v10, %v216_v11 }
  0x70   :  { %2849 = vmatprep.subr.bf16.mxu0 %v9671_v14  ;;  %3013 = vmatprep.subr.bf16.mxu1 %v9673_v15  ;;  %v217_v14 = vld [vmem:[#allocation2 + $0x468] sm:$0xff]  ;;  %v228_v27 = vld [vmem:[#allocation2 + $0x4c0] sm:$0xff] }
  0x71   :  { %v13696_v15 = vld [vmem:[%s18708_s0 + $0x8] sm:$0xff]  ;;  %v9736_v25 = vcombine.low %v213_v13, %v217_v14  ;;  %v236_v35 = vld [vmem:[#allocation2 + $0x500] sm:$0xff] }
  0x72   :  { %v225_v53 = vld [vmem:[#allocation2 + $0x4a8] sm:$0xff]  ;;  %v244_v43 = vld [vmem:[#allocation2 + $0x540] sm:$0xff] }
  0x73   :  { %2850 = vmatpush1.bf16.msra.mxu0 %v9670_v20  ;;  %3014 = vmatpush1.bf16.msra.mxu1 %v9672_v21  ;;  %v224_v20 = vld [vmem:[#allocation2 + $0x4a0] sm:$0xff]  ;;  %v9737_v21 = vcombine.high %v213_v13, %v217_v14 }
  0x74   :  { %2851 = vmatprep.subr.bf16.mxu0 %v9679_v22  ;;  %3015 = vmatprep.subr.bf16.mxu1 %v9681_v23  ;;  %v221_v22 = vld [vmem:[#allocation2 + $0x488] sm:$0xff]  ;;  %v13700_v23 = vcombine.high %v13696_v15, %v13696_v15  ;;  %v9743_v26 = vcombine.high %v220_v19, %v224_v20  ;;  %v9742_v32 = vcombine.low %v220_v19, %v224_v20  ;;  %v252_v51 = vld [vmem:[#allocation2 + $0x580] sm:$0xff] }
  0x75   :  { %v9744_v33 = vcombine.low %v221_v22, %v225_v53  ;;  %v260_v61 = vld [vmem:[#allocation2 + $0x5c0] sm:$0xff]  ;;  %v281_v19 = vld [vmem:[#allocation2 + $0x668] sm:$0xff] }
  0x76   :  { %v268_v5 = vld [vmem:[#allocation2 + $0x600] sm:$0xff] }
  0x77   :  { %2852 = vmatpush1.bf16.msra.mxu0 %v9678_v28  ;;  %3016 = vmatpush1.bf16.msra.mxu1 %v9680_v29  ;;  %v232_v28 = vld [vmem:[#allocation2 + $0x4e0] sm:$0xff]  ;;  %v229_v29 = vld [vmem:[#allocation2 + $0x4c8] sm:$0xff] }
  0x78   :  { %2853 = vmatprep.subr.bf16.mxu0 %v9687_v30  ;;  %3017 = vmatprep.subr.bf16.mxu1 %v9689_v31  ;;  %v9745_v30 = vcombine.high %v221_v22, %v225_v53  ;;  %v233_v31 = vld [vmem:[#allocation2 + $0x4e8] sm:$0xff]  ;;  %v9751_v34 = vcombine.high %v228_v27, %v232_v28  ;;  %v9750_v40 = vcombine.low %v228_v27, %v232_v28  ;;  %v276_v14 = vld [vmem:[#allocation2 + $0x640] sm:$0xff] }
  0x79   :  { %v9752_v41 = vcombine.low %v229_v29, %v233_v31  ;;  %v284_v53 = vld [vmem:[#allocation2 + $0x680] sm:$0xff]  ;;  %v289_v27 = vld [vmem:[#allocation2 + $0x6a8] sm:$0xff] }
  0x7b   :  { %2854 = vmatpush1.bf16.msra.mxu0 %v9686_v36  ;;  %3018 = vmatpush1.bf16.msra.mxu1 %v9688_v37  ;;  %v240_v36 = vld [vmem:[#allocation2 + $0x520] sm:$0xff]  ;;  %v237_v37 = vld [vmem:[#allocation2 + $0x508] sm:$0xff] }
  0x7c   :  { %2855 = vmatprep.subr.bf16.mxu0 %v9695_v38  ;;  %3019 = vmatprep.subr.bf16.mxu1 %v9697_v39  ;;  %v9753_v38 = vcombine.high %v229_v29, %v233_v31  ;;  %v241_v39 = vld [vmem:[#allocation2 + $0x528] sm:$0xff]  ;;  %v9759_v42 = vcombine.high %v236_v35, %v240_v36  ;;  %v9758_v48 = vcombine.low %v236_v35, %v240_v36  ;;  %v292_v31 = vld [vmem:[#allocation2 + $0x6c0] sm:$0xff] }
  0x7d   :  { %v9760_v49 = vcombine.low %v237_v37, %v241_v39  ;;  %v297_v35 = vld [vmem:[#allocation2 + $0x6e8] sm:$0xff] }
  0x7f   :  { %2856 = vmatpush1.bf16.msra.mxu0 %v9694_v44  ;;  %3020 = vmatpush1.bf16.msra.mxu1 %v9696_v45  ;;  %v248_v44 = vld [vmem:[#allocation2 + $0x560] sm:$0xff]  ;;  %v245_v45 = vld [vmem:[#allocation2 + $0x548] sm:$0xff] }
  0x80   :  { %2857 = vmatprep.subr.bf16.mxu0 %v9703_v46  ;;  %3021 = vmatprep.subr.bf16.mxu1 %v9705_v47  ;;  %v9761_v46 = vcombine.high %v237_v37, %v241_v39  ;;  %v249_v47 = vld [vmem:[#allocation2 + $0x568] sm:$0xff]  ;;  %v9767_v50 = vcombine.high %v244_v43, %v248_v44  ;;  %v9766_v58 = vcombine.low %v244_v43, %v248_v44  ;;  %v300_v39 = vld [vmem:[#allocation2 + $0x700] sm:$0xff] }
  0x81   :  { %v9768_v59 = vcombine.low %v245_v45, %v249_v47  ;;  %v305_v43 = vld [vmem:[#allocation2 + $0x728] sm:$0xff] }
  0x83   :  { %2858 = vmatpush1.bf16.msra.mxu0 %v9702_v52  ;;  %3022 = vmatpush1.bf16.msra.mxu1 %v9704_v54  ;;  %v256_v52 = vld [vmem:[#allocation2 + $0x5a0] sm:$0xff]  ;;  %v253_v54 = vld [vmem:[#allocation2 + $0x588] sm:$0xff] }
  0x84   :  { %2859 = vmatprep.subr.bf16.mxu0 %v9711_v55  ;;  %3023 = vmatprep.subr.bf16.mxu1 %v9713_v56  ;;  %v9769_v55 = vcombine.high %v245_v45, %v249_v47  ;;  %v257_v56 = vld [vmem:[#allocation2 + $0x5a8] sm:$0xff]  ;;  %v9775_v60 = vcombine.high %v252_v51, %v256_v52  ;;  %v9774_v2 = vcombine.low %v252_v51, %v256_v52  ;;  %v308_v47 = vld [vmem:[#allocation2 + $0x740] sm:$0xff] }
  0x85   :  { %v9776_v3 = vcombine.low %v253_v54, %v257_v56  ;;  %v313_v51 = vld [vmem:[#allocation2 + $0x768] sm:$0xff] }
  0x87   :  { %2860 = vmatpush1.bf16.msra.mxu0 %v9710_v62  ;;  %3024 = vmatpush1.bf16.msra.mxu1 %v9712_v63  ;;  %v264_v62 = vld [vmem:[#allocation2 + $0x5e0] sm:$0xff]  ;;  %v261_v63 = vld [vmem:[#allocation2 + $0x5c8] sm:$0xff] }
  0x88   :  { %2861 = vmatprep.subr.bf16.mxu0 %v9719_v0  ;;  %3025 = vmatprep.subr.bf16.mxu1 %v9721_v1  ;;  %v9777_v0 = vcombine.high %v253_v54, %v257_v56  ;;  %v265_v1 = vld [vmem:[#allocation2 + $0x5e8] sm:$0xff]  ;;  %v9783_v4 = vcombine.high %v260_v61, %v264_v62  ;;  %v9782_v10 = vcombine.low %v260_v61, %v264_v62  ;;  %v316_v56 = vld [vmem:[#allocation2 + $0x780] sm:$0xff] }
  0x89   :  { %v9784_v11 = vcombine.low %v261_v63, %v265_v1  ;;  %v321_v61 = vld [vmem:[#allocation2 + $0x7a8] sm:$0xff] }
  0x8b   :  { %2862 = vmatpush1.bf16.msra.mxu0 %v9718_v6  ;;  %3026 = vmatpush1.bf16.msra.mxu1 %v9720_v7  ;;  %v272_v6 = vld [vmem:[#allocation2 + $0x620] sm:$0xff]  ;;  %v269_v7 = vld [vmem:[#allocation2 + $0x608] sm:$0xff] }
  0x8c   :  { %2872 = vmatprep.subr.bf16.mxu0 %v9727_v8  ;;  %3036 = vmatprep.subr.bf16.mxu1 %v9729_v9  ;;  %v9785_v8 = vcombine.high %v261_v63, %v265_v1  ;;  %v273_v9 = vld [vmem:[#allocation2 + $0x628] sm:$0xff]  ;;  %v9791_v13 = vcombine.high %v268_v5, %v272_v6  ;;  %v9790_v20 = vcombine.low %v268_v5, %v272_v6  ;;  %v324_v1 = vld [vmem:[#allocation2 + $0x7c0] sm:$0xff] }
  0x8d   :  { %v329_v5 = vld [vmem:[#allocation2 + $0x7e8] sm:$0xff] }
  0x8e   :  { %2864 = vmatmul.mubr.bf16.vlgmr.msra.gmra.mrb[0].mxu0 %v13691_v12  ;;  %3028 = vmatmul.mubr.bf16.vlgmr.msra.gmra.mrb[0].mxu1 %v13691_v12 }
  0x8f   :  { %2873 = vmatpush1.bf16.msra.mxu0 %v9726_v16  ;;  %3037 = vmatpush1.bf16.msra.mxu1 %v9728_v17  ;;  %v280_v16 = vld [vmem:[#allocation2 + $0x660] sm:$0xff]  ;;  %v277_v17 = vld [vmem:[#allocation2 + $0x648] sm:$0xff] }
  0x90   :  { %2874 = vmatprep.subr.bf16.mxu0 %v9735_v18  ;;  %3038 = vmatprep.subr.bf16.mxu1 %v9737_v21  ;;  %v9793_v18 = vcombine.high %v269_v7, %v273_v9  ;;  %v9792_v21 = vcombine.low %v269_v7, %v273_v9  ;;  %v9799_v22 = vcombine.high %v276_v14, %v280_v16  ;;  %v332_v9 = vld [vmem:[#allocation2 + $0x800] sm:$0xff] }
  0x91   :  { %2904 = vmatprep.mubr.bf16.mxu0 %v13700_v23  ;;  %3068 = vmatprep.mubr.bf16.mxu1 %v13700_v23  ;;  %v9798_v28 = vcombine.low %v276_v14, %v280_v16  ;;  %v9800_v29 = vcombine.low %v277_v17, %v281_v19  ;;  %v337_v14 = vld [vmem:[#allocation2 + $0x828] sm:$0xff] }
  0x93   :  { %2875 = vmatpush1.bf16.msra.mxu0 %v9734_v24  ;;  %3039 = vmatpush1.bf16.msra.mxu1 %v9736_v25  ;;  %v288_v24 = vld [vmem:[#allocation2 + $0x6a0] sm:$0xff]  ;;  %v9801_v25 = vcombine.high %v277_v17, %v281_v19 }
  0x94   :  { %2876 = vmatprep.subr.bf16.mxu0 %v9743_v26  ;;  %3040 = vmatprep.subr.bf16.mxu1 %v9745_v30  ;;  %v285_v26 = vld [vmem:[#allocation2 + $0x688] sm:$0xff]  ;;  %v9807_v30 = vcombine.high %v284_v53, %v288_v24  ;;  %v9806_v36 = vcombine.low %v284_v53, %v288_v24  ;;  %v340_v17 = vld [vmem:[#allocation2 + $0x840] sm:$0xff]  ;;  %v13709_v24 = vld [vmem:[%s18708_s0 + $0x10] sm:$0xff] }
  0x95   :  { %v9808_v37 = vcombine.low %v285_v26, %v289_v27 }
  0x97   :  { %2877 = vmatpush1.bf16.msra.mxu0 %v9742_v32  ;;  %3041 = vmatpush1.bf16.msra.mxu1 %v9744_v33  ;;  %v296_v32 = vld [vmem:[#allocation2 + $0x6e0] sm:$0xff]  ;;  %v293_v33 = vld [vmem:[#allocation2 + $0x6c8] sm:$0xff] }
  0x98   :  { %2878 = vmatprep.subr.bf16.mxu0 %v9751_v34  ;;  %3042 = vmatprep.subr.bf16.mxu1 %v9753_v38  ;;  %v9809_v34 = vcombine.high %v285_v26, %v289_v27  ;;  %v9815_v38 = vcombine.high %v292_v31, %v296_v32  ;;  %v9814_v44 = vcombine.low %v292_v31, %v296_v32  ;;  %v352_v31 = vld [vmem:[#allocation2 + $0x8a0] sm:$0xff] }
  0x99   :  { %v9816_v45 = vcombine.low %v293_v33, %v297_v35  ;;  %v13717_v32 = vcombine.high %v13709_v24, %v13709_v24 }
  0x9b   :  { %2879 = vmatpush1.bf16.msra.mxu0 %v9750_v40  ;;  %3043 = vmatpush1.bf16.msra.mxu1 %v9752_v41  ;;  %v304_v40 = vld [vmem:[#allocation2 + $0x720] sm:$0xff]  ;;  %v301_v41 = vld [vmem:[#allocation2 + $0x708] sm:$0xff] }
  0x9c   :  { %2880 = vmatprep.subr.bf16.mxu0 %v9759_v42  ;;  %3044 = vmatprep.subr.bf16.mxu1 %v9761_v46  ;;  %v9817_v42 = vcombine.high %v293_v33, %v297_v35  ;;  %v9823_v46 = vcombine.high %v300_v39, %v304_v40  ;;  %v9822_v52 = vcombine.low %v300_v39, %v304_v40  ;;  %v349_v33 = vld [vmem:[#allocation2 + $0x888] sm:$0xff]  ;;  %v360_v39 = vld [vmem:[#allocation2 + $0x8e0] sm:$0xff] }
  0x9d   :  { %v9824_v54 = vcombine.low %v301_v41, %v305_v43  ;;  %v357_v40 = vld [vmem:[#allocation2 + $0x8c8] sm:$0xff] }
  0x9f   :  { %2881 = vmatpush1.bf16.msra.mxu0 %v9758_v48  ;;  %3045 = vmatpush1.bf16.msra.mxu1 %v9760_v49  ;;  %v312_v48 = vld [vmem:[#allocation2 + $0x760] sm:$0xff]  ;;  %v309_v49 = vld [vmem:[#allocation2 + $0x748] sm:$0xff] }
  0xa0   :  { %2882 = vmatprep.subr.bf16.mxu0 %v9767_v50  ;;  %3046 = vmatprep.subr.bf16.mxu1 %v9769_v55  ;;  %v9825_v50 = vcombine.high %v301_v41, %v305_v43  ;;  %v9831_v55 = vcombine.high %v308_v47, %v312_v48  ;;  %v9830_v62 = vcombine.low %v308_v47, %v312_v48  ;;  %v361_v41 = vld [vmem:[#allocation2 + $0x8e8] sm:$0xff]  ;;  %v368_v47 = vld [vmem:[#allocation2 + $0x920] sm:$0xff] }
  0xa1   :  { %v9832_v63 = vcombine.low %v309_v49, %v313_v51  ;;  %v365_v48 = vld [vmem:[#allocation2 + $0x908] sm:$0xff] }
  0xa3   :  { %2883 = vmatpush1.bf16.msra.mxu0 %v9766_v58  ;;  %3047 = vmatpush1.bf16.msra.mxu1 %v9768_v59  ;;  %v320_v58 = vld [vmem:[#allocation2 + $0x7a0] sm:$0xff]  ;;  %v317_v59 = vld [vmem:[#allocation2 + $0x788] sm:$0xff] }
  0xa4   :  { %2884 = vmatprep.subr.bf16.mxu0 %v9775_v60  ;;  %3048 = vmatprep.subr.bf16.mxu1 %v9777_v0  ;;  %v9833_v60 = vcombine.high %v309_v49, %v313_v51  ;;  %v9839_v0 = vcombine.high %v316_v56, %v320_v58  ;;  %v9838_v6 = vcombine.low %v316_v56, %v320_v58  ;;  %v369_v49 = vld [vmem:[#allocation2 + $0x928] sm:$0xff]  ;;  %v376_v56 = vld [vmem:[#allocation2 + $0x960] sm:$0xff] }
  0xa5   :  { %v9840_v7 = vcombine.low %v317_v59, %v321_v61  ;;  %v9880_v51 = vcombine.low %v357_v40, %v361_v41  ;;  %v373_v58 = vld [vmem:[#allocation2 + $0x948] sm:$0xff] }
  0xa7   :  { %2885 = vmatpush1.bf16.msra.mxu0 %v9774_v2  ;;  %3049 = vmatpush1.bf16.msra.mxu1 %v9776_v3  ;;  %v328_v2 = vld [vmem:[#allocation2 + $0x7e0] sm:$0xff]  ;;  %v325_v3 = vld [vmem:[#allocation2 + $0x7c8] sm:$0xff] }
  0xa8   :  { %2886 = vmatprep.subr.bf16.mxu0 %v9783_v4  ;;  %3050 = vmatprep.subr.bf16.mxu1 %v9785_v8  ;;  %v9841_v4 = vcombine.high %v317_v59, %v321_v61  ;;  %v9847_v8 = vcombine.high %v324_v1, %v328_v2  ;;  %v9846_v16 = vcombine.low %v324_v1, %v328_v2  ;;  %v377_v59 = vld [vmem:[#allocation2 + $0x968] sm:$0xff]  ;;  %v384_v1 = vld [vmem:[#allocation2 + $0x9a0] sm:$0xff] }
  0xa9   :  { %v9888_v61 = vcombine.low %v365_v48, %v369_v49  ;;  %v381_v2 = vld [vmem:[#allocation2 + $0x988] sm:$0xff] }
  0xab   :  { %2887 = vmatpush1.bf16.msra.mxu0 %v9782_v10  ;;  %3051 = vmatpush1.bf16.msra.mxu1 %v9784_v11  ;;  %v336_v10 = vld [vmem:[#allocation2 + $0x820] sm:$0xff]  ;;  %v333_v11 = vld [vmem:[#allocation2 + $0x808] sm:$0xff] }
  0xac   :  { %2888 = vmatprep.subr.bf16.mxu0 %v9791_v13  ;;  %3052 = vmatprep.subr.bf16.mxu1 %v9793_v18  ;;  %v9849_v13 = vcombine.high %v325_v3, %v329_v5  ;;  %v9848_v18 = vcombine.low %v325_v3, %v329_v5  ;;  %v9855_v19 = vcombine.high %v332_v9, %v336_v10  ;;  %v385_v3 = vld [vmem:[#allocation2 + $0x9a8] sm:$0xff] }
  0xad   :  { %v9857_v53 = vcombine.high %v333_v11, %v337_v14  ;;  %v9854_v26 = vcombine.low %v332_v9, %v336_v10  ;;  %v9856_v27 = vcombine.low %v333_v11, %v337_v14  ;;  %v9896_v5 = vcombine.low %v373_v58, %v377_v59  ;;  %v392_v9 = vld [vmem:[#allocation2 + $0x9e0] sm:$0xff]  ;;  %v389_v10 = vld [vmem:[#allocation2 + $0x9c8] sm:$0xff] }
  0xae   :  { %v393_v11 = vld [vmem:[#allocation2 + $0x9e8] sm:$0xff]  ;;  %v9904_v14 = vcombine.low %v381_v2, %v385_v3 }
  0xaf   :  { %2889 = vmatpush1.bf16.msra.mxu0 %v9790_v20  ;;  %3053 = vmatpush1.bf16.msra.mxu1 %v9792_v21  ;;  %v344_v20 = vld [vmem:[#allocation2 + $0x860] sm:$0xff]  ;;  %v341_v21 = vld [vmem:[#allocation2 + $0x848] sm:$0xff] }
  0xb0   :  { %2890 = vmatprep.subr.bf16.mxu0 %v9799_v22  ;;  %3054 = vmatprep.subr.bf16.mxu1 %v9801_v25  ;;  %v345_v22 = vld [vmem:[#allocation2 + $0x868] sm:$0xff]  ;;  %v13713_v25 = vcombine.low %v13696_v15, %v13696_v15  ;;  %v9862_v15 = vcombine.low %v340_v17, %v344_v20 }
  0xb1   :  { %v9864_v35 = vcombine.low %v341_v21, %v345_v22 }
  0xb3   :  { %2891 = vmatpush1.bf16.msra.mxu0 %v9798_v28  ;;  %3055 = vmatpush1.bf16.msra.mxu1 %v9800_v29  ;;  %v9863_v28 = vcombine.high %v340_v17, %v344_v20  ;;  %v348_v29 = vld [vmem:[#allocation2 + $0x880] sm:$0xff]  ;;  %v9913_v17 = vcombine.high %v389_v10, %v393_v11  ;;  %v397_v20 = vld [vmem:[#allocation2 + $0xa08] sm:$0xff] }
  0xb4   :  { %2892 = vmatprep.subr.bf16.mxu0 %v9807_v30  ;;  %3056 = vmatprep.subr.bf16.mxu1 %v9809_v34  ;;  %v9865_v30 = vcombine.high %v341_v21, %v345_v22  ;;  %v353_v34 = vld [vmem:[#allocation2 + $0x8a8] sm:$0xff] }
  0xb5   :  { %v9872_v43 = vcombine.low %v349_v33, %v353_v34  ;;  %v401_v21 = vld [vmem:[#allocation2 + $0xa28] sm:$0xff] }
  0xb7   :  { %2893 = vmatpush1.bf16.msra.mxu0 %v9806_v36  ;;  %3057 = vmatpush1.bf16.msra.mxu1 %v9808_v37  ;;  %v9871_v36 = vcombine.high %v348_v29, %v352_v31  ;;  %v9873_v37 = vcombine.high %v349_v33, %v353_v34  ;;  %v9920_v34 = vcombine.low %v397_v20, %v401_v21 }
  0xb8   :  { %2894 = vmatprep.subr.bf16.mxu0 %v9815_v38  ;;  %3058 = vmatprep.subr.bf16.mxu1 %v9817_v42  ;;  %v356_v38 = vld [vmem:[#allocation2 + $0x8c0] sm:$0xff]  ;;  %v9870_v42 = vcombine.low %v348_v29, %v352_v31  ;;  %v409_v31 = vld [vmem:[#allocation2 + $0xa68] sm:$0xff] }
  0xb9   :  { %v408_v29 = vld [vmem:[#allocation2 + $0xa60] sm:$0xff] }
  0xbb   :  { %2895 = vmatpush1.bf16.msra.mxu0 %v9814_v44  ;;  %3059 = vmatpush1.bf16.msra.mxu1 %v9816_v45  ;;  %v9879_v44 = vcombine.high %v356_v38, %v360_v39  ;;  %v9881_v45 = vcombine.high %v357_v40, %v361_v41 }
  0xbc   :  { %2896 = vmatprep.subr.bf16.mxu0 %v9823_v46  ;;  %3060 = vmatprep.subr.bf16.mxu1 %v9825_v50  ;;  %v364_v46 = vld [vmem:[#allocation2 + $0x900] sm:$0xff]  ;;  %v9878_v50 = vcombine.low %v356_v38, %v360_v39  ;;  %v413_v38 = vld [vmem:[#allocation2 + $0xa88] sm:$0xff] }
  0xbd   :  { %v417_v39 = vld [vmem:[#allocation2 + $0xaa8] sm:$0xff] }
  0xbf   :  { %2897 = vmatpush1.bf16.msra.mxu0 %v9822_v52  ;;  %3061 = vmatpush1.bf16.msra.mxu1 %v9824_v54  ;;  %v9887_v52 = vcombine.high %v364_v46, %v368_v47  ;;  %v9889_v54 = vcombine.high %v365_v48, %v369_v49  ;;  %v9936_v49 = vcombine.low %v413_v38, %v417_v39 }
  0xc0   :  { %2898 = vmatprep.subr.bf16.mxu0 %v9831_v55  ;;  %3062 = vmatprep.subr.bf16.mxu1 %v9833_v60  ;;  %v372_v55 = vld [vmem:[#allocation2 + $0x940] sm:$0xff]  ;;  %v9886_v60 = vcombine.low %v364_v46, %v368_v47  ;;  %v421_v46 = vld [vmem:[#allocation2 + $0xac8] sm:$0xff] }
  0xc1   :  { %v425_v47 = vld [vmem:[#allocation2 + $0xae8] sm:$0xff] }
  0xc3   :  { %2899 = vmatpush1.bf16.msra.mxu0 %v9830_v62  ;;  %3063 = vmatpush1.bf16.msra.mxu1 %v9832_v63  ;;  %v9895_v62 = vcombine.high %v372_v55, %v376_v56  ;;  %v9897_v63 = vcombine.high %v373_v58, %v377_v59  ;;  %v9944_v59 = vcombine.low %v421_v46, %v425_v47 }
  0xc4   :  { %2900 = vmatprep.subr.bf16.mxu0 %v9839_v0  ;;  %3064 = vmatprep.subr.bf16.mxu1 %v9841_v4  ;;  %v380_v0 = vld [vmem:[#allocation2 + $0x980] sm:$0xff]  ;;  %v9894_v4 = vcombine.low %v372_v55, %v376_v56  ;;  %v429_v55 = vld [vmem:[#allocation2 + $0xb08] sm:$0xff] }
  0xc5   :  { %v433_v56 = vld [vmem:[#allocation2 + $0xb28] sm:$0xff] }
  0xc7   :  { %2901 = vmatpush1.bf16.msra.mxu0 %v9838_v6  ;;  %3065 = vmatpush1.bf16.msra.mxu1 %v9840_v7  ;;  %v9903_v6 = vcombine.high %v380_v0, %v384_v1  ;;  %v9905_v7 = vcombine.high %v381_v2, %v385_v3  ;;  %v9952_v3 = vcombine.low %v429_v55, %v433_v56 }
  0xc8   :  { %2902 = vmatprep.subr.bf16.mxu0 %v9847_v8  ;;  %3066 = vmatprep.subr.bf16.mxu1 %v9849_v13  ;;  %v388_v8 = vld [vmem:[#allocation2 + $0x9c0] sm:$0xff]  ;;  %v9902_v13 = vcombine.low %v380_v0, %v384_v1  ;;  %v437_v0 = vld [vmem:[#allocation2 + $0xb48] sm:$0xff] }
  0xc9   :  { %v9910_v22 = vcombine.low %v388_v8, %v392_v9  ;;  %v441_v1 = vld [vmem:[#allocation2 + $0xb68] sm:$0xff] }
  0xcb   :  { %2903 = vmatpush1.bf16.msra.mxu0 %v9846_v16  ;;  %3067 = vmatpush1.bf16.msra.mxu1 %v9848_v18  ;;  %v9911_v16 = vcombine.high %v388_v8, %v392_v9  ;;  %v396_v18 = vld [vmem:[#allocation2 + $0xa00] sm:$0xff]  ;;  %v445_v8 = vld [vmem:[#allocation2 + $0xb88] sm:$0xff] }
  0xcc   :  { %2913 = vmatprep.subr.bf16.mxu0 %v9855_v19  ;;  %3077 = vmatprep.subr.bf16.mxu1 %v9857_v53  ;;  %v400_v19 = vld [vmem:[#allocation2 + $0xa20] sm:$0xff]  ;;  %v9912_v53 = vcombine.low %v389_v10, %v393_v11  ;;  %v449_v9 = vld [vmem:[#allocation2 + $0xba8] sm:$0xff]  ;;  %v9960_v11 = vcombine.low %v437_v0, %v441_v1 }
  0xcd   :  { %v9918_v33 = vcombine.low %v396_v18, %v400_v19 }
  0xce   :  { %2905 = vmatmul.mubr.bf16.vlgmr.msra.gmra.mrb[0].mxu0 %v13713_v25  ;;  %3069 = vmatmul.mubr.bf16.vlgmr.msra.gmra.mrb[0].mxu1 %v13713_v25 }
  0xcf   :  { %2914 = vmatpush1.bf16.msra.mxu0 %v9854_v26  ;;  %3078 = vmatpush1.bf16.msra.mxu1 %v9856_v27  ;;  %v9919_v26 = vcombine.high %v396_v18, %v400_v19  ;;  %v9921_v27 = vcombine.high %v397_v20, %v401_v21  ;;  %v453_v18 = vld [vmem:[#allocation2 + $0xbc8] sm:$0xff]  ;;  %v9968_v21 = vcombine.low %v445_v8, %v449_v9 }
  0xd0   :  { %2915 = vmatprep.subr.bf16.mxu0 %v9863_v28  ;;  %3079 = vmatprep.subr.bf16.mxu1 %v9865_v30  ;;  %v404_v28 = vld [vmem:[#allocation2 + $0xa40] sm:$0xff]  ;;  %v405_v30 = vld [vmem:[#allocation2 + $0xa48] sm:$0xff] }
  0xd1   :  { %2945 = vmatprep.mubr.bf16.mxu0 %v13717_v32  ;;  %3109 = vmatprep.mubr.bf16.mxu1 %v13717_v32  ;;  %v9926_v40 = vcombine.low %v404_v28, %v408_v29  ;;  %v9928_v41 = vcombine.low %v405_v30, %v409_v31  ;;  %v457_v19 = vld [vmem:[#allocation2 + $0xbe8] sm:$0xff] }
  0xd3   :  { %2916 = vmatpush1.bf16.msra.mxu0 %v9862_v15  ;;  %3080 = vmatpush1.bf16.msra.mxu1 %v9864_v35  ;;  %v9927_v15 = vcombine.high %v404_v28, %v408_v29  ;;  %v9929_v35 = vcombine.high %v405_v30, %v409_v31  ;;  %v461_v28 = vld [vmem:[#allocation2 + $0xc08] sm:$0xff]  ;;  %v9976_v31 = vcombine.low %v453_v18, %v457_v19 }
  0xd4   :  { %2917 = vmatprep.subr.bf16.mxu0 %v9871_v36  ;;  %3081 = vmatprep.subr.bf16.mxu1 %v9873_v37  ;;  %v412_v36 = vld [vmem:[#allocation2 + $0xa80] sm:$0xff]  ;;  %v465_v29 = vld [vmem:[#allocation2 + $0xc28] sm:$0xff] }
  0xd5   :  { %v416_v37 = vld [vmem:[#allocation2 + $0xaa0] sm:$0xff] }
  0xd6   :  { %v9934_v48 = vcombine.low %v412_v36, %v416_v37 }
  0xd7   :  { %2918 = vmatpush1.bf16.msra.mxu0 %v9870_v42  ;;  %3082 = vmatpush1.bf16.msra.mxu1 %v9872_v43  ;;  %v9935_v42 = vcombine.high %v412_v36, %v416_v37  ;;  %v9937_v43 = vcombine.high %v413_v38, %v417_v39  ;;  %v13725_v36 = vcombine.low %v13709_v24, %v13709_v24  ;;  %v469_v37 = vld [vmem:[#allocation2 + $0xc48] sm:$0xff] }
  0xd8   :  { %2919 = vmatprep.subr.bf16.mxu0 %v9879_v44  ;;  %3083 = vmatprep.subr.bf16.mxu1 %v9881_v45  ;;  %v420_v44 = vld [vmem:[#allocation2 + $0xac0] sm:$0xff]  ;;  %v473_v38 = vld [vmem:[#allocation2 + $0xc68] sm:$0xff] }
  0xd9   :  { %v424_v45 = vld [vmem:[#allocation2 + $0xae0] sm:$0xff] }
  0xda   :  { %v9942_v58 = vcombine.low %v420_v44, %v424_v45 }
  0xdb   :  { %2920 = vmatpush1.bf16.msra.mxu0 %v9878_v50  ;;  %3084 = vmatpush1.bf16.msra.mxu1 %v9880_v51  ;;  %v9943_v50 = vcombine.high %v420_v44, %v424_v45  ;;  %v9945_v51 = vcombine.high %v421_v46, %v425_v47  ;;  %v480_v44 = vld [vmem:[#allocation2 + $0xca0] sm:$0xff]  ;;  %v477_v45 = vld [vmem:[#allocation2 + $0xc88] sm:$0xff]  ;;  %v9992_v47 = vcombine.low %v469_v37, %v473_v38 }
  0xdc   :  { %2921 = vmatprep.subr.bf16.mxu0 %v9887_v52  ;;  %3085 = vmatprep.subr.bf16.mxu1 %v9889_v54  ;;  %v428_v52 = vld [vmem:[#allocation2 + $0xb00] sm:$0xff]  ;;  %v481_v46 = vld [vmem:[#allocation2 + $0xca8] sm:$0xff] }
  0xdd   :  { %v432_v54 = vld [vmem:[#allocation2 + $0xb20] sm:$0xff] }
  0xde   :  { %v9950_v2 = vcombine.low %v428_v52, %v432_v54 }
  0xdf   :  { %2922 = vmatpush1.bf16.msra.mxu0 %v9886_v60  ;;  %3086 = vmatpush1.bf16.msra.mxu1 %v9888_v61  ;;  %v9951_v60 = vcombine.high %v428_v52, %v432_v54  ;;  %v9953_v61 = vcombine.high %v429_v55, %v433_v56  ;;  %v13590_v52 = vmov 0   ;;  %v485_v54 = vld [vmem:[#allocation2 + $0xcc8] sm:$0xff] }
  0xe0   :  { %2923 = vmatprep.subr.bf16.mxu0 %v9895_v62  ;;  %3087 = vmatprep.subr.bf16.mxu1 %v9897_v63  ;;  %v436_v62 = vld [vmem:[#allocation2 + $0xb40] sm:$0xff]  ;;  %v489_v55 = vld [vmem:[#allocation2 + $0xce8] sm:$0xff] }
  0xe1   :  { %v440_v63 = vld [vmem:[#allocation2 + $0xb60] sm:$0xff] }
  0xe2   :  { %v9958_v10 = vcombine.low %v436_v62, %v440_v63 }
  0xe3   :  { %2924 = vmatpush1.bf16.msra.mxu0 %v9894_v4  ;;  %3088 = vmatpush1.bf16.msra.mxu1 %v9896_v5  ;;  %v9959_v4 = vcombine.high %v436_v62, %v440_v63  ;;  %v9961_v5 = vcombine.high %v437_v0, %v441_v1  ;;  %v496_v62 = vld [vmem:[#allocation2 + $0xd20] sm:$0xff]  ;;  %v493_v63 = vld [vmem:[#allocation2 + $0xd08] sm:$0xff] }
  0xe4   :  { %2925 = vmatprep.subr.bf16.mxu0 %v9903_v6  ;;  %3089 = vmatprep.subr.bf16.mxu1 %v9905_v7  ;;  %v444_v6 = vld [vmem:[#allocation2 + $0xb80] sm:$0xff]  ;;  %v497_v0 = vld [vmem:[#allocation2 + $0xd28] sm:$0xff] }
  0xe5   :  { %v448_v7 = vld [vmem:[#allocation2 + $0xba0] sm:$0xff] }
  0xe6   :  { %v9966_v20 = vcombine.low %v444_v6, %v448_v7 }
  0xe7   :  { %2926 = vmatpush1.bf16.msra.mxu0 %v9902_v13  ;;  %3090 = vmatpush1.bf16.msra.mxu1 %v9904_v14  ;;  %v9967_v13 = vcombine.high %v444_v6, %v448_v7  ;;  %v9969_v14 = vcombine.high %v445_v8, %v449_v9  ;;  %v504_v6 = vld [vmem:[#allocation2 + $0xd60] sm:$0xff]  ;;  %v501_v7 = vld [vmem:[#allocation2 + $0xd48] sm:$0xff] }
  0xe8   :  { %2927 = vmatprep.subr.bf16.mxu0 %v9911_v16  ;;  %3091 = vmatprep.subr.bf16.mxu1 %v9913_v17  ;;  %v452_v16 = vld [vmem:[#allocation2 + $0xbc0] sm:$0xff]  ;;  %v505_v8 = vld [vmem:[#allocation2 + $0xd68] sm:$0xff] }
  0xe9   :  { %v456_v17 = vld [vmem:[#allocation2 + $0xbe0] sm:$0xff] }
  0xea   :  { %v9974_v30 = vcombine.low %v452_v16, %v456_v17 }
  0xeb   :  { %2928 = vmatpush1.bf16.msra.mxu0 %v9910_v22  ;;  %3092 = vmatpush1.bf16.msra.mxu1 %v9912_v53  ;;  %v9975_v22 = vcombine.high %v452_v16, %v456_v17  ;;  %v9977_v53 = vcombine.high %v453_v18, %v457_v19  ;;  %v512_v16 = vld [vmem:[#allocation2 + $0xda0] sm:$0xff]  ;;  %v509_v17 = vld [vmem:[#allocation2 + $0xd88] sm:$0xff] }
  0xec   :  { %2929 = vmatprep.subr.bf16.mxu0 %v9919_v26  ;;  %3093 = vmatprep.subr.bf16.mxu1 %v9921_v27  ;;  %v460_v26 = vld [vmem:[#allocation2 + $0xc00] sm:$0xff]  ;;  %v513_v18 = vld [vmem:[#allocation2 + $0xda8] sm:$0xff] }
  0xed   :  { %v464_v27 = vld [vmem:[#allocation2 + $0xc20] sm:$0xff] }
  0xee   :  { %v9982_v39 = vcombine.low %v460_v26, %v464_v27 }
  0xef   :  { %2930 = vmatpush1.bf16.msra.mxu0 %v9918_v33  ;;  %3094 = vmatpush1.bf16.msra.mxu1 %v9920_v34  ;;  %v9983_v33 = vcombine.high %v460_v26, %v464_v27  ;;  %v9985_v34 = vcombine.high %v461_v28, %v465_v29  ;;  %v520_v26 = vld [vmem:[#allocation2 + $0xde0] sm:$0xff]  ;;  %v517_v27 = vld [vmem:[#allocation2 + $0xdc8] sm:$0xff] }
  0xf0   :  { %2931 = vmatprep.subr.bf16.mxu0 %v9927_v15  ;;  %3095 = vmatprep.subr.bf16.mxu1 %v9929_v35  ;;  %v468_v15 = vld [vmem:[#allocation2 + $0xc40] sm:$0xff] }
  0xf1   :  { %v472_v35 = vld [vmem:[#allocation2 + $0xc60] sm:$0xff] }
  0xf2   :  { %v9990_v24 = vcombine.low %v468_v15, %v472_v35 }
  0xf3   :  { %2932 = vmatpush1.bf16.msra.mxu0 %v9926_v40  ;;  %3096 = vmatpush1.bf16.msra.mxu1 %v9928_v41  ;;  %v9984_v40 = vcombine.low %v461_v28, %v465_v29  ;;  %v9991_v41 = vcombine.high %v468_v15, %v472_v35  ;;  %v521_v28 = vld [vmem:[#allocation2 + $0xde8] sm:$0xff]  ;;  %v82_v15 = vld [vmem:[#allocation2 + $0x30] sm:$0xff]  ;;  %v79_v35 = vld [vmem:[#allocation2 + $0x18] sm:$0xff] }
  0xf4   :  { %2933 = vmatprep.subr.bf16.mxu0 %v9935_v42  ;;  %3097 = vmatprep.subr.bf16.mxu1 %v9937_v43  ;;  %v9993_v42 = vcombine.high %v469_v37, %v473_v38  ;;  %v476_v43 = vld [vmem:[#allocation2 + $0xc80] sm:$0xff]  ;;  %v83_v37 = vld [vmem:[#allocation2 + $0x38] sm:$0xff] }
  0xf5   :  { %v9998_v56 = vcombine.low %v476_v43, %v480_v44 }
  0xf7   :  { %2934 = vmatpush1.bf16.msra.mxu0 %v9934_v48  ;;  %3098 = vmatpush1.bf16.msra.mxu1 %v9936_v49  ;;  %v9999_v48 = vcombine.high %v476_v43, %v480_v44  ;;  %v10001_v49 = vcombine.high %v477_v45, %v481_v46  ;;  %v90_v43 = vld [vmem:[#allocation2 + $0x70] sm:$0xff]  ;;  %v13032_v44 = vld [vmem:[%s18708_s0 + $0x18] ss:$0 sps:$4 sm:$0xff]  }
  0xf8   :  { %2935 = vmatprep.subr.bf16.mxu0 %v9943_v50  ;;  %3099 = vmatprep.subr.bf16.mxu1 %v9945_v51  ;;  %v484_v50 = vld [vmem:[#allocation2 + $0xcc0] sm:$0xff] }
  0xf9   :  { %v488_v51 = vld [vmem:[#allocation2 + $0xce0] sm:$0xff] }
  0xfa   :  { %v10006_v1 = vcombine.low %v484_v50, %v488_v51 }
  0xfb   :  { %2936 = vmatpush1.bf16.msra.mxu0 %v9942_v58  ;;  %3100 = vmatpush1.bf16.msra.mxu1 %v9944_v59  ;;  %v10000_v58 = vcombine.low %v477_v45, %v481_v46  ;;  %v10007_v59 = vcombine.high %v484_v50, %v488_v51  ;;  %v87_v45 = vld [vmem:[#allocation2 + $0x58] sm:$0xff]  ;;  %v94_v50 = vld [vmem:[#allocation2 + $0x90] sm:$0xff] }
  0xfc   :  { %2937 = vmatprep.subr.bf16.mxu0 %v9951_v60  ;;  %3101 = vmatprep.subr.bf16.mxu1 %v9953_v61  ;;  %v10009_v60 = vcombine.high %v485_v54, %v489_v55  ;;  %v492_v61 = vld [vmem:[#allocation2 + $0xd00] sm:$0xff]  ;;  %v91_v46 = vld [vmem:[#allocation2 + $0x78] sm:$0xff]  ;;  %v98_v51 = vld [vmem:[#allocation2 + $0xb0] sm:$0xff] }
  0xfd   :  { %v10014_v9 = vcombine.low %v492_v61, %v496_v62 }
  0xff   :  { %2938 = vmatpush1.bf16.msra.mxu0 %v9950_v2  ;;  %3102 = vmatpush1.bf16.msra.mxu1 %v9952_v3  ;;  %v10008_v2 = vcombine.low %v485_v54, %v489_v55  ;;  %v10015_v3 = vcombine.high %v492_v61, %v496_v62  ;;  %v95_v54 = vld [vmem:[#allocation2 + $0x98] sm:$0xff]  ;;  %v102_v61 = vld [vmem:[#allocation2 + $0xd0] sm:$0xff] }
 0x100   :  { %2939 = vmatprep.subr.bf16.mxu0 %v9959_v4  ;;  %3103 = vmatprep.subr.bf16.mxu1 %v9961_v5  ;;  %v10017_v4 = vcombine.high %v493_v63, %v497_v0  ;;  %v500_v5 = vld [vmem:[#allocation2 + $0xd40] sm:$0xff]  ;;  %v99_v55 = vld [vmem:[#allocation2 + $0xb8] sm:$0xff]  ;;  %v106_v62 = vld [vmem:[#allocation2 + $0xf0] sm:$0xff] }
 0x101   :  { %v10022_v19 = vcombine.low %v500_v5, %v504_v6 }
 0x103   :  { %2940 = vmatpush1.bf16.msra.mxu0 %v9958_v10  ;;  %3104 = vmatpush1.bf16.msra.mxu1 %v9960_v11  ;;  %v10016_v10 = vcombine.low %v493_v63, %v497_v0  ;;  %v10023_v11 = vcombine.high %v500_v5, %v504_v6  ;;  %v103_v63 = vld [vmem:[#allocation2 + $0xd8] sm:$0xff]  ;;  %v110_v5 = vld [vmem:[#allocation2 + $0x110] sm:$0xff] }
 0x104   :  { %2941 = vmatprep.subr.bf16.mxu0 %v9967_v13  ;;  %3105 = vmatprep.subr.bf16.mxu1 %v9969_v14  ;;  %v10025_v13 = vcombine.high %v501_v7, %v505_v8  ;;  %v508_v14 = vld [vmem:[#allocation2 + $0xd80] sm:$0xff]  ;;  %v107_v0 = vld [vmem:[#allocation2 + $0xf8] sm:$0xff]  ;;  %v114_v6 = vld [vmem:[#allocation2 + $0x130] sm:$0xff] }
 0x105   :  { %v10030_v29 = vcombine.low %v508_v14, %v512_v16 }
 0x107   :  { %2942 = vmatpush1.bf16.msra.mxu0 %v9966_v20  ;;  %3106 = vmatpush1.bf16.msra.mxu1 %v9968_v21  ;;  %v10024_v20 = vcombine.low %v501_v7, %v505_v8  ;;  %v10031_v21 = vcombine.high %v508_v14, %v512_v16  ;;  %v111_v7 = vld [vmem:[#allocation2 + $0x118] sm:$0xff]  ;;  %v122_v14 = vld [vmem:[#allocation2 + $0x170] sm:$0xff] }
 0x108   :  { %2943 = vmatprep.subr.bf16.mxu0 %v9975_v22  ;;  %3107 = vmatprep.subr.bf16.mxu1 %v9977_v53  ;;  %v10033_v22 = vcombine.high %v509_v17, %v513_v18  ;;  %v516_v53 = vld [vmem:[#allocation2 + $0xdc0] sm:$0xff]  ;;  %v115_v8 = vld [vmem:[#allocation2 + $0x138] sm:$0xff] }
 0x109   :  { %v10038_v38 = vcombine.low %v516_v53, %v520_v26  ;;  %v119_v16 = vld [vmem:[#allocation2 + $0x158] sm:$0xff] }
 0x10b   :  { %2944 = vmatpush1.bf16.msra.mxu0 %v9974_v30  ;;  %3108 = vmatpush1.bf16.msra.mxu1 %v9976_v31  ;;  %v10032_v30 = vcombine.low %v509_v17, %v513_v18  ;;  %v10039_v31 = vcombine.high %v516_v53, %v520_v26  ;;  %v123_v17 = vld [vmem:[#allocation2 + $0x178] sm:$0xff]  ;;  %v9634_v18 = vcombine.low %v110_v5, %v114_v6  ;;  %v130_v53 = vld [vmem:[#allocation2 + $0x1b0] sm:$0xff] }
 0x10c   :  { %2954 = vmatprep.subr.bf16.mxu0 %v9983_v33  ;;  %3118 = vmatprep.subr.bf16.mxu1 %v9985_v34  ;;  %v10041_v33 = vcombine.high %v517_v27, %v521_v28  ;;  %v78_v34 = vld [vmem:[#allocation2 + $0x10] sm:$0xff]  ;;  %v127_v26 = vld [vmem:[#allocation2 + $0x198] sm:$0xff] }
 0x10e   :  { %2946 = vmatmul.mubr.bf16.vlgmr.msra.gmra.mrb[0].mxu0 %v13725_v36  ;;  %3110 = vmatmul.mubr.bf16.vlgmr.msra.gmra.mrb[0].mxu1 %v13725_v36 }
 0x10f   :  { %2955 = vmatpush1.bf16.msra.mxu0 %v9982_v39  ;;  %3119 = vmatpush1.bf16.msra.mxu1 %v9984_v40  ;;  %v10040_v39 = vcombine.low %v517_v27, %v521_v28  ;;  %v9603_v40 = vcombine.high %v78_v34, %v82_v15  ;;  %v131_v27 = vld [vmem:[#allocation2 + $0x1b8] sm:$0xff] }
 0x110   :  { %2956 = vmatprep.subr.bf16.mxu0 %v9991_v41  ;;  %3120 = vmatprep.subr.bf16.mxu1 %v9993_v42  ;;  %v9605_v41 = vcombine.high %v79_v35, %v83_v37  ;;  %v86_v42 = vld [vmem:[#allocation2 + $0x50] sm:$0xff] }
 0x111   :  { %2986 = vmatprep.mubr.bf16.mxu0 %v13590_v52  ;;  %3150 = vmatprep.mubr.bf16.mxu1 %v13590_v52 }
 0x113   :  { %2957 = vmatpush1.bf16.msra.mxu0 %v9990_v24  ;;  %3121 = vmatpush1.bf16.msra.mxu1 %v9992_v47  ;;  %v9602_v24 = vcombine.low %v78_v34, %v82_v15  ;;  %v9604_v47 = vcombine.low %v79_v35, %v83_v37  ;;  %v138_v34 = vld [vmem:[#allocation2 + $0x1f0] sm:$0xff]  ;;  %v135_v15 = vld [vmem:[#allocation2 + $0x1d8] sm:$0xff] }
 0x114   :  { %2958 = vmatprep.subr.bf16.mxu0 %v9999_v48  ;;  %3122 = vmatprep.subr.bf16.mxu1 %v10001_v49  ;;  %v9611_v48 = vcombine.high %v86_v42, %v90_v43  ;;  %v9613_v49 = vcombine.high %v87_v45, %v91_v46  ;;  %v139_v35 = vld [vmem:[#allocation2 + $0x1f8] sm:$0xff] }
 0x117   :  { %2959 = vmatpush1.bf16.msra.mxu0 %v9998_v56  ;;  %3123 = vmatpush1.bf16.msra.mxu1 %v10000_v58  ;;  %v9610_v56 = vcombine.low %v86_v42, %v90_v43  ;;  %v9612_v58 = vcombine.low %v87_v45, %v91_v46  ;;  %v146_v42 = vld [vmem:[#allocation2 + $0x230] sm:$0xff]  ;;  %v143_v43 = vld [vmem:[#allocation2 + $0x218] sm:$0xff]  ;;  %v9660_v46 = vcombine.low %v135_v15, %v139_v35 }
 0x118   :  { %2960 = vmatprep.subr.bf16.mxu0 %v10007_v59  ;;  %3124 = vmatprep.subr.bf16.mxu1 %v10009_v60  ;;  %v9619_v59 = vcombine.high %v94_v50, %v98_v51  ;;  %v9621_v60 = vcombine.high %v95_v54, %v99_v55 }
 0x11b   :  { %2961 = vmatpush1.bf16.msra.mxu0 %v10006_v1  ;;  %3125 = vmatpush1.bf16.msra.mxu1 %v10008_v2  ;;  %v9618_v1 = vcombine.low %v94_v50, %v98_v51  ;;  %v9620_v2 = vcombine.low %v95_v54, %v99_v55  ;;  %v151_v50 = vld [vmem:[#allocation2 + $0x258] sm:$0xff] }
 0x11c   :  { %2962 = vmatprep.subr.bf16.mxu0 %v10015_v3  ;;  %3126 = vmatprep.subr.bf16.mxu1 %v10017_v4  ;;  %v9627_v3 = vcombine.high %v102_v61, %v106_v62  ;;  %v9629_v4 = vcombine.high %v103_v63, %v107_v0  ;;  %v155_v51 = vld [vmem:[#allocation2 + $0x278] sm:$0xff] }
 0x11f   :  { %2963 = vmatpush1.bf16.msra.mxu0 %v10014_v9  ;;  %3127 = vmatpush1.bf16.msra.mxu1 %v10016_v10  ;;  %v9626_v9 = vcombine.low %v102_v61, %v106_v62  ;;  %v9628_v10 = vcombine.low %v103_v63, %v107_v0  ;;  %v159_v61 = vld [vmem:[#allocation2 + $0x298] sm:$0xff]  ;;  %v9676_v0 = vcombine.low %v151_v50, %v155_v51 }
 0x120   :  { %2964 = vmatprep.subr.bf16.mxu0 %v10023_v11  ;;  %3128 = vmatprep.subr.bf16.mxu1 %v10025_v13  ;;  %v9635_v11 = vcombine.high %v110_v5, %v114_v6  ;;  %v118_v13 = vld [vmem:[#allocation2 + $0x150] sm:$0xff]  ;;  %v163_v62 = vld [vmem:[#allocation2 + $0x2b8] sm:$0xff] }
 0x121   :  { %v9642_v28 = vcombine.low %v118_v13, %v122_v14  ;;  %v167_v5 = vld [vmem:[#allocation2 + $0x2d8] sm:$0xff] }
 0x122   :  { %v171_v6 = vld [vmem:[#allocation2 + $0x2f8] sm:$0xff] }
 0x123   :  { %2965 = vmatpush1.bf16.msra.mxu0 %v10022_v19  ;;  %3129 = vmatpush1.bf16.msra.mxu1 %v10024_v20  ;;  %v9636_v19 = vcombine.low %v111_v7, %v115_v8  ;;  %v9643_v20 = vcombine.high %v118_v13, %v122_v14  ;;  %v175_v13 = vld [vmem:[#allocation2 + $0x318] sm:$0xff] }
 0x124   :  { %2966 = vmatprep.subr.bf16.mxu0 %v10031_v21  ;;  %3130 = vmatprep.subr.bf16.mxu1 %v10033_v22  ;;  %v9645_v21 = vcombine.high %v119_v16, %v123_v17  ;;  %v126_v22 = vld [vmem:[#allocation2 + $0x190] sm:$0xff]  ;;  %v179_v14 = vld [vmem:[#allocation2 + $0x338] sm:$0xff] }
 0x125   :  { %v9650_v37 = vcombine.low %v126_v22, %v130_v53 }
 0x127   :  { %2967 = vmatpush1.bf16.msra.mxu0 %v10030_v29  ;;  %3131 = vmatpush1.bf16.msra.mxu1 %v10032_v30  ;;  %v9644_v29 = vcombine.low %v119_v16, %v123_v17  ;;  %v9651_v30 = vcombine.high %v126_v22, %v130_v53  ;;  %v9692_v17 = vcombine.low %v167_v5, %v171_v6  ;;  %v183_v22 = vld [vmem:[#allocation2 + $0x358] sm:$0xff] }
 0x128   :  { %2968 = vmatprep.subr.bf16.mxu0 %v10039_v31  ;;  %3132 = vmatprep.subr.bf16.mxu1 %v10041_v33  ;;  %v9653_v31 = vcombine.high %v127_v26, %v131_v27  ;;  %v134_v33 = vld [vmem:[#allocation2 + $0x1d0] sm:$0xff]  ;;  %v187_v53 = vld [vmem:[#allocation2 + $0x378] sm:$0xff] }
 0x129   :  { %v9658_v45 = vcombine.low %v134_v33, %v138_v34 }
 0x12b   :  { %2969 = vmatpush1.bf16.msra.mxu0 %v10038_v38  ;;  %3133 = vmatpush1.bf16.msra.mxu1 %v10040_v39  ;;  %v9652_v38 = vcombine.low %v127_v26, %v131_v27  ;;  %v9659_v39 = vcombine.high %v134_v33, %v138_v34  ;;  %v9700_v27 = vcombine.low %v175_v13, %v179_v14  ;;  %v191_v33 = vld [vmem:[#allocation2 + $0x398] sm:$0xff] }
 0x12c   :  { %3159 = vmatprep.subr.bf16.mxu0 %v9603_v40  ;;  %3323 = vmatprep.subr.bf16.mxu1 %v9605_v41  ;;  %v9661_v40 = vcombine.high %v135_v15, %v139_v35  ;;  %v142_v41 = vld [vmem:[#allocation2 + $0x210] sm:$0xff]  ;;  %v195_v34 = vld [vmem:[#allocation2 + $0x3b8] sm:$0xff]  ;;  %v9708_v35 = vcombine.low %v183_v22, %v187_v53 }
 0x12d   :  { %v9666_v54 = vcombine.low %v142_v41, %v146_v42 }
 0x12e   :  { %2987 = vmatmul.mubr.bf16.vlgmr.msra.gmra.mrb[0].mxu0 %v13032_v44  ;;  %3151 = vmatmul.mubr.bf16.vlgmr.msra.gmra.mrb[0].mxu1 %v13032_v44  ;;  %v147_v44 = vld [vmem:[#allocation2 + $0x238] sm:$0xff] }
 0x12f   :  { %3160 = vmatpush1.bf16.msra.mxu0 %v9602_v24  ;;  %3324 = vmatpush1.bf16.msra.mxu1 %v9604_v47  ;;  %v9667_v24 = vcombine.high %v142_v41, %v146_v42  ;;  %v9669_v47 = vcombine.high %v143_v43, %v147_v44  ;;  %v9668_v55 = vcombine.low %v143_v43, %v147_v44  ;;  %v199_v41 = vld [vmem:[#allocation2 + $0x3d8] sm:$0xff] }
 0x130   :  { %3161 = vmatprep.subr.bf16.mxu0 %v9611_v48  ;;  %3325 = vmatprep.subr.bf16.mxu1 %v9613_v49  ;;  %v150_v48 = vld [vmem:[#allocation2 + $0x250] sm:$0xff]  ;;  %v203_v42 = vld [vmem:[#allocation2 + $0x3f8] sm:$0xff]  ;;  %v9716_v44 = vcombine.low %v191_v33, %v195_v34 }
 0x131   :  { %3191 = vmatprep.mubr.bf16.mxu0 %v13685_v57  ;;  %3355 = vmatprep.mubr.bf16.mxu1 %v13685_v57  ;;  %v9637_v57 = vcombine.high %v111_v7, %v115_v8  ;;  %v154_v49 = vld [vmem:[#allocation2 + $0x270] sm:$0xff]  ;;  %v9684_v8 = vcombine.low %v159_v61, %v163_v62 }
 0x132   :  { %v9674_v63 = vcombine.low %v150_v48, %v154_v49 }
 0x133   :  { %3162 = vmatpush1.bf16.msra.mxu0 %v9610_v56  ;;  %3326 = vmatpush1.bf16.msra.mxu1 %v9612_v58  ;;  %v9675_v56 = vcombine.high %v150_v48, %v154_v49  ;;  %v9677_v58 = vcombine.high %v151_v50, %v155_v51  ;;  %v207_v48 = vld [vmem:[#allocation2 + $0x418] sm:$0xff]  ;;  %v9724_v51 = vcombine.low %v199_v41, %v203_v42 }
 0x134   :  { %3163 = vmatprep.subr.bf16.mxu0 %v9619_v59  ;;  %3327 = vmatprep.subr.bf16.mxu1 %v9621_v60  ;;  %v158_v59 = vld [vmem:[#allocation2 + $0x290] sm:$0xff]  ;;  %v211_v49 = vld [vmem:[#allocation2 + $0x438] sm:$0xff] }
 0x135   :  { %v162_v60 = vld [vmem:[#allocation2 + $0x2b0] sm:$0xff] }
 0x136   :  { %v9682_v7 = vcombine.low %v158_v59, %v162_v60 }
 0x137   :  { %3164 = vmatpush1.bf16.msra.mxu0 %v9618_v1  ;;  %3328 = vmatpush1.bf16.msra.mxu1 %v9620_v2  ;;  %v9683_v1 = vcombine.high %v158_v59, %v162_v60  ;;  %v9685_v2 = vcombine.high %v159_v61, %v163_v62  ;;  %v215_v59 = vld [vmem:[#allocation2 + $0x458] sm:$0xff]  ;;  %v9732_v62 = vcombine.low %v207_v48, %v211_v49 }
 0x138   :  { %3165 = vmatprep.subr.bf16.mxu0 %v9627_v3  ;;  %3329 = vmatprep.subr.bf16.mxu1 %v9629_v4  ;;  %v166_v3 = vld [vmem:[#allocation2 + $0x2d0] sm:$0xff]  ;;  %v219_v60 = vld [vmem:[#allocation2 + $0x478] sm:$0xff] }
 0x139   :  { %v170_v4 = vld [vmem:[#allocation2 + $0x2f0] sm:$0xff] }
 0x13a   :  { %v9690_v16 = vcombine.low %v166_v3, %v170_v4 }
 0x13b   :  { %3166 = vmatpush1.bf16.msra.mxu0 %v9626_v9  ;;  %3330 = vmatpush1.bf16.msra.mxu1 %v9628_v10  ;;  %v9691_v9 = vcombine.high %v166_v3, %v170_v4  ;;  %v9693_v10 = vcombine.high %v167_v5, %v171_v6  ;;  %v223_v3 = vld [vmem:[#allocation2 + $0x498] sm:$0xff]  ;;  %v9740_v6 = vcombine.low %v215_v59, %v219_v60 }
 0x13c   :  { %3167 = vmatprep.subr.bf16.mxu0 %v9635_v11  ;;  %3331 = vmatprep.subr.bf16.mxu1 %v9637_v57  ;;  %v174_v11 = vld [vmem:[#allocation2 + $0x310] sm:$0xff]  ;;  %v227_v4 = vld [vmem:[#allocation2 + $0x4b8] sm:$0xff] }
 0x13d   :  { %v178_v57 = vld [vmem:[#allocation2 + $0x330] sm:$0xff] }
 0x13e   :  { %v9698_v26 = vcombine.low %v174_v11, %v178_v57 }
 0x13f   :  { %3168 = vmatpush1.bf16.msra.mxu0 %v9634_v18  ;;  %3332 = vmatpush1.bf16.msra.mxu1 %v9636_v19  ;;  %v9699_v18 = vcombine.high %v174_v11, %v178_v57  ;;  %v9701_v19 = vcombine.high %v175_v13, %v179_v14  ;;  %v231_v11 = vld [vmem:[#allocation2 + $0x4d8] sm:$0xff] }
 0x140   :  { %3169 = vmatprep.subr.bf16.mxu0 %v9643_v20  ;;  %3333 = vmatprep.subr.bf16.mxu1 %v9645_v21  ;;  %v182_v20 = vld [vmem:[#allocation2 + $0x350] sm:$0xff]  ;;  %v235_v57 = vld [vmem:[#allocation2 + $0x4f8] sm:$0xff] }
 0x141   :  { %v186_v21 = vld [vmem:[#allocation2 + $0x370] sm:$0xff] }
 0x142   :  { %v9706_v15 = vcombine.low %v182_v20, %v186_v21 }
 0x143   :  { %3170 = vmatpush1.bf16.msra.mxu0 %v9642_v28  ;;  %3334 = vmatpush1.bf16.msra.mxu1 %v9644_v29  ;;  %v9707_v28 = vcombine.high %v182_v20, %v186_v21  ;;  %v9709_v29 = vcombine.high %v183_v22, %v187_v53  ;;  %v243_v20 = vld [vmem:[#allocation2 + $0x538] sm:$0xff]  ;;  %v9756_v22 = vcombine.low %v231_v11, %v235_v57 }
 0x144   :  { %3171 = vmatprep.subr.bf16.mxu0 %v9651_v30  ;;  %3335 = vmatprep.subr.bf16.mxu1 %v9653_v31  ;;  %v190_v30 = vld [vmem:[#allocation2 + $0x390] sm:$0xff] }
 0x145   :  { %v194_v31 = vld [vmem:[#allocation2 + $0x3b0] sm:$0xff] }
 0x146   :  { %v9714_v43 = vcombine.low %v190_v30, %v194_v31 }
 0x147   :  { %3172 = vmatpush1.bf16.msra.mxu0 %v9650_v37  ;;  %3336 = vmatpush1.bf16.msra.mxu1 %v9652_v38  ;;  %v9715_v37 = vcombine.high %v190_v30, %v194_v31  ;;  %v9717_v38 = vcombine.high %v191_v33, %v195_v34 }
 0x148   :  { %3173 = vmatprep.subr.bf16.mxu0 %v9659_v39  ;;  %3337 = vmatprep.subr.bf16.mxu1 %v9661_v40  ;;  %v198_v39 = vld [vmem:[#allocation2 + $0x3d0] sm:$0xff] }
 0x149   :  { %v202_v40 = vld [vmem:[#allocation2 + $0x3f0] sm:$0xff] }
 0x14a   :  { %v9722_v50 = vcombine.low %v198_v39, %v202_v40 }
 0x14b   :  { %3174 = vmatpush1.bf16.msra.mxu0 %v9658_v45  ;;  %3338 = vmatpush1.bf16.msra.mxu1 %v9660_v46  ;;  %v9723_v45 = vcombine.high %v198_v39, %v202_v40  ;;  %v9725_v46 = vcombine.high %v199_v41, %v203_v42 }
 0x14c   :  { %3175 = vmatprep.subr.bf16.mxu0 %v9667_v24  ;;  %3339 = vmatprep.subr.bf16.mxu1 %v9669_v47  ;;  %v206_v24 = vld [vmem:[#allocation2 + $0x410] sm:$0xff] }
 0x14d   :  { %v210_v47 = vld [vmem:[#allocation2 + $0x430] sm:$0xff] }
 0x14e   :  { %v9730_v61 = vcombine.low %v206_v24, %v210_v47 }
 0x14f   :  { %3176 = vmatpush1.bf16.msra.mxu0 %v9666_v54  ;;  %3340 = vmatpush1.bf16.msra.mxu1 %v9668_v55  ;;  %v9731_v54 = vcombine.high %v206_v24, %v210_v47  ;;  %v9733_v55 = vcombine.high %v207_v48, %v211_v49 }
 0x150   :  { %3177 = vmatprep.subr.bf16.mxu0 %v9675_v56  ;;  %3341 = vmatprep.subr.bf16.mxu1 %v9677_v58  ;;  %v214_v56 = vld [vmem:[#allocation2 + $0x450] sm:$0xff] }
 0x151   :  { %v218_v58 = vld [vmem:[#allocation2 + $0x470] sm:$0xff] }
 0x152   :  { %v9738_v5 = vcombine.low %v214_v56, %v218_v58 }
 0x153   :  { %3178 = vmatpush1.bf16.msra.mxu0 %v9674_v63  ;;  %3342 = vmatpush1.bf16.msra.mxu1 %v9676_v0  ;;  %v9739_v63 = vcombine.high %v214_v56, %v218_v58  ;;  %v9741_v0 = vcombine.high %v215_v59, %v219_v60 }
 0x154   :  { %3179 = vmatprep.subr.bf16.mxu0 %v9683_v1  ;;  %3343 = vmatprep.subr.bf16.mxu1 %v9685_v2  ;;  %v222_v1 = vld [vmem:[#allocation2 + $0x490] sm:$0xff] }
 0x155   :  { %v226_v2 = vld [vmem:[#allocation2 + $0x4b0] sm:$0xff] }
 0x156   :  { %v9746_v13 = vcombine.low %v222_v1, %v226_v2 }
 0x157   :  { %3180 = vmatpush1.bf16.msra.mxu0 %v9682_v7  ;;  %3344 = vmatpush1.bf16.msra.mxu1 %v9684_v8  ;;  %v9747_v7 = vcombine.high %v222_v1, %v226_v2  ;;  %v9749_v8 = vcombine.high %v223_v3, %v227_v4 }
 0x158   :  { %3181 = vmatprep.subr.bf16.mxu0 %v9691_v9  ;;  %3345 = vmatprep.subr.bf16.mxu1 %v9693_v10  ;;  %v230_v9 = vld [vmem:[#allocation2 + $0x4d0] sm:$0xff] }
 0x159   :  { %v234_v10 = vld [vmem:[#allocation2 + $0x4f0] sm:$0xff] }
 0x15a   :  { %v9755_v14 = vcombine.high %v230_v9, %v234_v10  ;;  %v9754_v21 = vcombine.low %v230_v9, %v234_v10 }
 0x15b   :  { %3182 = vmatpush1.bf16.msra.mxu0 %v9690_v16  ;;  %3346 = vmatpush1.bf16.msra.mxu1 %v9692_v17  ;;  %v9757_v16 = vcombine.high %v231_v11, %v235_v57  ;;  %v238_v17 = vld [vmem:[#allocation2 + $0x510] sm:$0xff] }
 0x15c   :  { %3183 = vmatprep.subr.bf16.mxu0 %v9699_v18  ;;  %3347 = vmatprep.subr.bf16.mxu1 %v9701_v19  ;;  %v242_v18 = vld [vmem:[#allocation2 + $0x530] sm:$0xff]  ;;  %v239_v19 = vld [vmem:[#allocation2 + $0x518] sm:$0xff] }
 0x15d   :  { %v9763_v53 = vcombine.high %v238_v17, %v242_v18  ;;  %v9762_v30 = vcombine.low %v238_v17, %v242_v18  ;;  %v9764_v31 = vcombine.low %v239_v19, %v243_v20 }
 0x15f   :  { %3184 = vmatpush1.bf16.msra.mxu0 %v9698_v26  ;;  %3348 = vmatpush1.bf16.msra.mxu1 %v9700_v27  ;;  %v246_v26 = vld [vmem:[#allocation2 + $0x550] sm:$0xff] }
 0x160   :  { %3185 = vmatprep.subr.bf16.mxu0 %v9707_v28  ;;  %3349 = vmatprep.subr.bf16.mxu1 %v9709_v29  ;;  %v250_v27 = vld [vmem:[#allocation2 + $0x570] sm:$0xff]  ;;  %v247_v28 = vld [vmem:[#allocation2 + $0x558] sm:$0xff] }
 0x161   :  { %v251_v29 = vld [vmem:[#allocation2 + $0x578] sm:$0xff]  ;;  %v9771_v33 = vcombine.high %v246_v26, %v250_v27  ;;  %v9770_v39 = vcombine.low %v246_v26, %v250_v27 }
 0x162   :  { %v9773_v34 = vcombine.high %v247_v28, %v251_v29  ;;  %v9772_v40 = vcombine.low %v247_v28, %v251_v29 }
 0x163   :  { %3186 = vmatpush1.bf16.msra.mxu0 %v9706_v15  ;;  %3350 = vmatpush1.bf16.msra.mxu1 %v9708_v35  ;;  %v254_v15 = vld [vmem:[#allocation2 + $0x590] sm:$0xff] }
 0x164   :  { %3187 = vmatprep.subr.bf16.mxu0 %v9715_v37  ;;  %3351 = vmatprep.subr.bf16.mxu1 %v9717_v38  ;;  %v258_v35 = vld [vmem:[#allocation2 + $0x5b0] sm:$0xff]  ;;  %v255_v37 = vld [vmem:[#allocation2 + $0x598] sm:$0xff] }
 0x165   :  { %v259_v38 = vld [vmem:[#allocation2 + $0x5b8] sm:$0xff]  ;;  %v9779_v41 = vcombine.high %v254_v15, %v258_v35  ;;  %v9778_v24 = vcombine.low %v254_v15, %v258_v35 }
 0x166   :  { %v9781_v42 = vcombine.high %v255_v37, %v259_v38  ;;  %v9780_v47 = vcombine.low %v255_v37, %v259_v38 }
 0x167   :  { %3188 = vmatpush1.bf16.msra.mxu0 %v9714_v43  ;;  %3352 = vmatpush1.bf16.msra.mxu1 %v9716_v44  ;;  %v262_v43 = vld [vmem:[#allocation2 + $0x5d0] sm:$0xff] }
 0x168   :  { %3189 = vmatprep.subr.bf16.mxu0 %v9723_v45  ;;  %3353 = vmatprep.subr.bf16.mxu1 %v9725_v46  ;;  %v266_v44 = vld [vmem:[#allocation2 + $0x5f0] sm:$0xff]  ;;  %v263_v45 = vld [vmem:[#allocation2 + $0x5d8] sm:$0xff] }
 0x169   :  { %v267_v46 = vld [vmem:[#allocation2 + $0x5f8] sm:$0xff]  ;;  %v9787_v48 = vcombine.high %v262_v43, %v266_v44  ;;  %v9786_v56 = vcombine.low %v262_v43, %v266_v44 }
 0x16a   :  { %v9789_v49 = vcombine.high %v263_v45, %v267_v46  ;;  %v9788_v58 = vcombine.low %v263_v45, %v267_v46 }
 0x16b   :  { %3190 = vmatpush1.bf16.msra.mxu0 %v9722_v50  ;;  %3354 = vmatpush1.bf16.msra.mxu1 %v9724_v51  ;;  %v270_v50 = vld [vmem:[#allocation2 + $0x610] sm:$0xff] }
 0x16c   :  { %3200 = vmatprep.subr.bf16.mxu0 %v9731_v54  ;;  %3364 = vmatprep.subr.bf16.mxu1 %v9733_v55  ;;  %v274_v51 = vld [vmem:[#allocation2 + $0x630] sm:$0xff]  ;;  %v271_v54 = vld [vmem:[#allocation2 + $0x618] sm:$0xff] }
 0x16d   :  { %v275_v55 = vld [vmem:[#allocation2 + $0x638] sm:$0xff]  ;;  %v9795_v59 = vcombine.high %v270_v50, %v274_v51  ;;  %v9794_v1 = vcombine.low %v270_v50, %v274_v51 }
 0x16e   :  { %3192 = vmatmul.mubr.bf16.vlgmr.msra.gmra.mrb[4].mxu0 %v13691_v12  ;;  %3356 = vmatmul.mubr.bf16.vlgmr.msra.gmra.mrb[4].mxu1 %v13691_v12  ;;  %v9748_v12 = vcombine.low %v223_v3, %v227_v4  ;;  %v9797_v60 = vcombine.high %v271_v54, %v275_v55  ;;  %v9796_v2 = vcombine.low %v271_v54, %v275_v55 }
 0x16f   :  { %3201 = vmatpush1.bf16.msra.mxu0 %v9730_v61  ;;  %3365 = vmatpush1.bf16.msra.mxu1 %v9732_v62  ;;  %v278_v61 = vld [vmem:[#allocation2 + $0x650] sm:$0xff] }
 0x170   :  { %3202 = vmatprep.subr.bf16.mxu0 %v9739_v63  ;;  %3366 = vmatprep.subr.bf16.mxu1 %v9741_v0  ;;  %v282_v62 = vld [vmem:[#allocation2 + $0x670] sm:$0xff]  ;;  %v279_v63 = vld [vmem:[#allocation2 + $0x658] sm:$0xff] }
 0x171   :  { %3232 = vmatprep.mubr.bf16.mxu0 %v13700_v23  ;;  %3396 = vmatprep.mubr.bf16.mxu1 %v13700_v23  ;;  %v9765_v23 = vcombine.high %v239_v19, %v243_v20  ;;  %v283_v0 = vld [vmem:[#allocation2 + $0x678] sm:$0xff]  ;;  %v9803_v3 = vcombine.high %v278_v61, %v282_v62  ;;  %v9802_v9 = vcombine.low %v278_v61, %v282_v62 }
 0x172   :  { %v9805_v4 = vcombine.high %v279_v63, %v283_v0  ;;  %v9804_v10 = vcombine.low %v279_v63, %v283_v0 }
 0x173   :  { %3203 = vmatpush1.bf16.msra.mxu0 %v9738_v5  ;;  %3367 = vmatpush1.bf16.msra.mxu1 %v9740_v6  ;;  %v286_v5 = vld [vmem:[#allocation2 + $0x690] sm:$0xff] }
 0x174   :  { %3204 = vmatprep.subr.bf16.mxu0 %v9747_v7  ;;  %3368 = vmatprep.subr.bf16.mxu1 %v9749_v8  ;;  %v290_v6 = vld [vmem:[#allocation2 + $0x6b0] sm:$0xff]  ;;  %v287_v7 = vld [vmem:[#allocation2 + $0x698] sm:$0xff] }
 0x175   :  { %v291_v8 = vld [vmem:[#allocation2 + $0x6b8] sm:$0xff]  ;;  %v9811_v11 = vcombine.high %v286_v5, %v290_v6  ;;  %v9810_v17 = vcombine.low %v286_v5, %v290_v6 }
 0x176   :  { %v9813_v57 = vcombine.high %v287_v7, %v291_v8  ;;  %v9812_v18 = vcombine.low %v287_v7, %v291_v8 }
 0x177   :  { %3205 = vmatpush1.bf16.msra.mxu0 %v9746_v13  ;;  %3369 = vmatpush1.bf16.msra.mxu1 %v9748_v12  ;;  %v294_v13 = vld [vmem:[#allocation2 + $0x6d0] sm:$0xff] }
 0x178   :  { %3206 = vmatprep.subr.bf16.mxu0 %v9755_v14  ;;  %3370 = vmatprep.subr.bf16.mxu1 %v9757_v16  ;;  %v298_v12 = vld [vmem:[#allocation2 + $0x6f0] sm:$0xff]  ;;  %v295_v14 = vld [vmem:[#allocation2 + $0x6d8] sm:$0xff] }
 0x179   :  { %v299_v16 = vld [vmem:[#allocation2 + $0x6f8] sm:$0xff]  ;;  %v9819_v19 = vcombine.high %v294_v13, %v298_v12  ;;  %v9818_v26 = vcombine.low %v294_v13, %v298_v12 }
 0x17a   :  { %v9821_v20 = vcombine.high %v295_v14, %v299_v16  ;;  %v9820_v27 = vcombine.low %v295_v14, %v299_v16 }
 0x17b   :  { %3207 = vmatpush1.bf16.msra.mxu0 %v9754_v21  ;;  %3371 = vmatpush1.bf16.msra.mxu1 %v9756_v22  ;;  %v302_v21 = vld [vmem:[#allocation2 + $0x710] sm:$0xff] }
 0x17c   :  { %3208 = vmatprep.subr.bf16.mxu0 %v9763_v53  ;;  %3372 = vmatprep.subr.bf16.mxu1 %v9765_v23  ;;  %v306_v22 = vld [vmem:[#allocation2 + $0x730] sm:$0xff]  ;;  %v303_v53 = vld [vmem:[#allocation2 + $0x718] sm:$0xff] }
 0x17d   :  { %v307_v23 = vld [vmem:[#allocation2 + $0x738] sm:$0xff]  ;;  %v9827_v28 = vcombine.high %v302_v21, %v306_v22  ;;  %v9826_v15 = vcombine.low %v302_v21, %v306_v22 }
 0x17e   :  { %v9829_v29 = vcombine.high %v303_v53, %v307_v23  ;;  %v9828_v35 = vcombine.low %v303_v53, %v307_v23  ;;  %v366_v23 = vld [vmem:[#allocation2 + $0x910] sm:$0xff] }
 0x17f   :  { %3209 = vmatpush1.bf16.msra.mxu0 %v9762_v30  ;;  %3373 = vmatpush1.bf16.msra.mxu1 %v9764_v31  ;;  %v310_v30 = vld [vmem:[#allocation2 + $0x750] sm:$0xff] }
 0x180   :  { %3210 = vmatprep.subr.bf16.mxu0 %v9771_v33  ;;  %3374 = vmatprep.subr.bf16.mxu1 %v9773_v34  ;;  %v314_v31 = vld [vmem:[#allocation2 + $0x770] sm:$0xff]  ;;  %v311_v33 = vld [vmem:[#allocation2 + $0x758] sm:$0xff] }
 0x181   :  { %v315_v34 = vld [vmem:[#allocation2 + $0x778] sm:$0xff]  ;;  %v9835_v37 = vcombine.high %v310_v30, %v314_v31  ;;  %v9834_v43 = vcombine.low %v310_v30, %v314_v31 }
 0x182   :  { %v9837_v38 = vcombine.high %v311_v33, %v315_v34  ;;  %v9836_v44 = vcombine.low %v311_v33, %v315_v34  ;;  %v374_v33 = vld [vmem:[#allocation2 + $0x950] sm:$0xff] }
 0x183   :  { %3211 = vmatpush1.bf16.msra.mxu0 %v9770_v39  ;;  %3375 = vmatpush1.bf16.msra.mxu1 %v9772_v40  ;;  %v318_v39 = vld [vmem:[#allocation2 + $0x790] sm:$0xff] }
 0x184   :  { %3212 = vmatprep.subr.bf16.mxu0 %v9779_v41  ;;  %3376 = vmatprep.subr.bf16.mxu1 %v9781_v42  ;;  %v322_v40 = vld [vmem:[#allocation2 + $0x7b0] sm:$0xff]  ;;  %v319_v41 = vld [vmem:[#allocation2 + $0x798] sm:$0xff] }
 0x185   :  { %v323_v42 = vld [vmem:[#allocation2 + $0x7b8] sm:$0xff]  ;;  %v9843_v45 = vcombine.high %v318_v39, %v322_v40  ;;  %v9842_v50 = vcombine.low %v318_v39, %v322_v40  ;;  %v378_v34 = vld [vmem:[#allocation2 + $0x970] sm:$0xff] }
 0x186   :  { %v9845_v46 = vcombine.high %v319_v41, %v323_v42  ;;  %v9844_v51 = vcombine.low %v319_v41, %v323_v42  ;;  %v9899_v39 = vcombine.high %v374_v33, %v378_v34  ;;  %v382_v41 = vld [vmem:[#allocation2 + $0x990] sm:$0xff] }
 0x187   :  { %3213 = vmatpush1.bf16.msra.mxu0 %v9778_v24  ;;  %3377 = vmatpush1.bf16.msra.mxu1 %v9780_v47  ;;  %v326_v24 = vld [vmem:[#allocation2 + $0x7d0] sm:$0xff] }
 0x188   :  { %3214 = vmatprep.subr.bf16.mxu0 %v9787_v48  ;;  %3378 = vmatprep.subr.bf16.mxu1 %v9789_v49  ;;  %v330_v47 = vld [vmem:[#allocation2 + $0x7f0] sm:$0xff]  ;;  %v327_v48 = vld [vmem:[#allocation2 + $0x7d8] sm:$0xff] }
 0x189   :  { %v331_v49 = vld [vmem:[#allocation2 + $0x7f8] sm:$0xff]  ;;  %v9851_v54 = vcombine.high %v326_v24, %v330_v47  ;;  %v9850_v61 = vcombine.low %v326_v24, %v330_v47  ;;  %v386_v42 = vld [vmem:[#allocation2 + $0x9b0] sm:$0xff] }
 0x18a   :  { %v9853_v55 = vcombine.high %v327_v48, %v331_v49  ;;  %v9852_v62 = vcombine.low %v327_v48, %v331_v49  ;;  %v9907_v24 = vcombine.high %v382_v41, %v386_v42  ;;  %v390_v48 = vld [vmem:[#allocation2 + $0x9d0] sm:$0xff] }
 0x18b   :  { %3215 = vmatpush1.bf16.msra.mxu0 %v9786_v56  ;;  %3379 = vmatpush1.bf16.msra.mxu1 %v9788_v58  ;;  %v334_v56 = vld [vmem:[#allocation2 + $0x810] sm:$0xff] }
 0x18c   :  { %3216 = vmatprep.subr.bf16.mxu0 %v9795_v59  ;;  %3380 = vmatprep.subr.bf16.mxu1 %v9797_v60  ;;  %v338_v58 = vld [vmem:[#allocation2 + $0x830] sm:$0xff]  ;;  %v335_v59 = vld [vmem:[#allocation2 + $0x818] sm:$0xff] }
 0x18d   :  { %v339_v60 = vld [vmem:[#allocation2 + $0x838] sm:$0xff]  ;;  %v9859_v63 = vcombine.high %v334_v56, %v338_v58  ;;  %v9858_v5 = vcombine.low %v334_v56, %v338_v58  ;;  %v394_v49 = vld [vmem:[#allocation2 + $0x9f0] sm:$0xff] }
 0x18e   :  { %v9861_v0 = vcombine.high %v335_v59, %v339_v60  ;;  %v9860_v6 = vcombine.low %v335_v59, %v339_v60  ;;  %v9915_v56 = vcombine.high %v390_v48, %v394_v49  ;;  %v398_v59 = vld [vmem:[#allocation2 + $0xa10] sm:$0xff] }
 0x18f   :  { %3217 = vmatpush1.bf16.msra.mxu0 %v9794_v1  ;;  %3381 = vmatpush1.bf16.msra.mxu1 %v9796_v2  ;;  %v342_v1 = vld [vmem:[#allocation2 + $0x850] sm:$0xff] }
 0x190   :  { %3218 = vmatprep.subr.bf16.mxu0 %v9803_v3  ;;  %3382 = vmatprep.subr.bf16.mxu1 %v9805_v4  ;;  %v346_v2 = vld [vmem:[#allocation2 + $0x870] sm:$0xff]  ;;  %v343_v3 = vld [vmem:[#allocation2 + $0x858] sm:$0xff] }
 0x191   :  { %v347_v4 = vld [vmem:[#allocation2 + $0x878] sm:$0xff]  ;;  %v9867_v7 = vcombine.high %v342_v1, %v346_v2  ;;  %v9866_v13 = vcombine.low %v342_v1, %v346_v2  ;;  %v402_v60 = vld [vmem:[#allocation2 + $0xa30] sm:$0xff] }
 0x192   :  { %v9869_v8 = vcombine.high %v343_v3, %v347_v4  ;;  %v9868_v12 = vcombine.low %v343_v3, %v347_v4  ;;  %v9923_v1 = vcombine.high %v398_v59, %v402_v60  ;;  %v406_v3 = vld [vmem:[#allocation2 + $0xa50] sm:$0xff] }
 0x193   :  { %3219 = vmatpush1.bf16.msra.mxu0 %v9802_v9  ;;  %3383 = vmatpush1.bf16.msra.mxu1 %v9804_v10  ;;  %v350_v9 = vld [vmem:[#allocation2 + $0x890] sm:$0xff] }
 0x194   :  { %3220 = vmatprep.subr.bf16.mxu0 %v9811_v11  ;;  %3384 = vmatprep.subr.bf16.mxu1 %v9813_v57  ;;  %v354_v10 = vld [vmem:[#allocation2 + $0x8b0] sm:$0xff]  ;;  %v351_v11 = vld [vmem:[#allocation2 + $0x898] sm:$0xff] }
 0x195   :  { %v355_v57 = vld [vmem:[#allocation2 + $0x8b8] sm:$0xff]  ;;  %v9875_v14 = vcombine.high %v350_v9, %v354_v10  ;;  %v9874_v21 = vcombine.low %v350_v9, %v354_v10  ;;  %v410_v4 = vld [vmem:[#allocation2 + $0xa70] sm:$0xff] }
 0x196   :  { %v9877_v16 = vcombine.high %v351_v11, %v355_v57  ;;  %v9931_v9 = vcombine.high %v406_v3, %v410_v4 }
 0x197   :  { %3221 = vmatpush1.bf16.msra.mxu0 %v9810_v17  ;;  %3385 = vmatpush1.bf16.msra.mxu1 %v9812_v18  ;;  %v358_v17 = vld [vmem:[#allocation2 + $0x8d0] sm:$0xff] }
 0x198   :  { %3222 = vmatprep.subr.bf16.mxu0 %v9819_v19  ;;  %3386 = vmatprep.subr.bf16.mxu1 %v9821_v20  ;;  %v362_v18 = vld [vmem:[#allocation2 + $0x8f0] sm:$0xff]  ;;  %v359_v19 = vld [vmem:[#allocation2 + $0x8d8] sm:$0xff] }
 0x199   :  { %v363_v20 = vld [vmem:[#allocation2 + $0x8f8] sm:$0xff]  ;;  %v9883_v22 = vcombine.high %v358_v17, %v362_v18 }
 0x19a   :  { %v9885_v53 = vcombine.high %v359_v19, %v363_v20  ;;  %v9884_v30 = vcombine.low %v359_v19, %v363_v20  ;;  %v422_v19 = vld [vmem:[#allocation2 + $0xad0] sm:$0xff] }
 0x19b   :  { %3223 = vmatpush1.bf16.msra.mxu0 %v9818_v26  ;;  %3387 = vmatpush1.bf16.msra.mxu1 %v9820_v27  ;;  %v370_v26 = vld [vmem:[#allocation2 + $0x930] sm:$0xff]  ;;  %v367_v27 = vld [vmem:[#allocation2 + $0x918] sm:$0xff] }
 0x19c   :  { %3224 = vmatprep.subr.bf16.mxu0 %v9827_v28  ;;  %3388 = vmatprep.subr.bf16.mxu1 %v9829_v29  ;;  %v371_v28 = vld [vmem:[#allocation2 + $0x938] sm:$0xff]  ;;  %v9882_v29 = vcombine.low %v358_v17, %v362_v18  ;;  %v9891_v31 = vcombine.high %v366_v23, %v370_v26  ;;  %v426_v20 = vld [vmem:[#allocation2 + $0xaf0] sm:$0xff] }
 0x19f   :  { %3225 = vmatpush1.bf16.msra.mxu0 %v9826_v15  ;;  %3389 = vmatpush1.bf16.msra.mxu1 %v9828_v35  ;;  %v375_v15 = vld [vmem:[#allocation2 + $0x958] sm:$0xff] }
 0x1a0   :  { %3226 = vmatprep.subr.bf16.mxu0 %v9835_v37  ;;  %3390 = vmatprep.subr.bf16.mxu1 %v9837_v38  ;;  %v379_v35 = vld [vmem:[#allocation2 + $0x978] sm:$0xff]  ;;  %v9890_v37 = vcombine.low %v366_v23, %v370_v26  ;;  %v9892_v38 = vcombine.low %v367_v27, %v371_v28  ;;  %v9947_v23 = vcombine.high %v422_v19, %v426_v20 }
 0x1a1   :  { %v9901_v40 = vcombine.high %v375_v15, %v379_v35 }
 0x1a3   :  { %3227 = vmatpush1.bf16.msra.mxu0 %v9834_v43  ;;  %3391 = vmatpush1.bf16.msra.mxu1 %v9836_v44  ;;  %v383_v43 = vld [vmem:[#allocation2 + $0x998] sm:$0xff] }
 0x1a4   :  { %3228 = vmatprep.subr.bf16.mxu0 %v9843_v45  ;;  %3392 = vmatprep.subr.bf16.mxu1 %v9845_v46  ;;  %v387_v44 = vld [vmem:[#allocation2 + $0x9b8] sm:$0xff]  ;;  %v9898_v45 = vcombine.low %v374_v33, %v378_v34  ;;  %v9900_v46 = vcombine.low %v375_v15, %v379_v35  ;;  %v438_v15 = vld [vmem:[#allocation2 + $0xb50] sm:$0xff] }
 0x1a5   :  { %v9909_v47 = vcombine.high %v383_v43, %v387_v44  ;;  %v442_v35 = vld [vmem:[#allocation2 + $0xb70] sm:$0xff] }
 0x1a7   :  { %3229 = vmatpush1.bf16.msra.mxu0 %v9842_v50  ;;  %3393 = vmatpush1.bf16.msra.mxu1 %v9844_v51  ;;  %v391_v50 = vld [vmem:[#allocation2 + $0x9d8] sm:$0xff] }
 0x1a8   :  { %3230 = vmatprep.subr.bf16.mxu0 %v9851_v54  ;;  %3394 = vmatprep.subr.bf16.mxu1 %v9853_v55  ;;  %v395_v51 = vld [vmem:[#allocation2 + $0x9f8] sm:$0xff]  ;;  %v9906_v54 = vcombine.low %v382_v41, %v386_v42  ;;  %v9908_v55 = vcombine.low %v383_v43, %v387_v44  ;;  %v9963_v41 = vcombine.high %v438_v15, %v442_v35  ;;  %v446_v43 = vld [vmem:[#allocation2 + $0xb90] sm:$0xff] }
 0x1a9   :  { %v9917_v58 = vcombine.high %v391_v50, %v395_v51  ;;  %v450_v44 = vld [vmem:[#allocation2 + $0xbb0] sm:$0xff] }
 0x1ab   :  { %3231 = vmatpush1.bf16.msra.mxu0 %v9850_v61  ;;  %3395 = vmatpush1.bf16.msra.mxu1 %v9852_v62  ;;  %v399_v61 = vld [vmem:[#allocation2 + $0xa18] sm:$0xff] }
 0x1ac   :  { %3241 = vmatprep.subr.bf16.mxu0 %v9859_v63  ;;  %3405 = vmatprep.subr.bf16.mxu1 %v9861_v0  ;;  %v403_v62 = vld [vmem:[#allocation2 + $0xa38] sm:$0xff]  ;;  %v9914_v63 = vcombine.low %v390_v48, %v394_v49  ;;  %v9916_v0 = vcombine.low %v391_v50, %v395_v51  ;;  %v9971_v48 = vcombine.high %v446_v43, %v450_v44  ;;  %v454_v50 = vld [vmem:[#allocation2 + $0xbd0] sm:$0xff] }
 0x1ad   :  { %v9925_v2 = vcombine.high %v399_v61, %v403_v62  ;;  %v458_v51 = vld [vmem:[#allocation2 + $0xbf0] sm:$0xff] }
 0x1ae   :  { %3233 = vmatmul.mubr.bf16.vlgmr.msra.gmra.mrb[4].mxu0 %v13713_v25  ;;  %3397 = vmatmul.mubr.bf16.vlgmr.msra.gmra.mrb[4].mxu1 %v13713_v25  ;;  %v9876_v25 = vcombine.low %v351_v11, %v355_v57  ;;  %v414_v11 = vld [vmem:[#allocation2 + $0xa90] sm:$0xff] }
 0x1af   :  { %3242 = vmatpush1.bf16.msra.mxu0 %v9858_v5  ;;  %3406 = vmatpush1.bf16.msra.mxu1 %v9860_v6  ;;  %v407_v5 = vld [vmem:[#allocation2 + $0xa58] sm:$0xff]  ;;  %v418_v57 = vld [vmem:[#allocation2 + $0xab0] sm:$0xff] }
 0x1b0   :  { %3243 = vmatprep.subr.bf16.mxu0 %v9867_v7  ;;  %3407 = vmatprep.subr.bf16.mxu1 %v9869_v8  ;;  %v411_v6 = vld [vmem:[#allocation2 + $0xa78] sm:$0xff]  ;;  %v9922_v7 = vcombine.low %v398_v59, %v402_v60  ;;  %v9924_v8 = vcombine.low %v399_v61, %v403_v62  ;;  %v9939_v17 = vcombine.high %v414_v11, %v418_v57  ;;  %v462_v61 = vld [vmem:[#allocation2 + $0xc10] sm:$0xff] }
 0x1b1   :  { %3273 = vmatprep.mubr.bf16.mxu0 %v13717_v32  ;;  %3437 = vmatprep.mubr.bf16.mxu1 %v13717_v32  ;;  %v9893_v32 = vcombine.high %v367_v27, %v371_v28  ;;  %v9933_v10 = vcombine.high %v407_v5, %v411_v6  ;;  %v430_v27 = vld [vmem:[#allocation2 + $0xb10] sm:$0xff]  ;;  %v9979_v59 = vcombine.high %v454_v50, %v458_v51 }
 0x1b2   :  { %v434_v28 = vld [vmem:[#allocation2 + $0xb30] sm:$0xff] }
 0x1b3   :  { %3244 = vmatpush1.bf16.msra.mxu0 %v9866_v13  ;;  %3408 = vmatpush1.bf16.msra.mxu1 %v9868_v12  ;;  %v415_v13 = vld [vmem:[#allocation2 + $0xa98] sm:$0xff]  ;;  %v9955_v33 = vcombine.high %v430_v27, %v434_v28  ;;  %v466_v62 = vld [vmem:[#allocation2 + $0xc30] sm:$0xff] }
 0x1b4   :  { %3245 = vmatprep.subr.bf16.mxu0 %v9875_v14  ;;  %3409 = vmatprep.subr.bf16.mxu1 %v9877_v16  ;;  %v419_v12 = vld [vmem:[#allocation2 + $0xab8] sm:$0xff]  ;;  %v9930_v14 = vcombine.low %v406_v3, %v410_v4  ;;  %v9932_v16 = vcombine.low %v407_v5, %v411_v6  ;;  %v9987_v3 = vcombine.high %v462_v61, %v466_v62  ;;  %v470_v5 = vld [vmem:[#allocation2 + $0xc50] sm:$0xff] }
 0x1b5   :  { %v9941_v18 = vcombine.high %v415_v13, %v419_v12  ;;  %v474_v6 = vld [vmem:[#allocation2 + $0xc70] sm:$0xff] }
 0x1b7   :  { %3246 = vmatpush1.bf16.msra.mxu0 %v9874_v21  ;;  %3410 = vmatpush1.bf16.msra.mxu1 %v9876_v25  ;;  %v423_v21 = vld [vmem:[#allocation2 + $0xad8] sm:$0xff] }
 0x1b8   :  { %3247 = vmatprep.subr.bf16.mxu0 %v9883_v22  ;;  %3411 = vmatprep.subr.bf16.mxu1 %v9885_v53  ;;  %v427_v25 = vld [vmem:[#allocation2 + $0xaf8] sm:$0xff]  ;;  %v9938_v22 = vcombine.low %v414_v11, %v418_v57  ;;  %v9940_v53 = vcombine.low %v415_v13, %v419_v12  ;;  %v9995_v11 = vcombine.high %v470_v5, %v474_v6  ;;  %v478_v13 = vld [vmem:[#allocation2 + $0xc90] sm:$0xff] }
 0x1b9   :  { %v9949_v26 = vcombine.high %v423_v21, %v427_v25  ;;  %v482_v12 = vld [vmem:[#allocation2 + $0xcb0] sm:$0xff] }
 0x1bb   :  { %3248 = vmatpush1.bf16.msra.mxu0 %v9882_v29  ;;  %3412 = vmatpush1.bf16.msra.mxu1 %v9884_v30  ;;  %v431_v29 = vld [vmem:[#allocation2 + $0xb18] sm:$0xff] }
 0x1bc   :  { %3249 = vmatprep.subr.bf16.mxu0 %v9891_v31  ;;  %3413 = vmatprep.subr.bf16.mxu1 %v9893_v32  ;;  %v435_v30 = vld [vmem:[#allocation2 + $0xb38] sm:$0xff]  ;;  %v9946_v31 = vcombine.low %v422_v19, %v426_v20  ;;  %v9948_v32 = vcombine.low %v423_v21, %v427_v25  ;;  %v10003_v19 = vcombine.high %v478_v13, %v482_v12  ;;  %v486_v21 = vld [vmem:[#allocation2 + $0xcd0] sm:$0xff] }
 0x1bd   :  { %v9957_v34 = vcombine.high %v431_v29, %v435_v30  ;;  %v490_v25 = vld [vmem:[#allocation2 + $0xcf0] sm:$0xff] }
 0x1bf   :  { %3250 = vmatpush1.bf16.msra.mxu0 %v9890_v37  ;;  %3414 = vmatpush1.bf16.msra.mxu1 %v9892_v38  ;;  %v439_v37 = vld [vmem:[#allocation2 + $0xb58] sm:$0xff] }
 0x1c0   :  { %3251 = vmatprep.subr.bf16.mxu0 %v9899_v39  ;;  %3415 = vmatprep.subr.bf16.mxu1 %v9901_v40  ;;  %v443_v38 = vld [vmem:[#allocation2 + $0xb78] sm:$0xff]  ;;  %v9954_v39 = vcombine.low %v430_v27, %v434_v28  ;;  %v9956_v40 = vcombine.low %v431_v29, %v435_v30  ;;  %v494_v28 = vld [vmem:[#allocation2 + $0xd10] sm:$0xff] }
 0x1c1   :  { %v9965_v42 = vcombine.high %v439_v37, %v443_v38  ;;  %v498_v29 = vld [vmem:[#allocation2 + $0xd30] sm:$0xff]  ;;  %v495_v30 = vld [vmem:[#allocation2 + $0xd18] sm:$0xff] }
 0x1c3   :  { %3252 = vmatpush1.bf16.msra.mxu0 %v9898_v45  ;;  %3416 = vmatpush1.bf16.msra.mxu1 %v9900_v46  ;;  %v447_v45 = vld [vmem:[#allocation2 + $0xb98] sm:$0xff] }
 0x1c4   :  { %3253 = vmatprep.subr.bf16.mxu0 %v9907_v24  ;;  %3417 = vmatprep.subr.bf16.mxu1 %v9909_v47  ;;  %v451_v46 = vld [vmem:[#allocation2 + $0xbb8] sm:$0xff]  ;;  %v9962_v24 = vcombine.low %v438_v15, %v442_v35  ;;  %v9964_v47 = vcombine.low %v439_v37, %v443_v38  ;;  %v526_v15 = vlaneseq  ;;  %v502_v35 = vld [vmem:[#allocation2 + $0xd50] sm:$0xff] }
 0x1c5   :  { %v9973_v49 = vcombine.high %v447_v45, %v451_v46  ;;  %v506_v37 = vld [vmem:[#allocation2 + $0xd70] sm:$0xff]  ;;  %v503_v38 = vld [vmem:[#allocation2 + $0xd58] sm:$0xff] }
 0x1c7   :  { %3254 = vmatpush1.bf16.msra.mxu0 %v9906_v54  ;;  %3418 = vmatpush1.bf16.msra.mxu1 %v9908_v55  ;;  %v455_v54 = vld [vmem:[#allocation2 + $0xbd8] sm:$0xff] }
 0x1c8   :  { %3255 = vmatprep.subr.bf16.mxu0 %v9915_v56  ;;  %3419 = vmatprep.subr.bf16.mxu1 %v9917_v58  ;;  %v459_v55 = vld [vmem:[#allocation2 + $0xbf8] sm:$0xff]  ;;  %v9970_v56 = vcombine.low %v446_v43, %v450_v44  ;;  %v9972_v58 = vcombine.low %v447_v45, %v451_v46  ;;  %v10027_v43 = vcombine.high %v502_v35, %v506_v37  ;;  %v510_v45 = vld [vmem:[#allocation2 + $0xd90] sm:$0xff] }
 0x1c9   :  { %v9981_v60 = vcombine.high %v455_v54, %v459_v55  ;;  %v514_v46 = vld [vmem:[#allocation2 + $0xdb0] sm:$0xff] }
 0x1cb   :  { %3256 = vmatpush1.bf16.msra.mxu0 %v9914_v63  ;;  %3420 = vmatpush1.bf16.msra.mxu1 %v9916_v0  ;;  %v463_v63 = vld [vmem:[#allocation2 + $0xc18] sm:$0xff] }
 0x1cc   :  { %3257 = vmatprep.subr.bf16.mxu0 %v9923_v1  ;;  %3421 = vmatprep.subr.bf16.mxu1 %v9925_v2  ;;  %v467_v0 = vld [vmem:[#allocation2 + $0xc38] sm:$0xff]  ;;  %v9978_v1 = vcombine.low %v454_v50, %v458_v51  ;;  %v9980_v2 = vcombine.low %v455_v54, %v459_v55  ;;  %v10035_v51 = vcombine.high %v510_v45, %v514_v46  ;;  %v13751_v54 = vld [vmem:[#allocation4] sm:$0xff] }
 0x1cd   :  { %v9989_v4 = vcombine.high %v463_v63, %v467_v0 }
 0x1cf   :  { %3258 = vmatpush1.bf16.msra.mxu0 %v9922_v7  ;;  %3422 = vmatpush1.bf16.msra.mxu1 %v9924_v8  ;;  %v471_v7 = vld [vmem:[#allocation2 + $0xc58] sm:$0xff] }
 0x1d0   :  { %3259 = vmatprep.subr.bf16.mxu0 %v9931_v9  ;;  %3423 = vmatprep.subr.bf16.mxu1 %v9933_v10  ;;  %v475_v8 = vld [vmem:[#allocation2 + $0xc78] sm:$0xff]  ;;  %v9986_v9 = vcombine.low %v462_v61, %v466_v62  ;;  %v9988_v10 = vcombine.low %v463_v63, %v467_v0 }
 0x1d1   :  { %v9997_v57 = vcombine.high %v471_v7, %v475_v8  ;;  %v519_v63 = vld [vmem:[#allocation2 + $0xdd8] sm:$0xff] }
 0x1d2   :  { %v523_v0 = vld [vmem:[#allocation2 + $0xdf8] sm:$0xff] }
 0x1d3   :  { %3260 = vmatpush1.bf16.msra.mxu0 %v9930_v14  ;;  %3424 = vmatpush1.bf16.msra.mxu1 %v9932_v16  ;;  %v479_v14 = vld [vmem:[#allocation2 + $0xc98] sm:$0xff] }
 0x1d4   :  { %3261 = vmatprep.subr.bf16.mxu0 %v9939_v17  ;;  %3425 = vmatprep.subr.bf16.mxu1 %v9941_v18  ;;  %v483_v16 = vld [vmem:[#allocation2 + $0xcb8] sm:$0xff]  ;;  %v9994_v17 = vcombine.low %v470_v5, %v474_v6  ;;  %v9996_v18 = vcombine.low %v471_v7, %v475_v8 }
 0x1d5   :  { %v10005_v20 = vcombine.high %v479_v14, %v483_v16 }
 0x1d7   :  { %3262 = vmatpush1.bf16.msra.mxu0 %v9938_v22  ;;  %3426 = vmatpush1.bf16.msra.mxu1 %v9940_v53  ;;  %v487_v22 = vld [vmem:[#allocation2 + $0xcd8] sm:$0xff] }
 0x1d8   :  { %3263 = vmatprep.subr.bf16.mxu0 %v9947_v23  ;;  %3427 = vmatprep.subr.bf16.mxu1 %v9949_v26  ;;  %v491_v53 = vld [vmem:[#allocation2 + $0xcf8] sm:$0xff]  ;;  %v10002_v23 = vcombine.low %v478_v13, %v482_v12  ;;  %v10011_v26 = vcombine.high %v486_v21, %v490_v25  ;;  %v10044_v12 = vcombine.low %v519_v63, %v523_v0 }
 0x1d9   :  { %v10013_v27 = vcombine.high %v487_v22, %v491_v53 }
 0x1db   :  { %3264 = vmatpush1.bf16.msra.mxu0 %v9946_v31  ;;  %3428 = vmatpush1.bf16.msra.mxu1 %v9948_v32  ;;  %v499_v31 = vld [vmem:[#allocation2 + $0xd38] sm:$0xff]  ;;  %v10010_v32 = vcombine.low %v486_v21, %v490_v25  ;;  %v13781_v25 = vld [vmem:[#allocation6 + $0xc8] sm:$0xff]  }
 0x1dc   :  { %3265 = vmatprep.subr.bf16.mxu0 %v9955_v33  ;;  %3429 = vmatprep.subr.bf16.mxu1 %v9957_v34  ;;  %v10012_v33 = vcombine.low %v487_v22, %v491_v53  ;;  %v10019_v34 = vcombine.high %v494_v28, %v498_v29  ;;  %v13097_v21 = vld [vmem:[%s18708_s0 + $0x18] ss:$0 sps:$4 sm:$0xff]   ;;  %v13787_v22 = vld [vmem:[#allocation6 + $0x8] sm:$0xff]   ;;  %v18714_v53 = vmov 1.0|1.0  }
 0x1df   :  { %3266 = vmatpush1.bf16.msra.mxu0 %v9954_v39  ;;  %3430 = vmatpush1.bf16.msra.mxu1 %v9956_v40  ;;  %v507_v39 = vld [vmem:[#allocation2 + $0xd78] sm:$0xff]  ;;  %v10018_v40 = vcombine.low %v494_v28, %v498_v29  ;;  %v13810_v29 = vld [vmem:[#allocation6 + $0x58] sm:$0xff]  }
 0x1e0   :  { %3267 = vmatprep.subr.bf16.mxu0 %v9963_v41  ;;  %3431 = vmatprep.subr.bf16.mxu1 %v9965_v42  ;;  %v10020_v41 = vcombine.low %v495_v30, %v499_v31  ;;  %v13748_v42 = vshrl.u32 %v526_v15, 7  ;;  %v10029_v44 = vcombine.high %v503_v38, %v507_v39  ;;  %v10028_v50 = vcombine.low %v503_v38, %v507_v39  ;;  %v13808_v28 = vld [vmem:[#allocation6 + $0x90] sm:$0xff]   ;;  %v13828_v15 = vld [vmem:[#allocation6 + $0x20] sm:$0xff]  }
 0x1e1   :  { %19175 = vst [vmem:[#allocation20_spill] sm:$0xff] %v13828_v15 }
 0x1e2   :  { %v528_v38 = vsub.s32 0, %v13748_v42  ;;  %v536_v39 = vsub.s32 2, %v13748_v42 }
 0x1e3   :  { %3268 = vmatpush1.bf16.msra.mxu0 %v9962_v24  ;;  %3432 = vmatpush1.bf16.msra.mxu1 %v9964_v47  ;;  %v511_v24 = vld [vmem:[#allocation2 + $0xd98] sm:$0xff] }
 0x1e4   :  { %3269 = vmatprep.subr.bf16.mxu0 %v9971_v48  ;;  %3433 = vmatprep.subr.bf16.mxu1 %v9973_v49  ;;  %v515_v47 = vld [vmem:[#allocation2 + $0xdb8] sm:$0xff]  ;;  %v10026_v48 = vcombine.low %v502_v35, %v506_v37  ;;  %v532_v49 = vsub.s32 1, %v13748_v42  ;;  %v13834_v35 = vld [vmem:[#allocation6 + $0x68] sm:$0xff]  }
 0x1e5   :  { %v10036_v7 = vcombine.low %v511_v24, %v515_v47  ;;  %19177 = vst [vmem:[#allocation22_spill] sm:$0xff] %v13834_v35  ;;  %v13837_v37 = vld [vmem:[#allocation6 + $0xe8] sm:$0xff]  }
 0x1e6   :  { %19178 = vst [vmem:[#allocation23_spill] sm:$0xff] %v13837_v37 }
 0x1e7   :  { %3270 = vmatpush1.bf16.msra.mxu0 %v9970_v56  ;;  %3434 = vmatpush1.bf16.msra.mxu1 %v9972_v58  ;;  %v540_v56 = vsub.s32 3, %v13748_v42  ;;  %v10037_v58 = vcombine.high %v511_v24, %v515_v47  ;;  %v13856_v24 = vld [vmem:[#allocation6 + $0x30] sm:$0xff]  }
 0x1e8   :  { %3271 = vmatprep.subr.bf16.mxu0 %v9979_v59  ;;  %3435 = vmatprep.subr.bf16.mxu1 %v9981_v60  ;;  %v518_v59 = vld [vmem:[#allocation2 + $0xdd0] sm:$0xff]  ;;  %19182 = vst [vmem:[#allocation27_spill] sm:$0xff] %v13856_v24  ;;  %v13860_v47 = vld [vmem:[#allocation6 + $0xb0] sm:$0xff]  }
 0x1e9   :  { %v522_v60 = vld [vmem:[#allocation2 + $0xdf0] sm:$0xff]  ;;  %19183 = vst [vmem:[#allocation28_spill] sm:$0xff] %v13860_v47 }
 0x1ea   :  { %v10043_v8 = vcombine.high %v518_v59, %v522_v60 }
 0x1eb   :  { %3272 = vmatpush1.bf16.msra.mxu0 %v9978_v1  ;;  %3436 = vmatpush1.bf16.msra.mxu1 %v9980_v2 }
 0x1ec   :  { %3282 = vmatprep.subr.bf16.mxu0 %v9987_v3  ;;  %3446 = vmatprep.subr.bf16.mxu1 %v9989_v4  ;;  %v10034_v3 = vcombine.low %v510_v45, %v514_v46  ;;  %v533_v4 = vrot.slane %v13751_v54, %v532_v49  ;;  %v529_v45 = vrot.slane %v13751_v54, %v528_v38  ;;  %v13865_v49 = vld [vmem:[#allocation6 + $0xf8] sm:$0xff]   ;;  %v13953_v38 = vld [vmem:[#allocation6 + $0x1e8] sm:$0xff]  }
 0x1ed   :  { %v537_v46 = vrot.slane %v13751_v54, %v536_v39  ;;  %19199 = vst [vmem:[#allocation44_spill] sm:$0xff] %v13953_v38  ;;  %v13956_v39 = vld [vmem:[#allocation6 + $0x128] sm:$0xff]  }
 0x1ee   :  { %3274 = vmatmul.mubr.bf16.vlgmr.msra.gmra.mrb[4].mxu0 %v13725_v36  ;;  %3438 = vmatmul.mubr.bf16.vlgmr.msra.gmra.mrb[4].mxu1 %v13725_v36  ;;  %v10004_v36 = vcombine.low %v479_v14, %v483_v16  ;;  %v13762_v14 = vld [vmem:[#allocation6 + $0x40] sm:$0xff]   ;;  %19200 = vst [vmem:[#allocation45_spill] sm:$0xff] %v13956_v39 }
 0x1ef   :  { %3283 = vmatpush1.bf16.msra.mxu0 %v9986_v9  ;;  %3447 = vmatpush1.bf16.msra.mxu1 %v9988_v10  ;;  %v541_v9 = vrot.slane %v13751_v54, %v540_v56  ;;  %19168 = vst [vmem:[#allocation13_spill] sm:$0xff] %v13762_v14  ;;  %v13874_v56 = vld [vmem:[#allocation6 + $0x38] sm:$0xff]  }
 0x1f0   :  { %3284 = vmatprep.subr.bf16.mxu0 %v9995_v11  ;;  %3448 = vmatprep.subr.bf16.mxu1 %v9997_v57  ;;  %v10045_v11 = vcombine.high %v519_v63, %v523_v0  ;;  %v10042_v57 = vcombine.low %v518_v59, %v522_v60  ;;  %v13880_v59 = vld [vmem:[#allocation6 + $0x140] sm:$0xff]   ;;  %v13900_v63 = vld [vmem:[#allocation6 + $0x1c8] sm:$0xff]  }
 0x1f1   :  { %3314 = vmatprep.mubr.bf16.mxu0 %v13590_v52  ;;  %3478 = vmatprep.mubr.bf16.mxu1 %v13590_v52  ;;  %v10021_v52 = vcombine.high %v495_v30, %v499_v31  ;;  %v13813_v30 = vld [vmem:[#allocation6 + $0xd8] sm:$0xff]   ;;  %v13883_v60 = vld [vmem:[#allocation6 + $0x1c0] sm:$0xff]   ;;  %v13908_v0 = vld [vmem:[#allocation6 + $0x108] sm:$0xff]  }
 0x1f2   :  { %v13816_v31 = vld [vmem:[#allocation6 + $0x18] sm:$0xff]   ;;  %19184 = vst [vmem:[#allocation29_spill] sm:$0xff] %v13908_v0 }
 0x1f3   :  { %3285 = vmatpush1.bf16.msra.mxu0 %v9994_v17  ;;  %3449 = vmatpush1.bf16.msra.mxu1 %v9996_v18  ;;  %v13766_v17 = vld [vmem:[#allocation6 + $0xc0] sm:$0xff]   ;;  %19171 = vst [vmem:[#allocation16_spill] sm:$0xff] %v13816_v31 }
 0x1f4   :  { %3286 = vmatprep.subr.bf16.mxu0 %v10003_v19  ;;  %3450 = vmatprep.subr.bf16.mxu1 %v10005_v20  ;;  %19170 = vst [vmem:[#allocation15_spill] sm:$0xff] %v13766_v17  ;;  %v13768_v18 = vld [vmem:[#allocation6] sm:$0xff]   ;;  %v13776_v20 = vld [vmem:[#allocation6 + $0x48] sm:$0xff]  }
 0x1f5   :  { %v13772_v19 = vld [vmem:[#allocation6 + $0x80] sm:$0xff]  }
 0x1f7   :  { %3287 = vmatpush1.bf16.msra.mxu0 %v10002_v23  ;;  %3451 = vmatpush1.bf16.msra.mxu1 %v10004_v36  ;;  %v13794_v23 = vld [vmem:[#allocation6 + $0x88] sm:$0xff]   ;;  %v13796_v36 = vld [vmem:[#allocation6 + $0x50] sm:$0xff]  }
 0x1f8   :  { %3288 = vmatprep.subr.bf16.mxu0 %v10011_v26  ;;  %3452 = vmatprep.subr.bf16.mxu1 %v10013_v27  ;;  %v13800_v26 = vld [vmem:[#allocation6 + $0xd0] sm:$0xff]  }
 0x1f9   :  { %v13804_v27 = vld [vmem:[#allocation6 + $0x10] sm:$0xff]  }
 0x1fb   :  { %3289 = vmatpush1.bf16.msra.mxu0 %v10010_v32  ;;  %3453 = vmatpush1.bf16.msra.mxu1 %v10012_v33  ;;  %v13820_v32 = vld [vmem:[#allocation6 + $0x98] sm:$0xff]   ;;  %v13822_v33 = vld [vmem:[#allocation6 + $0x60] sm:$0xff]  }
 0x1fc   :  { %3290 = vmatprep.subr.bf16.mxu0 %v10019_v34  ;;  %3454 = vmatprep.subr.bf16.mxu1 %v10021_v52  ;;  %19172 = vst [vmem:[#allocation17_spill] sm:$0xff] %v13820_v32  ;;  %19173 = vst [vmem:[#allocation18_spill] sm:$0xff] %v13822_v33  ;;  %v13825_v34 = vld [vmem:[#allocation6 + $0xe0] sm:$0xff]  }
 0x1fd   :  { %19174 = vst [vmem:[#allocation19_spill] sm:$0xff] %v13825_v34  ;;  %v13832_v52 = vld [vmem:[#allocation6 + $0xa0] sm:$0xff]  }
 0x1fe   :  { %19176 = vst [vmem:[#allocation21_spill] sm:$0xff] %v13832_v52 }
 0x1ff   :  { %3291 = vmatpush1.bf16.msra.mxu0 %v10018_v40  ;;  %3455 = vmatpush1.bf16.msra.mxu1 %v10020_v41  ;;  %v13842_v40 = vld [vmem:[#allocation6 + $0x28] sm:$0xff]  }
 0x200   :  { %3292 = vmatprep.subr.bf16.mxu0 %v10027_v43  ;;  %3456 = vmatprep.subr.bf16.mxu1 %v10029_v44  ;;  %19179 = vst [vmem:[#allocation24_spill] sm:$0xff] %v13842_v40  ;;  %v13846_v41 = vld [vmem:[#allocation6 + $0xa8] sm:$0xff]   ;;  %v13848_v43 = vld [vmem:[#allocation6 + $0x70] sm:$0xff]  }
 0x201   :  { %v13753_v55 = vpop.f32.mrb[0].mxu0  ;;  %v13756_v61 = vpop.f32.mrb[0].mxu1  ;;  %19180 = vst [vmem:[#allocation25_spill] sm:$0xff] %v13848_v43  ;;  %v13851_v44 = vld [vmem:[#allocation6 + $0xf0] sm:$0xff]  }
 0x202   :  { %v2990_v62 = vpop.f32.mrb[1].mxu0  ;;  %v3154_v1 = vpop.f32.mrb[1].mxu1  ;;  %19181 = vst [vmem:[#allocation26_spill] sm:$0xff] %v13851_v44 }
 0x203   :  { %v2992_v2 = vpop.f32.mrb[2].mxu0  ;;  %3293 = vmatpush1.bf16.msra.mxu0 %v10026_v48  ;;  %v3156_v5 = vpop.f32.mrb[2].mxu1  ;;  %3457 = vmatpush1.bf16.msra.mxu1 %v10028_v50  ;;  %v13760_v13 = vadd.f32 %v2990_v62, %v533_v4  ;;  %v13764_v16 = vadd.f32 %v3154_v1, %v541_v9  ;;  %v13862_v48 = vld [vmem:[#allocation6 + $0x78] sm:$0xff]   ;;  %v13868_v50 = vadd.f32 %v13753_v55, %v529_v45  ;;  %v13888_v55 = vld [vmem:[#allocation6 + $0x100] sm:$0xff]   ;;  %v13894_v62 = vld [vmem:[#allocation6 + $0x148] sm:$0xff]  }
 0x204   :  { %v2993_v6 = vpop.f32.mrb[3].mxu0  ;;  %3294 = vmatprep.subr.bf16.mxu0 %v10035_v51  ;;  %v3157_v10 = vpop.f32.mrb[3].mxu1  ;;  %3458 = vmatprep.subr.bf16.mxu1 %v10037_v58  ;;  %v13871_v51 = vadd.f32 %v13756_v61, %v537_v46  ;;  %v13878_v58 = vld [vmem:[#allocation6 + $0xb8] sm:$0xff]   ;;  %v13892_v61 = vld [vmem:[#allocation6 + $0x180] sm:$0xff]   ;;  %v13912_v1 = vld [vmem:[#allocation6 + $0x188] sm:$0xff]  }
 0x205   :  { %19167 = vst [vmem:[#allocation12_spill] sm:$0xff] %v13760_v13  ;;  %19169 = vst [vmem:[#allocation14_spill] sm:$0xff] %v13764_v16  ;;  %vm3625_vm0 = vcmp.gt.f32.partialorder %v13760_v13, 1.0  ;;  %vm3627_vm1 = vcmp.gt.f32.partialorder %v13764_v16, 1.0  ;;  %vm3624_vm4 = vcmp.gt.f32.partialorder %v13868_v50, 1.0  ;;  %v13914_v2 = vld [vmem:[#allocation6 + $0x150] sm:$0xff]  }
 0x206   :  { %vm10119_vm2 = vmpackc.low %vm3625_vm0, %vm3625_vm0  ;;  %vm3626_vm5 = vcmp.gt.f32.partialorder %v13871_v51, 1.0  ;;  %19185 = vst [vmem:[#allocation30_spill] sm:$0xff] %v13912_v1  ;;  %v13920_v4 = vld [vmem:[#allocation6 + $0x110] sm:$0xff]   ;;  %v13926_v6 = vld [vmem:[#allocation6 + $0x158] sm:$0xff]  }
 0x207   :  { %3295 = vmatpush1.bf16.msra.mxu0 %v10034_v3  ;;  %3459 = vmatpush1.bf16.msra.mxu1 %v10036_v7  ;;  %vm10123_vm3 = vmpackc.low %vm3627_vm1, %vm3627_vm1  ;;  %19186 = vst [vmem:[#allocation31_spill] sm:$0xff] %v13914_v2  ;;  %v13917_v3 = vld [vmem:[#allocation6 + $0x1d0] sm:$0xff]   ;;  %v13929_v7 = vld [vmem:[#allocation6 + $0x1d8] sm:$0xff]  }
 0x208   :  { %3296 = vmatprep.subr.bf16.mxu0 %v10043_v8  ;;  %3460 = vmatprep.subr.bf16.mxu1 %v10045_v11  ;;  %vm10121_vm6 = vmpackc.low %vm3624_vm4, %vm3624_vm4  ;;  %19187 = vst [vmem:[#allocation32_spill] sm:$0xff] %v13917_v3  ;;  %v13924_v5 = vld [vmem:[#allocation6 + $0x190] sm:$0xff]   ;;  %v13932_v8 = vld [vmem:[#allocation6 + $0x118] sm:$0xff]  }
 0x209   :  { %vm10125_vm7 = vmpackc.low %vm3626_vm5, %vm3626_vm5  ;;  %19188 = vst [vmem:[#allocation33_spill] sm:$0xff] %v13920_v4  ;;  %v13936_v9 = vld [vmem:[#allocation6 + $0x198] sm:$0xff]   ;;  %v13938_v10 = vld [vmem:[#allocation6 + $0x160] sm:$0xff]  }
 0x20a   :  { %19189 = vst [vmem:[#allocation34_spill] sm:$0xff] %v13924_v5  ;;  %19190 = vst [vmem:[#allocation35_spill] sm:$0xff] %v13926_v6  ;;  %v13941_v11 = vld [vmem:[#allocation6 + $0x1e0] sm:$0xff]   ;;  %v13960_v45 = vld [vmem:[#allocation6 + $0x1a8] sm:$0xff]  }
 0x20b   :  { %3297 = vmatpush1.bf16.msra.mxu0 %v10042_v57  ;;  %3461 = vmatpush1.bf16.msra.mxu1 %v10044_v12  ;;  %19191 = vst [vmem:[#allocation36_spill] sm:$0xff] %v13929_v7  ;;  %19192 = vst [vmem:[#allocation37_spill] sm:$0xff] %v13932_v8  ;;  %v13944_v57 = vld [vmem:[#allocation6 + $0x120] sm:$0xff]   ;;  %v13962_v46 = vld [vmem:[#allocation6 + $0x170] sm:$0xff]  }
 0x20c   :  { %10759 = vmatprep.subr.bf16.mxu0 %v13762_v14  ;;  %10781 = vmatprep.subr.bf16.mxu1 %v13766_v17  ;;  %19193 = vst [vmem:[#allocation38_spill] sm:$0xff] %v13936_v9  ;;  %19194 = vst [vmem:[#allocation39_spill] sm:$0xff] %v13938_v10  ;;  %v13948_v12 = vld [vmem:[#allocation6 + $0x1a0] sm:$0xff]  }
 0x20d   :  { %19195 = vst [vmem:[#allocation40_spill] sm:$0xff] %v13941_v11  ;;  %19196 = vst [vmem:[#allocation41_spill] sm:$0xff] %v13944_v57 }
 0x20e   :  { %3315 = vmatmul.mubr.bf16.vlgmr.msra.gmra.mrb[4].mxu0 %v13097_v21  ;;  %3479 = vmatmul.mubr.bf16.vlgmr.msra.gmra.mrb[4].mxu1 %v13097_v21  ;;  %19197 = vst [vmem:[#allocation42_spill] sm:$0xff] %v13948_v12  ;;  %v13950_v21 = vld [vmem:[#allocation6 + $0x168] sm:$0xff]   ;;  %19201 = vst [vmem:[#allocation46_spill] sm:$0xff] %v13960_v45 }
 0x20f   :  { %10760 = vmatpush3.bf16.msra.mxu0 %v13768_v18  ;;  %10120 = vmatprep.mubr.msk.bf16.mxu0 %vm10119_vm2, %v18714_v53  ;;  %19198 = vst [vmem:[#allocation43_spill] sm:$0xff] %v13950_v21  ;;  %19202 = vst [vmem:[#allocation47_spill] sm:$0xff] %v13962_v46 }
 0x210   :  { %10782 = vmatpush3.bf16.msra.mxu1 %v13772_v19  ;;  %10124 = vmatprep.mubr.msk.bf16.mxu1 %vm10123_vm3, %v18714_v53 }
 0x211   :  { %10761 = vmatprep.subr.bf16.mxu0 %v13776_v20  ;;  %10783 = vmatprep.subr.bf16.mxu1 %v13781_v25 }
 0x213   :  { %10762 = vmatpush3.bf16.msra.mxu0 %v13787_v22 }
 0x214   :  { %10784 = vmatpush3.bf16.msra.mxu1 %v13794_v23  ;;  %10763 = vmatprep.subr.bf16.mxu0 %v13796_v36 }
 0x215   :  { %10785 = vmatprep.subr.bf16.mxu1 %v13800_v26 }
 0x217   :  { %10764 = vmatpush3.bf16.msra.mxu0 %v13804_v27 }
 0x218   :  { %10786 = vmatpush3.bf16.msra.mxu1 %v13808_v28  ;;  %10765 = vmatprep.subr.bf16.mxu0 %v13810_v29 }
 0x219   :  { %10787 = vmatprep.subr.bf16.mxu1 %v13813_v30 }
 0x21b   :  { %10766 = vmatpush3.bf16.msra.mxu0 %v13816_v31 }
 0x21c   :  { %10788 = vmatpush3.bf16.msra.mxu1 %v13820_v32  ;;  %10767 = vmatprep.subr.bf16.mxu0 %v13822_v33 }
 0x21d   :  { %10789 = vmatprep.subr.bf16.mxu1 %v13825_v34 }
 0x21f   :  { %10768 = vmatpush3.bf16.msra.mxu0 %v13828_v15 }
 0x220   :  { %10790 = vmatpush3.bf16.msra.mxu1 %v13832_v52  ;;  %10769 = vmatprep.subr.bf16.mxu0 %v13834_v35 }
 0x221   :  { %10791 = vmatprep.subr.bf16.mxu1 %v13837_v37 }
 0x223   :  { %10770 = vmatpush3.bf16.msra.mxu0 %v13842_v40 }
 0x224   :  { %10792 = vmatpush3.bf16.msra.mxu1 %v13846_v41  ;;  %10771 = vmatprep.subr.bf16.mxu0 %v13848_v43 }
 0x225   :  { %10793 = vmatprep.subr.bf16.mxu1 %v13851_v44 }
 0x227   :  { %10772 = vmatpush3.bf16.msra.mxu0 %v13856_v24 }
 0x228   :  { %10794 = vmatpush3.bf16.msra.mxu1 %v13860_v47  ;;  %10773 = vmatprep.subr.bf16.mxu0 %v13862_v48 }
 0x229   :  { %10795 = vmatprep.subr.bf16.mxu1 %v13865_v49 }
 0x22b   :  { %10774 = vmatpush3.bf16.msra.mxu0 %v13874_v56 }
 0x22c   :  { %10796 = vmatpush3.bf16.msra.mxu1 %v13878_v58  ;;  %10803 = vmatprep.subr.bf16.mxu0 %v13880_v59 }
 0x22d   :  { %10825 = vmatprep.subr.bf16.mxu1 %v13883_v60 }
 0x22e   :  { %10122 = vmatmul.mubr.msk.bf16.vlgmr.msra.gmra.mrb[8].mxu0 %vm10121_vm6, %v18714_v53 }
 0x22f   :  { %10126 = vmatmul.mubr.msk.bf16.vlgmr.msra.gmra.mrb[8].mxu1 %vm10125_vm7, %v18714_v53  ;;  %10804 = vmatpush3.bf16.msra.mxu0 %v13888_v55  ;;  %v13965_v53 = vld [vmem:[#allocation6 + $0x1f0] sm:$0xff]  }
 0x230   :  { %10826 = vmatpush3.bf16.msra.mxu1 %v13892_v61  ;;  %10805 = vmatprep.subr.bf16.mxu0 %v13894_v62  ;;  %19203 = vst [vmem:[#allocation48_spill] sm:$0xff] %v13965_v53 }
 0x231   :  { %10827 = vmatprep.subr.bf16.mxu1 %v13900_v63 }
 0x233   :  { %10806 = vmatpush3.bf16.msra.mxu0 %v13908_v0 }
 0x234   :  { %10828 = vmatpush3.bf16.msra.mxu1 %v13912_v1  ;;  %10807 = vmatprep.subr.bf16.mxu0 %v13914_v2 }
 0x235   :  { %10829 = vmatprep.subr.bf16.mxu1 %v13917_v3 }
 0x237   :  { %10808 = vmatpush3.bf16.msra.mxu0 %v13920_v4 }
 0x238   :  { %10830 = vmatpush3.bf16.msra.mxu1 %v13924_v5  ;;  %10809 = vmatprep.subr.bf16.mxu0 %v13926_v6 }
 0x239   :  { %10831 = vmatprep.subr.bf16.mxu1 %v13929_v7 }
 0x23b   :  { %10810 = vmatpush3.bf16.msra.mxu0 %v13932_v8 }
 0x23c   :  { %10832 = vmatpush3.bf16.msra.mxu1 %v13936_v9  ;;  %10811 = vmatprep.subr.bf16.mxu0 %v13938_v10  ;;  %v18774_v9 = vmov 0.0  }
 0x23d   :  { %10833 = vmatprep.subr.bf16.mxu1 %v13941_v11  ;;  %v13968_v11 = vld [vmem:[#allocation6 + $0x130] sm:$0xff]   ;;  %v10047_v8 = vsel %vm3625_vm0, 1.0, %v18774_v9 }
 0x23e   :  { %19204 = vst [vmem:[#allocation49_spill] sm:$0xff] %v13968_v11 }
 0x23f   :  { %10812 = vmatpush3.bf16.msra.mxu0 %v13944_v57  ;;  %v13972_v57 = vld [vmem:[#allocation6 + $0x1b0] sm:$0xff]  }
 0x240   :  { %10834 = vmatpush3.bf16.msra.mxu1 %v13948_v12  ;;  %10813 = vmatprep.subr.bf16.mxu0 %v13950_v21  ;;  %19205 = vst [vmem:[#allocation50_spill] sm:$0xff] %v13972_v57  ;;  %v13977_v21 = vld [vmem:[#allocation6 + $0x178] sm:$0xff]  }
 0x241   :  { %10835 = vmatprep.subr.bf16.mxu1 %v13953_v38  ;;  %19206 = vst [vmem:[#allocation51_spill] sm:$0xff] %v13977_v21  ;;  %v13979_v38 = vld [vmem:[#allocation6 + $0x1f8] sm:$0xff]  }
 0x242   :  { %19207 = vst [vmem:[#allocation52_spill] sm:$0xff] %v13979_v38  ;;  %v13981_v12 = vld [vmem:[#allocation6 + $0x138] sm:$0xff]  }
 0x243   :  { %10814 = vmatpush3.bf16.msra.mxu0 %v13956_v39  ;;  %19208 = vst [vmem:[#allocation53_spill] sm:$0xff] %v13981_v12  ;;  %v13983_v39 = vld [vmem:[#allocation6 + $0x1b8] sm:$0xff]  }
 0x244   :  { %10836 = vmatpush3.bf16.msra.mxu1 %v13960_v45  ;;  %10815 = vmatprep.subr.bf16.mxu0 %v13962_v46  ;;  %19209 = vst [vmem:[#allocation54_spill] sm:$0xff] %v13983_v39  ;;  %v548_v46 = vsub.s32 5, %v13748_v42 }
 0x245   :  { %10837 = vmatprep.subr.bf16.mxu1 %v13965_v53  ;;  %v552_v53 = vsub.s32 6, %v13748_v42 }
 0x247   :  { %10816 = vmatpush3.bf16.msra.mxu0 %v13968_v11  ;;  %v4212_v11 = vmul.f32 0.95, %v13760_v13 }
 0x248   :  { %10838 = vmatpush3.bf16.msra.mxu1 %v13972_v57  ;;  %10817 = vmatprep.subr.bf16.mxu0 %v13977_v21  ;;  %v544_v57 = vsub.s32 4, %v13748_v42  ;;  %v4214_v21 = vmul.f32 0.95, %v13764_v16 }
 0x249   :  { %10839 = vmatprep.subr.bf16.mxu1 %v13979_v38  ;;  %v556_v38 = vsub.s32 7, %v13748_v42  ;;  %v10049_v42 = vsel %vm3627_vm1, 1.0, %v18774_v9 }
 0x24a   :  { %v4222_v45 = vadd.f32 %v13764_v16, %v4214_v21 }
 0x24b   :  { %10818 = vmatpush3.bf16.msra.mxu0 %v13981_v12  ;;  %v545_v12 = vrot.slane %v13751_v54, %v544_v57  ;;  %v557_v10 = vrot.slane %v13751_v54, %v556_v38 }
 0x24c   :  { %10840 = vmatpush3.bf16.msra.mxu1 %v13983_v39  ;;  %10847 = vmatprep.subr.bf16.mxu0 %v13762_v14  ;;  %v4220_v39 = vadd.f32 %v13760_v13, %v4212_v11  ;;  %v553_v14 = vrot.slane %v13751_v54, %v552_v53  ;;  %v14017_v5 = vsub.f32 %v4222_v45, %v10049_v42  ;;  %v10046_v45 = vsel %vm3624_vm4, 1.0, %v18774_v9 }
 0x24d   :  { %10869 = vmatprep.subr.bf16.mxu1 %v13766_v17  ;;  %v549_v17 = vrot.slane %v13751_v54, %v548_v46 }
 0x24e   :  { %v14011_v6 = vsub.f32 %v4220_v39, %v10047_v8  ;;  %vm4238_vm0 = vcmp.gt.f32.partialorder %v14017_v5, 1.0 }
 0x24f   :  { %vm10148_vm3 = vmpackc.low %vm4238_vm0, %vm4238_vm0 }
 0x250   :  { %vm4236_vm14 = vcmp.gt.f32.partialorder %v14011_v6, 1.0 }
 0x251   :  { %vm10144_vm2 = vmpackc.low %vm4236_vm14, %vm4236_vm14 }
 0x2e1   :  { %v3316_v7 = vpop.f32.mrb[4].mxu0  ;;  %v3480_v11 = vpop.f32.mrb[4].mxu1 }
 0x2e2   :  { %v14009_v57 = vadd.f32 %v3316_v7, %v545_v12  ;;  %v3318_v53 = vpop.f32.mrb[5].mxu0  ;;  %v14013_v46 = vadd.f32 %v3480_v11, %v553_v14  ;;  %v3482_v54 = vpop.f32.mrb[5].mxu1  ;;  %v19212_v14 = vmov 1.0|1.0   ;;  %v10048_v11 = vsel %vm3626_vm5, 1.0, %v18774_v9 }
 0x2e3   :  { %v14015_v21 = vadd.f32 %v3318_v53, %v549_v17  ;;  %v3320_v38 = vpop.f32.mrb[6].mxu0  ;;  %v14019_v13 = vadd.f32 %v3482_v54, %v557_v10  ;;  %v3484_v4 = vpop.f32.mrb[6].mxu1  ;;  %v4211_v17 = vmul.f32 0.95, %v13868_v50 }
 0x2e4   :  { %v3321_v3 = vpop.f32.mrb[7].mxu0  ;;  %vm3628_vm8 = vcmp.gt.f32.partialorder %v14009_v57, 1.0  ;;  %v3485_v7 = vpop.f32.mrb[7].mxu1  ;;  %vm3630_vm11 = vcmp.gt.f32.partialorder %v14013_v46, 1.0 }
 0x2e5   :  { %19210 = vst [vmem:[#allocation55_spill] sm:$0xff] %v14015_v21  ;;  %19211 = vst [vmem:[#allocation56_spill] sm:$0xff] %v14019_v13  ;;  %vm3629_vm9 = vcmp.gt.f32.partialorder %v14015_v21, 1.0  ;;  %vm3631_vm13 = vcmp.gt.f32.partialorder %v14019_v13, 1.0  ;;  %v4213_v3 = vmul.f32 0.95, %v13871_v51  ;;  %v4219_v10 = vadd.f32 %v13868_v50, %v4211_v17 }
 0x2e6   :  { %vm10129_vm10 = vmpackc.low %vm3628_vm8, %vm3628_vm8  ;;  %v4216_v4 = vmul.f32 0.95, %v14015_v21  ;;  %v4218_v8 = vmul.f32 0.95, %v14019_v13  ;;  %v10051_v54 = vsel %vm3629_vm9, 1.0, %v18774_v9  ;;  %v10053_v17 = vsel %vm3631_vm13, 1.0, %v18774_v9 }
 0x2e7   :  { %vm10127_vm12 = vmpackc.low %vm3629_vm9, %vm3629_vm9  ;;  %v4221_v12 = vadd.f32 %v13871_v51, %v4213_v3  ;;  %v14089_v53 = vsub.f32 %v4219_v10, %v10046_v45 }
 0x2e8   :  { %10128 = vmatprep.mubr.msk.bf16.mxu0 %vm10127_vm12, %v19212_v14  ;;  %vm10131_vm15 = vmpackc.low %vm3631_vm13, %vm3631_vm13  ;;  %v4224_v39 = vadd.f32 %v14015_v21, %v4216_v4  ;;  %v4226_v42 = vadd.f32 %v14019_v13, %v4218_v8  ;;  %v14101_v4 = vld [vmem:[#allocation7] ss:$0 sm:$0xff] }
 0x2e9   :  { %10132 = vmatprep.mubr.msk.bf16.mxu1 %vm10131_vm15, %v19212_v14  ;;  %10130 = vmatmul.mubr.msk.bf16.vlgmr.msra.gmra.mrb[12].mxu0 %vm10129_vm10, %v19212_v14  ;;  %vm10133_vm1 = vmpackc.low %vm3630_vm11, %vm3630_vm11  ;;  %v14095_v7 = vsub.f32 %v4221_v12, %v10048_v11  ;;  %19213 = vst [vmem:[#allocation57_spill] sm:$0xff] %v14101_v4  ;;  %vm4235_vm4 = vcmp.gt.f32.partialorder %v14089_v53, 1.0 }
 0x2ea   :  { %10134 = vmatmul.mubr.msk.bf16.vlgmr.msra.gmra.mrb[12].mxu1 %vm10133_vm1, %v19212_v14  ;;  %10848 = vmatpush3.bf16.msra.mxu0 %v13768_v18  ;;  %v14104_v10 = vsub.f32 %v4224_v39, %v10051_v54  ;;  %v14107_v12 = vsub.f32 %v4226_v42, %v10053_v17  ;;  %vm10146_vm7 = vmpackc.low %vm4235_vm4, %vm4235_vm4  ;;  %v19220_v39 = vld [vmem:[#allocation37_spill] sm:$0xff]  ;;  %v19221_v42 = vld [vmem:[#allocation38_spill] sm:$0xff]  ;;  %v4215_v17 = vmul.f32 0.95, %v14009_v57 }
 0x2eb   :  { %10870 = vmatpush3.bf16.msra.mxu1 %v13772_v19  ;;  %10145 = vmatprep.mubr.msk.bf16.mxu0 %vm10144_vm2, %v19212_v14  ;;  %vm4237_vm5 = vcmp.gt.f32.partialorder %v14095_v7, 1.0  ;;  %v19222_v54 = vld [vmem:[#allocation39_spill] sm:$0xff] }
 0x2ec   :  { %10149 = vmatprep.mubr.msk.bf16.mxu1 %vm10148_vm3, %v19212_v14  ;;  %10849 = vmatprep.subr.bf16.mxu0 %v13776_v20  ;;  %vm4240_vm6 = vcmp.gt.f32.partialorder %v14104_v10, 1.0  ;;  %vm4242_vm9 = vcmp.gt.f32.partialorder %v14107_v12, 1.0  ;;  %vm10150_vm10 = vmpackc.low %vm4237_vm5, %vm4237_vm5 }
 0x2ed   :  { %10871 = vmatprep.subr.bf16.mxu1 %v13781_v25  ;;  %vm10152_vm12 = vmpackc.low %vm4240_vm6, %vm4240_vm6 }
 0x2ee   :  { %10850 = vmatpush3.bf16.msra.mxu0 %v13787_v22  ;;  %vm10156_vm13 = vmpackc.low %vm4242_vm9, %vm4242_vm9 }
 0x2ef   :  { %10872 = vmatpush3.bf16.msra.mxu1 %v13794_v23  ;;  %10851 = vmatprep.subr.bf16.mxu0 %v13796_v36 }
 0x2f0   :  { %10873 = vmatprep.subr.bf16.mxu1 %v13800_v26 }
 0x2f2   :  { %10852 = vmatpush3.bf16.msra.mxu0 %v13804_v27 }
 0x2f3   :  { %10874 = vmatpush3.bf16.msra.mxu1 %v13808_v28  ;;  %10853 = vmatprep.subr.bf16.mxu0 %v13810_v29 }
 0x2f4   :  { %10875 = vmatprep.subr.bf16.mxu1 %v13813_v30 }
 0x2f6   :  { %10854 = vmatpush3.bf16.msra.mxu0 %v13816_v31 }
 0x2f7   :  { %10876 = vmatpush3.bf16.msra.mxu1 %v13820_v32  ;;  %10855 = vmatprep.subr.bf16.mxu0 %v13822_v33 }
 0x2f8   :  { %10877 = vmatprep.subr.bf16.mxu1 %v13825_v34 }
 0x2fa   :  { %10856 = vmatpush3.bf16.msra.mxu0 %v13828_v15 }
 0x2fb   :  { %10878 = vmatpush3.bf16.msra.mxu1 %v13832_v52  ;;  %10857 = vmatprep.subr.bf16.mxu0 %v13834_v35 }
 0x2fc   :  { %10879 = vmatprep.subr.bf16.mxu1 %v13837_v37 }
 0x2fe   :  { %10858 = vmatpush3.bf16.msra.mxu0 %v13842_v40 }
 0x2ff   :  { %10880 = vmatpush3.bf16.msra.mxu1 %v13846_v41  ;;  %10859 = vmatprep.subr.bf16.mxu0 %v13848_v43 }
 0x300   :  { %10881 = vmatprep.subr.bf16.mxu1 %v13851_v44 }
 0x301   :  { %v10775_v38 = vpop.f32.mrb[8].mxu0 }
 0x302   :  { %10860 = vmatpush3.bf16.msra.mxu0 %v13856_v24  ;;  %v10797_v3 = vpop.f32.mrb[8].mxu1  ;;  %v10776_v8 = vpop.f32.mrb[9].mxu0 }
 0x303   :  { %10882 = vmatpush3.bf16.msra.mxu1 %v13860_v47  ;;  %10861 = vmatprep.subr.bf16.mxu0 %v13862_v48  ;;  %v10777_v45 = vadd.f32 %v10776_v8, %v10775_v38  ;;  %v10798_v44 = vpop.f32.mrb[9].mxu1  ;;  %v10778_v24 = vpop.f32.mrb[10].mxu0  ;;  %v19223_v38 = vld [vmem:[#allocation40_spill] sm:$0xff]  ;;  %v4217_v8 = vmul.f32 0.95, %v14013_v46 }
 0x304   :  { %10883 = vmatprep.subr.bf16.mxu1 %v13865_v49  ;;  %v10799_v11 = vadd.f32 %v10798_v44, %v10797_v3  ;;  %v10800_v13 = vpop.f32.mrb[10].mxu1  ;;  %v10779_v9 = vpop.f32.mrb[11].mxu0  ;;  %v19216_v44 = vld [vmem:[#allocation33_spill] sm:$0xff] }
 0x305   :  { %v4081_v47 = vadd.f32 %v10777_v45, %v14101_v4  ;;  %v10801_v21 = vpop.f32.mrb[11].mxu1  ;;  %v19215_v13 = vld [vmem:[#allocation32_spill] sm:$0xff]  ;;  %v19218_v9 = vld [vmem:[#allocation35_spill] sm:$0xff]  ;;  %v19224_v3 = vld [vmem:[#allocation41_spill] sm:$0xff]  ;;  %v4436_v45 = vmul.f32 0.95, %v14011_v6 }
 0x306   :  { %10862 = vmatpush3.bf16.msra.mxu0 %v13874_v56  ;;  %v19219_v21 = vld [vmem:[#allocation36_spill] sm:$0xff]  ;;  %v19226_v4 = vld [vmem:[#allocation43_spill] sm:$0xff]  ;;  %v19238_v6 = vld [vmem:[#allocation53_spill] sm:$0xff] }
 0x307   :  { %10884 = vmatpush3.bf16.msra.mxu1 %v13878_v58  ;;  %10891 = vmatprep.subr.bf16.mxu0 %v13880_v59  ;;  %v14116_v24 = vadd.f32 %v10799_v11, %v4081_v47  ;;  %v19217_v47 = vld [vmem:[#allocation34_spill] sm:$0xff] }
 0x308   :  { %10913 = vmatprep.subr.bf16.mxu1 %v13883_v60  ;;  %v19225_v11 = vld [vmem:[#allocation42_spill] sm:$0xff] }
 0x309   :  { %19214 = vst [vmem:[#allocation58_spill] sm:$0xff] %v14116_v24  ;;  %10147 = vmatmul.mubr.msk.bf16.vlgmr.msra.gmra.mrb[16].mxu0 %vm10146_vm7, %v19212_v14  ;;  %v4438_v24 = vmul.f32 0.95, %v14017_v5  ;;  %v19240_v5 = vld [vmem:[#allocation13_spill] sm:$0xff] }
 0x30a   :  { %10151 = vmatmul.mubr.msk.bf16.vlgmr.msra.gmra.mrb[16].mxu1 %vm10150_vm10, %v19212_v14  ;;  %10892 = vmatpush3.bf16.msra.mxu0 %v13888_v55 }
 0x30b   :  { %10153 = vmatprep.mubr.msk.bf16.mxu0 %vm10152_vm12, %v19212_v14  ;;  %10914 = vmatpush3.bf16.msra.mxu1 %v13892_v61 }
 0x30c   :  { %10157 = vmatprep.mubr.msk.bf16.mxu1 %vm10156_vm13, %v19212_v14  ;;  %10893 = vmatprep.subr.bf16.mxu0 %v13894_v62 }
 0x30d   :  { %10915 = vmatprep.subr.bf16.mxu1 %v13900_v63 }
 0x30e   :  { %10894 = vmatpush3.bf16.msra.mxu0 %v13908_v0 }
 0x30f   :  { %10916 = vmatpush3.bf16.msra.mxu1 %v13912_v1  ;;  %10895 = vmatprep.subr.bf16.mxu0 %v13914_v2 }
 0x310   :  { %10917 = vmatprep.subr.bf16.mxu1 %v19215_v13 }
 0x312   :  { %10896 = vmatpush3.bf16.msra.mxu0 %v19216_v44  ;;  %v19232_v44 = vmov 0.0  }
 0x313   :  { %10918 = vmatpush3.bf16.msra.mxu1 %v19217_v47  ;;  %10897 = vmatprep.subr.bf16.mxu0 %v19218_v9  ;;  %v19231_v9 = vld [vmem:[#allocation12_spill] sm:$0xff] }
 0x314   :  { %10919 = vmatprep.subr.bf16.mxu1 %v19219_v21  ;;  %v19229_v21 = vld [vmem:[#allocation46_spill] sm:$0xff]  ;;  %v4444_v47 = vadd.f32 %v19231_v9, %v4436_v45 }
 0x315   :  { %v19235_v9 = vld [vmem:[#allocation50_spill] sm:$0xff] }
 0x316   :  { %10898 = vmatpush3.bf16.msra.mxu0 %v19220_v39  ;;  %v19227_v39 = vld [vmem:[#allocation44_spill] sm:$0xff] }
 0x317   :  { %10920 = vmatpush3.bf16.msra.mxu1 %v19221_v42  ;;  %10899 = vmatprep.subr.bf16.mxu0 %v19222_v54  ;;  %v4223_v54 = vadd.f32 %v14009_v57, %v4215_v17  ;;  %v19228_v42 = vld [vmem:[#allocation45_spill] sm:$0xff]  ;;  %v10052_v17 = vsel %vm3630_vm11, 1.0, %v19232_v44 }
 0x318   :  { %10921 = vmatprep.subr.bf16.mxu1 %v19223_v38  ;;  %v4225_v38 = vadd.f32 %v14013_v46, %v4217_v8  ;;  %v10137_v8 = vsel %vm4236_vm14, 1.0, %v19232_v44 }
 0x31a   :  { %10900 = vmatpush3.bf16.msra.mxu0 %v19224_v3  ;;  %v19230_v3 = vld [vmem:[#allocation47_spill] sm:$0xff]  ;;  %v14180_v45 = vsub.f32 %v4225_v38, %v10052_v17  ;;  %v19239_v38 = vld [vmem:[#allocation54_spill] sm:$0xff]  ;;  %v4440_v17 = vmul.f32 0.95, %v14104_v10  ;;  %v19251_v10 = vld [vmem:[#allocation37_spill] sm:$0xff] }
 0x31b   :  { %10922 = vmatpush3.bf16.msra.mxu1 %v19225_v11  ;;  %10901 = vmatprep.subr.bf16.mxu0 %v19226_v4  ;;  %v10050_v4 = vsel %vm3628_vm8, 1.0, %v19232_v44  ;;  %v19233_v11 = vld [vmem:[#allocation48_spill] sm:$0xff] }
 0x31c   :  { %10923 = vmatprep.subr.bf16.mxu1 %v19227_v39  ;;  %v4446_v39 = vadd.f32 %v13764_v16, %v4438_v24  ;;  %v19236_v24 = vld [vmem:[#allocation51_spill] sm:$0xff]  ;;  %v14187_v16 = vsub.f32 %v4444_v47, %v10137_v8  ;;  %vm4241_vm11 = vcmp.gt.f32.partialorder %v14180_v45, 1.0  ;;  %v4442_v8 = vmul.f32 0.95, %v14107_v12  ;;  %v19252_v12 = vld [vmem:[#allocation38_spill] sm:$0xff] }
 0x31d   :  { %v19241_v47 = vld [vmem:[#allocation15_spill] sm:$0xff]  ;;  %vm10158_vm1 = vmpackc.low %vm4241_vm11, %vm4241_vm11 }
 0x31e   :  { %10902 = vmatpush3.bf16.msra.mxu0 %v19228_v42  ;;  %v14174_v42 = vsub.f32 %v4223_v54, %v10050_v4  ;;  %v19237_v4 = vld [vmem:[#allocation52_spill] sm:$0xff]  ;;  %vm4460_vm14 = vcmp.gt.f32.partialorder %v14187_v16, 1.0 }
 0x31f   :  { %10924 = vmatpush3.bf16.msra.mxu1 %v19229_v21  ;;  %10903 = vmatprep.subr.bf16.mxu0 %v19230_v3  ;;  %v19234_v3 = vld [vmem:[#allocation49_spill] sm:$0xff]  ;;  %vm10170_vm2 = vmpackc.low %vm4460_vm14, %vm4460_vm14 }
 0x320   :  { %10925 = vmatprep.subr.bf16.mxu1 %v19233_v11  ;;  %v10139_v11 = vsel %vm4238_vm0, 1.0, %v19232_v44  ;;  %vm4239_vm8 = vcmp.gt.f32.partialorder %v14174_v42, 1.0 }
 0x321   :  { %v14190_v54 = vsub.f32 %v4446_v39, %v10139_v11  ;;  %vm10154_vm15 = vmpackc.low %vm4239_vm8, %vm4239_vm8  ;;  %v4435_v39 = vmul.f32 0.95, %v14089_v53  ;;  %v4437_v11 = vmul.f32 0.95, %v14095_v7  ;;  %v10143_v53 = vsel %vm4242_vm9, 1.0, %v19232_v44 }
 0x322   :  { %10904 = vmatpush3.bf16.msra.mxu0 %v19234_v3 }
 0x323   :  { %10926 = vmatpush3.bf16.msra.mxu1 %v19235_v9  ;;  %10905 = vmatprep.subr.bf16.mxu0 %v19236_v24  ;;  %vm4462_vm0 = vcmp.gt.f32.partialorder %v14190_v54, 1.0 }
 0x324   :  { %10927 = vmatprep.subr.bf16.mxu1 %v19237_v4  ;;  %vm10174_vm3 = vmpackc.low %vm4462_vm0, %vm4462_vm0 }
 0x326   :  { %10906 = vmatpush3.bf16.msra.mxu0 %v19238_v6 }
 0x327   :  { %10928 = vmatpush3.bf16.msra.mxu1 %v19239_v38  ;;  %10935 = vmatprep.subr.bf16.mxu0 %v19240_v5 }
 0x328   :  { %10957 = vmatprep.subr.bf16.mxu1 %v19241_v47 }
 0x329   :  { %10155 = vmatmul.mubr.msk.bf16.vlgmr.msra.gmra.mrb[20].mxu0 %vm10154_vm15, %v19212_v14 }
 0x32a   :  { %10159 = vmatmul.mubr.msk.bf16.vlgmr.msra.gmra.mrb[20].mxu1 %vm10158_vm1, %v19212_v14  ;;  %10936 = vmatpush3.bf16.msra.mxu0 %v13768_v18 }
 0x32b   :  { %10171 = vmatprep.mubr.msk.bf16.mxu0 %vm10170_vm2, %v19212_v14  ;;  %10958 = vmatpush3.bf16.msra.mxu1 %v13772_v19 }
 0x32c   :  { %10175 = vmatprep.mubr.msk.bf16.mxu1 %vm10174_vm3, %v19212_v14  ;;  %10937 = vmatprep.subr.bf16.mxu0 %v13776_v20 }
 0x32d   :  { %10959 = vmatprep.subr.bf16.mxu1 %v13781_v25 }
 0x32e   :  { %10938 = vmatpush3.bf16.msra.mxu0 %v13787_v22 }
 0x32f   :  { %10960 = vmatpush3.bf16.msra.mxu1 %v13794_v23  ;;  %10939 = vmatprep.subr.bf16.mxu0 %v13796_v36 }
 0x330   :  { %10961 = vmatprep.subr.bf16.mxu1 %v13800_v26 }
 0x332   :  { %10940 = vmatpush3.bf16.msra.mxu0 %v13804_v27 }
 0x333   :  { %10962 = vmatpush3.bf16.msra.mxu1 %v13808_v28  ;;  %10941 = vmatprep.subr.bf16.mxu0 %v13810_v29 }
 0x334   :  { %10963 = vmatprep.subr.bf16.mxu1 %v13813_v30 }
 0x336   :  { %10942 = vmatpush3.bf16.msra.mxu0 %v13816_v31  ;;  %v19244_v31 = vld [vmem:[#allocation56_spill] sm:$0xff] }
 0x337   :  { %10964 = vmatpush3.bf16.msra.mxu1 %v13820_v32  ;;  %10943 = vmatprep.subr.bf16.mxu0 %v13822_v33  ;;  %v4443_v33 = vadd.f32 %v13868_v50, %v4435_v39  ;;  %v10138_v39 = vsel %vm4237_vm5, 1.0, %v19232_v44 }
 0x338   :  { %10965 = vmatprep.subr.bf16.mxu1 %v13825_v34  ;;  %v4445_v34 = vadd.f32 %v13871_v51, %v4437_v11  ;;  %v10141_v11 = vsel %vm4240_vm6, 1.0, %v19232_v44 }
 0x33a   :  { %10944 = vmatpush3.bf16.msra.mxu0 %v13828_v15  ;;  %v19242_v15 = vld [vmem:[#allocation55_spill] sm:$0xff] }
 0x33b   :  { %10966 = vmatpush3.bf16.msra.mxu1 %v13832_v52  ;;  %10945 = vmatprep.subr.bf16.mxu0 %v13834_v35  ;;  %v4448_v32 = vadd.f32 %v19242_v15, %v4440_v17  ;;  %v10136_v35 = vsel %vm4235_vm4, 1.0, %v19232_v44  ;;  %v19243_v52 = vld [vmem:[#allocation26_spill] sm:$0xff]  ;;  %v14260_v17 = vsub.f32 %v4445_v34, %v10138_v39  ;;  %v19254_v39 = vld [vmem:[#allocation40_spill] sm:$0xff] }
 0x33c   :  { %10967 = vmatprep.subr.bf16.mxu1 %v13837_v37  ;;  %v4450_v37 = vadd.f32 %v19244_v31, %v4442_v8  ;;  %v19248_v34 = vld [vmem:[#allocation34_spill] sm:$0xff]  ;;  %v19253_v8 = vld [vmem:[#allocation39_spill] sm:$0xff] }
 0x33d   :  { %v14267_v7 = vsub.f32 %v4448_v32, %v10141_v11  ;;  %vm4461_vm5 = vcmp.gt.f32.partialorder %v14260_v17, 1.0  ;;  %v19247_v32 = vld [vmem:[#allocation33_spill] sm:$0xff]  ;;  %v4439_v11 = vmul.f32 0.95, %v14174_v42  ;;  %v10165_v42 = vsel %vm4462_vm0, 1.0, %v19232_v44 }
 0x33e   :  { %10946 = vmatpush3.bf16.msra.mxu0 %v13842_v40  ;;  %v14254_v40 = vsub.f32 %v4443_v33, %v10136_v35  ;;  %v14270_v33 = vsub.f32 %v4450_v37, %v10143_v53  ;;  %vm10176_vm10 = vmpackc.low %vm4461_vm5, %vm4461_vm5  ;;  %v19249_v35 = vld [vmem:[#allocation35_spill] sm:$0xff]  ;;  %v19250_v37 = vld [vmem:[#allocation36_spill] sm:$0xff]  ;;  %v4441_v53 = vmul.f32 0.95, %v14180_v45 }
 0x33f   :  { %10968 = vmatpush3.bf16.msra.mxu1 %v13846_v41  ;;  %10947 = vmatprep.subr.bf16.mxu0 %v13848_v43  ;;  %v19245_v43 = vld [vmem:[#allocation27_spill] sm:$0xff]  ;;  %vm4464_vm6 = vcmp.gt.f32.partialorder %v14267_v7, 1.0 }
 0x340   :  { %10969 = vmatprep.subr.bf16.mxu1 %v19243_v52  ;;  %v19246_v52 = vld [vmem:[#allocation28_spill] sm:$0xff]  ;;  %vm4459_vm4 = vcmp.gt.f32.partialorder %v14254_v40, 1.0  ;;  %vm4466_vm9 = vcmp.gt.f32.partialorder %v14270_v33, 1.0  ;;  %vm10178_vm12 = vmpackc.low %vm4464_vm6, %vm4464_vm6 }
 0x341   :  { %vm10172_vm7 = vmpackc.low %vm4459_vm4, %vm4459_vm4 }
 0x342   :  { %10948 = vmatpush3.bf16.msra.mxu0 %v19245_v43  ;;  %vm10182_vm13 = vmpackc.low %vm4466_vm9, %vm4466_vm9 }
 0x343   :  { %10970 = vmatpush3.bf16.msra.mxu1 %v19246_v52  ;;  %10949 = vmatprep.subr.bf16.mxu0 %v13862_v48 }
 0x344   :  { %10971 = vmatprep.subr.bf16.mxu1 %v13865_v49 }
 0x346   :  { %10950 = vmatpush3.bf16.msra.mxu0 %v13874_v56 }
 0x347   :  { %10972 = vmatpush3.bf16.msra.mxu1 %v13878_v58  ;;  %10979 = vmatprep.subr.bf16.mxu0 %v13880_v59 }
 0x348   :  { %11001 = vmatprep.subr.bf16.mxu1 %v13883_v60 }
 0x349   :  { %10173 = vmatmul.mubr.msk.bf16.vlgmr.msra.gmra.mrb[24].mxu0 %vm10172_vm7, %v19212_v14 }
 0x34a   :  { %10177 = vmatmul.mubr.msk.bf16.vlgmr.msra.gmra.mrb[24].mxu1 %vm10176_vm10, %v19212_v14  ;;  %10980 = vmatpush3.bf16.msra.mxu0 %v13888_v55 }
 0x34b   :  { %10179 = vmatprep.mubr.msk.bf16.mxu0 %vm10178_vm12, %v19212_v14  ;;  %11002 = vmatpush3.bf16.msra.mxu1 %v13892_v61 }
 0x34c   :  { %10183 = vmatprep.mubr.msk.bf16.mxu1 %vm10182_vm13, %v19212_v14  ;;  %10981 = vmatprep.subr.bf16.mxu0 %v13894_v62 }
 0x34d   :  { %11003 = vmatprep.subr.bf16.mxu1 %v13900_v63 }
 0x34e   :  { %10982 = vmatpush3.bf16.msra.mxu0 %v13908_v0  ;;  %v19263_v0 = vld [vmem:[#allocation14_spill] sm:$0xff] }
 0x34f   :  { %11004 = vmatpush3.bf16.msra.mxu1 %v13912_v1  ;;  %10983 = vmatprep.subr.bf16.mxu0 %v13914_v2  ;;  %v19260_v2 = vld [vmem:[#allocation47_spill] sm:$0xff] }
 0x350   :  { %11005 = vmatprep.subr.bf16.mxu1 %v19215_v13  ;;  %v19255_v13 = vld [vmem:[#allocation41_spill] sm:$0xff] }
 0x352   :  { %10984 = vmatpush3.bf16.msra.mxu0 %v19247_v32  ;;  %v19256_v32 = vld [vmem:[#allocation42_spill] sm:$0xff] }
 0x353   :  { %11006 = vmatpush3.bf16.msra.mxu1 %v19248_v34  ;;  %10985 = vmatprep.subr.bf16.mxu0 %v19249_v35  ;;  %v4660_v34 = vmul.f32 0.95, %v14187_v16  ;;  %v19257_v35 = vld [vmem:[#allocation43_spill] sm:$0xff]  ;;  %v19264_v16 = vld [vmem:[#allocation16_spill] sm:$0xff] }
 0x354   :  { %11007 = vmatprep.subr.bf16.mxu1 %v19250_v37  ;;  %v19258_v37 = vld [vmem:[#allocation44_spill] sm:$0xff] }
 0x356   :  { %10986 = vmatpush3.bf16.msra.mxu0 %v19251_v10  ;;  %v4662_v10 = vmul.f32 0.95, %v14190_v54 }
 0x357   :  { %11008 = vmatpush3.bf16.msra.mxu1 %v19252_v12  ;;  %10987 = vmatprep.subr.bf16.mxu0 %v19253_v8  ;;  %v4447_v8 = vadd.f32 %v14009_v57, %v4439_v11  ;;  %v19259_v12 = vld [vmem:[#allocation45_spill] sm:$0xff]  ;;  %v10142_v11 = vsel %vm4241_vm11, 1.0, %v19232_v44 }
 0x358   :  { %11009 = vmatprep.subr.bf16.mxu1 %v19254_v39  ;;  %v4449_v39 = vadd.f32 %v14013_v46, %v4441_v53  ;;  %v10163_v53 = vsel %vm4460_vm14, 1.0, %v19232_v44 }
 0x35a   :  { %10988 = vmatpush3.bf16.msra.mxu0 %v19255_v13  ;;  %v19261_v13 = vld [vmem:[#allocation12_spill] sm:$0xff] }
 0x35b   :  { %11010 = vmatpush3.bf16.msra.mxu1 %v19256_v32  ;;  %10989 = vmatprep.subr.bf16.mxu0 %v19257_v35  ;;  %v4668_v1 = vadd.f32 %v19261_v13, %v4660_v34  ;;  %v10140_v35 = vsel %vm4239_vm8, 1.0, %v19232_v44  ;;  %v19262_v32 = vld [vmem:[#allocation48_spill] sm:$0xff]  ;;  %v14340_v34 = vsub.f32 %v4449_v39, %v10142_v11  ;;  %v10164_v39 = vsel %vm4461_vm5, 1.0, %v19232_v44 }
 0x35c   :  { %11011 = vmatprep.subr.bf16.mxu1 %v19258_v37  ;;  %v4670_v37 = vadd.f32 %v19263_v0, %v4662_v10  ;;  %v19274_v10 = vld [vmem:[#allocation26_spill] sm:$0xff] }
 0x35d   :  { %v14347_v45 = vsub.f32 %v4668_v1, %v10163_v53  ;;  %vm4465_vm11 = vcmp.gt.f32.partialorder %v14340_v34, 1.0  ;;  %v19272_v1 = vld [vmem:[#allocation24_spill] sm:$0xff] }
 0x35e   :  { %10990 = vmatpush3.bf16.msra.mxu0 %v19259_v12  ;;  %v14334_v12 = vsub.f32 %v4447_v8, %v10140_v35  ;;  %v14350_v35 = vsub.f32 %v4670_v37, %v10165_v42  ;;  %vm10184_vm1 = vmpackc.low %vm4465_vm11, %vm4465_vm11  ;;  %v10162_v37 = vsel %vm4459_vm4, 1.0, %v19232_v44 }
 0x35f   :  { %11012 = vmatpush3.bf16.msra.mxu1 %v19229_v21  ;;  %10991 = vmatprep.subr.bf16.mxu0 %v19260_v2  ;;  %vm4684_vm14 = vcmp.gt.f32.partialorder %v14347_v45, 1.0 }
 0x360   :  { %11013 = vmatprep.subr.bf16.mxu1 %v19262_v32  ;;  %vm4463_vm8 = vcmp.gt.f32.partialorder %v14334_v12, 1.0  ;;  %vm4686_vm0 = vcmp.gt.f32.partialorder %v14350_v35, 1.0  ;;  %vm10196_vm2 = vmpackc.low %vm4684_vm14, %vm4684_vm14 }
 0x361   :  { %vm10180_vm15 = vmpackc.low %vm4463_vm8, %vm4463_vm8 }
 0x362   :  { %10992 = vmatpush3.bf16.msra.mxu0 %v19234_v3  ;;  %vm10200_vm3 = vmpackc.low %vm4686_vm0, %vm4686_vm0 }
 0x363   :  { %11014 = vmatpush3.bf16.msra.mxu1 %v19235_v9  ;;  %10993 = vmatprep.subr.bf16.mxu0 %v19236_v24 }
 0x364   :  { %11015 = vmatprep.subr.bf16.mxu1 %v19237_v4 }
 0x366   :  { %10994 = vmatpush3.bf16.msra.mxu0 %v19238_v6 }
 0x367   :  { %11016 = vmatpush3.bf16.msra.mxu1 %v19239_v38  ;;  %11023 = vmatprep.subr.bf16.mxu0 %v19240_v5  ;;  %v19273_v5 = vld [vmem:[#allocation25_spill] sm:$0xff] }
 0x368   :  { %11045 = vmatprep.subr.bf16.mxu1 %v19241_v47 }
 0x369   :  { %10181 = vmatmul.mubr.msk.bf16.vlgmr.msra.gmra.mrb[28].mxu0 %vm10180_vm15, %v19212_v14 }
 0x36a   :  { %10185 = vmatmul.mubr.msk.bf16.vlgmr.msra.gmra.mrb[28].mxu1 %vm10184_vm1, %v19212_v14  ;;  %11024 = vmatpush3.bf16.msra.mxu0 %v13768_v18  ;;  %v19265_v18 = vld [vmem:[#allocation17_spill] sm:$0xff] }
 0x36b   :  { %10197 = vmatprep.mubr.msk.bf16.mxu0 %vm10196_vm2, %v19212_v14  ;;  %11046 = vmatpush3.bf16.msra.mxu1 %v13772_v19  ;;  %v19266_v19 = vld [vmem:[#allocation18_spill] sm:$0xff] }
 0x36c   :  { %10201 = vmatprep.mubr.msk.bf16.mxu1 %vm10200_vm3, %v19212_v14  ;;  %11025 = vmatprep.subr.bf16.mxu0 %v13776_v20  ;;  %v19267_v20 = vld [vmem:[#allocation19_spill] sm:$0xff] }
 0x36d   :  { %11047 = vmatprep.subr.bf16.mxu1 %v13781_v25  ;;  %v4659_v25 = vmul.f32 0.95, %v14254_v40  ;;  %v10169_v40 = vsel %vm4466_vm9, 1.0, %v19232_v44 }
 0x36e   :  { %11026 = vmatpush3.bf16.msra.mxu0 %v13787_v22  ;;  %v4661_v22 = vmul.f32 0.95, %v14260_v17 }
 0x36f   :  { %11048 = vmatpush3.bf16.msra.mxu1 %v13794_v23  ;;  %11027 = vmatprep.subr.bf16.mxu0 %v13796_v36  ;;  %v19268_v23 = vld [vmem:[#allocation20_spill] sm:$0xff]  ;;  %v4664_v36 = vmul.f32 0.95, %v14267_v7  ;;  %v4663_v7 = vmul.f32 0.95, %v14334_v12 }
 0x370   :  { %11049 = vmatprep.subr.bf16.mxu1 %v13800_v26  ;;  %v19269_v26 = vld [vmem:[#allocation21_spill] sm:$0xff]  ;;  %v4669_v54 = vadd.f32 %v13871_v51, %v4661_v22  ;;  %v19290_v22 = vld [vmem:[#allocation44_spill] sm:$0xff] }
 0x371   :  { %v4672_v47 = vadd.f32 %v19242_v15, %v4664_v36  ;;  %v19291_v36 = vld [vmem:[#allocation45_spill] sm:$0xff] }
 0x372   :  { %11028 = vmatpush3.bf16.msra.mxu0 %v13804_v27  ;;  %v19270_v27 = vld [vmem:[#allocation22_spill] sm:$0xff]  ;;  %v14420_v53 = vsub.f32 %v4669_v54, %v10164_v39 }
 0x373   :  { %11050 = vmatpush3.bf16.msra.mxu1 %v13808_v28  ;;  %11029 = vmatprep.subr.bf16.mxu0 %v13810_v29  ;;  %v4666_v28 = vmul.f32 0.95, %v14270_v33  ;;  %v19271_v29 = vld [vmem:[#allocation23_spill] sm:$0xff]  ;;  %v4665_v33 = vmul.f32 0.95, %v14340_v34  ;;  %v14558_v54 = vld [vmem:[#allocation6 + $0x50] sm:$0xff]  }
 0x374   :  { %11051 = vmatprep.subr.bf16.mxu1 %v13813_v30  ;;  %v4667_v30 = vadd.f32 %v13868_v50, %v4659_v25  ;;  %vm4685_vm5 = vcmp.gt.f32.partialorder %v14420_v53, 1.0  ;;  %v4886_v25 = vmul.f32 0.95, %v14350_v35  ;;  %v14555_v35 = vld [vmem:[#allocation6 + $0x88] sm:$0xff]   ;;  %v14576_v39 = vld [vmem:[#allocation6 + $0x18] sm:$0xff]  }
 0x375   :  { %v4674_v8 = vadd.f32 %v19244_v31, %v4666_v28  ;;  %vm10202_vm10 = vmpackc.low %vm4685_vm5, %vm4685_vm5  ;;  %v10166_v28 = vsel %vm4463_vm8, 1.0, %v19232_v44  ;;  %19295 = vst [vmem:[#allocation51_spill] sm:$0xff] %v14576_v39 }
 0x376   :  { %11030 = vmatpush3.bf16.msra.mxu0 %v19264_v16  ;;  %v14414_v11 = vsub.f32 %v4667_v30, %v10162_v37  ;;  %v19287_v16 = vld [vmem:[#allocation41_spill] sm:$0xff]  ;;  %v10168_v30 = vsel %vm4465_vm11, 1.0, %v19232_v44 }
 0x377   :  { %11052 = vmatpush3.bf16.msra.mxu1 %v19265_v18  ;;  %11031 = vmatprep.subr.bf16.mxu0 %v19266_v19  ;;  %v14430_v42 = vsub.f32 %v4674_v8, %v10169_v40  ;;  %v4884_v18 = vmul.f32 0.95, %v14347_v45  ;;  %v19288_v19 = vld [vmem:[#allocation42_spill] sm:$0xff]  ;;  %v14552_v45 = vld [vmem:[#allocation6 + $0x8] sm:$0xff]   ;;  %v14582_v40 = vld [vmem:[#allocation6 + $0x60] sm:$0xff]  }
 0x378   :  { %11053 = vmatprep.subr.bf16.mxu1 %v19267_v20  ;;  %vm4683_vm4 = vcmp.gt.f32.partialorder %v14414_v11, 1.0  ;;  %v19289_v20 = vld [vmem:[#allocation43_spill] sm:$0xff]  ;;  %v14567_v37 = vld [vmem:[#allocation6 + $0x90] sm:$0xff]   ;;  %19297 = vst [vmem:[#allocation53_spill] sm:$0xff] %v14582_v40 }
 0x379   :  { %vm10198_vm7 = vmpackc.low %vm4683_vm4, %vm4683_vm4  ;;  %vm4690_vm9 = vcmp.gt.f32.partialorder %v14430_v42, 1.0  ;;  %19292 = vst [vmem:[#allocation46_spill] sm:$0xff] %v14567_v37  ;;  %v14573_v8 = vld [vmem:[#allocation6 + $0xd8] sm:$0xff]  }
 0x37a   :  { %11032 = vmatpush3.bf16.msra.mxu0 %v19268_v23  ;;  %vm10208_vm13 = vmpackc.low %vm4690_vm9, %vm4690_vm9  ;;  %v4671_v23 = vadd.f32 %v14009_v57, %v4663_v7  ;;  %19294 = vst [vmem:[#allocation50_spill] sm:$0xff] %v14573_v8 }
 0x37b   :  { %11054 = vmatpush3.bf16.msra.mxu1 %v19269_v26  ;;  %11033 = vmatprep.subr.bf16.mxu0 %v19270_v27  ;;  %v4673_v26 = vadd.f32 %v14013_v46, %v4665_v33  ;;  %v4892_v27 = vadd.f32 %v19261_v13, %v4884_v18  ;;  %v14605_v18 = vld [vmem:[#allocation6 + $0x28] sm:$0xff]  }
 0x37c   :  { %11055 = vmatprep.subr.bf16.mxu1 %v19271_v29  ;;  %v4894_v29 = vadd.f32 %v19263_v0, %v4886_v25 }
 0x37e   :  { %11034 = vmatpush3.bf16.msra.mxu0 %v19272_v1  ;;  %v14494_v1 = vsub.f32 %v4671_v23, %v10166_v28  ;;  %v10188_v28 = vsel %vm4683_vm4, 1.0, %v19232_v44 }
 0x37f   :  { %11056 = vmatpush3.bf16.msra.mxu1 %v13846_v41  ;;  %11035 = vmatprep.subr.bf16.mxu0 %v19273_v5  ;;  %v10167_v41 = vsel %vm4464_vm6, 1.0, %v19232_v44  ;;  %v14561_v5 = vld [vmem:[#allocation6 + $0xd0] sm:$0xff]  }
 0x380   :  { %11057 = vmatprep.subr.bf16.mxu1 %v19274_v10  ;;  %v14427_v17 = vsub.f32 %v4672_v47, %v10167_v41  ;;  %vm4687_vm8 = vcmp.gt.f32.partialorder %v14494_v1, 1.0  ;;  %v14564_v47 = vld [vmem:[#allocation6 + $0x10] sm:$0xff]   ;;  %v14570_v10 = vld [vmem:[#allocation6 + $0x58] sm:$0xff]  }
 0x381   :  { %vm10206_vm15 = vmpackc.low %vm4687_vm8, %vm4687_vm8  ;;  %19293 = vst [vmem:[#allocation49_spill] sm:$0xff] %v14570_v10  ;;  %v14579_v41 = vld [vmem:[#allocation6 + $0x98] sm:$0xff]  }
 0x382   :  { %11036 = vmatpush3.bf16.msra.mxu0 %v19245_v43  ;;  %vm4688_vm6 = vcmp.gt.f32.partialorder %v14427_v17, 1.0  ;;  %v19276_v43 = vld [vmem:[#allocation30_spill] sm:$0xff]  ;;  %19296 = vst [vmem:[#allocation52_spill] sm:$0xff] %v14579_v41 }
 0x383   :  { %11058 = vmatpush3.bf16.msra.mxu1 %v19246_v52  ;;  %11037 = vmatprep.subr.bf16.mxu0 %v13862_v48  ;;  %vm10204_vm12 = vmpackc.low %vm4688_vm6, %vm4688_vm6  ;;  %v19275_v52 = vld [vmem:[#allocation29_spill] sm:$0xff]  ;;  %v19277_v48 = vld [vmem:[#allocation31_spill] sm:$0xff] }
 0x384   :  { %11059 = vmatprep.subr.bf16.mxu1 %v13865_v49  ;;  %v19278_v49 = vld [vmem:[#allocation32_spill] sm:$0xff] }
 0x386   :  { %11038 = vmatpush3.bf16.msra.mxu0 %v13874_v56  ;;  %v19279_v56 = vld [vmem:[#allocation33_spill] sm:$0xff] }
 0x387   :  { %11060 = vmatpush3.bf16.msra.mxu1 %v13878_v58  ;;  %11067 = vmatprep.subr.bf16.mxu0 %v13880_v59  ;;  %v19280_v58 = vld [vmem:[#allocation34_spill] sm:$0xff]  ;;  %v19281_v59 = vld [vmem:[#allocation35_spill] sm:$0xff] }
 0x388   :  { %11089 = vmatprep.subr.bf16.mxu1 %v13883_v60  ;;  %v19282_v60 = vld [vmem:[#allocation36_spill] sm:$0xff] }
 0x389   :  { %10199 = vmatmul.mubr.msk.bf16.vlgmr.msra.gmra.mrb[32].mxu0 %vm10198_vm7, %v19212_v14 }
 0x38a   :  { %10203 = vmatmul.mubr.msk.bf16.vlgmr.msra.gmra.mrb[32].mxu1 %vm10202_vm10, %v19212_v14  ;;  %11068 = vmatpush3.bf16.msra.mxu0 %v13888_v55  ;;  %v19283_v55 = vld [vmem:[#allocation37_spill] sm:$0xff] }
 0x38b   :  { %10205 = vmatprep.mubr.msk.bf16.mxu0 %vm10204_vm12, %v19212_v14  ;;  %11090 = vmatpush3.bf16.msra.mxu1 %v13892_v61  ;;  %v19284_v61 = vld [vmem:[#allocation38_spill] sm:$0xff] }
 0x38c   :  { %10209 = vmatprep.mubr.msk.bf16.mxu1 %vm10208_vm13, %v19212_v14  ;;  %11069 = vmatprep.subr.bf16.mxu0 %v13894_v62  ;;  %v19285_v62 = vld [vmem:[#allocation39_spill] sm:$0xff] }
 0x38d   :  { %11091 = vmatprep.subr.bf16.mxu1 %v13900_v63  ;;  %v19286_v63 = vld [vmem:[#allocation40_spill] sm:$0xff] }
 0x38e   :  { %11070 = vmatpush3.bf16.msra.mxu0 %v19275_v52  ;;  %v14585_v52 = vld [vmem:[#allocation6 + $0xe0] sm:$0xff]  }
 0x38f   :  { %11092 = vmatpush3.bf16.msra.mxu1 %v19276_v43  ;;  %11071 = vmatprep.subr.bf16.mxu0 %v19277_v48  ;;  %19298 = vst [vmem:[#allocation54_spill] sm:$0xff] %v14585_v52  ;;  %v4883_v43 = vmul.f32 0.95, %v14414_v11  ;;  %v4885_v48 = vmul.f32 0.95, %v14420_v53  ;;  %v10193_v11 = vsel %vm4688_vm6, 1.0, %v19232_v44 }
 0x390   :  { %11093 = vmatprep.subr.bf16.mxu1 %v19278_v49  ;;  %v14590_v49 = vld [vmem:[#allocation6 + $0x20] sm:$0xff]   ;;  %v14642_v53 = vld [vmem:[#allocation6 + $0xb0] sm:$0xff]  }
 0x391   :  { %19299 = vst [vmem:[#allocation13_spill] sm:$0xff] %v14590_v49  ;;  %v4891_v7 = vadd.f32 %v13868_v50, %v4883_v43  ;;  %19304 = vst [vmem:[#allocation27_spill] sm:$0xff] %v14642_v53 }
 0x392   :  { %11072 = vmatpush3.bf16.msra.mxu0 %v19279_v56  ;;  %v4888_v56 = vmul.f32 0.95, %v14427_v17 }
 0x393   :  { %11094 = vmatpush3.bf16.msra.mxu1 %v19280_v58  ;;  %11073 = vmatprep.subr.bf16.mxu0 %v19281_v59  ;;  %v14594_v58 = vld [vmem:[#allocation6 + $0xa0] sm:$0xff]   ;;  %v14597_v59 = vld [vmem:[#allocation6 + $0x68] sm:$0xff]  }
 0x394   :  { %11095 = vmatprep.subr.bf16.mxu1 %v19282_v60  ;;  %19300 = vst [vmem:[#allocation15_spill] sm:$0xff] %v14594_v58  ;;  %19301 = vst [vmem:[#allocation55_spill] sm:$0xff] %v14597_v59  ;;  %v4890_v60 = vmul.f32 0.95, %v14430_v42 }
 0x396   :  { %11074 = vmatpush3.bf16.msra.mxu0 %v19283_v55  ;;  %v4898_v43 = vadd.f32 %v19244_v31, %v4890_v60  ;;  %v10195_v60 = vsel %vm4690_vm9, 1.0, %v19232_v44 }
 0x397   :  { %11096 = vmatpush3.bf16.msra.mxu1 %v19284_v61  ;;  %11075 = vmatprep.subr.bf16.mxu0 %v19285_v62  ;;  %v14601_v61 = vld [vmem:[#allocation6 + $0xe8] sm:$0xff]  }
 0x398   :  { %11097 = vmatprep.subr.bf16.mxu1 %v19286_v63  ;;  %19302 = vst [vmem:[#allocation56_spill] sm:$0xff] %v14601_v61  ;;  %v14657_v42 = vsub.f32 %v4898_v43, %v10195_v60  ;;  %v14712_v43 = vld [vmem:[#allocation6 + $0x1d0] sm:$0xff]   ;;  %v14721_v60 = vld [vmem:[#allocation6 + $0x158] sm:$0xff]  }
 0x399   :  { %19318 = vst [vmem:[#allocation24_spill] sm:$0xff] %v14712_v43  ;;  %19321 = vst [vmem:[#allocation29_spill] sm:$0xff] %v14721_v60 }
 0x39a   :  { %11076 = vmatpush3.bf16.msra.mxu0 %v19287_v16  ;;  %vm4914_vm9 = vcmp.gt.f32.partialorder %v14657_v42, 1.0 }
 0x39b   :  { %11098 = vmatpush3.bf16.msra.mxu1 %v19288_v19  ;;  %11077 = vmatprep.subr.bf16.mxu0 %v19289_v20  ;;  %v4893_v20 = vadd.f32 %v13871_v51, %v4885_v48  ;;  %v10190_v48 = vsel %vm4685_vm5, 1.0, %v19232_v44  ;;  %vm10234_vm13 = vmpackc.low %vm4914_vm9, %vm4914_vm9 }
 0x39c   :  { %11099 = vmatprep.subr.bf16.mxu1 %v19290_v22  ;;  %v14609_v22 = vld [vmem:[#allocation6 + $0xa8] sm:$0xff]  }
 0x39e   :  { %11078 = vmatpush3.bf16.msra.mxu0 %v19291_v36 }
 0x39f   :  { %11100 = vmatpush3.bf16.msra.mxu1 %v19229_v21  ;;  %11079 = vmatprep.subr.bf16.mxu0 %v19260_v2  ;;  %v10189_v2 = vsel %vm4684_vm14, 1.0, %v19232_v44  ;;  %v14500_v21 = vsub.f32 %v4673_v26, %v10168_v30  ;;  %v14612_v26 = vld [vmem:[#allocation6 + $0x70] sm:$0xff]  }
 0x3a0   :  { %11101 = vmatprep.subr.bf16.mxu1 %v19262_v32  ;;  %v10191_v32 = vsel %vm4686_vm0, 1.0, %v19232_v44  ;;  %v14507_v12 = vsub.f32 %v4892_v27, %v10189_v2  ;;  %v4896_v27 = vadd.f32 %v19242_v15, %v4888_v56 }
 0x3a1   :  { %v14510_v34 = vsub.f32 %v4894_v29, %v10191_v32  ;;  %vm4689_vm11 = vcmp.gt.f32.partialorder %v14500_v21, 1.0  ;;  %v19303_v29 = vld [vmem:[#allocation58_spill] sm:$0xff] }
 0x3a2   :  { %11080 = vmatpush3.bf16.msra.mxu0 %v19234_v3  ;;  %v14516_v3 = vld [vmem:[#allocation6 + $0x40] sm:$0xff]   ;;  %vm4908_vm14 = vcmp.gt.f32.partialorder %v14507_v12, 1.0  ;;  %vm10210_vm1 = vmpackc.low %vm4689_vm11, %vm4689_vm11  ;;  %v14620_v32 = vld [vmem:[#allocation6 + $0xf0] sm:$0xff]   ;;  %v14648_v17 = vsub.f32 %v4896_v27, %v10193_v11 }
 0x3a3   :  { %11102 = vmatpush3.bf16.msra.mxu1 %v19235_v9  ;;  %11081 = vmatprep.subr.bf16.mxu0 %v19236_v24  ;;  %v14523_v9 = vld [vmem:[#allocation6 + $0xc0] sm:$0xff]   ;;  %vm4910_vm0 = vcmp.gt.f32.partialorder %v14510_v34, 1.0  ;;  %vm10222_vm2 = vmpackc.low %vm4908_vm14, %vm4908_vm14  ;;  %v14697_v27 = vld [vmem:[#allocation6 + $0x148] sm:$0xff]  }
 0x3a4   :  { %11103 = vmatprep.subr.bf16.mxu1 %v19237_v4  ;;  %v14532_v24 = vld [vmem:[#allocation6] sm:$0xff]   ;;  %vm10226_vm3 = vmpackc.low %vm4910_vm0, %vm4910_vm0  ;;  %vm4912_vm6 = vcmp.gt.f32.partialorder %v14648_v17, 1.0  ;;  %19313 = vst [vmem:[#allocation19_spill] sm:$0xff] %v14697_v27  ;;  %v14718_v11 = vld [vmem:[#allocation6 + $0x190] sm:$0xff]  }
 0x3a5   :  { %v14539_v4 = vld [vmem:[#allocation6 + $0x80] sm:$0xff]   ;;  %vm10230_vm12 = vmpackc.low %vm4912_vm6, %vm4912_vm6  ;;  %19320 = vst [vmem:[#allocation26_spill] sm:$0xff] %v14718_v11 }
 0x3a6   :  { %11082 = vmatpush3.bf16.msra.mxu0 %v19238_v6  ;;  %v14546_v6 = vld [vmem:[#allocation6 + $0x48] sm:$0xff]  }
 0x3a7   :  { %11104 = vmatpush3.bf16.msra.mxu1 %v19239_v38  ;;  %11111 = vmatprep.subr.bf16.mxu0 %v14516_v3  ;;  %v14549_v38 = vld [vmem:[#allocation6 + $0xc8] sm:$0xff]  }
 0x3a8   :  { %11133 = vmatprep.subr.bf16.mxu1 %v14523_v9 }
 0x3a9   :  { %10207 = vmatmul.mubr.msk.bf16.vlgmr.msra.gmra.mrb[36].mxu0 %vm10206_vm15, %v19212_v14 }
 0x3aa   :  { %10211 = vmatmul.mubr.msk.bf16.vlgmr.msra.gmra.mrb[36].mxu1 %vm10210_vm1, %v19212_v14  ;;  %11112 = vmatpush3.bf16.msra.mxu0 %v14532_v24 }
 0x3ab   :  { %10223 = vmatprep.mubr.msk.bf16.mxu0 %vm10222_vm2, %v19212_v14  ;;  %11134 = vmatpush3.bf16.msra.mxu1 %v14539_v4 }
 0x3ac   :  { %10227 = vmatprep.mubr.msk.bf16.mxu1 %vm10226_vm3, %v19212_v14  ;;  %11113 = vmatprep.subr.bf16.mxu0 %v14546_v6 }
 0x3ad   :  { %11135 = vmatprep.subr.bf16.mxu1 %v14549_v38 }
 0x3ae   :  { %11114 = vmatpush3.bf16.msra.mxu0 %v14552_v45 }
 0x3af   :  { %11136 = vmatpush3.bf16.msra.mxu1 %v14555_v35  ;;  %11115 = vmatprep.subr.bf16.mxu0 %v14558_v54 }
 0x3b0   :  { %11137 = vmatprep.subr.bf16.mxu1 %v14561_v5 }
 0x3b2   :  { %11116 = vmatpush3.bf16.msra.mxu0 %v14564_v47 }
 0x3b3   :  { %11138 = vmatpush3.bf16.msra.mxu1 %v14567_v37  ;;  %11117 = vmatprep.subr.bf16.mxu0 %v14570_v10 }
 0x3b4   :  { %11139 = vmatprep.subr.bf16.mxu1 %v14573_v8 }
 0x3b6   :  { %11118 = vmatpush3.bf16.msra.mxu0 %v14576_v39 }
 0x3b7   :  { %11140 = vmatpush3.bf16.msra.mxu1 %v14579_v41  ;;  %11119 = vmatprep.subr.bf16.mxu0 %v14582_v40 }
 0x3b8   :  { %11141 = vmatprep.subr.bf16.mxu1 %v14585_v52 }
 0x3ba   :  { %11120 = vmatpush3.bf16.msra.mxu0 %v14590_v49 }
 0x3bb   :  { %11142 = vmatpush3.bf16.msra.mxu1 %v14594_v58  ;;  %11121 = vmatprep.subr.bf16.mxu0 %v14597_v59 }
 0x3bc   :  { %v10819_v55 = vpop.f32.mrb[12].mxu0  ;;  %11143 = vmatprep.subr.bf16.mxu1 %v14601_v61 }
 0x3bd   :  { %v10841_v62 = vpop.f32.mrb[12].mxu1  ;;  %v10820_v63 = vpop.f32.mrb[13].mxu0 }
 0x3be   :  { %v10821_v33 = vadd.f32 %v10820_v63, %v10819_v55  ;;  %v10842_v16 = vpop.f32.mrb[13].mxu1  ;;  %11122 = vmatpush3.bf16.msra.mxu0 %v14605_v18  ;;  %v10822_v19 = vpop.f32.mrb[14].mxu0  ;;  %v14627_v55 = vsub.f32 %v4891_v7, %v10188_v28  ;;  %v14637_v63 = vsub.f32 %v4893_v20, %v10190_v48  ;;  %v14645_v7 = vld [vmem:[#allocation6 + $0x78] sm:$0xff]   ;;  %v14667_v20 = vld [vmem:[#allocation6 + $0x140] sm:$0xff]   ;;  %v14700_v28 = vld [vmem:[#allocation6 + $0x1c8] sm:$0xff]  }
 0x3bf   :  { %v10843_v25 = vadd.f32 %v10842_v16, %v10841_v62  ;;  %11144 = vmatpush3.bf16.msra.mxu1 %v14609_v22  ;;  %v10844_v23 = vpop.f32.mrb[14].mxu1  ;;  %v10823_v36 = vpop.f32.mrb[15].mxu0  ;;  %11123 = vmatprep.subr.bf16.mxu0 %v14612_v26  ;;  %v14634_v62 = vld [vmem:[#allocation6 + $0x30] sm:$0xff]   ;;  %19305 = vst [vmem:[#allocation28_spill] sm:$0xff] %v14645_v7  ;;  %v14660_v16 = vld [vmem:[#allocation6 + $0x38] sm:$0xff]   ;;  %19309 = vst [vmem:[#allocation14_spill] sm:$0xff] %v14667_v20 }
 0x3c0   :  { %v4161_v30 = vadd.f32 %v10821_v33, %v19303_v29  ;;  %v10845_v2 = vpop.f32.mrb[15].mxu1  ;;  %11145 = vmatprep.subr.bf16.mxu1 %v14620_v32  ;;  %v14654_v33 = vld [vmem:[#allocation6 + $0xf8] sm:$0xff]   ;;  %vm4907_vm4 = vcmp.gt.f32.partialorder %v14627_v55, 1.0  ;;  %19307 = vst [vmem:[#allocation12_spill] sm:$0xff] %v14660_v16  ;;  %vm4909_vm5 = vcmp.gt.f32.partialorder %v14637_v63, 1.0  ;;  %v14683_v23 = vld [vmem:[#allocation6 + $0x100] sm:$0xff]  }
 0x3c1   :  { %19306 = vst [vmem:[#allocation47_spill] sm:$0xff] %v14654_v33  ;;  %v14664_v19 = vld [vmem:[#allocation6 + $0xb8] sm:$0xff]   ;;  %vm10224_vm7 = vmpackc.low %vm4907_vm4, %vm4907_vm4  ;;  %v14690_v36 = vld [vmem:[#allocation6 + $0x180] sm:$0xff]  }
 0x3c2   :  { %v14632_v56 = vadd.f32 %v10843_v25, %v4161_v30  ;;  %11124 = vmatpush3.bf16.msra.mxu0 %v14634_v62  ;;  %19308 = vst [vmem:[#allocation48_spill] sm:$0xff] %v14664_v19  ;;  %v14674_v25 = vld [vmem:[#allocation6 + $0x1c0] sm:$0xff]   ;;  %vm10228_vm10 = vmpackc.low %vm4909_vm5, %vm4909_vm5  ;;  %v14703_v29 = vld [vmem:[#allocation6 + $0x108] sm:$0xff]  }
 0x3c3   :  { %11146 = vmatpush3.bf16.msra.mxu1 %v14642_v53  ;;  %11125 = vmatprep.subr.bf16.mxu0 %v14645_v7  ;;  %19310 = vst [vmem:[#allocation16_spill] sm:$0xff] %v14674_v25  ;;  %19311 = vst [vmem:[#allocation17_spill] sm:$0xff] %v14683_v23  ;;  %v14706_v30 = vld [vmem:[#allocation6 + $0x188] sm:$0xff]   ;;  %v14709_v2 = vld [vmem:[#allocation6 + $0x150] sm:$0xff]  }
 0x3c4   :  { %4210 = vst [vmem:[%s18713_s5] sm:$0xff] %v14632_v56  ;;  %11147 = vmatprep.subr.bf16.mxu1 %v14654_v33  ;;  %19312 = vst [vmem:[#allocation18_spill] sm:$0xff] %v14690_v36  ;;  %v14715_v48 = vld [vmem:[#allocation6 + $0x110] sm:$0xff]   ;;  %v14760_v7 = vld [vmem:[#allocation6 + $0x1a8] sm:$0xff]  }
 0x3c5   :  { %19314 = vst [vmem:[#allocation20_spill] sm:$0xff] %v14700_v28  ;;  %19315 = vst [vmem:[#allocation21_spill] sm:$0xff] %v14703_v29  ;;  %v14763_v53 = vld [vmem:[#allocation6 + $0x170] sm:$0xff]  }
 0x3c6   :  { %11126 = vmatpush3.bf16.msra.mxu0 %v14660_v16  ;;  %19316 = vst [vmem:[#allocation22_spill] sm:$0xff] %v14706_v30  ;;  %19317 = vst [vmem:[#allocation23_spill] sm:$0xff] %v14709_v2  ;;  %v14756_v16 = vld [vmem:[#allocation6 + $0x128] sm:$0xff]  }
 0x3c7   :  { %11148 = vmatpush3.bf16.msra.mxu1 %v14664_v19  ;;  %11155 = vmatprep.subr.bf16.mxu0 %v14667_v20  ;;  %19319 = vst [vmem:[#allocation25_spill] sm:$0xff] %v14715_v48 }
 0x3c8   :  { %11177 = vmatprep.subr.bf16.mxu1 %v14674_v25 }
 0x3c9   :  { %10225 = vmatmul.mubr.msk.bf16.vlgmr.msra.gmra.mrb[40].mxu0 %vm10224_vm7, %v19212_v14  ;;  %vm4207_vm7 = vcmp.gt.f32.partialorder %v14632_v56, 1.0 }
 0x3ca   :  { %10229 = vmatmul.mubr.msk.bf16.vlgmr.msra.gmra.mrb[40].mxu1 %vm10228_vm10, %v19212_v14  ;;  %11156 = vmatpush3.bf16.msra.mxu0 %v14683_v23 }
 0x3cb   :  { %10231 = vmatprep.mubr.msk.bf16.mxu0 %vm10230_vm12, %v19212_v14  ;;  %11178 = vmatpush3.bf16.msra.mxu1 %v14690_v36 }
 0x3cc   :  { %10235 = vmatprep.mubr.msk.bf16.mxu1 %vm10234_vm13, %v19212_v14  ;;  %11157 = vmatprep.subr.bf16.mxu0 %v14697_v27  ;;  %v14752_v27 = vld [vmem:[#allocation6 + $0x1e8] sm:$0xff]  }
 0x3cd   :  { %11179 = vmatprep.subr.bf16.mxu1 %v14700_v28  ;;  %v14745_v28 = vld [vmem:[#allocation6 + $0x1a0] sm:$0xff]   ;;  %19330 = vst [vmem:[#allocation38_spill] sm:$0xff] %v14752_v27 }
 0x3ce   :  { %11158 = vmatpush3.bf16.msra.mxu0 %v14703_v29  ;;  %v14741_v29 = vld [vmem:[#allocation6 + $0x120] sm:$0xff]   ;;  %19328 = vst [vmem:[#allocation36_spill] sm:$0xff] %v14745_v28 }
 0x3cf   :  { %11180 = vmatpush3.bf16.msra.mxu1 %v14706_v30  ;;  %11159 = vmatprep.subr.bf16.mxu0 %v14709_v2  ;;  %v14724_v30 = vld [vmem:[#allocation6 + $0x1d8] sm:$0xff]   ;;  %19327 = vst [vmem:[#allocation35_spill] sm:$0xff] %v14741_v29 }
 0x3d0   :  { %11181 = vmatprep.subr.bf16.mxu1 %v14712_v43  ;;  %19322 = vst [vmem:[#allocation30_spill] sm:$0xff] %v14724_v30  ;;  %v14727_v2 = vld [vmem:[#allocation6 + $0x118] sm:$0xff]  }
 0x3d1   :  { %19323 = vst [vmem:[#allocation31_spill] sm:$0xff] %v14727_v2  ;;  %v14730_v43 = vld [vmem:[#allocation6 + $0x198] sm:$0xff]  }
 0x3d2   :  { %11160 = vmatpush3.bf16.msra.mxu0 %v14715_v48  ;;  %19324 = vst [vmem:[#allocation32_spill] sm:$0xff] %v14730_v43  ;;  %v14733_v48 = vld [vmem:[#allocation6 + $0x160] sm:$0xff]  }
 0x3d3   :  { %11182 = vmatpush3.bf16.msra.mxu1 %v14718_v11  ;;  %11161 = vmatprep.subr.bf16.mxu0 %v14721_v60  ;;  %19325 = vst [vmem:[#allocation33_spill] sm:$0xff] %v14733_v48  ;;  %v14736_v11 = vld [vmem:[#allocation6 + $0x1e0] sm:$0xff]   ;;  %v4887_v60 = vmul.f32 0.95, %v14494_v1  ;;  %v10215_v1 = vsel %vm4908_vm14, 1.0, %v19232_v44 }
 0x3d4   :  { %11183 = vmatprep.subr.bf16.mxu1 %v14724_v30  ;;  %19326 = vst [vmem:[#allocation34_spill] sm:$0xff] %v14736_v11  ;;  %v4889_v30 = vmul.f32 0.95, %v14500_v21  ;;  %v14793_v21 = vld [vmem:[#allocation6 + $0x1b0] sm:$0xff]  }
 0x3d6   :  { %11162 = vmatpush3.bf16.msra.mxu0 %v14727_v2  ;;  %v5108_v2 = vmul.f32 0.95, %v14507_v12 }
 0x3d7   :  { %11184 = vmatpush3.bf16.msra.mxu1 %v14730_v43  ;;  %11163 = vmatprep.subr.bf16.mxu0 %v14733_v48  ;;  %v14748_v43 = vld [vmem:[#allocation6 + $0x168] sm:$0xff]  }
 0x3d8   :  { %11185 = vmatprep.subr.bf16.mxu1 %v14736_v11  ;;  %19329 = vst [vmem:[#allocation37_spill] sm:$0xff] %v14748_v43  ;;  %v5110_v11 = vmul.f32 0.95, %v14510_v34  ;;  %v14807_v34 = vld [vmem:[#allocation6 + $0x138] sm:$0xff]  }
 0x3da   :  { %11164 = vmatpush3.bf16.msra.mxu0 %v14741_v29  ;;  %v4895_v29 = vadd.f32 %v14009_v57, %v4887_v60 }
 0x3db   :  { %11186 = vmatpush3.bf16.msra.mxu1 %v14745_v28  ;;  %11165 = vmatprep.subr.bf16.mxu0 %v14748_v43  ;;  %v4897_v43 = vadd.f32 %v14013_v46, %v4889_v30 }
 0x3dc   :  { %v10863_v48 = vpop.f32.mrb[16].mxu0  ;;  %11187 = vmatprep.subr.bf16.mxu1 %v14752_v27 }
 0x3dd   :  { %v10885_v36 = vpop.f32.mrb[16].mxu1  ;;  %v10864_v23 = vpop.f32.mrb[17].mxu0 }
 0x3de   :  { %v10865_v25 = vadd.f32 %v10864_v23, %v10863_v48  ;;  %v10886_v20 = vpop.f32.mrb[17].mxu1  ;;  %v10866_v19 = vpop.f32.mrb[18].mxu0  ;;  %11166 = vmatpush3.bf16.msra.mxu0 %v14756_v16  ;;  %v5116_v23 = vadd.f32 %v19261_v13, %v5108_v2  ;;  %v19331_v48 = vld [vmem:[#allocation57_spill] sm:$0xff] }
 0x3df   :  { %v10887_v28 = vadd.f32 %v10886_v20, %v10885_v36  ;;  %v10888_v33 = vpop.f32.mrb[18].mxu1  ;;  %11188 = vmatpush3.bf16.msra.mxu1 %v14760_v7  ;;  %v10867_v27 = vpop.f32.mrb[19].mxu0  ;;  %11167 = vmatprep.subr.bf16.mxu0 %v14763_v53  ;;  %v10192_v19 = vsel %vm4687_vm8, 1.0, %v19232_v44  ;;  %v14771_v20 = vld [vmem:[#allocation6 + $0x1f0] sm:$0xff]   ;;  %v10194_v36 = vsel %vm4689_vm11, 1.0, %v19232_v44 }
 0x3e0   :  { %v4302_v60 = vadd.f32 %v10865_v25, %v19331_v48  ;;  %v10889_v30 = vpop.f32.mrb[19].mxu1  ;;  %11189 = vmatprep.subr.bf16.mxu1 %v14771_v20  ;;  %v5118_v33 = vadd.f32 %v19263_v0, %v5110_v11  ;;  %v14778_v27 = vsub.f32 %v4895_v29, %v10192_v19  ;;  %v14785_v25 = vld [vmem:[#allocation6 + $0x130] sm:$0xff]   ;;  %v14788_v48 = vsub.f32 %v4897_v43, %v10194_v36  ;;  %v14796_v29 = vld [vmem:[#allocation6 + $0x178] sm:$0xff]  }
 0x3e1   :  { %v10217_v11 = vsel %vm4910_vm0, 1.0, %v19232_v44  ;;  %v14799_v12 = vsub.f32 %v5116_v23, %v10215_v1  ;;  %v14811_v19 = vld [vmem:[#allocation6 + $0x1b8] sm:$0xff]   ;;  %v5107_v23 = vmul.f32 0.95, %v14627_v55  ;;  %v5112_v30 = vmul.f32 0.95, %v14648_v17 }
 0x3e2   :  { %v14783_v2 = vadd.f32 %v10887_v28, %v4302_v60  ;;  %11168 = vmatpush3.bf16.msra.mxu0 %v14785_v25  ;;  %v14801_v28 = vld [vmem:[#allocation6 + $0x1f8] sm:$0xff]   ;;  %v14804_v43 = vsub.f32 %v5118_v33, %v10217_v11  ;;  %vm4911_vm8 = vcmp.gt.f32.partialorder %v14778_v27, 1.0  ;;  %vm4913_vm11 = vcmp.gt.f32.partialorder %v14788_v48, 1.0 }
 0x3e3   :  { %11190 = vmatpush3.bf16.msra.mxu1 %v14793_v21  ;;  %11169 = vmatprep.subr.bf16.mxu0 %v14796_v29  ;;  %vm5132_vm14 = vcmp.gt.f32.partialorder %v14799_v12, 1.0  ;;  %vm10232_vm15 = vmpackc.low %vm4911_vm8, %vm4911_vm8  ;;  %v5109_v60 = vmul.f32 0.95, %v14637_v63  ;;  %v5114_v33 = vmul.f32 0.95, %v14657_v42  ;;  %v10219_v55 = vsel %vm4912_vm6, 1.0, %v19232_v44 }
 0x3e4   :  { %11191 = vmatprep.subr.bf16.mxu1 %v14801_v28  ;;  %vm5134_vm0 = vcmp.gt.f32.partialorder %v14804_v43, 1.0  ;;  %vm10236_vm1 = vmpackc.low %vm4913_vm11, %vm4913_vm11  ;;  %v4427_v63 = vmul.f32 0.95, %v14632_v56  ;;  %v19336_v42 = vld [vmem:[#allocation48_spill] sm:$0xff] }
 0x3e5   :  { %vm10248_vm2 = vmpackc.low %vm5132_vm14, %vm5132_vm14 }
 0x3e6   :  { %11170 = vmatpush3.bf16.msra.mxu0 %v14807_v34  ;;  %vm10252_vm3 = vmpackc.low %vm5134_vm0, %vm5134_vm0 }
 0x3e7   :  { %11192 = vmatpush3.bf16.msra.mxu1 %v14811_v19  ;;  %11199 = vmatprep.subr.bf16.mxu0 %v14516_v3 }
 0x3e8   :  { %11221 = vmatprep.subr.bf16.mxu1 %v14523_v9 }
 0x3e9   :  { %10233 = vmatmul.mubr.msk.bf16.vlgmr.msra.gmra.mrb[44].mxu0 %vm10232_vm15, %v19212_v14 }
 0x3ea   :  { %10237 = vmatmul.mubr.msk.bf16.vlgmr.msra.gmra.mrb[44].mxu1 %vm10236_vm1, %v19212_v14  ;;  %11200 = vmatpush3.bf16.msra.mxu0 %v14532_v24 }
 0x3eb   :  { %10249 = vmatprep.mubr.msk.bf16.mxu0 %vm10248_vm2, %v19212_v14  ;;  %11222 = vmatpush3.bf16.msra.mxu1 %v14539_v4 }
 0x3ec   :  { %10253 = vmatprep.mubr.msk.bf16.mxu1 %vm10252_vm3, %v19212_v14  ;;  %11201 = vmatprep.subr.bf16.mxu0 %v14546_v6 }
 0x3ed   :  { %11223 = vmatprep.subr.bf16.mxu1 %v14549_v38 }
 0x3ee   :  { %11202 = vmatpush3.bf16.msra.mxu0 %v14552_v45 }
 0x3ef   :  { %11224 = vmatpush3.bf16.msra.mxu1 %v14555_v35  ;;  %11203 = vmatprep.subr.bf16.mxu0 %v14558_v54 }
 0x3f0   :  { %11225 = vmatprep.subr.bf16.mxu1 %v14561_v5 }
 0x3f2   :  { %11204 = vmatpush3.bf16.msra.mxu0 %v14564_v47 }
 0x3f3   :  { %11226 = vmatpush3.bf16.msra.mxu1 %v14567_v37  ;;  %11205 = vmatprep.subr.bf16.mxu0 %v14570_v10 }
 0x3f4   :  { %11227 = vmatprep.subr.bf16.mxu1 %v14573_v8 }
 0x3f6   :  { %11206 = vmatpush3.bf16.msra.mxu0 %v14576_v39 }
 0x3f7   :  { %11228 = vmatpush3.bf16.msra.mxu1 %v14579_v41  ;;  %11207 = vmatprep.subr.bf16.mxu0 %v14582_v40  ;;  %v5117_v40 = vadd.f32 %v13871_v51, %v5109_v60  ;;  %v10216_v60 = vsel %vm4909_vm5, 1.0, %v19232_v44 }
 0x3f8   :  { %11229 = vmatprep.subr.bf16.mxu1 %v14585_v52  ;;  %v5115_v52 = vadd.f32 %v13868_v50, %v5107_v23  ;;  %v10214_v23 = vsel %vm4907_vm4, 1.0, %v19232_v44 }
 0x3fa   :  { %11208 = vmatpush3.bf16.msra.mxu0 %v14590_v49 }
 0x3fb   :  { %11230 = vmatpush3.bf16.msra.mxu1 %v14594_v58  ;;  %11209 = vmatprep.subr.bf16.mxu0 %v14597_v59 }
 0x3fc   :  { %v10907_v36 = vpop.f32.mrb[20].mxu0  ;;  %11231 = vmatprep.subr.bf16.mxu1 %v14601_v61  ;;  %v5120_v61 = vadd.f32 %v19242_v15, %v5112_v30 }
 0x3fd   :  { %v10929_v1 = vpop.f32.mrb[20].mxu1  ;;  %v10908_v11 = vpop.f32.mrb[21].mxu0 }
 0x3fe   :  { %v10909_v41 = vadd.f32 %v10908_v11, %v10907_v36  ;;  %v10930_v39 = vpop.f32.mrb[21].mxu1  ;;  %v10910_v49 = vpop.f32.mrb[22].mxu0  ;;  %11210 = vmatpush3.bf16.msra.mxu0 %v14605_v18  ;;  %v19335_v11 = vld [vmem:[#allocation12_spill] sm:$0xff] }
 0x3ff   :  { %v10931_v8 = vadd.f32 %v10930_v39, %v10929_v1  ;;  %v10932_v58 = vpop.f32.mrb[22].mxu1  ;;  %11232 = vmatpush3.bf16.msra.mxu1 %v14609_v22  ;;  %v10911_v59 = vpop.f32.mrb[23].mxu0  ;;  %11211 = vmatprep.subr.bf16.mxu0 %v14612_v26  ;;  %v5122_v39 = vadd.f32 %v19244_v31, %v5114_v33  ;;  %v19334_v1 = vld [vmem:[#allocation47_spill] sm:$0xff] }
 0x400   :  { %v4382_v49 = vadd.f32 %v10909_v41, %v14783_v2  ;;  %v10933_v36 = vpop.f32.mrb[23].mxu1  ;;  %11233 = vmatprep.subr.bf16.mxu1 %v14620_v32  ;;  %v14873_v58 = vsub.f32 %v5115_v52, %v10214_v23  ;;  %v14875_v59 = vsub.f32 %v5117_v40, %v10216_v60  ;;  %v10221_v41 = vsel %vm4914_vm9, 1.0, %v19232_v44  ;;  %v19332_v2 = vld [vmem:[#allocation27_spill] sm:$0xff]  ;;  %v19333_v52 = vld [vmem:[#allocation28_spill] sm:$0xff]  ;;  %v19337_v23 = vld [vmem:[#allocation14_spill] sm:$0xff] }
 0x401   :  { %v14888_v40 = vsub.f32 %v5120_v61, %v10219_v55  ;;  %v14891_v17 = vsub.f32 %v5122_v39, %v10221_v41  ;;  %v19338_v61 = vld [vmem:[#allocation16_spill] sm:$0xff]  ;;  %v19339_v60 = vld [vmem:[#allocation17_spill] sm:$0xff]  ;;  %v19341_v36 = vld [vmem:[#allocation19_spill] sm:$0xff] }
 0x402   :  { %v4422_v30 = vadd.f32 %v10931_v8, %v4382_v49  ;;  %11212 = vmatpush3.bf16.msra.mxu0 %v14634_v62  ;;  %v10135_v8 = vsel %vm4207_vm7, 1.0, %v19232_v44  ;;  %vm5131_vm4 = vcmp.gt.f32.partialorder %v14873_v58, 1.0  ;;  %vm5133_vm5 = vcmp.gt.f32.partialorder %v14875_v59, 1.0  ;;  %v19340_v49 = vld [vmem:[#allocation18_spill] sm:$0xff]  ;;  %v19342_v39 = vld [vmem:[#allocation20_spill] sm:$0xff]  ;;  %v19343_v55 = vld [vmem:[#allocation21_spill] sm:$0xff] }
 0x403   :  { %11234 = vmatpush3.bf16.msra.mxu1 %v19332_v2  ;;  %11213 = vmatprep.subr.bf16.mxu0 %v19333_v52  ;;  %vm5136_vm6 = vcmp.gt.f32.partialorder %v14888_v40, 1.0  ;;  %vm10250_vm9 = vmpackc.low %vm5131_vm4, %vm5131_vm4  ;;  %vm5138_vm10 = vcmp.gt.f32.partialorder %v14891_v17, 1.0  ;;  %v19346_v41 = vld [vmem:[#allocation24_spill] sm:$0xff] }
 0x404   :  { %v4428_v33 = vadd.f32 %v4427_v63, %v4422_v30  ;;  %11235 = vmatprep.subr.bf16.mxu1 %v19334_v1  ;;  %vm10254_vm12 = vmpackc.low %vm5133_vm5, %vm5133_vm5  ;;  %v19344_v30 = vld [vmem:[#allocation22_spill] sm:$0xff]  ;;  %v19345_v63 = vld [vmem:[#allocation23_spill] sm:$0xff] }
 0x405   :  { %vm10256_vm13 = vmpackc.low %vm5136_vm6, %vm5136_vm6 }
 0x406   :  { %v14895_v56 = vsub.f32 %v4428_v33, %v10135_v8  ;;  %11214 = vmatpush3.bf16.msra.mxu0 %v19335_v11  ;;  %vm10260_vm15 = vmpackc.low %vm5138_vm10, %vm5138_vm10  ;;  %v19347_v33 = vld [vmem:[#allocation25_spill] sm:$0xff]  ;;  %v19348_v8 = vld [vmem:[#allocation26_spill] sm:$0xff] }
 0x407   :  { %11236 = vmatpush3.bf16.msra.mxu1 %v19336_v42  ;;  %11243 = vmatprep.subr.bf16.mxu0 %v19337_v23 }
 0x408   :  { %10161 = vst [vmem:[%s18713_s5 + $0x8] sm:$0xff] %v14895_v56  ;;  %11265 = vmatprep.subr.bf16.mxu1 %v19338_v61  ;;  %v19351_v61 = vld [vmem:[#allocation31_spill] sm:$0xff] }
 0x409   :  { %10251 = vmatmul.mubr.msk.bf16.vlgmr.msra.gmra.mrb[48].mxu0 %vm10250_vm9, %v19212_v14  ;;  %vm4430_vm9 = vcmp.gt.f32.partialorder %v14895_v56, 1.0 }
 0x40a   :  { %10255 = vmatmul.mubr.msk.bf16.vlgmr.msra.gmra.mrb[48].mxu1 %vm10254_vm12, %v19212_v14  ;;  %11244 = vmatpush3.bf16.msra.mxu0 %v19339_v60  ;;  %v19350_v60 = vld [vmem:[#allocation30_spill] sm:$0xff] }
 0x40b   :  { %10257 = vmatprep.mubr.msk.bf16.mxu0 %vm10256_vm13, %v19212_v14  ;;  %11266 = vmatpush3.bf16.msra.mxu1 %v19340_v49  ;;  %v19349_v49 = vld [vmem:[#allocation29_spill] sm:$0xff] }
 0x40c   :  { %10261 = vmatprep.mubr.msk.bf16.mxu1 %vm10260_vm15, %v19212_v14  ;;  %11245 = vmatprep.subr.bf16.mxu0 %v19341_v36  ;;  %v19352_v36 = vld [vmem:[#allocation32_spill] sm:$0xff] }
 0x40d   :  { %11267 = vmatprep.subr.bf16.mxu1 %v19342_v39  ;;  %v19353_v39 = vld [vmem:[#allocation33_spill] sm:$0xff] }
 0x40e   :  { %11246 = vmatpush3.bf16.msra.mxu0 %v19343_v55  ;;  %v19354_v55 = vld [vmem:[#allocation34_spill] sm:$0xff] }
 0x40f   :  { %11268 = vmatpush3.bf16.msra.mxu1 %v19344_v30  ;;  %11247 = vmatprep.subr.bf16.mxu0 %v19345_v63  ;;  %v5111_v63 = vmul.f32 0.95, %v14778_v27  ;;  %v19355_v30 = vld [vmem:[#allocation35_spill] sm:$0xff]  ;;  %v10241_v27 = vsel %vm5132_vm14, 1.0, %v19232_v44 }
 0x410   :  { %11269 = vmatprep.subr.bf16.mxu1 %v19346_v41  ;;  %v5113_v41 = vmul.f32 0.95, %v14788_v48 }
 0x412   :  { %11248 = vmatpush3.bf16.msra.mxu0 %v19347_v33  ;;  %v19356_v33 = vld [vmem:[#allocation36_spill] sm:$0xff] }
 0x413   :  { %11270 = vmatpush3.bf16.msra.mxu1 %v19348_v8  ;;  %11249 = vmatprep.subr.bf16.mxu0 %v19349_v49  ;;  %v5332_v8 = vmul.f32 0.95, %v14799_v12  ;;  %v19357_v49 = vld [vmem:[#allocation37_spill] sm:$0xff] }
 0x414   :  { %11271 = vmatprep.subr.bf16.mxu1 %v19350_v60 }
 0x416   :  { %11250 = vmatpush3.bf16.msra.mxu0 %v19351_v61  ;;  %v5334_v61 = vmul.f32 0.95, %v14804_v43  ;;  %v19359_v43 = vld [vmem:[#allocation50_spill] sm:$0xff] }
 0x417   :  { %11272 = vmatpush3.bf16.msra.mxu1 %v19352_v36  ;;  %11251 = vmatprep.subr.bf16.mxu0 %v19353_v39  ;;  %v19358_v36 = vld [vmem:[#allocation38_spill] sm:$0xff] }
 0x418   :  { %11273 = vmatprep.subr.bf16.mxu1 %v19354_v55  ;;  %v5119_v55 = vadd.f32 %v14009_v57, %v5111_v63  ;;  %v10218_v63 = vsel %vm4911_vm8, 1.0, %v19232_v44 }
 0x41a   :  { %11252 = vmatpush3.bf16.msra.mxu0 %v19355_v30  ;;  %v5121_v30 = vadd.f32 %v14013_v46, %v5113_v41 }
 0x41b   :  { %11274 = vmatpush3.bf16.msra.mxu1 %v19356_v33  ;;  %11253 = vmatprep.subr.bf16.mxu0 %v19357_v49 }
 0x41c   :  { %v10951_v60 = vpop.f32.mrb[24].mxu0  ;;  %11275 = vmatprep.subr.bf16.mxu1 %v19358_v36  ;;  %v5340_v36 = vadd.f32 %v19261_v13, %v5332_v8  ;;  %v5333_v8 = vmul.f32 0.95, %v14875_v59  ;;  %v4651_v59 = vmul.f32 0.95, %v14895_v56 }
 0x41d   :  { %v10973_v39 = vpop.f32.mrb[24].mxu1  ;;  %v10952_v23 = vpop.f32.mrb[25].mxu0 }
 0x41e   :  { %v10953_v42 = vadd.f32 %v10952_v23, %v10951_v60  ;;  %v10974_v11 = vpop.f32.mrb[25].mxu1  ;;  %v10954_v1 = vpop.f32.mrb[26].mxu0  ;;  %11254 = vmatpush3.bf16.msra.mxu0 %v14756_v16  ;;  %v14957_v23 = vld [vmem:[#allocation7] ss:$0 sm:$0xff]  ;;  %v14980_v48 = vsub.f32 %v5340_v36, %v10241_v27  ;;  %v19361_v36 = vld [vmem:[#allocation52_spill] sm:$0xff] }
 0x41f   :  { %v10975_v52 = vadd.f32 %v10974_v11, %v10973_v39  ;;  %v10976_v33 = vpop.f32.mrb[26].mxu1  ;;  %11276 = vmatpush3.bf16.msra.mxu1 %v14760_v7  ;;  %v10955_v49 = vpop.f32.mrb[27].mxu0  ;;  %11255 = vmatprep.subr.bf16.mxu0 %v14763_v53  ;;  %v5342_v11 = vadd.f32 %v19263_v0, %v5334_v61  ;;  %v14965_v39 = vsub.f32 %v5119_v55, %v10218_v63  ;;  %v10243_v61 = vsel %vm5134_vm0, 1.0, %v19232_v44  ;;  %v19362_v55 = vld [vmem:[#allocation53_spill] sm:$0xff] }
 0x420   :  { %v4526_v1 = vadd.f32 %v14957_v23, %v10953_v42  ;;  %v10977_v60 = vpop.f32.mrb[27].mxu1  ;;  %11277 = vmatprep.subr.bf16.mxu1 %v14771_v20  ;;  %v10220_v49 = vsel %vm4913_vm11, 1.0, %v19232_v44  ;;  %vm5356_vm14 = vcmp.gt.f32.partialorder %v14980_v48, 1.0  ;;  %v5331_v33 = vmul.f32 0.95, %v14873_v58  ;;  %v19364_v63 = vld [vmem:[#allocation13_spill] sm:$0xff] }
 0x421   :  { %v14973_v42 = vsub.f32 %v5121_v30, %v10220_v49  ;;  %v14983_v12 = vsub.f32 %v5342_v11, %v10243_v61  ;;  %vm5135_vm8 = vcmp.gt.f32.partialorder %v14965_v39, 1.0  ;;  %vm10274_vm3 = vmpackc.low %vm5356_vm14, %vm5356_vm14  ;;  %v19363_v30 = vld [vmem:[#allocation54_spill] sm:$0xff]  ;;  %v19365_v60 = vld [vmem:[#allocation15_spill] sm:$0xff]  ;;  %v5338_v49 = vmul.f32 0.95, %v14891_v17 }
 0x422   :  { %v14970_v41 = vadd.f32 %v10975_v52, %v4526_v1  ;;  %11256 = vmatpush3.bf16.msra.mxu0 %v14785_v25  ;;  %vm10258_vm0 = vmpackc.low %vm5135_vm8, %vm5135_vm8  ;;  %v19360_v52 = vld [vmem:[#allocation51_spill] sm:$0xff]  ;;  %v5336_v1 = vmul.f32 0.95, %v14888_v40  ;;  %v19367_v61 = vld [vmem:[#allocation56_spill] sm:$0xff]  ;;  %v10245_v58 = vsel %vm5136_vm6, 1.0, %v19232_v44 }
 0x423   :  { %11278 = vmatpush3.bf16.msra.mxu1 %v14793_v21  ;;  %11257 = vmatprep.subr.bf16.mxu0 %v14796_v29  ;;  %vm5137_vm11 = vcmp.gt.f32.partialorder %v14973_v42, 1.0  ;;  %vm5358_vm1 = vcmp.gt.f32.partialorder %v14983_v12, 1.0  ;;  %v19366_v11 = vld [vmem:[#allocation55_spill] sm:$0xff]  ;;  %v19371_v17 = vld [vmem:[#allocation48_spill] sm:$0xff] }
 0x424   :  { %11279 = vmatprep.subr.bf16.mxu1 %v14801_v28  ;;  %vm10262_vm2 = vmpackc.low %vm5137_vm11, %vm5137_vm11 }
 0x425   :  { %vm10278_vm7 = vmpackc.low %vm5358_vm1, %vm5358_vm1 }
 0x426   :  { %11258 = vmatpush3.bf16.msra.mxu0 %v14807_v34 }
 0x427   :  { %11280 = vmatpush3.bf16.msra.mxu1 %v14811_v19  ;;  %11287 = vmatprep.subr.bf16.mxu0 %v14516_v3 }
 0x428   :  { %11309 = vmatprep.subr.bf16.mxu1 %v14523_v9 }
 0x429   :  { %10259 = vmatmul.mubr.msk.bf16.vlgmr.msra.gmra.mrb[52].mxu0 %vm10258_vm0, %v19212_v14 }
 0x42a   :  { %10263 = vmatmul.mubr.msk.bf16.vlgmr.msra.gmra.mrb[52].mxu1 %vm10262_vm2, %v19212_v14  ;;  %11288 = vmatpush3.bf16.msra.mxu0 %v14532_v24 }
 0x42b   :  { %10275 = vmatprep.mubr.msk.bf16.mxu0 %vm10274_vm3, %v19212_v14  ;;  %11310 = vmatpush3.bf16.msra.mxu1 %v14539_v4 }
 0x42c   :  { %10279 = vmatprep.mubr.msk.bf16.mxu1 %vm10278_vm7, %v19212_v14  ;;  %11289 = vmatprep.subr.bf16.mxu0 %v14546_v6 }
 0x42d   :  { %11311 = vmatprep.subr.bf16.mxu1 %v14549_v38 }
 0x42e   :  { %11290 = vmatpush3.bf16.msra.mxu0 %v14552_v45 }
 0x42f   :  { %11312 = vmatpush3.bf16.msra.mxu1 %v14555_v35  ;;  %11291 = vmatprep.subr.bf16.mxu0 %v14558_v54 }
 0x430   :  { %11313 = vmatprep.subr.bf16.mxu1 %v14561_v5 }
 0x432   :  { %11292 = vmatpush3.bf16.msra.mxu0 %v14564_v47 }
 0x433   :  { %11314 = vmatpush3.bf16.msra.mxu1 %v14567_v37  ;;  %11293 = vmatprep.subr.bf16.mxu0 %v14570_v10 }
 0x434   :  { %11315 = vmatprep.subr.bf16.mxu1 %v19359_v43 }
 0x436   :  { %11294 = vmatpush3.bf16.msra.mxu0 %v19360_v52  ;;  %v5341_v52 = vadd.f32 %v13871_v51, %v5333_v8 }
 0x437   :  { %11316 = vmatpush3.bf16.msra.mxu1 %v19361_v36  ;;  %11295 = vmatprep.subr.bf16.mxu0 %v19362_v55 }
 0x438   :  { %11317 = vmatprep.subr.bf16.mxu1 %v19363_v30  ;;  %v5339_v30 = vadd.f32 %v13868_v50, %v5331_v33  ;;  %v10240_v33 = vsel %vm5131_vm4, 1.0, %v19232_v44 }
 0x43a   :  { %11296 = vmatpush3.bf16.msra.mxu0 %v19364_v63 }
 0x43b   :  { %11318 = vmatpush3.bf16.msra.mxu1 %v19365_v60  ;;  %11297 = vmatprep.subr.bf16.mxu0 %v19366_v11 }
 0x43c   :  { %v10995_v27 = vpop.f32.mrb[28].mxu0  ;;  %11319 = vmatprep.subr.bf16.mxu1 %v19367_v61  ;;  %v5344_v61 = vadd.f32 %v19242_v15, %v5336_v1 }
 0x43d   :  { %v11017_v55 = vpop.f32.mrb[28].mxu1  ;;  %v10996_v36 = vpop.f32.mrb[29].mxu0 }
 0x43e   :  { %v10997_v43 = vadd.f32 %v10996_v36, %v10995_v27  ;;  %v11018_v10 = vpop.f32.mrb[29].mxu1  ;;  %v10998_v63 = vpop.f32.mrb[30].mxu0  ;;  %11298 = vmatpush3.bf16.msra.mxu0 %v14605_v18  ;;  %v10242_v36 = vsel %vm5133_vm5, 1.0, %v19232_v44  ;;  %v19372_v27 = vld [vmem:[#allocation14_spill] sm:$0xff] }
 0x43f   :  { %v11019_v37 = vadd.f32 %v11018_v10, %v11017_v55  ;;  %v11020_v60 = vpop.f32.mrb[30].mxu1  ;;  %11320 = vmatpush3.bf16.msra.mxu1 %v14609_v22  ;;  %v10999_v11 = vpop.f32.mrb[31].mxu0  ;;  %11299 = vmatprep.subr.bf16.mxu0 %v14612_v26  ;;  %v5346_v10 = vadd.f32 %v19244_v31, %v5338_v49  ;;  %v15048_v55 = vsub.f32 %v5339_v30, %v10240_v33  ;;  %v19370_v49 = vld [vmem:[#allocation12_spill] sm:$0xff]  ;;  %v19374_v33 = vld [vmem:[#allocation17_spill] sm:$0xff] }
 0x440   :  { %v4606_v8 = vadd.f32 %v10997_v43, %v14970_v41  ;;  %v11021_v63 = vpop.f32.mrb[31].mxu1  ;;  %11321 = vmatprep.subr.bf16.mxu1 %v14620_v32  ;;  %v15050_v60 = vsub.f32 %v5341_v52, %v10242_v36  ;;  %v10247_v41 = vsel %vm5138_vm10, 1.0, %v19232_v44  ;;  %v19368_v43 = vld [vmem:[#allocation28_spill] sm:$0xff]  ;;  %v15063_v52 = vsub.f32 %v5344_v61, %v10245_v58  ;;  %v19369_v11 = vld [vmem:[#allocation47_spill] sm:$0xff]  ;;  %v19375_v36 = vld [vmem:[#allocation18_spill] sm:$0xff] }
 0x441   :  { %v15066_v40 = vsub.f32 %v5346_v10, %v10247_v41  ;;  %vm5355_vm4 = vcmp.gt.f32.partialorder %v15048_v55, 1.0  ;;  %v19373_v61 = vld [vmem:[#allocation16_spill] sm:$0xff]  ;;  %v19378_v10 = vld [vmem:[#allocation21_spill] sm:$0xff]  ;;  %v19379_v58 = vld [vmem:[#allocation22_spill] sm:$0xff] }
 0x442   :  { %v4646_v1 = vadd.f32 %v11019_v37, %v4606_v8  ;;  %11300 = vmatpush3.bf16.msra.mxu0 %v14634_v62  ;;  %v10160_v37 = vsel %vm4430_vm9, 1.0, %v19232_v44  ;;  %vm5357_vm5 = vcmp.gt.f32.partialorder %v15050_v60, 1.0  ;;  %vm5360_vm6 = vcmp.gt.f32.partialorder %v15063_v52, 1.0  ;;  %vm10276_vm10 = vmpackc.low %vm5355_vm4, %vm5355_vm4  ;;  %v19376_v8 = vld [vmem:[#allocation19_spill] sm:$0xff]  ;;  %v19377_v63 = vld [vmem:[#allocation20_spill] sm:$0xff] }
 0x443   :  { %11322 = vmatpush3.bf16.msra.mxu1 %v19332_v2  ;;  %11301 = vmatprep.subr.bf16.mxu0 %v19368_v43  ;;  %vm5362_vm12 = vcmp.gt.f32.partialorder %v15066_v40, 1.0  ;;  %vm10280_vm13 = vmpackc.low %vm5357_vm5, %vm5357_vm5  ;;  %v19382_v41 = vld [vmem:[#allocation25_spill] sm:$0xff] }
 0x444   :  { %v4652_v30 = vadd.f32 %v4651_v59, %v4646_v1  ;;  %11323 = vmatprep.subr.bf16.mxu1 %v19369_v11  ;;  %vm10282_vm15 = vmpackc.low %vm5360_vm6, %vm5360_vm6  ;;  %v19380_v1 = vld [vmem:[#allocation23_spill] sm:$0xff]  ;;  %v19381_v59 = vld [vmem:[#allocation24_spill] sm:$0xff] }
 0x445   :  { %vm10286_vm0 = vmpackc.low %vm5362_vm12, %vm5362_vm12 }
 0x446   :  { %v15070_v56 = vsub.f32 %v4652_v30, %v10160_v37  ;;  %11302 = vmatpush3.bf16.msra.mxu0 %v19370_v49  ;;  %v19383_v30 = vld [vmem:[#allocation26_spill] sm:$0xff]  ;;  %v19384_v37 = vld [vmem:[#allocation29_spill] sm:$0xff] }
 0x447   :  { %11324 = vmatpush3.bf16.msra.mxu1 %v19371_v17  ;;  %11331 = vmatprep.subr.bf16.mxu0 %v19372_v27 }
 0x448   :  { %10187 = vst [vmem:[%s18713_s5 + $0x10] sm:$0xff] %v15070_v56  ;;  %11353 = vmatprep.subr.bf16.mxu1 %v19373_v61 }
 0x449   :  { %10277 = vmatmul.mubr.msk.bf16.vlgmr.msra.gmra.mrb[56].mxu0 %vm10276_vm10, %v19212_v14  ;;  %vm4654_vm10 = vcmp.gt.f32.partialorder %v15070_v56, 1.0 }
 0x44a   :  { %10281 = vmatmul.mubr.msk.bf16.vlgmr.msra.gmra.mrb[56].mxu1 %vm10280_vm13, %v19212_v14  ;;  %11332 = vmatpush3.bf16.msra.mxu0 %v19374_v33  ;;  %v19386_v33 = vld [vmem:[#allocation31_spill] sm:$0xff] }
 0x44b   :  { %10283 = vmatprep.mubr.msk.bf16.mxu0 %vm10282_vm15, %v19212_v14  ;;  %11354 = vmatpush3.bf16.msra.mxu1 %v19375_v36  ;;  %v19385_v36 = vld [vmem:[#allocation30_spill] sm:$0xff] }
 0x44c   :  { %10287 = vmatprep.mubr.msk.bf16.mxu1 %vm10286_vm0, %v19212_v14  ;;  %11333 = vmatprep.subr.bf16.mxu0 %v19376_v8  ;;  %v19387_v8 = vld [vmem:[#allocation32_spill] sm:$0xff] }
 0x44d   :  { %11355 = vmatprep.subr.bf16.mxu1 %v19377_v63  ;;  %v19388_v63 = vld [vmem:[#allocation33_spill] sm:$0xff] }
 0x44e   :  { %11334 = vmatpush3.bf16.msra.mxu0 %v19378_v10  ;;  %v19389_v10 = vld [vmem:[#allocation34_spill] sm:$0xff] }
 0x44f   :  { %11356 = vmatpush3.bf16.msra.mxu1 %v19379_v58  ;;  %11335 = vmatprep.subr.bf16.mxu0 %v19380_v1  ;;  %v5335_v1 = vmul.f32 0.95, %v14965_v39  ;;  %v19390_v58 = vld [vmem:[#allocation35_spill] sm:$0xff] }
 0x450   :  { %11357 = vmatprep.subr.bf16.mxu1 %v19381_v59  ;;  %v5337_v59 = vmul.f32 0.95, %v14973_v42 }
 0x452   :  { %11336 = vmatpush3.bf16.msra.mxu0 %v19382_v41  ;;  %v19391_v41 = vld [vmem:[#allocation36_spill] sm:$0xff] }
 0x453   :  { %11358 = vmatpush3.bf16.msra.mxu1 %v19383_v30  ;;  %11337 = vmatprep.subr.bf16.mxu0 %v19384_v37  ;;  %v5556_v30 = vmul.f32 0.95, %v14980_v48  ;;  %v19392_v37 = vld [vmem:[#allocation37_spill] sm:$0xff] }
 0x454   :  { %11359 = vmatprep.subr.bf16.mxu1 %v19385_v36 }
 0x456   :  { %11338 = vmatpush3.bf16.msra.mxu0 %v19386_v33  ;;  %v5558_v33 = vmul.f32 0.95, %v14983_v12  ;;  %v19402_v12 = vld [vmem:[#allocation15_spill] sm:$0xff] }
 0x457   :  { %11360 = vmatpush3.bf16.msra.mxu1 %v19387_v8  ;;  %11339 = vmatprep.subr.bf16.mxu0 %v19388_v63  ;;  %v19393_v8 = vld [vmem:[#allocation38_spill] sm:$0xff] }
 0x458   :  { %11361 = vmatprep.subr.bf16.mxu1 %v19389_v10  ;;  %v5343_v10 = vadd.f32 %v14009_v57, %v5335_v1  ;;  %v10244_v1 = vsel %vm5135_vm8, 1.0, %v19232_v44 }
 0x45a   :  { %11340 = vmatpush3.bf16.msra.mxu0 %v19390_v58  ;;  %v5345_v58 = vadd.f32 %v14013_v46, %v5337_v59  ;;  %v10267_v59 = vsel %vm5356_vm14, 1.0, %v19232_v44 }
 0x45b   :  { %11362 = vmatpush3.bf16.msra.mxu1 %v19391_v41  ;;  %11341 = vmatprep.subr.bf16.mxu0 %v19392_v37 }
 0x45c   :  { %v11039_v36 = vpop.f32.mrb[32].mxu0  ;;  %11363 = vmatprep.subr.bf16.mxu1 %v19393_v8  ;;  %v5564_v8 = vadd.f32 %v19261_v13, %v5556_v30 }
 0x45d   :  { %v11061_v63 = vpop.f32.mrb[32].mxu1  ;;  %v11040_v61 = vpop.f32.mrb[33].mxu0 }
 0x45e   :  { %v11041_v27 = vadd.f32 %v11040_v61, %v11039_v36  ;;  %v11062_v17 = vpop.f32.mrb[33].mxu1  ;;  %v11042_v49 = vpop.f32.mrb[34].mxu0  ;;  %11342 = vmatpush3.bf16.msra.mxu0 %v14756_v16  ;;  %v5566_v36 = vadd.f32 %v19263_v0, %v5558_v33  ;;  %v15153_v42 = vsub.f32 %v5564_v8, %v10267_v59  ;;  %v5562_v33 = vmul.f32 0.95, %v15066_v40  ;;  %v19409_v40 = vld [vmem:[#allocation16_spill] sm:$0xff] }
 0x45f   :  { %v11063_v11 = vadd.f32 %v11062_v17, %v11061_v63  ;;  %v11064_v41 = vpop.f32.mrb[34].mxu1  ;;  %11364 = vmatpush3.bf16.msra.mxu1 %v14760_v7  ;;  %v11043_v37 = vpop.f32.mrb[35].mxu0  ;;  %11343 = vmatprep.subr.bf16.mxu0 %v14763_v53  ;;  %v10246_v17 = vsel %vm5137_vm11, 1.0, %v19232_v44  ;;  %v15138_v63 = vsub.f32 %v5343_v10, %v10244_v1  ;;  %v19404_v10 = vld [vmem:[#allocation56_spill] sm:$0xff] }
 0x460   :  { %v4750_v61 = vadd.f32 %v14957_v23, %v11041_v27  ;;  %v11065_v49 = vpop.f32.mrb[35].mxu1  ;;  %11365 = vmatprep.subr.bf16.mxu1 %v14771_v20  ;;  %v15146_v39 = vsub.f32 %v5345_v58, %v10246_v17  ;;  %v10269_v27 = vsel %vm5358_vm1, 1.0, %v19232_v44  ;;  %vm5580_vm14 = vcmp.gt.f32.partialorder %v15153_v42, 1.0 }
 0x461   :  { %v15156_v48 = vsub.f32 %v5566_v36, %v10269_v27  ;;  %vm5359_vm8 = vcmp.gt.f32.partialorder %v15138_v63, 1.0  ;;  %vm10300_vm7 = vmpackc.low %vm5580_vm14, %vm5580_vm14 }
 0x462   :  { %v15143_v41 = vadd.f32 %v11063_v11, %v4750_v61  ;;  %11344 = vmatpush3.bf16.msra.mxu0 %v14785_v25  ;;  %vm5361_vm11 = vcmp.gt.f32.partialorder %v15146_v39, 1.0  ;;  %vm10284_vm1 = vmpackc.low %vm5359_vm8, %vm5359_vm8  ;;  %v19403_v11 = vld [vmem:[#allocation55_spill] sm:$0xff] }
 0x463   :  { %11366 = vmatpush3.bf16.msra.mxu1 %v14793_v21  ;;  %11345 = vmatprep.subr.bf16.mxu0 %v14796_v29  ;;  %vm5582_vm2 = vcmp.gt.f32.partialorder %v15156_v48, 1.0  ;;  %vm10288_vm3 = vmpackc.low %vm5361_vm11, %vm5361_vm11 }
 0x464   :  { %11367 = vmatprep.subr.bf16.mxu1 %v14801_v28  ;;  %vm10304_vm9 = vmpackc.low %vm5582_vm2, %vm5582_vm2 }
 0x466   :  { %11346 = vmatpush3.bf16.msra.mxu0 %v14807_v34 }
 0x467   :  { %11368 = vmatpush3.bf16.msra.mxu1 %v14811_v19  ;;  %11375 = vmatprep.subr.bf16.mxu0 %v14516_v3  ;;  %v19394_v3 = vld [vmem:[#allocation46_spill] sm:$0xff] }
 0x468   :  { %11397 = vmatprep.subr.bf16.mxu1 %v14523_v9  ;;  %v19395_v9 = vld [vmem:[#allocation49_spill] sm:$0xff] }
 0x469   :  { %10285 = vmatmul.mubr.msk.bf16.vlgmr.msra.gmra.mrb[60].mxu0 %vm10284_vm1, %v19212_v14 }
 0x46a   :  { %10289 = vmatmul.mubr.msk.bf16.vlgmr.msra.gmra.mrb[60].mxu1 %vm10288_vm3, %v19212_v14  ;;  %11376 = vmatpush3.bf16.msra.mxu0 %v14532_v24  ;;  %v19396_v24 = vld [vmem:[#allocation50_spill] sm:$0xff] }
 0x46b   :  { %10301 = vmatprep.mubr.msk.bf16.mxu0 %vm10300_vm7, %v19212_v14  ;;  %11398 = vmatpush3.bf16.msra.mxu1 %v14539_v4  ;;  %v19397_v4 = vld [vmem:[#allocation51_spill] sm:$0xff] }
 0x46c   :  { %10305 = vmatprep.mubr.msk.bf16.mxu1 %vm10304_vm9, %v19212_v14  ;;  %11377 = vmatprep.subr.bf16.mxu0 %v14546_v6  ;;  %v19398_v6 = vld [vmem:[#allocation52_spill] sm:$0xff] }
 0x46d   :  { %11399 = vmatprep.subr.bf16.mxu1 %v14549_v38  ;;  %v19399_v38 = vld [vmem:[#allocation53_spill] sm:$0xff] }
 0x46e   :  { %11378 = vmatpush3.bf16.msra.mxu0 %v14552_v45  ;;  %v19400_v45 = vld [vmem:[#allocation54_spill] sm:$0xff] }
 0x46f   :  { %11400 = vmatpush3.bf16.msra.mxu1 %v14555_v35  ;;  %11379 = vmatprep.subr.bf16.mxu0 %v14558_v54  ;;  %v5555_v35 = vmul.f32 0.95, %v15048_v55  ;;  %v5557_v54 = vmul.f32 0.95, %v15050_v60  ;;  %v10271_v55 = vsel %vm5360_vm6, 1.0, %v19232_v44 }
 0x470   :  { %11401 = vmatprep.subr.bf16.mxu1 %v14561_v5  ;;  %v19401_v5 = vld [vmem:[#allocation13_spill] sm:$0xff]  ;;  %v4875_v60 = vmul.f32 0.95, %v15070_v56  ;;  %v19406_v56 = vld [vmem:[#allocation12_spill] sm:$0xff] }
 0x471   :  { %v5563_v37 = vadd.f32 %v13868_v50, %v5555_v35  ;;  %v5565_v1 = vadd.f32 %v13871_v51, %v5557_v54  ;;  %v19405_v35 = vld [vmem:[#allocation47_spill] sm:$0xff]  ;;  %v10186_v54 = vsel %vm4654_vm10, 1.0, %v19232_v44 }
 0x472   :  { %11380 = vmatpush3.bf16.msra.mxu0 %v14564_v47  ;;  %v5560_v47 = vmul.f32 0.95, %v15063_v52 }
 0x473   :  { %11402 = vmatpush3.bf16.msra.mxu1 %v19394_v3  ;;  %11381 = vmatprep.subr.bf16.mxu0 %v19395_v9  ;;  %v10266_v9 = vsel %vm5355_vm4, 1.0, %v19232_v44 }
 0x474   :  { %11403 = vmatprep.subr.bf16.mxu1 %v19396_v24  ;;  %v5568_v3 = vadd.f32 %v19242_v15, %v5560_v47  ;;  %v10268_v24 = vsel %vm5357_vm5, 1.0, %v19232_v44  ;;  %v19411_v47 = vld [vmem:[#allocation18_spill] sm:$0xff] }
 0x476   :  { %11382 = vmatpush3.bf16.msra.mxu0 %v19397_v4 }
 0x477   :  { %11404 = vmatpush3.bf16.msra.mxu1 %v19398_v6  ;;  %11383 = vmatprep.subr.bf16.mxu0 %v19399_v38  ;;  %v15221_v6 = vsub.f32 %v5563_v37, %v10266_v9  ;;  %v19419_v37 = vld [vmem:[#allocation26_spill] sm:$0xff]  ;;  %v19426_v9 = vld [vmem:[#allocation35_spill] sm:$0xff] }
 0x478   :  { %11405 = vmatprep.subr.bf16.mxu1 %v19400_v45 }
 0x479   :  { %vm5579_vm4 = vcmp.gt.f32.partialorder %v15221_v6, 1.0 }
 0x47a   :  { %11384 = vmatpush3.bf16.msra.mxu0 %v19401_v5  ;;  %v19410_v5 = vld [vmem:[#allocation17_spill] sm:$0xff] }
 0x47b   :  { %11406 = vmatpush3.bf16.msra.mxu1 %v19402_v12  ;;  %11385 = vmatprep.subr.bf16.mxu0 %v19403_v11  ;;  %v19412_v12 = vld [vmem:[#allocation19_spill] sm:$0xff]  ;;  %v19413_v11 = vld [vmem:[#allocation20_spill] sm:$0xff] }
 0x47c   :  { %v11083_v8 = vpop.f32.mrb[36].mxu0  ;;  %11407 = vmatprep.subr.bf16.mxu1 %v19404_v10  ;;  %v19416_v10 = vld [vmem:[#allocation23_spill] sm:$0xff] }
 0x47d   :  { %v11105_v58 = vpop.f32.mrb[36].mxu1  ;;  %v11084_v30 = vpop.f32.mrb[37].mxu0 }
 0x47e   :  { %v11085_v61 = vadd.f32 %v11084_v30, %v11083_v8  ;;  %v11106_v49 = vpop.f32.mrb[37].mxu1  ;;  %v11086_v36 = vpop.f32.mrb[38].mxu0  ;;  %11386 = vmatpush3.bf16.msra.mxu0 %v14605_v18  ;;  %v19415_v8 = vld [vmem:[#allocation22_spill] sm:$0xff]  ;;  %v19418_v30 = vld [vmem:[#allocation25_spill] sm:$0xff] }
 0x47f   :  { %v11107_v17 = vadd.f32 %v11106_v49, %v11105_v58  ;;  %v11108_v59 = vpop.f32.mrb[38].mxu1  ;;  %11408 = vmatpush3.bf16.msra.mxu1 %v14609_v22  ;;  %v11087_v27 = vpop.f32.mrb[39].mxu0  ;;  %11387 = vmatprep.subr.bf16.mxu0 %v14612_v26  ;;  %v5570_v22 = vadd.f32 %v19244_v31, %v5562_v33  ;;  %v15223_v26 = vsub.f32 %v5565_v1, %v10268_v24  ;;  %v19414_v33 = vld [vmem:[#allocation21_spill] sm:$0xff]  ;;  %v19417_v58 = vld [vmem:[#allocation24_spill] sm:$0xff]  ;;  %v19422_v49 = vld [vmem:[#allocation31_spill] sm:$0xff] }
 0x480   :  { %v4830_v4 = vadd.f32 %v11085_v61, %v15143_v41  ;;  %v11109_v18 = vpop.f32.mrb[39].mxu1  ;;  %11409 = vmatprep.subr.bf16.mxu1 %v14620_v32  ;;  %v10273_v32 = vsel %vm5362_vm12, 1.0, %v19232_v44  ;;  %v15236_v41 = vsub.f32 %v5568_v3, %v10271_v55  ;;  %vm10302_vm12 = vmpackc.low %vm5579_vm4, %vm5579_vm4  ;;  %v19420_v1 = vld [vmem:[#allocation29_spill] sm:$0xff]  ;;  %v19421_v61 = vld [vmem:[#allocation30_spill] sm:$0xff]  ;;  %v5559_v27 = vmul.f32 0.95, %v15138_v63 }
 0x481   :  { %v15239_v52 = vsub.f32 %v5570_v22, %v10273_v32  ;;  %vm5581_vm5 = vcmp.gt.f32.partialorder %v15223_v26, 1.0  ;;  %v19423_v36 = vld [vmem:[#allocation32_spill] sm:$0xff]  ;;  %v19425_v59 = vld [vmem:[#allocation34_spill] sm:$0xff]  ;;  %v5561_v3 = vmul.f32 0.95, %v15146_v39  ;;  %v19428_v18 = vld [vmem:[#allocation37_spill] sm:$0xff] }
 0x482   :  { %v4870_v38 = vadd.f32 %v11107_v17, %v4830_v4  ;;  %11388 = vmatpush3.bf16.msra.mxu0 %v14634_v62  ;;  %vm5584_vm6 = vcmp.gt.f32.partialorder %v15236_v41, 1.0  ;;  %vm10306_vm15 = vmpackc.low %vm5581_vm5, %vm5581_vm5  ;;  %v19424_v17 = vld [vmem:[#allocation33_spill] sm:$0xff]  ;;  %v5780_v24 = vmul.f32 0.95, %v15153_v42  ;;  %v19427_v4 = vld [vmem:[#allocation36_spill] sm:$0xff] }
 0x483   :  { %11410 = vmatpush3.bf16.msra.mxu1 %v19332_v2  ;;  %11389 = vmatprep.subr.bf16.mxu0 %v19368_v43  ;;  %v19407_v2 = vld [vmem:[#allocation48_spill] sm:$0xff]  ;;  %v19408_v43 = vld [vmem:[#allocation14_spill] sm:$0xff]  ;;  %vm5586_vm13 = vcmp.gt.f32.partialorder %v15239_v52, 1.0  ;;  %vm10308_vm0 = vmpackc.low %vm5584_vm6, %vm5584_vm6  ;;  %v5782_v22 = vmul.f32 0.95, %v15156_v48 }
 0x484   :  { %v4876_v45 = vadd.f32 %v4875_v60, %v4870_v38  ;;  %11411 = vmatprep.subr.bf16.mxu1 %v19405_v35  ;;  %vm10312_vm1 = vmpackc.low %vm5586_vm13, %vm5586_vm13  ;;  %v19429_v38 = vld [vmem:[#allocation38_spill] sm:$0xff]  ;;  %v15371_v48 = vld [vmem:[#allocation6 + $0x8] sm:$0xff]  }
 0x486   :  { %v15243_v62 = vsub.f32 %v4876_v45, %v10186_v54  ;;  %11390 = vmatpush3.bf16.msra.mxu0 %v19406_v56  ;;  %v5567_v45 = vadd.f32 %v14009_v57, %v5559_v27  ;;  %v15401_v27 = vld [vmem:[#allocation6 + $0x60] sm:$0xff]  }
 0x487   :  { %11412 = vmatpush3.bf16.msra.mxu1 %v19407_v2  ;;  %11419 = vmatprep.subr.bf16.mxu0 %v19408_v43  ;;  %v5569_v2 = vadd.f32 %v14013_v46, %v5561_v3  ;;  %19434 = vst [vmem:[#allocation43_spill] sm:$0xff] %v15401_v27  ;;  %v15404_v3 = vld [vmem:[#allocation6 + $0xe0] sm:$0xff]  }
 0x488   :  { %10213 = vst [vmem:[%s18713_s5 + $0x18] sm:$0xff] %v15243_v62  ;;  %11441 = vmatprep.subr.bf16.mxu1 %v19409_v40  ;;  %19435 = vst [vmem:[#allocation44_spill] sm:$0xff] %v15404_v3 }
 0x489   :  { %10303 = vmatmul.mubr.msk.bf16.vlgmr.msra.gmra.mrb[64].mxu0 %vm10302_vm12, %v19212_v14  ;;  %vm4878_vm12 = vcmp.gt.f32.partialorder %v15243_v62, 1.0 }
 0x48a   :  { %10307 = vmatmul.mubr.msk.bf16.vlgmr.msra.gmra.mrb[64].mxu1 %vm10306_vm15, %v19212_v14  ;;  %11420 = vmatpush3.bf16.msra.mxu0 %v19410_v5 }
 0x48b   :  { %10309 = vmatprep.mubr.msk.bf16.mxu0 %vm10308_vm0, %v19212_v14  ;;  %11442 = vmatpush3.bf16.msra.mxu1 %v19411_v47  ;;  %v5788_v47 = vadd.f32 %v19261_v13, %v5780_v24  ;;  %v5781_v24 = vmul.f32 0.95, %v15223_v26 }
 0x48c   :  { %10313 = vmatprep.mubr.msk.bf16.mxu1 %vm10312_vm1, %v19212_v14  ;;  %11421 = vmatprep.subr.bf16.mxu0 %v19412_v12  ;;  %v10270_v12 = vsel %vm5359_vm8, 1.0, %v19232_v44 }
 0x48d   :  { %11443 = vmatprep.subr.bf16.mxu1 %v19413_v11 }
 0x48e   :  { %11422 = vmatpush3.bf16.msra.mxu0 %v19414_v33 }
 0x48f   :  { %11444 = vmatpush3.bf16.msra.mxu1 %v19415_v8  ;;  %11423 = vmatprep.subr.bf16.mxu0 %v19416_v10  ;;  %v15311_v8 = vsub.f32 %v5567_v45, %v10270_v12 }
 0x490   :  { %11445 = vmatprep.subr.bf16.mxu1 %v19417_v58  ;;  %v15374_v58 = vld [vmem:[#allocation6 + $0x88] sm:$0xff]  }
 0x491   :  { %vm5583_vm8 = vcmp.gt.f32.partialorder %v15311_v8, 1.0 }
 0x492   :  { %11424 = vmatpush3.bf16.msra.mxu0 %v19418_v30  ;;  %v15377_v30 = vld [vmem:[#allocation6 + $0x50] sm:$0xff]  }
 0x493   :  { %11446 = vmatpush3.bf16.msra.mxu1 %v19419_v37  ;;  %11425 = vmatprep.subr.bf16.mxu0 %v19420_v1  ;;  %v15380_v37 = vld [vmem:[#allocation6 + $0xd0] sm:$0xff]  }
 0x494   :  { %11447 = vmatprep.subr.bf16.mxu1 %v19421_v61  ;;  %v15383_v1 = vld [vmem:[#allocation6 + $0x10] sm:$0xff]  }
 0x495   :  { %v15386_v61 = vld [vmem:[#allocation6 + $0x90] sm:$0xff]  }
 0x496   :  { %11426 = vmatpush3.bf16.msra.mxu0 %v19422_v49  ;;  %v15389_v49 = vld [vmem:[#allocation6 + $0x58] sm:$0xff]  }
 0x497   :  { %11448 = vmatpush3.bf16.msra.mxu1 %v19423_v36  ;;  %11427 = vmatprep.subr.bf16.mxu0 %v19424_v17  ;;  %19430 = vst [vmem:[#allocation39_spill] sm:$0xff] %v15389_v49  ;;  %v15392_v36 = vld [vmem:[#allocation6 + $0xd8] sm:$0xff]  }
 0x498   :  { %11449 = vmatprep.subr.bf16.mxu1 %v19425_v59  ;;  %19431 = vst [vmem:[#allocation40_spill] sm:$0xff] %v15392_v36  ;;  %v15395_v17 = vld [vmem:[#allocation6 + $0x18] sm:$0xff]  }
 0x499   :  { %19432 = vst [vmem:[#allocation41_spill] sm:$0xff] %v15395_v17  ;;  %v15398_v59 = vld [vmem:[#allocation6 + $0x98] sm:$0xff]  }
 0x49a   :  { %11428 = vmatpush3.bf16.msra.mxu0 %v19426_v9  ;;  %19433 = vst [vmem:[#allocation42_spill] sm:$0xff] %v15398_v59  ;;  %v5779_v9 = vmul.f32 0.95, %v15221_v6  ;;  %v10297_v6 = vsel %vm5584_vm6, 1.0, %v19232_v44 }
 0x49b   :  { %11450 = vmatpush3.bf16.msra.mxu1 %v19427_v4  ;;  %11429 = vmatprep.subr.bf16.mxu0 %v19428_v18  ;;  %v15409_v4 = vld [vmem:[#allocation6 + $0x20] sm:$0xff]   ;;  %v5784_v18 = vmul.f32 0.95, %v15236_v41 }
 0x49c   :  { %v11127_v55 = vpop.f32.mrb[40].mxu0  ;;  %11451 = vmatprep.subr.bf16.mxu1 %v19429_v38  ;;  %19436 = vst [vmem:[#allocation45_spill] sm:$0xff] %v15409_v4  ;;  %v5786_v38 = vmul.f32 0.95, %v15239_v52  ;;  %v10212_v52 = vsel %vm4878_vm12, 1.0, %v19232_v44 }
 0x49d   :  { %v11149_v60 = vpop.f32.mrb[40].mxu1  ;;  %v11128_v32 = vpop.f32.mrb[41].mxu0 }
 0x49e   :  { %v11129_v35 = vadd.f32 %v11128_v32, %v11127_v55  ;;  %v11150_v54 = vpop.f32.mrb[41].mxu1  ;;  %v11130_v56 = vpop.f32.mrb[42].mxu0  ;;  %11430 = vmatpush3.bf16.msra.mxu0 %v14756_v16  ;;  %v5790_v16 = vadd.f32 %v19263_v0, %v5782_v22  ;;  %v15413_v22 = vld [vmem:[#allocation6 + $0xa0] sm:$0xff]   ;;  %v15416_v55 = vld [vmem:[#allocation6 + $0x68] sm:$0xff]  }
 0x49f   :  { %v11151_v43 = vadd.f32 %v11150_v54, %v11149_v60  ;;  %v11152_v40 = vpop.f32.mrb[42].mxu1  ;;  %11452 = vmatpush3.bf16.msra.mxu1 %v14760_v7  ;;  %v11131_v5 = vpop.f32.mrb[43].mxu0  ;;  %11431 = vmatprep.subr.bf16.mxu0 %v14763_v53  ;;  %v10272_v7 = vsel %vm5361_vm11, 1.0, %v19232_v44  ;;  %v10293_v53 = vsel %vm5580_vm14, 1.0, %v19232_v44  ;;  %19437 = vst [vmem:[#allocation58_spill] sm:$0xff] %v15413_v22  ;;  %19438 = vst [vmem:[#allocation57_spill] sm:$0xff] %v15416_v55 }
 0x4a0   :  { %v4974_v11 = vadd.f32 %v14957_v23, %v11129_v35  ;;  %v11153_v33 = vpop.f32.mrb[43].mxu1  ;;  %11453 = vmatprep.subr.bf16.mxu1 %v14771_v20  ;;  %v15319_v63 = vsub.f32 %v5569_v2, %v10272_v7  ;;  %v10295_v20 = vsel %vm5582_vm2, 1.0, %v19232_v44  ;;  %v15326_v39 = vsub.f32 %v5788_v47, %v10293_v53  ;;  %vm10310_vm2 = vmpackc.low %vm5583_vm8, %vm5583_vm8  ;;  %v15420_v32 = vld [vmem:[#allocation6 + $0xe8] sm:$0xff]  }
 0x4a1   :  { %v15329_v42 = vsub.f32 %v5790_v16, %v10295_v20  ;;  %19439 = vst [vmem:[#allocation27_spill] sm:$0xff] %v15420_v32  ;;  %v5787_v54 = vadd.f32 %v13868_v50, %v5779_v9  ;;  %v5789_v56 = vadd.f32 %v13871_v51, %v5781_v24  ;;  %v15425_v5 = vld [vmem:[#allocation6 + $0x28] sm:$0xff]   ;;  %v15431_v16 = vld [vmem:[#allocation6 + $0x70] sm:$0xff]   ;;  %v5792_v7 = vadd.f32 %v19242_v15, %v5784_v18 }
 0x4a2   :  { %v15316_v10 = vadd.f32 %v11151_v43, %v4974_v11  ;;  %11432 = vmatpush3.bf16.msra.mxu0 %v14785_v25  ;;  %vm5585_vm11 = vcmp.gt.f32.partialorder %v15319_v63, 1.0  ;;  %v15335_v25 = vld [vmem:[#allocation6 + $0x40] sm:$0xff]   ;;  %vm5804_vm14 = vcmp.gt.f32.partialorder %v15326_v39, 1.0  ;;  %v15428_v11 = vld [vmem:[#allocation6 + $0xa8] sm:$0xff]   ;;  %v10292_v53 = vsel %vm5579_vm4, 1.0, %v19232_v44 }
 0x4a3   :  { %11454 = vmatpush3.bf16.msra.mxu1 %v14793_v21  ;;  %11433 = vmatprep.subr.bf16.mxu0 %v14796_v29  ;;  %v15342_v21 = vld [vmem:[#allocation6 + $0xc0] sm:$0xff]   ;;  %vm5806_vm3 = vcmp.gt.f32.partialorder %v15329_v42, 1.0  ;;  %vm10314_vm7 = vmpackc.low %vm5585_vm11, %vm5585_vm11  ;;  %v10294_v20 = vsel %vm5581_vm5, 1.0, %v19232_v44  ;;  %v15467_v41 = vsub.f32 %v5792_v7, %v10297_v6  ;;  %v15484_v7 = vld [vmem:[#allocation6 + $0xb8] sm:$0xff]  }
 0x4a4   :  { %11455 = vmatprep.subr.bf16.mxu1 %v14801_v28  ;;  %v15351_v29 = vld [vmem:[#allocation6] sm:$0xff]   ;;  %vm10326_vm9 = vmpackc.low %vm5804_vm14, %vm5804_vm14  ;;  %v15448_v18 = vsub.f32 %v5789_v56, %v10294_v20  ;;  %v15464_v56 = vld [vmem:[#allocation6 + $0x78] sm:$0xff]   ;;  %19445 = vst [vmem:[#allocation52_spill] sm:$0xff] %v15484_v7 }
 0x4a5   :  { %v15358_v28 = vld [vmem:[#allocation6 + $0x80] sm:$0xff]   ;;  %vm10330_vm10 = vmpackc.low %vm5806_vm3, %vm5806_vm3  ;;  %19442 = vst [vmem:[#allocation49_spill] sm:$0xff] %v15464_v56  ;;  %vm5808_vm6 = vcmp.gt.f32.partialorder %v15467_v41, 1.0  ;;  %v15527_v6 = vld [vmem:[#allocation6 + $0x108] sm:$0xff]  }
 0x4a6   :  { %11434 = vmatpush3.bf16.msra.mxu0 %v14807_v34  ;;  %v15365_v34 = vld [vmem:[#allocation6 + $0x48] sm:$0xff]   ;;  %vm5805_vm5 = vcmp.gt.f32.partialorder %v15448_v18, 1.0  ;;  %v15507_v20 = vld [vmem:[#allocation6 + $0x100] sm:$0xff]   ;;  %vm10334_vm1 = vmpackc.low %vm5808_vm6, %vm5808_vm6  ;;  %19452 = vst [vmem:[#allocation47_spill] sm:$0xff] %v15527_v6 }
 0x4a7   :  { %11456 = vmatpush3.bf16.msra.mxu1 %v14811_v19  ;;  %11463 = vmatprep.subr.bf16.mxu0 %v15335_v25  ;;  %v15368_v19 = vld [vmem:[#allocation6 + $0xc8] sm:$0xff]   ;;  %vm10332_vm0 = vmpackc.low %vm5805_vm5, %vm5805_vm5  ;;  %19448 = vst [vmem:[#allocation13_spill] sm:$0xff] %v15507_v20 }
 0x4a8   :  { %11485 = vmatprep.subr.bf16.mxu1 %v15342_v21 }
 0x4a9   :  { %10311 = vmatmul.mubr.msk.bf16.vlgmr.msra.gmra.mrb[68].mxu0 %vm10310_vm2, %v19212_v14 }
 0x4aa   :  { %10315 = vmatmul.mubr.msk.bf16.vlgmr.msra.gmra.mrb[68].mxu1 %vm10314_vm7, %v19212_v14  ;;  %11464 = vmatpush3.bf16.msra.mxu0 %v15351_v29 }
 0x4ab   :  { %10327 = vmatprep.mubr.msk.bf16.mxu0 %vm10326_vm9, %v19212_v14  ;;  %11486 = vmatpush3.bf16.msra.mxu1 %v15358_v28 }
 0x4ac   :  { %10331 = vmatprep.mubr.msk.bf16.mxu1 %vm10330_vm10, %v19212_v14  ;;  %11465 = vmatprep.subr.bf16.mxu0 %v15365_v34 }
 0x4ad   :  { %11487 = vmatprep.subr.bf16.mxu1 %v15368_v19 }
 0x4ae   :  { %11466 = vmatpush3.bf16.msra.mxu0 %v15371_v48 }
 0x4af   :  { %11488 = vmatpush3.bf16.msra.mxu1 %v15374_v58  ;;  %11467 = vmatprep.subr.bf16.mxu0 %v15377_v30 }
 0x4b0   :  { %11489 = vmatprep.subr.bf16.mxu1 %v15380_v37 }
 0x4b2   :  { %11468 = vmatpush3.bf16.msra.mxu0 %v15383_v1 }
 0x4b3   :  { %11490 = vmatpush3.bf16.msra.mxu1 %v15386_v61  ;;  %11469 = vmatprep.subr.bf16.mxu0 %v15389_v49 }
 0x4b4   :  { %11491 = vmatprep.subr.bf16.mxu1 %v15392_v36 }
 0x4b6   :  { %11470 = vmatpush3.bf16.msra.mxu0 %v15395_v17 }
 0x4b7   :  { %11492 = vmatpush3.bf16.msra.mxu1 %v15398_v59  ;;  %11471 = vmatprep.subr.bf16.mxu0 %v15401_v27 }
 0x4b8   :  { %11493 = vmatprep.subr.bf16.mxu1 %v15404_v3 }
 0x4ba   :  { %11472 = vmatpush3.bf16.msra.mxu0 %v15409_v4 }
 0x4bb   :  { %11494 = vmatpush3.bf16.msra.mxu1 %v15413_v22  ;;  %11473 = vmatprep.subr.bf16.mxu0 %v15416_v55 }
 0x4bc   :  { %v11171_v60 = vpop.f32.mrb[44].mxu0  ;;  %11495 = vmatprep.subr.bf16.mxu1 %v15420_v32 }
 0x4bd   :  { %v11193_v45 = vpop.f32.mrb[44].mxu1  ;;  %v11172_v35 = vpop.f32.mrb[45].mxu0 }
 0x4be   :  { %v11173_v2 = vadd.f32 %v11172_v35, %v11171_v60  ;;  %v11194_v43 = vpop.f32.mrb[45].mxu1  ;;  %v11174_v40 = vpop.f32.mrb[46].mxu0  ;;  %11474 = vmatpush3.bf16.msra.mxu0 %v15425_v5  ;;  %v15442_v60 = vld [vmem:[#allocation6 + $0xf0] sm:$0xff]   ;;  %v15446_v35 = vsub.f32 %v5787_v54, %v10292_v53  ;;  %v15487_v53 = vld [vmem:[#allocation6 + $0x140] sm:$0xff]  }
 0x4bf   :  { %v11195_v47 = vadd.f32 %v11194_v43, %v11193_v45  ;;  %v11196_v12 = vpop.f32.mrb[46].mxu1  ;;  %11496 = vmatpush3.bf16.msra.mxu1 %v15428_v11  ;;  %v11175_v33 = vpop.f32.mrb[47].mxu0  ;;  %11475 = vmatprep.subr.bf16.mxu0 %v15431_v16  ;;  %v5794_v45 = vadd.f32 %v19244_v31, %v5786_v38  ;;  %v10299_v38 = vsel %vm5586_vm13, 1.0, %v19232_v44  ;;  %v15461_v54 = vld [vmem:[#allocation6 + $0xb0] sm:$0xff]   ;;  %v15469_v40 = vld [vmem:[#allocation6 + $0xf8] sm:$0xff]   ;;  %19446 = vst [vmem:[#allocation53_spill] sm:$0xff] %v15487_v53 }
 0x4c0   :  { %v5054_v9 = vadd.f32 %v11173_v2, %v15316_v10  ;;  %v11197_v24 = vpop.f32.mrb[47].mxu1  ;;  %11497 = vmatprep.subr.bf16.mxu1 %v15442_v60  ;;  %v5099_v10 = vmul.f32 0.95, %v15243_v62  ;;  %v15455_v2 = vld [vmem:[#allocation6 + $0x30] sm:$0xff]   ;;  %19441 = vst [vmem:[#allocation46_spill] sm:$0xff] %v15461_v54  ;;  %19443 = vst [vmem:[#allocation50_spill] sm:$0xff] %v15469_v40 }
 0x4c1   :  { %19440 = vst [vmem:[#allocation28_spill] sm:$0xff] %v15455_v2  ;;  %vm5803_vm4 = vcmp.gt.f32.partialorder %v15446_v35, 1.0  ;;  %v15480_v33 = vld [vmem:[#allocation6 + $0x38] sm:$0xff]   ;;  %v15498_v62 = vld [vmem:[#allocation6 + $0x1c0] sm:$0xff]   ;;  %v15521_v24 = vld [vmem:[#allocation6 + $0x148] sm:$0xff]  }
 0x4c2   :  { %v5094_v26 = vadd.f32 %v11195_v47, %v5054_v9  ;;  %11476 = vmatpush3.bf16.msra.mxu0 %v15455_v2  ;;  %v15472_v47 = vsub.f32 %v5794_v45, %v10299_v38  ;;  %19444 = vst [vmem:[#allocation51_spill] sm:$0xff] %v15480_v33  ;;  %vm10328_vm13 = vmpackc.low %vm5803_vm4, %vm5803_vm4  ;;  %v15514_v9 = vld [vmem:[#allocation6 + $0x180] sm:$0xff]   ;;  %v15524_v45 = vld [vmem:[#allocation6 + $0x1c8] sm:$0xff]  }
 0x4c3   :  { %11498 = vmatpush3.bf16.msra.mxu1 %v15461_v54  ;;  %11477 = vmatprep.subr.bf16.mxu0 %v15464_v56  ;;  %19447 = vst [vmem:[#allocation54_spill] sm:$0xff] %v15498_v62  ;;  %19449 = vst [vmem:[#allocation15_spill] sm:$0xff] %v15514_v9  ;;  %v15536_v38 = vld [vmem:[#allocation6 + $0x1d0] sm:$0xff]   ;;  %v15584_v54 = vld [vmem:[#allocation6 + $0x1a8] sm:$0xff]  }
 0x4c4   :  { %v5100_v43 = vadd.f32 %v5099_v10, %v5094_v26  ;;  %11499 = vmatprep.subr.bf16.mxu1 %v15469_v40  ;;  %vm5810_vm15 = vcmp.gt.f32.partialorder %v15472_v47, 1.0  ;;  %19450 = vst [vmem:[#allocation55_spill] sm:$0xff] %v15521_v24  ;;  %19451 = vst [vmem:[#allocation56_spill] sm:$0xff] %v15524_v45  ;;  %v15530_v26 = vld [vmem:[#allocation6 + $0x188] sm:$0xff]   ;;  %v15533_v10 = vld [vmem:[#allocation6 + $0x150] sm:$0xff]  }
 0x4c5   :  { %vm10338_vm2 = vmpackc.low %vm5810_vm15, %vm5810_vm15  ;;  %19453 = vst [vmem:[#allocation12_spill] sm:$0xff] %v15530_v26  ;;  %v15580_v40 = vld [vmem:[#allocation6 + $0x128] sm:$0xff]   ;;  %v15587_v2 = vld [vmem:[#allocation6 + $0x170] sm:$0xff]  }
 0x4c6   :  { %v15478_v12 = vsub.f32 %v5100_v43, %v10212_v52  ;;  %11478 = vmatpush3.bf16.msra.mxu0 %v15480_v33  ;;  %19454 = vst [vmem:[#allocation48_spill] sm:$0xff] %v15533_v10  ;;  %19455 = vst [vmem:[#allocation14_spill] sm:$0xff] %v15536_v38  ;;  %v15539_v43 = vld [vmem:[#allocation6 + $0x110] sm:$0xff]  }
 0x4c7   :  { %11500 = vmatpush3.bf16.msra.mxu1 %v15484_v7  ;;  %11507 = vmatprep.subr.bf16.mxu0 %v15487_v53  ;;  %19456 = vst [vmem:[#allocation16_spill] sm:$0xff] %v15539_v43  ;;  %v15542_v52 = vld [vmem:[#allocation6 + $0x190] sm:$0xff]  }
 0x4c8   :  { %10239 = vst [vmem:[%s18713_s5 + $0x20] sm:$0xff] %v15478_v12  ;;  %11529 = vmatprep.subr.bf16.mxu1 %v15498_v62  ;;  %19457 = vst [vmem:[#allocation17_spill] sm:$0xff] %v15542_v52 }
 0x4c9   :  { %10329 = vmatmul.mubr.msk.bf16.vlgmr.msra.gmra.mrb[72].mxu0 %vm10328_vm13, %v19212_v14  ;;  %vm5102_vm13 = vcmp.gt.f32.partialorder %v15478_v12, 1.0 }
 0x4ca   :  { %10333 = vmatmul.mubr.msk.bf16.vlgmr.msra.gmra.mrb[72].mxu1 %vm10332_vm0, %v19212_v14  ;;  %11508 = vmatpush3.bf16.msra.mxu0 %v15507_v20 }
 0x4cb   :  { %10335 = vmatprep.mubr.msk.bf16.mxu0 %vm10334_vm1, %v19212_v14  ;;  %11530 = vmatpush3.bf16.msra.mxu1 %v15514_v9  ;;  %v15576_v9 = vld [vmem:[#allocation6 + $0x1e8] sm:$0xff]  }
 0x4cc   :  { %10339 = vmatprep.mubr.msk.bf16.mxu1 %vm10338_vm2, %v19212_v14  ;;  %11509 = vmatprep.subr.bf16.mxu0 %v15521_v24  ;;  %v15569_v24 = vld [vmem:[#allocation6 + $0x1a0] sm:$0xff]   ;;  %19467 = vst [vmem:[#allocation29_spill] sm:$0xff] %v15576_v9 }
 0x4cd   :  { %11531 = vmatprep.subr.bf16.mxu1 %v15524_v45  ;;  %v15565_v45 = vld [vmem:[#allocation6 + $0x120] sm:$0xff]   ;;  %19465 = vst [vmem:[#allocation25_spill] sm:$0xff] %v15569_v24 }
 0x4ce   :  { %11510 = vmatpush3.bf16.msra.mxu0 %v15527_v6  ;;  %v15545_v6 = vld [vmem:[#allocation6 + $0x158] sm:$0xff]   ;;  %19464 = vst [vmem:[#allocation24_spill] sm:$0xff] %v15565_v45 }
 0x4cf   :  { %11532 = vmatpush3.bf16.msra.mxu1 %v15530_v26  ;;  %11511 = vmatprep.subr.bf16.mxu0 %v15533_v10  ;;  %19458 = vst [vmem:[#allocation18_spill] sm:$0xff] %v15545_v6  ;;  %v15548_v26 = vld [vmem:[#allocation6 + $0x1d8] sm:$0xff]  }
 0x4d0   :  { %11533 = vmatprep.subr.bf16.mxu1 %v15536_v38  ;;  %19459 = vst [vmem:[#allocation19_spill] sm:$0xff] %v15548_v26  ;;  %v15551_v10 = vld [vmem:[#allocation6 + $0x118] sm:$0xff]  }
 0x4d1   :  { %19460 = vst [vmem:[#allocation20_spill] sm:$0xff] %v15551_v10  ;;  %v15554_v38 = vld [vmem:[#allocation6 + $0x198] sm:$0xff]  }
 0x4d2   :  { %11512 = vmatpush3.bf16.msra.mxu0 %v15539_v43  ;;  %19461 = vst [vmem:[#allocation21_spill] sm:$0xff] %v15554_v38  ;;  %v15557_v43 = vld [vmem:[#allocation6 + $0x160] sm:$0xff]  }
 0x4d3   :  { %11534 = vmatpush3.bf16.msra.mxu1 %v15542_v52  ;;  %11513 = vmatprep.subr.bf16.mxu0 %v15545_v6  ;;  %19462 = vst [vmem:[#allocation22_spill] sm:$0xff] %v15557_v43  ;;  %v15560_v52 = vld [vmem:[#allocation6 + $0x1e0] sm:$0xff]   ;;  %v5783_v6 = vmul.f32 0.95, %v15311_v8  ;;  %v10319_v8 = vsel %vm5804_vm14, 1.0, %v19232_v44 }
 0x4d4   :  { %11535 = vmatprep.subr.bf16.mxu1 %v15548_v26  ;;  %19463 = vst [vmem:[#allocation23_spill] sm:$0xff] %v15560_v52  ;;  %v5785_v26 = vmul.f32 0.95, %v15319_v63  ;;  %v15617_v63 = vld [vmem:[#allocation6 + $0x1b0] sm:$0xff]  }
 0x4d6   :  { %11514 = vmatpush3.bf16.msra.mxu0 %v15551_v10  ;;  %v6004_v10 = vmul.f32 0.95, %v15326_v39 }
 0x4d7   :  { %11536 = vmatpush3.bf16.msra.mxu1 %v15554_v38  ;;  %11515 = vmatprep.subr.bf16.mxu0 %v15557_v43  ;;  %v15572_v38 = vld [vmem:[#allocation6 + $0x168] sm:$0xff]  }
 0x4d8   :  { %11537 = vmatprep.subr.bf16.mxu1 %v15560_v52  ;;  %19466 = vst [vmem:[#allocation26_spill] sm:$0xff] %v15572_v38  ;;  %v6006_v52 = vmul.f32 0.95, %v15329_v42  ;;  %v15631_v42 = vld [vmem:[#allocation6 + $0x138] sm:$0xff]  }
 0x4da   :  { %11516 = vmatpush3.bf16.msra.mxu0 %v15565_v45  ;;  %v5791_v45 = vadd.f32 %v14009_v57, %v5783_v6 }
 0x4db   :  { %11538 = vmatpush3.bf16.msra.mxu1 %v15569_v24  ;;  %11517 = vmatprep.subr.bf16.mxu0 %v15572_v38  ;;  %v5793_v38 = vadd.f32 %v14013_v46, %v5785_v26 }
 0x4dc   :  { %v11215_v43 = vpop.f32.mrb[48].mxu0  ;;  %11539 = vmatprep.subr.bf16.mxu1 %v15576_v9 }
 0x4dd   :  { %v11237_v20 = vpop.f32.mrb[48].mxu1  ;;  %v11216_v62 = vpop.f32.mrb[49].mxu0 }
 0x4de   :  { %v11217_v53 = vadd.f32 %v11216_v62, %v11215_v43  ;;  %v11238_v7 = vpop.f32.mrb[49].mxu1  ;;  %v11218_v33 = vpop.f32.mrb[50].mxu0  ;;  %11518 = vmatpush3.bf16.msra.mxu0 %v15580_v40  ;;  %v6012_v62 = vadd.f32 %v19261_v13, %v6004_v10  ;;  %v10321_v43 = vsel %vm5806_vm3, 1.0, %v19232_v44 }
 0x4df   :  { %v11239_v24 = vadd.f32 %v11238_v7, %v11237_v20  ;;  %v11240_v56 = vpop.f32.mrb[50].mxu1  ;;  %11540 = vmatpush3.bf16.msra.mxu1 %v15584_v54  ;;  %v11219_v9 = vpop.f32.mrb[51].mxu0  ;;  %11519 = vmatprep.subr.bf16.mxu0 %v15587_v2  ;;  %v10296_v33 = vsel %vm5583_vm8, 1.0, %v19232_v44  ;;  %v15595_v7 = vld [vmem:[#allocation6 + $0x1f0] sm:$0xff]   ;;  %v10298_v20 = vsel %vm5585_vm11, 1.0, %v19232_v44 }
 0x4e0   :  { %v5198_v6 = vadd.f32 %v14957_v23, %v11217_v53  ;;  %v11241_v26 = vpop.f32.mrb[51].mxu1  ;;  %11541 = vmatprep.subr.bf16.mxu1 %v15595_v7  ;;  %v6014_v56 = vadd.f32 %v19263_v0, %v6006_v52  ;;  %v15602_v9 = vsub.f32 %v5791_v45, %v10296_v33  ;;  %v15609_v23 = vld [vmem:[#allocation6 + $0x130] sm:$0xff]   ;;  %v15612_v53 = vsub.f32 %v5793_v38, %v10298_v20  ;;  %v15620_v45 = vld [vmem:[#allocation6 + $0x178] sm:$0xff]  }
 0x4e1   :  { %v15623_v39 = vsub.f32 %v6012_v62, %v10319_v8  ;;  %v15635_v52 = vld [vmem:[#allocation6 + $0x1b8] sm:$0xff]   ;;  %v6003_v62 = vmul.f32 0.95, %v15446_v35  ;;  %v6005_v33 = vmul.f32 0.95, %v15448_v18  ;;  %v10323_v35 = vsel %vm5808_vm6, 1.0, %v19232_v44 }
 0x4e2   :  { %v15607_v10 = vadd.f32 %v11239_v24, %v5198_v6  ;;  %11520 = vmatpush3.bf16.msra.mxu0 %v15609_v23  ;;  %v15625_v24 = vld [vmem:[#allocation6 + $0x1f8] sm:$0xff]   ;;  %v15628_v38 = vsub.f32 %v6014_v56, %v10321_v43  ;;  %vm5807_vm8 = vcmp.gt.f32.partialorder %v15602_v9, 1.0  ;;  %vm5809_vm11 = vcmp.gt.f32.partialorder %v15612_v53, 1.0 }
 0x4e3   :  { %11542 = vmatpush3.bf16.msra.mxu1 %v15617_v63  ;;  %11521 = vmatprep.subr.bf16.mxu0 %v15620_v45  ;;  %vm6028_vm14 = vcmp.gt.f32.partialorder %v15623_v39, 1.0  ;;  %vm10336_vm3 = vmpackc.low %vm5807_vm8, %vm5807_vm8  ;;  %v6008_v6 = vmul.f32 0.95, %v15467_v41  ;;  %v6010_v26 = vmul.f32 0.95, %v15472_v47  ;;  %v6011_v43 = vadd.f32 %v13868_v50, %v6003_v62  ;;  %v19473_v47 = vld [vmem:[#allocation52_spill] sm:$0xff] }
 0x4e4   :  { %11543 = vmatprep.subr.bf16.mxu1 %v15625_v24  ;;  %vm6030_vm7 = vcmp.gt.f32.partialorder %v15628_v38, 1.0  ;;  %vm10340_vm9 = vmpackc.low %vm5809_vm11, %vm5809_vm11  ;;  %v10318_v62 = vsel %vm5803_vm4, 1.0, %v19232_v44  ;;  %v5323_v18 = vmul.f32 0.95, %v15478_v12 }
 0x4e5   :  { %vm10352_vm10 = vmpackc.low %vm6028_vm14, %vm6028_vm14 }
 0x4e6   :  { %11522 = vmatpush3.bf16.msra.mxu0 %v15631_v42  ;;  %vm10356_vm12 = vmpackc.low %vm6030_vm7, %vm6030_vm7 }
 0x4e7   :  { %11544 = vmatpush3.bf16.msra.mxu1 %v15635_v52  ;;  %11551 = vmatprep.subr.bf16.mxu0 %v15335_v25 }
 0x4e8   :  { %11573 = vmatprep.subr.bf16.mxu1 %v15342_v21 }
 0x4e9   :  { %10337 = vmatmul.mubr.msk.bf16.vlgmr.msra.gmra.mrb[76].mxu0 %vm10336_vm3, %v19212_v14 }
 0x4ea   :  { %10341 = vmatmul.mubr.msk.bf16.vlgmr.msra.gmra.mrb[76].mxu1 %vm10340_vm9, %v19212_v14  ;;  %11552 = vmatpush3.bf16.msra.mxu0 %v15351_v29 }
 0x4eb   :  { %10353 = vmatprep.mubr.msk.bf16.mxu0 %vm10352_vm10, %v19212_v14  ;;  %11574 = vmatpush3.bf16.msra.mxu1 %v15358_v28 }
 0x4ec   :  { %10357 = vmatprep.mubr.msk.bf16.mxu1 %vm10356_vm12, %v19212_v14  ;;  %11553 = vmatprep.subr.bf16.mxu0 %v15365_v34 }
 0x4ed   :  { %11575 = vmatprep.subr.bf16.mxu1 %v15368_v19 }
 0x4ee   :  { %11554 = vmatpush3.bf16.msra.mxu0 %v15371_v48 }
 0x4ef   :  { %11576 = vmatpush3.bf16.msra.mxu1 %v15374_v58  ;;  %11555 = vmatprep.subr.bf16.mxu0 %v15377_v30 }
 0x4f0   :  { %11577 = vmatprep.subr.bf16.mxu1 %v15380_v37 }
 0x4f2   :  { %11556 = vmatpush3.bf16.msra.mxu0 %v15383_v1 }
 0x4f3   :  { %11578 = vmatpush3.bf16.msra.mxu1 %v15386_v61  ;;  %11557 = vmatprep.subr.bf16.mxu0 %v15389_v49 }
 0x4f4   :  { %11579 = vmatprep.subr.bf16.mxu1 %v15392_v36 }
 0x4f6   :  { %11558 = vmatpush3.bf16.msra.mxu0 %v15395_v17 }
 0x4f7   :  { %11580 = vmatpush3.bf16.msra.mxu1 %v15398_v59  ;;  %11559 = vmatprep.subr.bf16.mxu0 %v15401_v27 }
 0x4f8   :  { %11581 = vmatprep.subr.bf16.mxu1 %v15404_v3  ;;  %v6013_v3 = vadd.f32 %v13871_v51, %v6005_v33  ;;  %v10320_v33 = vsel %vm5805_vm5, 1.0, %v19232_v44 }
 0x4fa   :  { %11560 = vmatpush3.bf16.msra.mxu0 %v15409_v4 }
 0x4fb   :  { %11582 = vmatpush3.bf16.msra.mxu1 %v15413_v22  ;;  %11561 = vmatprep.subr.bf16.mxu0 %v15416_v55 }
 0x4fc   :  { %v11259_v56 = vpop.f32.mrb[52].mxu0  ;;  %11583 = vmatprep.subr.bf16.mxu1 %v15420_v32  ;;  %v6016_v32 = vadd.f32 %v19242_v15, %v6008_v6 }
 0x4fd   :  { %v11281_v20 = vpop.f32.mrb[52].mxu1  ;;  %v11260_v8 = vpop.f32.mrb[53].mxu0 }
 0x4fe   :  { %v11261_v27 = vadd.f32 %v11260_v8, %v11259_v56  ;;  %v11282_v59 = vpop.f32.mrb[53].mxu1  ;;  %v11262_v4 = vpop.f32.mrb[54].mxu0  ;;  %11562 = vmatpush3.bf16.msra.mxu0 %v15425_v5 }
 0x4ff   :  { %v11283_v17 = vadd.f32 %v11282_v59, %v11281_v20  ;;  %v11284_v22 = vpop.f32.mrb[54].mxu1  ;;  %11584 = vmatpush3.bf16.msra.mxu1 %v15428_v11  ;;  %v11263_v55 = vpop.f32.mrb[55].mxu0  ;;  %11563 = vmatprep.subr.bf16.mxu0 %v15431_v16  ;;  %v6018_v59 = vadd.f32 %v19244_v31, %v6010_v26  ;;  %v19468_v20 = vld [vmem:[#allocation28_spill] sm:$0xff]  ;;  %v19470_v26 = vld [vmem:[#allocation49_spill] sm:$0xff] }
 0x500   :  { %v5278_v4 = vadd.f32 %v11261_v27, %v15607_v10  ;;  %v11285_v56 = vpop.f32.mrb[55].mxu1  ;;  %11585 = vmatprep.subr.bf16.mxu1 %v15442_v60  ;;  %v15697_v22 = vsub.f32 %v6011_v43, %v10318_v62  ;;  %v15699_v55 = vsub.f32 %v6013_v3, %v10320_v33  ;;  %v10325_v27 = vsel %vm5810_vm15, 1.0, %v19232_v44  ;;  %v19469_v10 = vld [vmem:[#allocation46_spill] sm:$0xff]  ;;  %v19472_v62 = vld [vmem:[#allocation51_spill] sm:$0xff]  ;;  %v19474_v33 = vld [vmem:[#allocation53_spill] sm:$0xff] }
 0x501   :  { %v15712_v3 = vsub.f32 %v6016_v32, %v10323_v35  ;;  %v19471_v43 = vld [vmem:[#allocation50_spill] sm:$0xff]  ;;  %v15715_v41 = vsub.f32 %v6018_v59, %v10325_v27  ;;  %v19477_v56 = vld [vmem:[#allocation15_spill] sm:$0xff]  ;;  %v19479_v35 = vld [vmem:[#allocation56_spill] sm:$0xff] }
 0x502   :  { %v5318_v6 = vadd.f32 %v11283_v17, %v5278_v4  ;;  %11564 = vmatpush3.bf16.msra.mxu0 %v19468_v20  ;;  %v10238_v17 = vsel %vm5102_vm13, 1.0, %v19232_v44  ;;  %vm6027_vm4 = vcmp.gt.f32.partialorder %v15697_v22, 1.0  ;;  %vm6029_vm5 = vcmp.gt.f32.partialorder %v15699_v55, 1.0  ;;  %v19475_v32 = vld [vmem:[#allocation54_spill] sm:$0xff]  ;;  %v19476_v4 = vld [vmem:[#allocation13_spill] sm:$0xff]  ;;  %v19478_v59 = vld [vmem:[#allocation55_spill] sm:$0xff] }
 0x503   :  { %11586 = vmatpush3.bf16.msra.mxu1 %v19469_v10  ;;  %11565 = vmatprep.subr.bf16.mxu0 %v19470_v26  ;;  %vm6032_vm6 = vcmp.gt.f32.partialorder %v15712_v3, 1.0  ;;  %vm10354_vm15 = vmpackc.low %vm6027_vm4, %vm6027_vm4  ;;  %vm6034_vm0 = vcmp.gt.f32.partialorder %v15715_v41, 1.0  ;;  %v19482_v27 = vld [vmem:[#allocation48_spill] sm:$0xff] }
 0x504   :  { %v5324_v8 = vadd.f32 %v5323_v18, %v5318_v6  ;;  %11587 = vmatprep.subr.bf16.mxu1 %v19471_v43  ;;  %vm10358_vm1 = vmpackc.low %vm6029_vm5, %vm6029_vm5  ;;  %v19480_v6 = vld [vmem:[#allocation47_spill] sm:$0xff]  ;;  %v19481_v18 = vld [vmem:[#allocation12_spill] sm:$0xff] }
 0x505   :  { %vm10360_vm2 = vmpackc.low %vm6032_vm6, %vm6032_vm6 }
 0x506   :  { %v15719_v12 = vsub.f32 %v5324_v8, %v10238_v17  ;;  %11566 = vmatpush3.bf16.msra.mxu0 %v19472_v62  ;;  %vm10364_vm3 = vmpackc.low %vm6034_vm0, %vm6034_vm0  ;;  %v19483_v8 = vld [vmem:[#allocation14_spill] sm:$0xff]  ;;  %v19484_v17 = vld [vmem:[#allocation16_spill] sm:$0xff] }
 0x507   :  { %11588 = vmatpush3.bf16.msra.mxu1 %v19473_v47  ;;  %11595 = vmatprep.subr.bf16.mxu0 %v19474_v33  ;;  %v19488_v33 = vld [vmem:[#allocation20_spill] sm:$0xff] }
 0x508   :  { %10265 = vst [vmem:[%s18713_s5 + $0x28] sm:$0xff] %v15719_v12  ;;  %11617 = vmatprep.subr.bf16.mxu1 %v19475_v32  ;;  %v19487_v32 = vld [vmem:[#allocation19_spill] sm:$0xff] }
 0x509   :  { %10355 = vmatmul.mubr.msk.bf16.vlgmr.msra.gmra.mrb[80].mxu0 %vm10354_vm15, %v19212_v14  ;;  %vm5326_vm15 = vcmp.gt.f32.partialorder %v15719_v12, 1.0 }
 0x50a   :  { %10359 = vmatmul.mubr.msk.bf16.vlgmr.msra.gmra.mrb[80].mxu1 %vm10358_vm1, %v19212_v14  ;;  %11596 = vmatpush3.bf16.msra.mxu0 %v19476_v4  ;;  %v19486_v4 = vld [vmem:[#allocation18_spill] sm:$0xff] }
 0x50b   :  { %10361 = vmatprep.mubr.msk.bf16.mxu0 %vm10360_vm2, %v19212_v14  ;;  %11618 = vmatpush3.bf16.msra.mxu1 %v19477_v56  ;;  %v19485_v56 = vld [vmem:[#allocation17_spill] sm:$0xff] }
 0x50c   :  { %10365 = vmatprep.mubr.msk.bf16.mxu1 %vm10364_vm3, %v19212_v14  ;;  %11597 = vmatprep.subr.bf16.mxu0 %v19478_v59  ;;  %v19489_v59 = vld [vmem:[#allocation21_spill] sm:$0xff] }
 0x50d   :  { %11619 = vmatprep.subr.bf16.mxu1 %v19479_v35  ;;  %v19490_v35 = vld [vmem:[#allocation22_spill] sm:$0xff] }
 0x50e   :  { %11598 = vmatpush3.bf16.msra.mxu0 %v19480_v6  ;;  %v19491_v6 = vld [vmem:[#allocation23_spill] sm:$0xff] }
 0x50f   :  { %11620 = vmatpush3.bf16.msra.mxu1 %v19481_v18  ;;  %11599 = vmatprep.subr.bf16.mxu0 %v19482_v27  ;;  %v6007_v27 = vmul.f32 0.95, %v15602_v9  ;;  %v19492_v18 = vld [vmem:[#allocation24_spill] sm:$0xff]  ;;  %v10345_v9 = vsel %vm6028_vm14, 1.0, %v19232_v44 }
 0x510   :  { %11621 = vmatprep.subr.bf16.mxu1 %v19483_v8  ;;  %v6009_v8 = vmul.f32 0.95, %v15612_v53 }
 0x512   :  { %11600 = vmatpush3.bf16.msra.mxu0 %v19484_v17  ;;  %v19493_v17 = vld [vmem:[#allocation25_spill] sm:$0xff] }
 0x513   :  { %11622 = vmatpush3.bf16.msra.mxu1 %v19485_v56  ;;  %11601 = vmatprep.subr.bf16.mxu0 %v19486_v4  ;;  %v6228_v56 = vmul.f32 0.95, %v15623_v39  ;;  %v19494_v4 = vld [vmem:[#allocation26_spill] sm:$0xff] }
 0x514   :  { %11623 = vmatprep.subr.bf16.mxu1 %v19487_v32 }
 0x516   :  { %11602 = vmatpush3.bf16.msra.mxu0 %v19488_v33  ;;  %v6230_v33 = vmul.f32 0.95, %v15628_v38  ;;  %v19496_v38 = vld [vmem:[#allocation41_spill] sm:$0xff] }
 0x517   :  { %11624 = vmatpush3.bf16.msra.mxu1 %v19489_v59  ;;  %11603 = vmatprep.subr.bf16.mxu0 %v19490_v35  ;;  %v19495_v59 = vld [vmem:[#allocation29_spill] sm:$0xff] }
 0x518   :  { %11625 = vmatprep.subr.bf16.mxu1 %v19491_v6  ;;  %v6015_v6 = vadd.f32 %v14009_v57, %v6007_v27  ;;  %v10322_v27 = vsel %vm5807_vm8, 1.0, %v19232_v44 }
 0x51a   :  { %11604 = vmatpush3.bf16.msra.mxu0 %v19492_v18  ;;  %v6017_v18 = vadd.f32 %v14013_v46, %v6009_v8  ;;  %v6229_v8 = vmul.f32 0.95, %v15699_v55  ;;  %v5547_v55 = vmul.f32 0.95, %v15719_v12 }
 0x51b   :  { %11626 = vmatpush3.bf16.msra.mxu1 %v19493_v17  ;;  %11605 = vmatprep.subr.bf16.mxu0 %v19494_v4 }
 0x51c   :  { %v11303_v32 = vpop.f32.mrb[56].mxu0  ;;  %11627 = vmatprep.subr.bf16.mxu1 %v19495_v59  ;;  %v6236_v59 = vadd.f32 %v19261_v13, %v6228_v56 }
 0x51d   :  { %v11325_v35 = vpop.f32.mrb[56].mxu1  ;;  %v11304_v47 = vpop.f32.mrb[57].mxu0 }
 0x51e   :  { %v11305_v62 = vadd.f32 %v11304_v47, %v11303_v32  ;;  %v11326_v43 = vpop.f32.mrb[57].mxu1  ;;  %v11306_v26 = vpop.f32.mrb[58].mxu0  ;;  %11606 = vmatpush3.bf16.msra.mxu0 %v15580_v40  ;;  %v15781_v47 = vld [vmem:[#allocation7] ss:$0 sm:$0xff]  ;;  %v15804_v53 = vsub.f32 %v6236_v59, %v10345_v9 }
 0x51f   :  { %v11327_v10 = vadd.f32 %v11326_v43, %v11325_v35  ;;  %v11328_v17 = vpop.f32.mrb[58].mxu1  ;;  %11628 = vmatpush3.bf16.msra.mxu1 %v15584_v54  ;;  %v11307_v4 = vpop.f32.mrb[59].mxu0  ;;  %11607 = vmatprep.subr.bf16.mxu0 %v15587_v2  ;;  %v6238_v43 = vadd.f32 %v19263_v0, %v6230_v33  ;;  %v15789_v35 = vsub.f32 %v6015_v6, %v10322_v27  ;;  %v10347_v33 = vsel %vm6030_vm7, 1.0, %v19232_v44  ;;  %v19498_v59 = vld [vmem:[#allocation43_spill] sm:$0xff]  ;;  %v19499_v6 = vld [vmem:[#allocation44_spill] sm:$0xff] }
 0x520   :  { %v5422_v26 = vadd.f32 %v15781_v47, %v11305_v62  ;;  %v11329_v32 = vpop.f32.mrb[59].mxu1  ;;  %11629 = vmatprep.subr.bf16.mxu1 %v15595_v7  ;;  %v10324_v4 = vsel %vm5809_vm11, 1.0, %v19232_v44  ;;  %vm6252_vm14 = vcmp.gt.f32.partialorder %v15804_v53, 1.0  ;;  %v19500_v17 = vld [vmem:[#allocation45_spill] sm:$0xff]  ;;  %v6232_v27 = vmul.f32 0.95, %v15712_v3 }
 0x521   :  { %v15797_v62 = vsub.f32 %v6017_v18, %v10324_v4  ;;  %v15807_v39 = vsub.f32 %v6238_v43, %v10347_v33  ;;  %vm6031_vm8 = vcmp.gt.f32.partialorder %v15789_v35, 1.0  ;;  %vm10378_vm12 = vmpackc.low %vm6252_vm14, %vm6252_vm14  ;;  %v6227_v18 = vmul.f32 0.95, %v15697_v22  ;;  %v19502_v32 = vld [vmem:[#allocation57_spill] sm:$0xff]  ;;  %v19503_v9 = vld [vmem:[#allocation27_spill] sm:$0xff] }
 0x522   :  { %v15794_v56 = vadd.f32 %v11327_v10, %v5422_v26  ;;  %11608 = vmatpush3.bf16.msra.mxu0 %v15609_v23  ;;  %vm10362_vm7 = vmpackc.low %vm6031_vm8, %vm6031_vm8  ;;  %v19497_v10 = vld [vmem:[#allocation42_spill] sm:$0xff]  ;;  %v6234_v43 = vmul.f32 0.95, %v15715_v41  ;;  %v10349_v22 = vsel %vm6032_vm6, 1.0, %v19232_v44  ;;  %v19508_v41 = vld [vmem:[#allocation52_spill] sm:$0xff] }
 0x523   :  { %11630 = vmatpush3.bf16.msra.mxu1 %v15617_v63  ;;  %11609 = vmatprep.subr.bf16.mxu0 %v15620_v45  ;;  %vm6033_vm11 = vcmp.gt.f32.partialorder %v15797_v62, 1.0  ;;  %vm6254_vm9 = vcmp.gt.f32.partialorder %v15807_v39, 1.0  ;;  %v19501_v26 = vld [vmem:[#allocation58_spill] sm:$0xff] }
 0x524   :  { %11631 = vmatprep.subr.bf16.mxu1 %v15625_v24  ;;  %vm10366_vm10 = vmpackc.low %vm6033_vm11, %vm6033_vm11 }
 0x525   :  { %vm10382_vm13 = vmpackc.low %vm6254_vm9, %vm6254_vm9 }
 0x526   :  { %11610 = vmatpush3.bf16.msra.mxu0 %v15631_v42 }
 0x527   :  { %11632 = vmatpush3.bf16.msra.mxu1 %v15635_v52  ;;  %11639 = vmatprep.subr.bf16.mxu0 %v15335_v25 }
 0x528   :  { %11661 = vmatprep.subr.bf16.mxu1 %v15342_v21 }
 0x529   :  { %10363 = vmatmul.mubr.msk.bf16.vlgmr.msra.gmra.mrb[84].mxu0 %vm10362_vm7, %v19212_v14 }
 0x52a   :  { %10367 = vmatmul.mubr.msk.bf16.vlgmr.msra.gmra.mrb[84].mxu1 %vm10366_vm10, %v19212_v14  ;;  %11640 = vmatpush3.bf16.msra.mxu0 %v15351_v29 }
 0x52b   :  { %10379 = vmatprep.mubr.msk.bf16.mxu0 %vm10378_vm12, %v19212_v14  ;;  %11662 = vmatpush3.bf16.msra.mxu1 %v15358_v28 }
 0x52c   :  { %10383 = vmatprep.mubr.msk.bf16.mxu1 %vm10382_vm13, %v19212_v14  ;;  %11641 = vmatprep.subr.bf16.mxu0 %v15365_v34 }
 0x52d   :  { %11663 = vmatprep.subr.bf16.mxu1 %v15368_v19 }
 0x52e   :  { %11642 = vmatpush3.bf16.msra.mxu0 %v15371_v48 }
 0x52f   :  { %11664 = vmatpush3.bf16.msra.mxu1 %v15374_v58  ;;  %11643 = vmatprep.subr.bf16.mxu0 %v15377_v30 }
 0x530   :  { %11665 = vmatprep.subr.bf16.mxu1 %v15380_v37 }
 0x532   :  { %11644 = vmatpush3.bf16.msra.mxu0 %v15383_v1 }
 0x533   :  { %11666 = vmatpush3.bf16.msra.mxu1 %v15386_v61  ;;  %11645 = vmatprep.subr.bf16.mxu0 %v15389_v49 }
 0x534   :  { %11667 = vmatprep.subr.bf16.mxu1 %v15392_v36 }
 0x536   :  { %11646 = vmatpush3.bf16.msra.mxu0 %v19496_v38 }
 0x537   :  { %11668 = vmatpush3.bf16.msra.mxu1 %v19497_v10  ;;  %11647 = vmatprep.subr.bf16.mxu0 %v19498_v59  ;;  %v6237_v10 = vadd.f32 %v13871_v51, %v6229_v8 }
 0x538   :  { %11669 = vmatprep.subr.bf16.mxu1 %v19499_v6  ;;  %v6235_v6 = vadd.f32 %v13868_v50, %v6227_v18  ;;  %v10344_v18 = vsel %vm6027_vm4, 1.0, %v19232_v44 }
 0x53a   :  { %11648 = vmatpush3.bf16.msra.mxu0 %v19500_v17 }
 0x53b   :  { %11670 = vmatpush3.bf16.msra.mxu1 %v19501_v26  ;;  %11649 = vmatprep.subr.bf16.mxu0 %v19502_v32 }
 0x53c   :  { %v11347_v4 = vpop.f32.mrb[60].mxu0  ;;  %11671 = vmatprep.subr.bf16.mxu1 %v19503_v9  ;;  %v6240_v9 = vadd.f32 %v19242_v15, %v6232_v27 }
 0x53d   :  { %v11369_v33 = vpop.f32.mrb[60].mxu1  ;;  %v11348_v59 = vpop.f32.mrb[61].mxu0 }
 0x53e   :  { %v11349_v38 = vadd.f32 %v11348_v59, %v11347_v4  ;;  %v11370_v36 = vpop.f32.mrb[61].mxu1  ;;  %v11350_v17 = vpop.f32.mrb[62].mxu0  ;;  %11650 = vmatpush3.bf16.msra.mxu0 %v15425_v5  ;;  %v10346_v59 = vsel %vm6029_vm5, 1.0, %v19232_v44  ;;  %v19506_v4 = vld [vmem:[#allocation50_spill] sm:$0xff] }
 0x53f   :  { %v11371_v49 = vadd.f32 %v11370_v36, %v11369_v33  ;;  %v11372_v26 = vpop.f32.mrb[62].mxu1  ;;  %11672 = vmatpush3.bf16.msra.mxu1 %v15428_v11  ;;  %v11351_v32 = vpop.f32.mrb[63].mxu0  ;;  %11651 = vmatprep.subr.bf16.mxu0 %v15431_v16  ;;  %v6242_v36 = vadd.f32 %v19244_v31, %v6234_v43  ;;  %v19507_v33 = vld [vmem:[#allocation51_spill] sm:$0xff] }
 0x540   :  { %v5502_v8 = vadd.f32 %v11349_v38, %v15794_v56  ;;  %v11373_v17 = vpop.f32.mrb[63].mxu1  ;;  %11673 = vmatprep.subr.bf16.mxu1 %v15442_v60  ;;  %v15872_v26 = vsub.f32 %v6235_v6, %v10344_v18  ;;  %v15874_v32 = vsub.f32 %v6237_v10, %v10346_v59  ;;  %v10351_v56 = vsel %vm6034_vm0, 1.0, %v19232_v44  ;;  %v19504_v38 = vld [vmem:[#allocation46_spill] sm:$0xff]  ;;  %v19505_v6 = vld [vmem:[#allocation49_spill] sm:$0xff] }
 0x541   :  { %v15887_v10 = vsub.f32 %v6240_v9, %v10349_v22  ;;  %v15890_v3 = vsub.f32 %v6242_v36, %v10351_v56  ;;  %v19509_v18 = vld [vmem:[#allocation53_spill] sm:$0xff]  ;;  %v19510_v9 = vld [vmem:[#allocation54_spill] sm:$0xff]  ;;  %v19513_v17 = vld [vmem:[#allocation55_spill] sm:$0xff] }
 0x542   :  { %v5542_v27 = vadd.f32 %v11371_v49, %v5502_v8  ;;  %11652 = vmatpush3.bf16.msra.mxu0 %v19468_v20  ;;  %v10264_v49 = vsel %vm5326_vm15, 1.0, %v19232_v44  ;;  %vm6251_vm4 = vcmp.gt.f32.partialorder %v15872_v26, 1.0  ;;  %vm6253_vm5 = vcmp.gt.f32.partialorder %v15874_v32, 1.0  ;;  %v19511_v59 = vld [vmem:[#allocation13_spill] sm:$0xff]  ;;  %v19512_v8 = vld [vmem:[#allocation15_spill] sm:$0xff]  ;;  %v19514_v36 = vld [vmem:[#allocation56_spill] sm:$0xff] }
 0x543   :  { %11674 = vmatpush3.bf16.msra.mxu1 %v19504_v38  ;;  %11653 = vmatprep.subr.bf16.mxu0 %v19505_v6  ;;  %vm6256_vm6 = vcmp.gt.f32.partialorder %v15887_v10, 1.0  ;;  %vm10380_vm0 = vmpackc.low %vm6251_vm4, %vm6251_vm4  ;;  %vm6258_vm1 = vcmp.gt.f32.partialorder %v15890_v3, 1.0  ;;  %v19515_v22 = vld [vmem:[#allocation47_spill] sm:$0xff]  ;;  %v19518_v56 = vld [vmem:[#allocation14_spill] sm:$0xff] }
 0x544   :  { %v5548_v43 = vadd.f32 %v5547_v55, %v5542_v27  ;;  %11675 = vmatprep.subr.bf16.mxu1 %v19506_v4  ;;  %vm10384_vm2 = vmpackc.low %vm6253_vm5, %vm6253_vm5  ;;  %v19516_v27 = vld [vmem:[#allocation12_spill] sm:$0xff] }
 0x545   :  { %vm10386_vm3 = vmpackc.low %vm6256_vm6, %vm6256_vm6  ;;  %v19517_v55 = vld [vmem:[#allocation48_spill] sm:$0xff] }
 0x546   :  { %v15894_v12 = vsub.f32 %v5548_v43, %v10264_v49  ;;  %11654 = vmatpush3.bf16.msra.mxu0 %v19507_v33  ;;  %vm10390_vm7 = vmpackc.low %vm6258_vm1, %vm6258_vm1  ;;  %v19519_v43 = vld [vmem:[#allocation16_spill] sm:$0xff]  ;;  %v19520_v49 = vld [vmem:[#allocation17_spill] sm:$0xff] }
 0x547   :  { %11676 = vmatpush3.bf16.msra.mxu1 %v19508_v41  ;;  %11683 = vmatprep.subr.bf16.mxu0 %v19509_v18 }
 0x548   :  { %10291 = vst [vmem:[%s18713_s5 + $0x30] sm:$0xff] %v15894_v12  ;;  %11705 = vmatprep.subr.bf16.mxu1 %v19510_v9  ;;  %v19523_v9 = vld [vmem:[#allocation20_spill] sm:$0xff] }
 0x549   :  { %10381 = vmatmul.mubr.msk.bf16.vlgmr.msra.gmra.mrb[88].mxu0 %vm10380_vm0, %v19212_v14  ;;  %vm5550_vm0 = vcmp.gt.f32.partialorder %v15894_v12, 1.0 }
 0x54a   :  { %10385 = vmatmul.mubr.msk.bf16.vlgmr.msra.gmra.mrb[88].mxu1 %vm10384_vm2, %v19212_v14  ;;  %11684 = vmatpush3.bf16.msra.mxu0 %v19511_v59  ;;  %v19522_v59 = vld [vmem:[#allocation19_spill] sm:$0xff] }
 0x54b   :  { %10387 = vmatprep.mubr.msk.bf16.mxu0 %vm10386_vm3, %v19212_v14  ;;  %11706 = vmatpush3.bf16.msra.mxu1 %v19512_v8  ;;  %v19521_v8 = vld [vmem:[#allocation18_spill] sm:$0xff] }
 0x54c   :  { %10391 = vmatprep.mubr.msk.bf16.mxu1 %vm10390_vm7, %v19212_v14  ;;  %11685 = vmatprep.subr.bf16.mxu0 %v19513_v17  ;;  %v19524_v17 = vld [vmem:[#allocation21_spill] sm:$0xff] }
 0x54d   :  { %11707 = vmatprep.subr.bf16.mxu1 %v19514_v36  ;;  %v19525_v36 = vld [vmem:[#allocation22_spill] sm:$0xff] }
 0x54e   :  { %11686 = vmatpush3.bf16.msra.mxu0 %v19515_v22  ;;  %v19526_v22 = vld [vmem:[#allocation23_spill] sm:$0xff] }
 0x54f   :  { %11708 = vmatpush3.bf16.msra.mxu1 %v19516_v27  ;;  %11687 = vmatprep.subr.bf16.mxu0 %v19517_v55  ;;  %v6231_v55 = vmul.f32 0.95, %v15789_v35  ;;  %v19527_v27 = vld [vmem:[#allocation24_spill] sm:$0xff] }
 0x550   :  { %11709 = vmatprep.subr.bf16.mxu1 %v19518_v56  ;;  %v6233_v56 = vmul.f32 0.95, %v15797_v62 }
 0x552   :  { %11688 = vmatpush3.bf16.msra.mxu0 %v19519_v43  ;;  %v19528_v43 = vld [vmem:[#allocation25_spill] sm:$0xff] }
 0x553   :  { %11710 = vmatpush3.bf16.msra.mxu1 %v19520_v49  ;;  %11689 = vmatprep.subr.bf16.mxu0 %v19521_v8  ;;  %v6452_v49 = vmul.f32 0.95, %v15804_v53  ;;  %v19529_v8 = vld [vmem:[#allocation26_spill] sm:$0xff] }
 0x554   :  { %11711 = vmatprep.subr.bf16.mxu1 %v19522_v59 }
 0x556   :  { %11690 = vmatpush3.bf16.msra.mxu0 %v19523_v9  ;;  %v6454_v9 = vmul.f32 0.95, %v15807_v39  ;;  %v6458_v39 = vmul.f32 0.95, %v15890_v3  ;;  %v19545_v3 = vld [vmem:[#allocation53_spill] sm:$0xff] }
 0x557   :  { %11712 = vmatpush3.bf16.msra.mxu1 %v19524_v17  ;;  %11691 = vmatprep.subr.bf16.mxu0 %v19525_v36  ;;  %v19530_v17 = vld [vmem:[#allocation29_spill] sm:$0xff] }
 0x558   :  { %11713 = vmatprep.subr.bf16.mxu1 %v19526_v22  ;;  %v6239_v22 = vadd.f32 %v14009_v57, %v6231_v55  ;;  %v10348_v55 = vsel %vm6031_vm8, 1.0, %v19232_v44 }
 0x55a   :  { %11692 = vmatpush3.bf16.msra.mxu0 %v19527_v27  ;;  %v6241_v27 = vadd.f32 %v14013_v46, %v6233_v56 }
 0x55b   :  { %11714 = vmatpush3.bf16.msra.mxu1 %v19528_v43  ;;  %11693 = vmatprep.subr.bf16.mxu0 %v19529_v8 }
 0x55c   :  { %v11391_v59 = vpop.f32.mrb[64].mxu0  ;;  %11715 = vmatprep.subr.bf16.mxu1 %v19530_v17  ;;  %v6460_v17 = vadd.f32 %v19261_v13, %v6452_v49 }
 0x55d   :  { %v11413_v36 = vpop.f32.mrb[64].mxu1  ;;  %v11392_v18 = vpop.f32.mrb[65].mxu0 }
 0x55e   :  { %v11393_v41 = vadd.f32 %v11392_v18, %v11391_v59  ;;  %v11414_v33 = vpop.f32.mrb[65].mxu1  ;;  %v11394_v4 = vpop.f32.mrb[66].mxu0  ;;  %11694 = vmatpush3.bf16.msra.mxu0 %v15580_v40  ;;  %v6462_v59 = vadd.f32 %v19263_v0, %v6454_v9  ;;  %v19540_v9 = vld [vmem:[#allocation27_spill] sm:$0xff] }
 0x55f   :  { %v11415_v6 = vadd.f32 %v11414_v33, %v11413_v36  ;;  %v11416_v43 = vpop.f32.mrb[66].mxu1  ;;  %11716 = vmatpush3.bf16.msra.mxu1 %v15584_v54  ;;  %v11395_v8 = vpop.f32.mrb[67].mxu0  ;;  %11695 = vmatprep.subr.bf16.mxu0 %v15587_v2  ;;  %v10350_v33 = vsel %vm6033_vm11, 1.0, %v19232_v44  ;;  %v10371_v36 = vsel %vm6252_vm14, 1.0, %v19232_v44 }
 0x560   :  { %v5646_v18 = vadd.f32 %v15781_v47, %v11393_v41  ;;  %v11417_v4 = vpop.f32.mrb[67].mxu1  ;;  %11717 = vmatprep.subr.bf16.mxu1 %v15595_v7  ;;  %v15962_v8 = vsub.f32 %v6239_v22, %v10348_v55  ;;  %v15970_v35 = vsub.f32 %v6241_v27, %v10350_v33  ;;  %v10373_v41 = vsel %vm6254_vm9, 1.0, %v19232_v44 }
 0x561   :  { %v15977_v62 = vsub.f32 %v6460_v17, %v10371_v36  ;;  %v15980_v53 = vsub.f32 %v6462_v59, %v10373_v41  ;;  %v10370_v41 = vsel %vm6251_vm4, 1.0, %v19232_v44 }
 0x562   :  { %v15967_v56 = vadd.f32 %v11415_v6, %v5646_v18  ;;  %11696 = vmatpush3.bf16.msra.mxu0 %v15609_v23  ;;  %vm6255_vm8 = vcmp.gt.f32.partialorder %v15962_v8, 1.0  ;;  %vm6257_vm11 = vcmp.gt.f32.partialorder %v15970_v35, 1.0 }
 0x563   :  { %11718 = vmatpush3.bf16.msra.mxu1 %v15617_v63  ;;  %11697 = vmatprep.subr.bf16.mxu0 %v15620_v45  ;;  %vm6476_vm14 = vcmp.gt.f32.partialorder %v15977_v62, 1.0  ;;  %vm10388_vm9 = vmpackc.low %vm6255_vm8, %vm6255_vm8  ;;  %vm6478_vm10 = vcmp.gt.f32.partialorder %v15980_v53, 1.0 }
 0x564   :  { %11719 = vmatprep.subr.bf16.mxu1 %v15625_v24  ;;  %vm10392_vm12 = vmpackc.low %vm6257_vm11, %vm6257_vm11 }
 0x565   :  { %vm10404_vm13 = vmpackc.low %vm6476_vm14, %vm6476_vm14 }
 0x566   :  { %11698 = vmatpush3.bf16.msra.mxu0 %v15631_v42  ;;  %vm10408_vm15 = vmpackc.low %vm6478_vm10, %vm6478_vm10 }
 0x567   :  { %11720 = vmatpush3.bf16.msra.mxu1 %v15635_v52  ;;  %11727 = vmatprep.subr.bf16.mxu0 %v15335_v25  ;;  %v19531_v25 = vld [vmem:[#allocation39_spill] sm:$0xff] }
 0x568   :  { %11749 = vmatprep.subr.bf16.mxu1 %v15342_v21  ;;  %v19532_v21 = vld [vmem:[#allocation40_spill] sm:$0xff] }
 0x569   :  { %10389 = vmatmul.mubr.msk.bf16.vlgmr.msra.gmra.mrb[92].mxu0 %vm10388_vm9, %v19212_v14 }
 0x56a   :  { %10393 = vmatmul.mubr.msk.bf16.vlgmr.msra.gmra.mrb[92].mxu1 %vm10392_vm12, %v19212_v14  ;;  %11728 = vmatpush3.bf16.msra.mxu0 %v15351_v29  ;;  %v19533_v29 = vld [vmem:[#allocation41_spill] sm:$0xff] }
 0x56b   :  { %10405 = vmatprep.mubr.msk.bf16.mxu0 %vm10404_vm13, %v19212_v14  ;;  %11750 = vmatpush3.bf16.msra.mxu1 %v15358_v28  ;;  %v19534_v28 = vld [vmem:[#allocation42_spill] sm:$0xff] }
 0x56c   :  { %10409 = vmatprep.mubr.msk.bf16.mxu1 %vm10408_vm15, %v19212_v14  ;;  %11729 = vmatprep.subr.bf16.mxu0 %v15365_v34  ;;  %v19535_v34 = vld [vmem:[#allocation43_spill] sm:$0xff] }
 0x56d   :  { %11751 = vmatprep.subr.bf16.mxu1 %v15368_v19  ;;  %v19536_v19 = vld [vmem:[#allocation44_spill] sm:$0xff] }
 0x56e   :  { %11730 = vmatpush3.bf16.msra.mxu0 %v15371_v48  ;;  %v6451_v48 = vmul.f32 0.95, %v15872_v26  ;;  %v10375_v26 = vsel %vm6256_vm6, 1.0, %v19232_v44 }
 0x56f   :  { %11752 = vmatpush3.bf16.msra.mxu1 %v15374_v58  ;;  %11731 = vmatprep.subr.bf16.mxu0 %v15377_v30  ;;  %v6453_v58 = vmul.f32 0.95, %v15874_v32  ;;  %v19537_v30 = vld [vmem:[#allocation45_spill] sm:$0xff]  ;;  %v5771_v32 = vmul.f32 0.95, %v15894_v12  ;;  %v19543_v12 = vld [vmem:[#allocation51_spill] sm:$0xff] }
 0x570   :  { %11753 = vmatprep.subr.bf16.mxu1 %v15380_v37  ;;  %v6456_v37 = vmul.f32 0.95, %v15887_v10  ;;  %v6459_v27 = vadd.f32 %v13868_v50, %v6451_v48  ;;  %v19542_v48 = vld [vmem:[#allocation50_spill] sm:$0xff] }
 0x571   :  { %v6461_v43 = vadd.f32 %v13871_v51, %v6453_v58  ;;  %v10290_v58 = vsel %vm5550_vm0, 1.0, %v19232_v44 }
 0x572   :  { %11732 = vmatpush3.bf16.msra.mxu0 %v15383_v1  ;;  %v19538_v1 = vld [vmem:[#allocation58_spill] sm:$0xff]  ;;  %v6464_v36 = vadd.f32 %v19242_v15, %v6456_v37  ;;  %v19547_v37 = vld [vmem:[#allocation13_spill] sm:$0xff] }
 0x573   :  { %11754 = vmatpush3.bf16.msra.mxu1 %v15386_v61  ;;  %11733 = vmatprep.subr.bf16.mxu0 %v19531_v25  ;;  %v19539_v61 = vld [vmem:[#allocation57_spill] sm:$0xff]  ;;  %v10372_v25 = vsel %vm6253_vm5, 1.0, %v19232_v44 }
 0x574   :  { %11755 = vmatprep.subr.bf16.mxu1 %v19532_v21 }
 0x576   :  { %11734 = vmatpush3.bf16.msra.mxu0 %v19533_v29  ;;  %v16045_v29 = vsub.f32 %v6459_v27, %v10370_v41  ;;  %v19555_v27 = vld [vmem:[#allocation16_spill] sm:$0xff]  ;;  %v6457_v41 = vmul.f32 0.95, %v15970_v35 }
 0x577   :  { %11756 = vmatpush3.bf16.msra.mxu1 %v19534_v28  ;;  %11735 = vmatprep.subr.bf16.mxu0 %v19535_v34  ;;  %v16060_v34 = vsub.f32 %v6464_v36, %v10375_v26  ;;  %v6455_v36 = vmul.f32 0.95, %v15962_v8  ;;  %v6678_v26 = vmul.f32 0.95, %v15980_v53  ;;  %v16195_v53 = vld [vmem:[#allocation6 + $0x8] sm:$0xff]  }
 0x578   :  { %11757 = vmatprep.subr.bf16.mxu1 %v19536_v19  ;;  %vm6475_vm4 = vcmp.gt.f32.partialorder %v16045_v29, 1.0 }
 0x579   :  { %vm6480_vm6 = vcmp.gt.f32.partialorder %v16060_v34, 1.0 }
 0x57a   :  { %11736 = vmatpush3.bf16.msra.mxu0 %v19537_v30  ;;  %v19546_v30 = vld [vmem:[#allocation54_spill] sm:$0xff]  ;;  %vm10412_vm7 = vmpackc.low %vm6480_vm6, %vm6480_vm6 }
 0x57b   :  { %11758 = vmatpush3.bf16.msra.mxu1 %v19538_v1  ;;  %11737 = vmatprep.subr.bf16.mxu0 %v19539_v61  ;;  %v19548_v1 = vld [vmem:[#allocation15_spill] sm:$0xff] }
 0x57c   :  { %v11435_v6 = vpop.f32.mrb[68].mxu0  ;;  %11759 = vmatprep.subr.bf16.mxu1 %v19540_v9  ;;  %v19549_v61 = vld [vmem:[#allocation55_spill] sm:$0xff]  ;;  %v19552_v9 = vld [vmem:[#allocation12_spill] sm:$0xff] }
 0x57d   :  { %v11457_v17 = vpop.f32.mrb[68].mxu1  ;;  %v11436_v22 = vpop.f32.mrb[69].mxu0 }
 0x57e   :  { %v11437_v49 = vadd.f32 %v11436_v22, %v11435_v6  ;;  %v11458_v55 = vpop.f32.mrb[69].mxu1  ;;  %v11438_v18 = vpop.f32.mrb[70].mxu0  ;;  %11738 = vmatpush3.bf16.msra.mxu0 %v15425_v5  ;;  %v19551_v6 = vld [vmem:[#allocation47_spill] sm:$0xff]  ;;  %v19554_v22 = vld [vmem:[#allocation14_spill] sm:$0xff] }
 0x57f   :  { %v11459_v4 = vadd.f32 %v11458_v55, %v11457_v17  ;;  %v11460_v59 = vpop.f32.mrb[70].mxu1  ;;  %11760 = vmatpush3.bf16.msra.mxu1 %v15428_v11  ;;  %v11439_v33 = vpop.f32.mrb[71].mxu0  ;;  %11739 = vmatprep.subr.bf16.mxu0 %v15431_v16  ;;  %v6466_v11 = vadd.f32 %v19244_v31, %v6458_v39  ;;  %v16047_v16 = vsub.f32 %v6461_v43, %v10372_v25  ;;  %v19550_v39 = vld [vmem:[#allocation56_spill] sm:$0xff]  ;;  %v19556_v43 = vld [vmem:[#allocation17_spill] sm:$0xff]  ;;  %v19558_v55 = vld [vmem:[#allocation19_spill] sm:$0xff] }
 0x580   :  { %v5726_v21 = vadd.f32 %v11437_v49, %v15967_v56  ;;  %v11461_v5 = vpop.f32.mrb[71].mxu1  ;;  %11761 = vmatprep.subr.bf16.mxu1 %v15442_v60  ;;  %v10377_v60 = vsel %vm6258_vm1, 1.0, %v19232_v44  ;;  %v19541_v56 = vld [vmem:[#allocation49_spill] sm:$0xff]  ;;  %vm10406_vm1 = vmpackc.low %vm6475_vm4, %vm6475_vm4  ;;  %v19553_v17 = vld [vmem:[#allocation48_spill] sm:$0xff] }
 0x581   :  { %v16063_v10 = vsub.f32 %v6466_v11, %v10377_v60  ;;  %vm6477_vm5 = vcmp.gt.f32.partialorder %v16047_v16, 1.0  ;;  %v19557_v49 = vld [vmem:[#allocation18_spill] sm:$0xff]  ;;  %v19559_v18 = vld [vmem:[#allocation20_spill] sm:$0xff]  ;;  %v19562_v33 = vld [vmem:[#allocation23_spill] sm:$0xff] }
 0x582   :  { %v5766_v28 = vadd.f32 %v11459_v4, %v5726_v21  ;;  %11740 = vmatpush3.bf16.msra.mxu0 %v19468_v20  ;;  %vm10410_vm3 = vmpackc.low %vm6477_vm5, %vm6477_vm5  ;;  %v19560_v4 = vld [vmem:[#allocation21_spill] sm:$0xff]  ;;  %v19561_v59 = vld [vmem:[#allocation22_spill] sm:$0xff]  ;;  %v6676_v21 = vmul.f32 0.95, %v15977_v62 }
 0x583   :  { %11762 = vmatpush3.bf16.msra.mxu1 %v19504_v38  ;;  %11741 = vmatprep.subr.bf16.mxu0 %v19541_v56  ;;  %v19544_v38 = vld [vmem:[#allocation52_spill] sm:$0xff]  ;;  %vm6482_vm2 = vcmp.gt.f32.partialorder %v16063_v10, 1.0  ;;  %v19564_v5 = vld [vmem:[#allocation25_spill] sm:$0xff]  ;;  %v19565_v11 = vld [vmem:[#allocation26_spill] sm:$0xff] }
 0x584   :  { %v5772_v19 = vadd.f32 %v5771_v32, %v5766_v28  ;;  %11763 = vmatprep.subr.bf16.mxu1 %v19542_v48  ;;  %vm10416_vm9 = vmpackc.low %vm6482_vm2, %vm6482_vm2  ;;  %v19563_v25 = vld [vmem:[#allocation24_spill] sm:$0xff]  ;;  %v19566_v32 = vld [vmem:[#allocation29_spill] sm:$0xff] }
 0x586   :  { %v16067_v20 = vsub.f32 %v5772_v19, %v10290_v58  ;;  %11742 = vmatpush3.bf16.msra.mxu0 %v19543_v12  ;;  %v6463_v19 = vadd.f32 %v14009_v57, %v6455_v36  ;;  %v16225_v36 = vld [vmem:[#allocation6 + $0x60] sm:$0xff]  }
 0x587   :  { %11764 = vmatpush3.bf16.msra.mxu1 %v19544_v38  ;;  %11771 = vmatprep.subr.bf16.mxu0 %v19545_v3  ;;  %v6465_v38 = vadd.f32 %v14013_v46, %v6457_v41  ;;  %19571 = vst [vmem:[#allocation34_spill] sm:$0xff] %v16225_v36  ;;  %v16228_v41 = vld [vmem:[#allocation6 + $0xe0] sm:$0xff]  }
 0x588   :  { %10317 = vst [vmem:[%s18713_s5 + $0x38] sm:$0xff] %v16067_v20  ;;  %11793 = vmatprep.subr.bf16.mxu1 %v19546_v30  ;;  %19572 = vst [vmem:[#allocation35_spill] sm:$0xff] %v16228_v41 }
 0x589   :  { %10407 = vmatmul.mubr.msk.bf16.vlgmr.msra.gmra.mrb[96].mxu0 %vm10406_vm1, %v19212_v14  ;;  %vm5774_vm1 = vcmp.gt.f32.partialorder %v16067_v20, 1.0 }
 0x58a   :  { %10411 = vmatmul.mubr.msk.bf16.vlgmr.msra.gmra.mrb[96].mxu1 %vm10410_vm3, %v19212_v14  ;;  %11772 = vmatpush3.bf16.msra.mxu0 %v19547_v37 }
 0x58b   :  { %10413 = vmatprep.mubr.msk.bf16.mxu0 %vm10412_vm7, %v19212_v14  ;;  %11794 = vmatpush3.bf16.msra.mxu1 %v19548_v1  ;;  %v6684_v1 = vadd.f32 %v19261_v13, %v6676_v21  ;;  %v6677_v21 = vmul.f32 0.95, %v16047_v16 }
 0x58c   :  { %10417 = vmatprep.mubr.msk.bf16.mxu1 %vm10416_vm9, %v19212_v14  ;;  %11773 = vmatprep.subr.bf16.mxu0 %v19549_v61  ;;  %v10374_v61 = vsel %vm6255_vm8, 1.0, %v19232_v44 }
 0x58d   :  { %11795 = vmatprep.subr.bf16.mxu1 %v19550_v39 }
 0x58e   :  { %11774 = vmatpush3.bf16.msra.mxu0 %v19551_v6 }
 0x58f   :  { %11796 = vmatpush3.bf16.msra.mxu1 %v19552_v9  ;;  %11775 = vmatprep.subr.bf16.mxu0 %v19553_v17  ;;  %v16135_v9 = vsub.f32 %v6463_v19, %v10374_v61 }
 0x590   :  { %11797 = vmatprep.subr.bf16.mxu1 %v19554_v22  ;;  %v16198_v22 = vld [vmem:[#allocation6 + $0x88] sm:$0xff]  }
 0x591   :  { %vm6479_vm8 = vcmp.gt.f32.partialorder %v16135_v9, 1.0 }
 0x592   :  { %11776 = vmatpush3.bf16.msra.mxu0 %v19555_v27  ;;  %v16201_v27 = vld [vmem:[#allocation6 + $0x50] sm:$0xff]  }
 0x593   :  { %11798 = vmatpush3.bf16.msra.mxu1 %v19556_v43  ;;  %11777 = vmatprep.subr.bf16.mxu0 %v19557_v49  ;;  %v16204_v43 = vld [vmem:[#allocation6 + $0xd0] sm:$0xff]  }
 0x594   :  { %11799 = vmatprep.subr.bf16.mxu1 %v19558_v55  ;;  %v16207_v49 = vld [vmem:[#allocation6 + $0x10] sm:$0xff]  }
 0x595   :  { %v16210_v55 = vld [vmem:[#allocation6 + $0x90] sm:$0xff]  }
 0x596   :  { %11778 = vmatpush3.bf16.msra.mxu0 %v19559_v18  ;;  %v16213_v18 = vld [vmem:[#allocation6 + $0x58] sm:$0xff]  }
 0x597   :  { %11800 = vmatpush3.bf16.msra.mxu1 %v19560_v4  ;;  %11779 = vmatprep.subr.bf16.mxu0 %v19561_v59  ;;  %19567 = vst [vmem:[#allocation30_spill] sm:$0xff] %v16213_v18  ;;  %v16216_v4 = vld [vmem:[#allocation6 + $0xd8] sm:$0xff]  }
 0x598   :  { %11801 = vmatprep.subr.bf16.mxu1 %v19562_v33  ;;  %19568 = vst [vmem:[#allocation31_spill] sm:$0xff] %v16216_v4  ;;  %v16219_v59 = vld [vmem:[#allocation6 + $0x18] sm:$0xff]  }
 0x599   :  { %19569 = vst [vmem:[#allocation32_spill] sm:$0xff] %v16219_v59  ;;  %v16222_v33 = vld [vmem:[#allocation6 + $0x98] sm:$0xff]  }
 0x59a   :  { %11780 = vmatpush3.bf16.msra.mxu0 %v19563_v25  ;;  %19570 = vst [vmem:[#allocation33_spill] sm:$0xff] %v16222_v33  ;;  %v6675_v25 = vmul.f32 0.95, %v16045_v29  ;;  %v10401_v29 = vsel %vm6480_vm6, 1.0, %v19232_v44 }
 0x59b   :  { %11802 = vmatpush3.bf16.msra.mxu1 %v19564_v5  ;;  %11781 = vmatprep.subr.bf16.mxu0 %v19565_v11  ;;  %v16233_v5 = vld [vmem:[#allocation6 + $0x20] sm:$0xff]   ;;  %v6680_v11 = vmul.f32 0.95, %v16060_v34 }
 0x59c   :  { %v11479_v28 = vpop.f32.mrb[72].mxu0  ;;  %11803 = vmatprep.subr.bf16.mxu1 %v19566_v32  ;;  %19573 = vst [vmem:[#allocation36_spill] sm:$0xff] %v16233_v5  ;;  %v6682_v32 = vmul.f32 0.95, %v16063_v10  ;;  %v10316_v10 = vsel %vm5774_vm1, 1.0, %v19232_v44 }
 0x59d   :  { %v11501_v60 = vpop.f32.mrb[72].mxu1  ;;  %v11480_v56 = vpop.f32.mrb[73].mxu0 }
 0x59e   :  { %v11481_v48 = vadd.f32 %v11480_v56, %v11479_v28  ;;  %v11502_v58 = vpop.f32.mrb[73].mxu1  ;;  %v11482_v12 = vpop.f32.mrb[74].mxu0  ;;  %11782 = vmatpush3.bf16.msra.mxu0 %v15580_v40  ;;  %v6686_v40 = vadd.f32 %v19263_v0, %v6678_v26  ;;  %v16237_v26 = vld [vmem:[#allocation6 + $0xa0] sm:$0xff]   ;;  %v16240_v28 = vld [vmem:[#allocation6 + $0x68] sm:$0xff]  }
 0x59f   :  { %v11503_v3 = vadd.f32 %v11502_v58, %v11501_v60  ;;  %v11504_v30 = vpop.f32.mrb[74].mxu1  ;;  %11804 = vmatpush3.bf16.msra.mxu1 %v15584_v54  ;;  %v11483_v37 = vpop.f32.mrb[75].mxu0  ;;  %11783 = vmatprep.subr.bf16.mxu0 %v15587_v2  ;;  %v10376_v54 = vsel %vm6257_vm11, 1.0, %v19232_v44  ;;  %v10397_v2 = vsel %vm6476_vm14, 1.0, %v19232_v44  ;;  %19574 = vst [vmem:[#allocation37_spill] sm:$0xff] %v16237_v26  ;;  %19575 = vst [vmem:[#allocation38_spill] sm:$0xff] %v16240_v28 }
 0x5a0   :  { %v5870_v39 = vadd.f32 %v15781_v47, %v11481_v48  ;;  %v11505_v6 = vpop.f32.mrb[75].mxu1  ;;  %11805 = vmatprep.subr.bf16.mxu1 %v15595_v7  ;;  %v16143_v8 = vsub.f32 %v6465_v38, %v10376_v54  ;;  %v10399_v7 = vsel %vm6478_vm10, 1.0, %v19232_v44  ;;  %v16150_v35 = vsub.f32 %v6684_v1, %v10397_v2  ;;  %vm10414_vm10 = vmpackc.low %vm6479_vm8, %vm6479_vm8  ;;  %v16244_v56 = vld [vmem:[#allocation6 + $0xe8] sm:$0xff]  }
 0x5a1   :  { %v16153_v62 = vsub.f32 %v6686_v40, %v10399_v7  ;;  %19576 = vst [vmem:[#allocation28_spill] sm:$0xff] %v16244_v56  ;;  %v6683_v58 = vadd.f32 %v13868_v50, %v6675_v25  ;;  %v6685_v12 = vadd.f32 %v13871_v51, %v6677_v21  ;;  %v16249_v37 = vld [vmem:[#allocation6 + $0x28] sm:$0xff]   ;;  %v16255_v40 = vld [vmem:[#allocation6 + $0x70] sm:$0xff]   ;;  %v6688_v54 = vadd.f32 %v19242_v15, %v6680_v11 }
 0x5a2   :  { %v16140_v17 = vadd.f32 %v11503_v3, %v5870_v39  ;;  %11784 = vmatpush3.bf16.msra.mxu0 %v15609_v23  ;;  %vm6481_vm11 = vcmp.gt.f32.partialorder %v16143_v8, 1.0  ;;  %v16159_v23 = vld [vmem:[#allocation6 + $0x40] sm:$0xff]   ;;  %vm6700_vm14 = vcmp.gt.f32.partialorder %v16150_v35, 1.0  ;;  %v16252_v39 = vld [vmem:[#allocation6 + $0xa8] sm:$0xff]   ;;  %v10396_v2 = vsel %vm6475_vm4, 1.0, %v19232_v44 }
 0x5a3   :  { %11806 = vmatpush3.bf16.msra.mxu1 %v15617_v63  ;;  %11785 = vmatprep.subr.bf16.mxu0 %v15620_v45  ;;  %v16166_v63 = vld [vmem:[#allocation6 + $0xc0] sm:$0xff]   ;;  %vm6702_vm12 = vcmp.gt.f32.partialorder %v16153_v62, 1.0  ;;  %vm10418_vm13 = vmpackc.low %vm6481_vm11, %vm6481_vm11  ;;  %v10398_v7 = vsel %vm6477_vm5, 1.0, %v19232_v44  ;;  %v16291_v34 = vsub.f32 %v6688_v54, %v10401_v29  ;;  %v16308_v54 = vld [vmem:[#allocation6 + $0xb8] sm:$0xff]  }
 0x5a4   :  { %11807 = vmatprep.subr.bf16.mxu1 %v15625_v24  ;;  %v16175_v45 = vld [vmem:[#allocation6] sm:$0xff]   ;;  %vm10430_vm15 = vmpackc.low %vm6700_vm14, %vm6700_vm14  ;;  %v16272_v11 = vsub.f32 %v6685_v12, %v10398_v7  ;;  %v16288_v12 = vld [vmem:[#allocation6 + $0x78] sm:$0xff]   ;;  %19582 = vst [vmem:[#allocation43_spill] sm:$0xff] %v16308_v54 }
 0x5a5   :  { %v16182_v24 = vld [vmem:[#allocation6 + $0x80] sm:$0xff]   ;;  %vm10434_vm0 = vmpackc.low %vm6702_vm12, %vm6702_vm12  ;;  %19579 = vst [vmem:[#allocation40_spill] sm:$0xff] %v16288_v12  ;;  %vm6704_vm6 = vcmp.gt.f32.partialorder %v16291_v34, 1.0  ;;  %v16351_v29 = vld [vmem:[#allocation6 + $0x108] sm:$0xff]  }
 0x5a6   :  { %11786 = vmatpush3.bf16.msra.mxu0 %v15631_v42  ;;  %v16189_v42 = vld [vmem:[#allocation6 + $0x48] sm:$0xff]   ;;  %vm6701_vm5 = vcmp.gt.f32.partialorder %v16272_v11, 1.0  ;;  %v16331_v7 = vld [vmem:[#allocation6 + $0x100] sm:$0xff]   ;;  %vm10438_vm9 = vmpackc.low %vm6704_vm6, %vm6704_vm6  ;;  %19589 = vst [vmem:[#allocation50_spill] sm:$0xff] %v16351_v29 }
 0x5a7   :  { %11808 = vmatpush3.bf16.msra.mxu1 %v15635_v52  ;;  %11815 = vmatprep.subr.bf16.mxu0 %v16159_v23  ;;  %v16192_v52 = vld [vmem:[#allocation6 + $0xc8] sm:$0xff]   ;;  %vm10436_vm7 = vmpackc.low %vm6701_vm5, %vm6701_vm5  ;;  %19585 = vst [vmem:[#allocation58_spill] sm:$0xff] %v16331_v7 }
 0x5a8   :  { %11837 = vmatprep.subr.bf16.mxu1 %v16166_v63 }
 0x5a9   :  { %10415 = vmatmul.mubr.msk.bf16.vlgmr.msra.gmra.mrb[100].mxu0 %vm10414_vm10, %v19212_v14 }
 0x5aa   :  { %10419 = vmatmul.mubr.msk.bf16.vlgmr.msra.gmra.mrb[100].mxu1 %vm10418_vm13, %v19212_v14  ;;  %11816 = vmatpush3.bf16.msra.mxu0 %v16175_v45 }
 0x5ab   :  { %10431 = vmatprep.mubr.msk.bf16.mxu0 %vm10430_vm15, %v19212_v14  ;;  %11838 = vmatpush3.bf16.msra.mxu1 %v16182_v24 }
 0x5ac   :  { %10435 = vmatprep.mubr.msk.bf16.mxu1 %vm10434_vm0, %v19212_v14  ;;  %11817 = vmatprep.subr.bf16.mxu0 %v16189_v42 }
 0x5ad   :  { %11839 = vmatprep.subr.bf16.mxu1 %v16192_v52 }
 0x5ae   :  { %11818 = vmatpush3.bf16.msra.mxu0 %v16195_v53 }
 0x5af   :  { %11840 = vmatpush3.bf16.msra.mxu1 %v16198_v22  ;;  %11819 = vmatprep.subr.bf16.mxu0 %v16201_v27 }
 0x5b0   :  { %11841 = vmatprep.subr.bf16.mxu1 %v16204_v43 }
 0x5b2   :  { %11820 = vmatpush3.bf16.msra.mxu0 %v16207_v49 }
 0x5b3   :  { %11842 = vmatpush3.bf16.msra.mxu1 %v16210_v55  ;;  %11821 = vmatprep.subr.bf16.mxu0 %v16213_v18 }
 0x5b4   :  { %11843 = vmatprep.subr.bf16.mxu1 %v16216_v4 }
 0x5b6   :  { %11822 = vmatpush3.bf16.msra.mxu0 %v16219_v59 }
 0x5b7   :  { %11844 = vmatpush3.bf16.msra.mxu1 %v16222_v33  ;;  %11823 = vmatprep.subr.bf16.mxu0 %v16225_v36 }
 0x5b8   :  { %11845 = vmatprep.subr.bf16.mxu1 %v16228_v41 }
 0x5ba   :  { %11824 = vmatpush3.bf16.msra.mxu0 %v16233_v5 }
 0x5bb   :  { %11846 = vmatpush3.bf16.msra.mxu1 %v16237_v26  ;;  %11825 = vmatprep.subr.bf16.mxu0 %v16240_v28 }
 0x5bc   :  { %v11523_v60 = vpop.f32.mrb[76].mxu0  ;;  %11847 = vmatprep.subr.bf16.mxu1 %v16244_v56 }
 0x5bd   :  { %v11545_v19 = vpop.f32.mrb[76].mxu1  ;;  %v11524_v48 = vpop.f32.mrb[77].mxu0 }
 0x5be   :  { %v11525_v38 = vadd.f32 %v11524_v48, %v11523_v60  ;;  %v11546_v3 = vpop.f32.mrb[77].mxu1  ;;  %v11526_v30 = vpop.f32.mrb[78].mxu0  ;;  %11826 = vmatpush3.bf16.msra.mxu0 %v16249_v37  ;;  %v16266_v60 = vld [vmem:[#allocation6 + $0xf0] sm:$0xff]   ;;  %v16270_v48 = vsub.f32 %v6683_v58, %v10396_v2  ;;  %v16311_v2 = vld [vmem:[#allocation6 + $0x140] sm:$0xff]  }
 0x5bf   :  { %v11547_v1 = vadd.f32 %v11546_v3, %v11545_v19  ;;  %v11548_v61 = vpop.f32.mrb[78].mxu1  ;;  %11848 = vmatpush3.bf16.msra.mxu1 %v16252_v39  ;;  %v11527_v6 = vpop.f32.mrb[79].mxu0  ;;  %11827 = vmatprep.subr.bf16.mxu0 %v16255_v40  ;;  %v6690_v19 = vadd.f32 %v19244_v31, %v6682_v32  ;;  %v10403_v32 = vsel %vm6482_vm2, 1.0, %v19232_v44  ;;  %v16285_v58 = vld [vmem:[#allocation6 + $0xb0] sm:$0xff]   ;;  %v16293_v30 = vld [vmem:[#allocation6 + $0xf8] sm:$0xff]   ;;  %19583 = vst [vmem:[#allocation44_spill] sm:$0xff] %v16311_v2 }
 0x5c0   :  { %v5950_v25 = vadd.f32 %v11525_v38, %v16140_v17  ;;  %v11549_v21 = vpop.f32.mrb[79].mxu1  ;;  %11849 = vmatprep.subr.bf16.mxu1 %v16266_v60  ;;  %v5995_v17 = vmul.f32 0.95, %v16067_v20  ;;  %v16279_v38 = vld [vmem:[#allocation6 + $0x30] sm:$0xff]   ;;  %19578 = vst [vmem:[#allocation39_spill] sm:$0xff] %v16285_v58  ;;  %19580 = vst [vmem:[#allocation41_spill] sm:$0xff] %v16293_v30 }
 0x5c1   :  { %19577 = vst [vmem:[#allocation46_spill] sm:$0xff] %v16279_v38  ;;  %vm6699_vm4 = vcmp.gt.f32.partialorder %v16270_v48, 1.0  ;;  %v16304_v6 = vld [vmem:[#allocation6 + $0x38] sm:$0xff]   ;;  %v16322_v20 = vld [vmem:[#allocation6 + $0x1c0] sm:$0xff]   ;;  %v16345_v21 = vld [vmem:[#allocation6 + $0x148] sm:$0xff]  }
 0x5c2   :  { %v5990_v16 = vadd.f32 %v11547_v1, %v5950_v25  ;;  %11828 = vmatpush3.bf16.msra.mxu0 %v16279_v38  ;;  %v16296_v1 = vsub.f32 %v6690_v19, %v10403_v32  ;;  %19581 = vst [vmem:[#allocation42_spill] sm:$0xff] %v16304_v6  ;;  %vm10432_vm2 = vmpackc.low %vm6699_vm4, %vm6699_vm4  ;;  %v16338_v25 = vld [vmem:[#allocation6 + $0x180] sm:$0xff]   ;;  %v16348_v19 = vld [vmem:[#allocation6 + $0x1c8] sm:$0xff]  }
 0x5c3   :  { %11850 = vmatpush3.bf16.msra.mxu1 %v16285_v58  ;;  %11829 = vmatprep.subr.bf16.mxu0 %v16288_v12  ;;  %19584 = vst [vmem:[#allocation45_spill] sm:$0xff] %v16322_v20  ;;  %19586 = vst [vmem:[#allocation57_spill] sm:$0xff] %v16338_v25  ;;  %v16360_v32 = vld [vmem:[#allocation6 + $0x1d0] sm:$0xff]   ;;  %v16408_v58 = vld [vmem:[#allocation6 + $0x1a8] sm:$0xff]  }
 0x5c4   :  { %v5996_v3 = vadd.f32 %v5995_v17, %v5990_v16  ;;  %11851 = vmatprep.subr.bf16.mxu1 %v16293_v30  ;;  %vm6706_vm3 = vcmp.gt.f32.partialorder %v16296_v1, 1.0  ;;  %19587 = vst [vmem:[#allocation27_spill] sm:$0xff] %v16345_v21  ;;  %19588 = vst [vmem:[#allocation49_spill] sm:$0xff] %v16348_v19  ;;  %v16354_v16 = vld [vmem:[#allocation6 + $0x188] sm:$0xff]   ;;  %v16357_v17 = vld [vmem:[#allocation6 + $0x150] sm:$0xff]  }
 0x5c5   :  { %vm10442_vm10 = vmpackc.low %vm6706_vm3, %vm6706_vm3  ;;  %19590 = vst [vmem:[#allocation51_spill] sm:$0xff] %v16354_v16  ;;  %v16404_v30 = vld [vmem:[#allocation6 + $0x128] sm:$0xff]   ;;  %v16411_v38 = vld [vmem:[#allocation6 + $0x170] sm:$0xff]  }
 0x5c6   :  { %v16302_v61 = vsub.f32 %v5996_v3, %v10316_v10  ;;  %11830 = vmatpush3.bf16.msra.mxu0 %v16304_v6  ;;  %19591 = vst [vmem:[#allocation52_spill] sm:$0xff] %v16357_v17  ;;  %19592 = vst [vmem:[#allocation53_spill] sm:$0xff] %v16360_v32  ;;  %v16363_v3 = vld [vmem:[#allocation6 + $0x110] sm:$0xff]  }
 0x5c7   :  { %11852 = vmatpush3.bf16.msra.mxu1 %v16308_v54  ;;  %11859 = vmatprep.subr.bf16.mxu0 %v16311_v2  ;;  %19593 = vst [vmem:[#allocation54_spill] sm:$0xff] %v16363_v3  ;;  %v16366_v10 = vld [vmem:[#allocation6 + $0x190] sm:$0xff]  }
 0x5c8   :  { %10343 = vst [vmem:[%s18713_s5 + $0x40] sm:$0xff] %v16302_v61  ;;  %11881 = vmatprep.subr.bf16.mxu1 %v16322_v20  ;;  %19594 = vst [vmem:[#allocation13_spill] sm:$0xff] %v16366_v10 }
 0x5c9   :  { %10433 = vmatmul.mubr.msk.bf16.vlgmr.msra.gmra.mrb[104].mxu0 %vm10432_vm2, %v19212_v14  ;;  %vm5998_vm2 = vcmp.gt.f32.partialorder %v16302_v61, 1.0 }
 0x5ca   :  { %10437 = vmatmul.mubr.msk.bf16.vlgmr.msra.gmra.mrb[104].mxu1 %vm10436_vm7, %v19212_v14  ;;  %11860 = vmatpush3.bf16.msra.mxu0 %v16331_v7 }
 0x5cb   :  { %10439 = vmatprep.mubr.msk.bf16.mxu0 %vm10438_vm9, %v19212_v14  ;;  %11882 = vmatpush3.bf16.msra.mxu1 %v16338_v25  ;;  %v16400_v25 = vld [vmem:[#allocation6 + $0x1e8] sm:$0xff]  }
 0x5cc   :  { %10443 = vmatprep.mubr.msk.bf16.mxu1 %vm10442_vm10, %v19212_v14  ;;  %11861 = vmatprep.subr.bf16.mxu0 %v16345_v21  ;;  %v16393_v21 = vld [vmem:[#allocation6 + $0x1a0] sm:$0xff]   ;;  %19604 = vst [vmem:[#allocation18_spill] sm:$0xff] %v16400_v25 }
 0x5cd   :  { %11883 = vmatprep.subr.bf16.mxu1 %v16348_v19  ;;  %v16389_v19 = vld [vmem:[#allocation6 + $0x120] sm:$0xff]   ;;  %19602 = vst [vmem:[#allocation16_spill] sm:$0xff] %v16393_v21 }
 0x5ce   :  { %11862 = vmatpush3.bf16.msra.mxu0 %v16351_v29  ;;  %v16369_v29 = vld [vmem:[#allocation6 + $0x158] sm:$0xff]   ;;  %19601 = vst [vmem:[#allocation14_spill] sm:$0xff] %v16389_v19 }
 0x5cf   :  { %11884 = vmatpush3.bf16.msra.mxu1 %v16354_v16  ;;  %11863 = vmatprep.subr.bf16.mxu0 %v16357_v17  ;;  %19595 = vst [vmem:[#allocation15_spill] sm:$0xff] %v16369_v29  ;;  %v16372_v16 = vld [vmem:[#allocation6 + $0x1d8] sm:$0xff]  }
 0x5d0   :  { %11885 = vmatprep.subr.bf16.mxu1 %v16360_v32  ;;  %19596 = vst [vmem:[#allocation55_spill] sm:$0xff] %v16372_v16  ;;  %v16375_v17 = vld [vmem:[#allocation6 + $0x118] sm:$0xff]  }
 0x5d1   :  { %19597 = vst [vmem:[#allocation56_spill] sm:$0xff] %v16375_v17  ;;  %v16378_v32 = vld [vmem:[#allocation6 + $0x198] sm:$0xff]  }
 0x5d2   :  { %11864 = vmatpush3.bf16.msra.mxu0 %v16363_v3  ;;  %19598 = vst [vmem:[#allocation47_spill] sm:$0xff] %v16378_v32  ;;  %v16381_v3 = vld [vmem:[#allocation6 + $0x160] sm:$0xff]  }
 0x5d3   :  { %11886 = vmatpush3.bf16.msra.mxu1 %v16366_v10  ;;  %11865 = vmatprep.subr.bf16.mxu0 %v16369_v29  ;;  %19599 = vst [vmem:[#allocation12_spill] sm:$0xff] %v16381_v3  ;;  %v16384_v10 = vld [vmem:[#allocation6 + $0x1e0] sm:$0xff]   ;;  %v6679_v29 = vmul.f32 0.95, %v16135_v9  ;;  %v10423_v9 = vsel %vm6700_vm14, 1.0, %v19232_v44 }
 0x5d4   :  { %11887 = vmatprep.subr.bf16.mxu1 %v16372_v16  ;;  %19600 = vst [vmem:[#allocation48_spill] sm:$0xff] %v16384_v10  ;;  %v6681_v16 = vmul.f32 0.95, %v16143_v8  ;;  %v16441_v8 = vld [vmem:[#allocation6 + $0x1b0] sm:$0xff]  }
 0x5d6   :  { %11866 = vmatpush3.bf16.msra.mxu0 %v16375_v17  ;;  %v6900_v17 = vmul.f32 0.95, %v16150_v35 }
 0x5d7   :  { %11888 = vmatpush3.bf16.msra.mxu1 %v16378_v32  ;;  %11867 = vmatprep.subr.bf16.mxu0 %v16381_v3  ;;  %v16396_v32 = vld [vmem:[#allocation6 + $0x168] sm:$0xff]  }
 0x5d8   :  { %11889 = vmatprep.subr.bf16.mxu1 %v16384_v10  ;;  %19603 = vst [vmem:[#allocation17_spill] sm:$0xff] %v16396_v32  ;;  %v6902_v10 = vmul.f32 0.95, %v16153_v62  ;;  %v16455_v62 = vld [vmem:[#allocation6 + $0x138] sm:$0xff]  }
 0x5da   :  { %11868 = vmatpush3.bf16.msra.mxu0 %v16389_v19  ;;  %v6687_v19 = vadd.f32 %v14009_v57, %v6679_v29 }
 0x5db   :  { %11890 = vmatpush3.bf16.msra.mxu1 %v16393_v21  ;;  %11869 = vmatprep.subr.bf16.mxu0 %v16396_v32  ;;  %v6689_v32 = vadd.f32 %v14013_v46, %v6681_v16 }
 0x5dc   :  { %v11567_v3 = vpop.f32.mrb[80].mxu0  ;;  %11891 = vmatprep.subr.bf16.mxu1 %v16400_v25 }
 0x5dd   :  { %v11589_v7 = vpop.f32.mrb[80].mxu1  ;;  %v11568_v20 = vpop.f32.mrb[81].mxu0 }
 0x5de   :  { %v11569_v2 = vadd.f32 %v11568_v20, %v11567_v3  ;;  %v11590_v54 = vpop.f32.mrb[81].mxu1  ;;  %v11570_v6 = vpop.f32.mrb[82].mxu0  ;;  %11870 = vmatpush3.bf16.msra.mxu0 %v16404_v30  ;;  %v6908_v20 = vadd.f32 %v19261_v13, %v6900_v17  ;;  %v10425_v3 = vsel %vm6702_vm12, 1.0, %v19232_v44 }
 0x5df   :  { %v11591_v21 = vadd.f32 %v11590_v54, %v11589_v7  ;;  %v11592_v12 = vpop.f32.mrb[82].mxu1  ;;  %11892 = vmatpush3.bf16.msra.mxu1 %v16408_v58  ;;  %v11571_v25 = vpop.f32.mrb[83].mxu0  ;;  %11871 = vmatprep.subr.bf16.mxu0 %v16411_v38  ;;  %v10400_v6 = vsel %vm6479_vm8, 1.0, %v19232_v44  ;;  %v16419_v54 = vld [vmem:[#allocation6 + $0x1f0] sm:$0xff]   ;;  %v10402_v7 = vsel %vm6481_vm11, 1.0, %v19232_v44 }
 0x5e0   :  { %v6094_v29 = vadd.f32 %v15781_v47, %v11569_v2  ;;  %v11593_v16 = vpop.f32.mrb[83].mxu1  ;;  %11893 = vmatprep.subr.bf16.mxu1 %v16419_v54  ;;  %v6910_v12 = vadd.f32 %v19263_v0, %v6902_v10  ;;  %v16426_v25 = vsub.f32 %v6687_v19, %v10400_v6  ;;  %v16433_v47 = vld [vmem:[#allocation6 + $0x130] sm:$0xff]   ;;  %v16436_v2 = vsub.f32 %v6689_v32, %v10402_v7  ;;  %v16444_v19 = vld [vmem:[#allocation6 + $0x178] sm:$0xff]  }
 0x5e1   :  { %v16447_v35 = vsub.f32 %v6908_v20, %v10423_v9  ;;  %v16459_v10 = vld [vmem:[#allocation6 + $0x1b8] sm:$0xff]   ;;  %v6899_v20 = vmul.f32 0.95, %v16270_v48  ;;  %v6901_v6 = vmul.f32 0.95, %v16272_v11  ;;  %v10427_v48 = vsel %vm6704_vm6, 1.0, %v19232_v44 }
 0x5e2   :  { %v16431_v17 = vadd.f32 %v11591_v21, %v6094_v29  ;;  %11872 = vmatpush3.bf16.msra.mxu0 %v16433_v47  ;;  %v16449_v21 = vld [vmem:[#allocation6 + $0x1f8] sm:$0xff]   ;;  %v16452_v32 = vsub.f32 %v6910_v12, %v10425_v3  ;;  %vm6703_vm8 = vcmp.gt.f32.partialorder %v16426_v25, 1.0  ;;  %vm6705_vm11 = vcmp.gt.f32.partialorder %v16436_v2, 1.0 }
 0x5e3   :  { %11894 = vmatpush3.bf16.msra.mxu1 %v16441_v8  ;;  %11873 = vmatprep.subr.bf16.mxu0 %v16444_v19  ;;  %vm6924_vm14 = vcmp.gt.f32.partialorder %v16447_v35, 1.0  ;;  %vm10440_vm12 = vmpackc.low %vm6703_vm8, %vm6703_vm8  ;;  %v6904_v29 = vmul.f32 0.95, %v16291_v34  ;;  %v6906_v16 = vmul.f32 0.95, %v16296_v1  ;;  %v6907_v3 = vadd.f32 %v13868_v50, %v6899_v20  ;;  %v19610_v1 = vld [vmem:[#allocation43_spill] sm:$0xff] }
 0x5e4   :  { %11895 = vmatprep.subr.bf16.mxu1 %v16449_v21  ;;  %vm6926_vm13 = vcmp.gt.f32.partialorder %v16452_v32, 1.0  ;;  %vm10444_vm15 = vmpackc.low %vm6705_vm11, %vm6705_vm11  ;;  %v10422_v20 = vsel %vm6699_vm4, 1.0, %v19232_v44  ;;  %v6219_v11 = vmul.f32 0.95, %v16302_v61 }
 0x5e5   :  { %vm10456_vm0 = vmpackc.low %vm6924_vm14, %vm6924_vm14 }
 0x5e6   :  { %11874 = vmatpush3.bf16.msra.mxu0 %v16455_v62  ;;  %vm10460_vm1 = vmpackc.low %vm6926_vm13, %vm6926_vm13 }
 0x5e7   :  { %11896 = vmatpush3.bf16.msra.mxu1 %v16459_v10  ;;  %11903 = vmatprep.subr.bf16.mxu0 %v16159_v23 }
 0x5e8   :  { %11925 = vmatprep.subr.bf16.mxu1 %v16166_v63 }
 0x5e9   :  { %10441 = vmatmul.mubr.msk.bf16.vlgmr.msra.gmra.mrb[108].mxu0 %vm10440_vm12, %v19212_v14 }
 0x5ea   :  { %10445 = vmatmul.mubr.msk.bf16.vlgmr.msra.gmra.mrb[108].mxu1 %vm10444_vm15, %v19212_v14  ;;  %11904 = vmatpush3.bf16.msra.mxu0 %v16175_v45 }
 0x5eb   :  { %10457 = vmatprep.mubr.msk.bf16.mxu0 %vm10456_vm0, %v19212_v14  ;;  %11926 = vmatpush3.bf16.msra.mxu1 %v16182_v24 }
 0x5ec   :  { %10461 = vmatprep.mubr.msk.bf16.mxu1 %vm10460_vm1, %v19212_v14  ;;  %11905 = vmatprep.subr.bf16.mxu0 %v16189_v42 }
 0x5ed   :  { %11927 = vmatprep.subr.bf16.mxu1 %v16192_v52 }
 0x5ee   :  { %11906 = vmatpush3.bf16.msra.mxu0 %v16195_v53 }
 0x5ef   :  { %11928 = vmatpush3.bf16.msra.mxu1 %v16198_v22  ;;  %11907 = vmatprep.subr.bf16.mxu0 %v16201_v27 }
 0x5f0   :  { %11929 = vmatprep.subr.bf16.mxu1 %v16204_v43 }
 0x5f2   :  { %11908 = vmatpush3.bf16.msra.mxu0 %v16207_v49 }
 0x5f3   :  { %11930 = vmatpush3.bf16.msra.mxu1 %v16210_v55  ;;  %11909 = vmatprep.subr.bf16.mxu0 %v16213_v18 }
 0x5f4   :  { %11931 = vmatprep.subr.bf16.mxu1 %v16216_v4 }
 0x5f6   :  { %11910 = vmatpush3.bf16.msra.mxu0 %v16219_v59 }
 0x5f7   :  { %11932 = vmatpush3.bf16.msra.mxu1 %v16222_v33  ;;  %11911 = vmatprep.subr.bf16.mxu0 %v16225_v36 }
 0x5f8   :  { %11933 = vmatprep.subr.bf16.mxu1 %v16228_v41  ;;  %v6909_v41 = vadd.f32 %v13871_v51, %v6901_v6  ;;  %v10424_v6 = vsel %vm6701_vm5, 1.0, %v19232_v44 }
 0x5fa   :  { %11912 = vmatpush3.bf16.msra.mxu0 %v16233_v5 }
 0x5fb   :  { %11934 = vmatpush3.bf16.msra.mxu1 %v16237_v26  ;;  %11913 = vmatprep.subr.bf16.mxu0 %v16240_v28 }
 0x5fc   :  { %v11611_v12 = vpop.f32.mrb[84].mxu0  ;;  %11935 = vmatprep.subr.bf16.mxu1 %v16244_v56  ;;  %v6912_v56 = vadd.f32 %v19242_v15, %v6904_v29 }
 0x5fd   :  { %v11633_v7 = vpop.f32.mrb[84].mxu1  ;;  %v11612_v9 = vpop.f32.mrb[85].mxu0 }
 0x5fe   :  { %v11613_v36 = vadd.f32 %v11612_v9, %v11611_v12  ;;  %v11634_v33 = vpop.f32.mrb[85].mxu1  ;;  %v11614_v5 = vpop.f32.mrb[86].mxu0  ;;  %11914 = vmatpush3.bf16.msra.mxu0 %v16249_v37 }
 0x5ff   :  { %v11635_v59 = vadd.f32 %v11634_v33, %v11633_v7  ;;  %v11636_v26 = vpop.f32.mrb[86].mxu1  ;;  %11936 = vmatpush3.bf16.msra.mxu1 %v16252_v39  ;;  %v11615_v28 = vpop.f32.mrb[87].mxu0  ;;  %11915 = vmatprep.subr.bf16.mxu0 %v16255_v40  ;;  %v6914_v33 = vadd.f32 %v19244_v31, %v6906_v16  ;;  %v19605_v7 = vld [vmem:[#allocation46_spill] sm:$0xff]  ;;  %v19607_v16 = vld [vmem:[#allocation40_spill] sm:$0xff] }
 0x600   :  { %v6174_v5 = vadd.f32 %v11613_v36, %v16431_v17  ;;  %v11637_v12 = vpop.f32.mrb[87].mxu1  ;;  %11937 = vmatprep.subr.bf16.mxu1 %v16266_v60  ;;  %v16521_v26 = vsub.f32 %v6907_v3, %v10422_v20  ;;  %v16523_v28 = vsub.f32 %v6909_v41, %v10424_v6  ;;  %v10429_v36 = vsel %vm6706_vm3, 1.0, %v19232_v44  ;;  %v19606_v17 = vld [vmem:[#allocation39_spill] sm:$0xff]  ;;  %v19608_v3 = vld [vmem:[#allocation41_spill] sm:$0xff]  ;;  %v19609_v20 = vld [vmem:[#allocation42_spill] sm:$0xff] }
 0x601   :  { %v16536_v41 = vsub.f32 %v6912_v56, %v10427_v48  ;;  %v16539_v34 = vsub.f32 %v6914_v33, %v10429_v36  ;;  %v19611_v6 = vld [vmem:[#allocation44_spill] sm:$0xff]  ;;  %v19612_v56 = vld [vmem:[#allocation45_spill] sm:$0xff]  ;;  %v19615_v33 = vld [vmem:[#allocation27_spill] sm:$0xff] }
 0x602   :  { %v6214_v29 = vadd.f32 %v11635_v59, %v6174_v5  ;;  %11916 = vmatpush3.bf16.msra.mxu0 %v19605_v7  ;;  %v10342_v59 = vsel %vm5998_vm2, 1.0, %v19232_v44  ;;  %vm6923_vm4 = vcmp.gt.f32.partialorder %v16521_v26, 1.0  ;;  %vm6925_vm5 = vcmp.gt.f32.partialorder %v16523_v28, 1.0  ;;  %v19613_v5 = vld [vmem:[#allocation58_spill] sm:$0xff]  ;;  %v19614_v12 = vld [vmem:[#allocation57_spill] sm:$0xff]  ;;  %v19619_v36 = vld [vmem:[#allocation52_spill] sm:$0xff] }
 0x603   :  { %11938 = vmatpush3.bf16.msra.mxu1 %v19606_v17  ;;  %11917 = vmatprep.subr.bf16.mxu0 %v19607_v16  ;;  %vm6928_vm6 = vcmp.gt.f32.partialorder %v16536_v41, 1.0  ;;  %vm10458_vm3 = vmpackc.low %vm6923_vm4, %vm6923_vm4  ;;  %vm6930_vm7 = vcmp.gt.f32.partialorder %v16539_v34, 1.0  ;;  %v19616_v48 = vld [vmem:[#allocation49_spill] sm:$0xff] }
 0x604   :  { %v6220_v9 = vadd.f32 %v6219_v11, %v6214_v29  ;;  %11939 = vmatprep.subr.bf16.mxu1 %v19608_v3  ;;  %vm10462_vm9 = vmpackc.low %vm6925_vm5, %vm6925_vm5  ;;  %v19617_v29 = vld [vmem:[#allocation50_spill] sm:$0xff]  ;;  %v19618_v11 = vld [vmem:[#allocation51_spill] sm:$0xff] }
 0x605   :  { %vm10464_vm10 = vmpackc.low %vm6928_vm6, %vm6928_vm6 }
 0x606   :  { %v16543_v61 = vsub.f32 %v6220_v9, %v10342_v59  ;;  %11918 = vmatpush3.bf16.msra.mxu0 %v19609_v20  ;;  %vm10468_vm12 = vmpackc.low %vm6930_vm7, %vm6930_vm7  ;;  %v19620_v9 = vld [vmem:[#allocation53_spill] sm:$0xff]  ;;  %v19621_v59 = vld [vmem:[#allocation54_spill] sm:$0xff] }
 0x607   :  { %11940 = vmatpush3.bf16.msra.mxu1 %v19610_v1  ;;  %11947 = vmatprep.subr.bf16.mxu0 %v19611_v6  ;;  %v19625_v6 = vld [vmem:[#allocation56_spill] sm:$0xff] }
 0x608   :  { %10369 = vst [vmem:[%s18713_s5 + $0x48] sm:$0xff] %v16543_v61  ;;  %11969 = vmatprep.subr.bf16.mxu1 %v19612_v56  ;;  %v19624_v56 = vld [vmem:[#allocation55_spill] sm:$0xff] }
 0x609   :  { %10459 = vmatmul.mubr.msk.bf16.vlgmr.msra.gmra.mrb[112].mxu0 %vm10458_vm3, %v19212_v14 }
 0x60a   :  { %10463 = vmatmul.mubr.msk.bf16.vlgmr.msra.gmra.mrb[112].mxu1 %vm10462_vm9, %v19212_v14  ;;  %11948 = vmatpush3.bf16.msra.mxu0 %v19613_v5  ;;  %v19623_v5 = vld [vmem:[#allocation15_spill] sm:$0xff] }
 0x60b   :  { %10465 = vmatprep.mubr.msk.bf16.mxu0 %vm10464_vm10, %v19212_v14  ;;  %11970 = vmatpush3.bf16.msra.mxu1 %v19614_v12  ;;  %v19622_v12 = vld [vmem:[#allocation13_spill] sm:$0xff] }
 0x60c   :  { %10469 = vmatprep.mubr.msk.bf16.mxu1 %vm10468_vm12, %v19212_v14  ;;  %11949 = vmatprep.subr.bf16.mxu0 %v19615_v33  ;;  %v19626_v33 = vld [vmem:[#allocation47_spill] sm:$0xff] }
 0x60d   :  { %11971 = vmatprep.subr.bf16.mxu1 %v19616_v48  ;;  %v19627_v48 = vld [vmem:[#allocation12_spill] sm:$0xff] }
 0x60e   :  { %11950 = vmatpush3.bf16.msra.mxu0 %v19617_v29  ;;  %v19628_v29 = vld [vmem:[#allocation48_spill] sm:$0xff] }
 0x60f   :  { %11972 = vmatpush3.bf16.msra.mxu1 %v19618_v11  ;;  %11951 = vmatprep.subr.bf16.mxu0 %v19619_v36  ;;  %v6903_v36 = vmul.f32 0.95, %v16426_v25  ;;  %v19629_v11 = vld [vmem:[#allocation14_spill] sm:$0xff]  ;;  %v10449_v25 = vsel %vm6924_vm14, 1.0, %v19232_v44 }
 0x610   :  { %11973 = vmatprep.subr.bf16.mxu1 %v19620_v9  ;;  %v6905_v9 = vmul.f32 0.95, %v16436_v2 }
 0x612   :  { %11952 = vmatpush3.bf16.msra.mxu0 %v19621_v59  ;;  %v19630_v59 = vld [vmem:[#allocation16_spill] sm:$0xff] }
 0x613   :  { %11974 = vmatpush3.bf16.msra.mxu1 %v19622_v12  ;;  %11953 = vmatprep.subr.bf16.mxu0 %v19623_v5  ;;  %v7124_v12 = vmul.f32 0.95, %v16447_v35  ;;  %v19631_v5 = vld [vmem:[#allocation17_spill] sm:$0xff] }
 0x614   :  { %11975 = vmatprep.subr.bf16.mxu1 %v19624_v56 }
 0x616   :  { %11954 = vmatpush3.bf16.msra.mxu0 %v19625_v6  ;;  %v7126_v6 = vmul.f32 0.95, %v16452_v32  ;;  %v19633_v32 = vld [vmem:[#allocation32_spill] sm:$0xff] }
 0x617   :  { %11976 = vmatpush3.bf16.msra.mxu1 %v19626_v33  ;;  %11955 = vmatprep.subr.bf16.mxu0 %v19627_v48  ;;  %v19632_v33 = vld [vmem:[#allocation18_spill] sm:$0xff] }
 0x618   :  { %11977 = vmatprep.subr.bf16.mxu1 %v19628_v29  ;;  %v6911_v29 = vadd.f32 %v14009_v57, %v6903_v36  ;;  %v10426_v36 = vsel %vm6703_vm8, 1.0, %v19232_v44 }
 0x61a   :  { %11956 = vmatpush3.bf16.msra.mxu0 %v19629_v11  ;;  %v6913_v11 = vadd.f32 %v14013_v46, %v6905_v9  ;;  %v7125_v9 = vmul.f32 0.95, %v16523_v28  ;;  %v6443_v28 = vmul.f32 0.95, %v16543_v61 }
 0x61b   :  { %11978 = vmatpush3.bf16.msra.mxu1 %v19630_v59  ;;  %11957 = vmatprep.subr.bf16.mxu0 %v19631_v5 }
 0x61c   :  { %v11655_v56 = vpop.f32.mrb[88].mxu0  ;;  %11979 = vmatprep.subr.bf16.mxu1 %v19632_v33  ;;  %v7132_v33 = vadd.f32 %v19261_v13, %v7124_v12 }
 0x61d   :  { %v11677_v48 = vpop.f32.mrb[88].mxu1  ;;  %v11656_v1 = vpop.f32.mrb[89].mxu0 }
 0x61e   :  { %v11657_v20 = vadd.f32 %v11656_v1, %v11655_v56  ;;  %v11678_v3 = vpop.f32.mrb[89].mxu1  ;;  %v11658_v16 = vpop.f32.mrb[90].mxu0  ;;  %11958 = vmatpush3.bf16.msra.mxu0 %v16404_v30  ;;  %v16605_v1 = vld [vmem:[#allocation7] ss:$0 sm:$0xff]  ;;  %v16628_v2 = vsub.f32 %v7132_v33, %v10449_v25  ;;  %v19635_v33 = vld [vmem:[#allocation34_spill] sm:$0xff]  ;;  %v19640_v25 = vld [vmem:[#allocation28_spill] sm:$0xff] }
 0x61f   :  { %v11679_v17 = vadd.f32 %v11678_v3, %v11677_v48  ;;  %v11680_v59 = vpop.f32.mrb[90].mxu1  ;;  %11980 = vmatpush3.bf16.msra.mxu1 %v16408_v58  ;;  %v11659_v5 = vpop.f32.mrb[91].mxu0  ;;  %11959 = vmatprep.subr.bf16.mxu0 %v16411_v38  ;;  %v7134_v3 = vadd.f32 %v19263_v0, %v7126_v6  ;;  %v16613_v48 = vsub.f32 %v6911_v29, %v10426_v36  ;;  %v10451_v6 = vsel %vm6926_vm13, 1.0, %v19232_v44  ;;  %v19636_v29 = vld [vmem:[#allocation35_spill] sm:$0xff] }
 0x620   :  { %v6318_v16 = vadd.f32 %v16605_v1, %v11657_v20  ;;  %v11681_v56 = vpop.f32.mrb[91].mxu1  ;;  %11981 = vmatprep.subr.bf16.mxu1 %v16419_v54  ;;  %v10428_v5 = vsel %vm6705_vm11, 1.0, %v19232_v44  ;;  %vm7148_vm14 = vcmp.gt.f32.partialorder %v16628_v2, 1.0  ;;  %v19637_v59 = vld [vmem:[#allocation36_spill] sm:$0xff]  ;;  %v7128_v36 = vmul.f32 0.95, %v16536_v41 }
 0x621   :  { %v16621_v20 = vsub.f32 %v6913_v11, %v10428_v5  ;;  %v16631_v35 = vsub.f32 %v7134_v3, %v10451_v6  ;;  %vm6927_vm8 = vcmp.gt.f32.partialorder %v16613_v48, 1.0  ;;  %vm10482_vm1 = vmpackc.low %vm7148_vm14, %vm7148_vm14  ;;  %v7123_v11 = vmul.f32 0.95, %v16521_v26  ;;  %v19639_v56 = vld [vmem:[#allocation38_spill] sm:$0xff]  ;;  %v19643_v41 = vld [vmem:[#allocation41_spill] sm:$0xff] }
 0x622   :  { %v16618_v12 = vadd.f32 %v11679_v17, %v6318_v16  ;;  %11960 = vmatpush3.bf16.msra.mxu0 %v16433_v47  ;;  %vm10466_vm13 = vmpackc.low %vm6927_vm8, %vm6927_vm8  ;;  %v19634_v17 = vld [vmem:[#allocation33_spill] sm:$0xff]  ;;  %v7130_v3 = vmul.f32 0.95, %v16539_v34  ;;  %v10453_v26 = vsel %vm6928_vm6, 1.0, %v19232_v44  ;;  %v19645_v34 = vld [vmem:[#allocation43_spill] sm:$0xff] }
 0x623   :  { %11982 = vmatpush3.bf16.msra.mxu1 %v16441_v8  ;;  %11961 = vmatprep.subr.bf16.mxu0 %v16444_v19  ;;  %vm6929_vm11 = vcmp.gt.f32.partialorder %v16621_v20, 1.0  ;;  %vm7150_vm15 = vcmp.gt.f32.partialorder %v16631_v35, 1.0  ;;  %v19638_v16 = vld [vmem:[#allocation37_spill] sm:$0xff] }
 0x624   :  { %11983 = vmatprep.subr.bf16.mxu1 %v16449_v21  ;;  %vm10470_vm0 = vmpackc.low %vm6929_vm11, %vm6929_vm11 }
 0x625   :  { %vm10486_vm2 = vmpackc.low %vm7150_vm15, %vm7150_vm15 }
 0x626   :  { %11962 = vmatpush3.bf16.msra.mxu0 %v16455_v62 }
 0x627   :  { %11984 = vmatpush3.bf16.msra.mxu1 %v16459_v10  ;;  %11991 = vmatprep.subr.bf16.mxu0 %v16159_v23 }
 0x628   :  { %12013 = vmatprep.subr.bf16.mxu1 %v16166_v63 }
 0x629   :  { %10467 = vmatmul.mubr.msk.bf16.vlgmr.msra.gmra.mrb[116].mxu0 %vm10466_vm13, %v19212_v14 }
 0x62a   :  { %10471 = vmatmul.mubr.msk.bf16.vlgmr.msra.gmra.mrb[116].mxu1 %vm10470_vm0, %v19212_v14  ;;  %11992 = vmatpush3.bf16.msra.mxu0 %v16175_v45 }
 0x62b   :  { %10483 = vmatprep.mubr.msk.bf16.mxu0 %vm10482_vm1, %v19212_v14  ;;  %12014 = vmatpush3.bf16.msra.mxu1 %v16182_v24 }
 0x62c   :  { %10487 = vmatprep.mubr.msk.bf16.mxu1 %vm10486_vm2, %v19212_v14  ;;  %11993 = vmatprep.subr.bf16.mxu0 %v16189_v42 }
 0x62d   :  { %12015 = vmatprep.subr.bf16.mxu1 %v16192_v52 }
 0x62e   :  { %11994 = vmatpush3.bf16.msra.mxu0 %v16195_v53 }
 0x62f   :  { %12016 = vmatpush3.bf16.msra.mxu1 %v16198_v22  ;;  %11995 = vmatprep.subr.bf16.mxu0 %v16201_v27 }
 0x630   :  { %12017 = vmatprep.subr.bf16.mxu1 %v16204_v43 }
 0x632   :  { %11996 = vmatpush3.bf16.msra.mxu0 %v16207_v49 }
 0x633   :  { %12018 = vmatpush3.bf16.msra.mxu1 %v16210_v55  ;;  %11997 = vmatprep.subr.bf16.mxu0 %v16213_v18 }
 0x634   :  { %12019 = vmatprep.subr.bf16.mxu1 %v16216_v4 }
 0x636   :  { %11998 = vmatpush3.bf16.msra.mxu0 %v19633_v32 }
 0x637   :  { %12020 = vmatpush3.bf16.msra.mxu1 %v19634_v17  ;;  %11999 = vmatprep.subr.bf16.mxu0 %v19635_v33  ;;  %v7133_v17 = vadd.f32 %v13871_v51, %v7125_v9 }
 0x638   :  { %12021 = vmatprep.subr.bf16.mxu1 %v19636_v29  ;;  %v7131_v29 = vadd.f32 %v13868_v50, %v7123_v11  ;;  %v10448_v11 = vsel %vm6923_vm4, 1.0, %v19232_v44  ;;  %vm6222_vm4 = vcmp.gt.f32.partialorder %v16543_v61, 1.0 }
 0x63a   :  { %12000 = vmatpush3.bf16.msra.mxu0 %v19637_v59 }
 0x63b   :  { %12022 = vmatpush3.bf16.msra.mxu1 %v19638_v16  ;;  %12001 = vmatprep.subr.bf16.mxu0 %v19639_v56 }
 0x63c   :  { %v11699_v5 = vpop.f32.mrb[92].mxu0  ;;  %12023 = vmatprep.subr.bf16.mxu1 %v19640_v25  ;;  %v7136_v25 = vadd.f32 %v19242_v15, %v7128_v36 }
 0x63d   :  { %v11721_v6 = vpop.f32.mrb[92].mxu1  ;;  %v11700_v33 = vpop.f32.mrb[93].mxu0 }
 0x63e   :  { %v11701_v32 = vadd.f32 %v11700_v33, %v11699_v5  ;;  %v11722_v4 = vpop.f32.mrb[93].mxu1  ;;  %v11702_v59 = vpop.f32.mrb[94].mxu0  ;;  %12002 = vmatpush3.bf16.msra.mxu0 %v16249_v37  ;;  %v10450_v33 = vsel %vm6925_vm5, 1.0, %v19232_v44 }
 0x63f   :  { %v11723_v18 = vadd.f32 %v11722_v4, %v11721_v6  ;;  %v11724_v16 = vpop.f32.mrb[94].mxu1  ;;  %12024 = vmatpush3.bf16.msra.mxu1 %v16252_v39  ;;  %v11703_v56 = vpop.f32.mrb[95].mxu0  ;;  %12003 = vmatprep.subr.bf16.mxu0 %v16255_v40  ;;  %v7138_v4 = vadd.f32 %v19244_v31, %v7130_v3  ;;  %v19644_v6 = vld [vmem:[#allocation42_spill] sm:$0xff] }
 0x640   :  { %v6398_v9 = vadd.f32 %v11701_v32, %v16618_v12  ;;  %v11725_v59 = vpop.f32.mrb[95].mxu1  ;;  %12025 = vmatprep.subr.bf16.mxu1 %v16266_v60  ;;  %v16696_v16 = vsub.f32 %v7131_v29, %v10448_v11  ;;  %v16698_v56 = vsub.f32 %v7133_v17, %v10450_v33  ;;  %v10455_v12 = vsel %vm6930_vm7, 1.0, %v19232_v44  ;;  %v19641_v32 = vld [vmem:[#allocation39_spill] sm:$0xff]  ;;  %v19642_v29 = vld [vmem:[#allocation40_spill] sm:$0xff]  ;;  %v19648_v33 = vld [vmem:[#allocation58_spill] sm:$0xff] }
 0x641   :  { %v16711_v17 = vsub.f32 %v7136_v25, %v10453_v26  ;;  %v16714_v5 = vsub.f32 %v7138_v4, %v10455_v12  ;;  %v19646_v11 = vld [vmem:[#allocation44_spill] sm:$0xff]  ;;  %v19647_v25 = vld [vmem:[#allocation45_spill] sm:$0xff]  ;;  %v19650_v59 = vld [vmem:[#allocation27_spill] sm:$0xff] }
 0x642   :  { %v6438_v36 = vadd.f32 %v11723_v18, %v6398_v9  ;;  %12004 = vmatpush3.bf16.msra.mxu0 %v19605_v7  ;;  %v10368_v18 = vsel %vm6222_vm4, 1.0, %v19232_v44  ;;  %vm7147_vm5 = vcmp.gt.f32.partialorder %v16696_v16, 1.0  ;;  %vm7149_vm6 = vcmp.gt.f32.partialorder %v16698_v56, 1.0  ;;  %v19649_v9 = vld [vmem:[#allocation57_spill] sm:$0xff]  ;;  %v19652_v26 = vld [vmem:[#allocation50_spill] sm:$0xff] }
 0x643   :  { %12026 = vmatpush3.bf16.msra.mxu1 %v19641_v32  ;;  %12005 = vmatprep.subr.bf16.mxu0 %v19642_v29  ;;  %vm7152_vm3 = vcmp.gt.f32.partialorder %v16711_v17, 1.0  ;;  %vm10484_vm7 = vmpackc.low %vm7147_vm5, %vm7147_vm5  ;;  %vm7154_vm9 = vcmp.gt.f32.partialorder %v16714_v5, 1.0  ;;  %v19651_v4 = vld [vmem:[#allocation49_spill] sm:$0xff] }
 0x644   :  { %v6444_v3 = vadd.f32 %v6443_v28, %v6438_v36  ;;  %12027 = vmatprep.subr.bf16.mxu1 %v19643_v41  ;;  %vm10488_vm10 = vmpackc.low %vm7149_vm6, %vm7149_vm6  ;;  %v19653_v36 = vld [vmem:[#allocation51_spill] sm:$0xff]  ;;  %v19654_v28 = vld [vmem:[#allocation52_spill] sm:$0xff] }
 0x645   :  { %vm10490_vm12 = vmpackc.low %vm7152_vm3, %vm7152_vm3  ;;  %v19655_v12 = vld [vmem:[#allocation53_spill] sm:$0xff] }
 0x646   :  { %v16718_v61 = vsub.f32 %v6444_v3, %v10368_v18  ;;  %12006 = vmatpush3.bf16.msra.mxu0 %v19644_v6  ;;  %vm10494_vm13 = vmpackc.low %vm7154_vm9, %vm7154_vm9  ;;  %v19656_v3 = vld [vmem:[#allocation54_spill] sm:$0xff]  ;;  %v19657_v18 = vld [vmem:[#allocation13_spill] sm:$0xff] }
 0x647   :  { %12028 = vmatpush3.bf16.msra.mxu1 %v19645_v34  ;;  %12035 = vmatprep.subr.bf16.mxu0 %v19646_v11 }
 0x648   :  { %10395 = vst [vmem:[%s18713_s5 + $0x50] sm:$0xff] %v16718_v61  ;;  %12057 = vmatprep.subr.bf16.mxu1 %v19647_v25  ;;  %v19660_v25 = vld [vmem:[#allocation56_spill] sm:$0xff] }
 0x649   :  { %10485 = vmatmul.mubr.msk.bf16.vlgmr.msra.gmra.mrb[120].mxu0 %vm10484_vm7, %v19212_v14 }
 0x64a   :  { %10489 = vmatmul.mubr.msk.bf16.vlgmr.msra.gmra.mrb[120].mxu1 %vm10488_vm10, %v19212_v14  ;;  %12036 = vmatpush3.bf16.msra.mxu0 %v19648_v33  ;;  %v19659_v33 = vld [vmem:[#allocation55_spill] sm:$0xff] }
 0x64b   :  { %10491 = vmatprep.mubr.msk.bf16.mxu0 %vm10490_vm12, %v19212_v14  ;;  %12058 = vmatpush3.bf16.msra.mxu1 %v19649_v9  ;;  %v19658_v9 = vld [vmem:[#allocation15_spill] sm:$0xff] }
 0x64c   :  { %10495 = vmatprep.mubr.msk.bf16.mxu1 %vm10494_vm13, %v19212_v14  ;;  %12037 = vmatprep.subr.bf16.mxu0 %v19650_v59  ;;  %v19661_v59 = vld [vmem:[#allocation47_spill] sm:$0xff] }
 0x64d   :  { %12059 = vmatprep.subr.bf16.mxu1 %v19651_v4  ;;  %v19662_v4 = vld [vmem:[#allocation12_spill] sm:$0xff] }
 0x64e   :  { %12038 = vmatpush3.bf16.msra.mxu0 %v19652_v26  ;;  %v19663_v26 = vld [vmem:[#allocation48_spill] sm:$0xff] }
 0x64f   :  { %12060 = vmatpush3.bf16.msra.mxu1 %v19653_v36  ;;  %12039 = vmatprep.subr.bf16.mxu0 %v19654_v28  ;;  %v7127_v28 = vmul.f32 0.95, %v16613_v48  ;;  %v19664_v36 = vld [vmem:[#allocation14_spill] sm:$0xff] }
 0x650   :  { %12061 = vmatprep.subr.bf16.mxu1 %v19655_v12  ;;  %v7129_v12 = vmul.f32 0.95, %v16621_v20 }
 0x652   :  { %12040 = vmatpush3.bf16.msra.mxu0 %v19656_v3  ;;  %v19665_v3 = vld [vmem:[#allocation16_spill] sm:$0xff] }
 0x653   :  { %12062 = vmatpush3.bf16.msra.mxu1 %v19657_v18  ;;  %12041 = vmatprep.subr.bf16.mxu0 %v19658_v9  ;;  %v7348_v18 = vmul.f32 0.95, %v16628_v2  ;;  %v19666_v9 = vld [vmem:[#allocation17_spill] sm:$0xff] }
 0x654   :  { %12063 = vmatprep.subr.bf16.mxu1 %v19659_v33 }
 0x656   :  { %12042 = vmatpush3.bf16.msra.mxu0 %v19660_v25  ;;  %v7350_v25 = vmul.f32 0.95, %v16631_v35  ;;  %v7354_v35 = vmul.f32 0.95, %v16714_v5  ;;  %v19682_v5 = vld [vmem:[#allocation44_spill] sm:$0xff] }
 0x657   :  { %12064 = vmatpush3.bf16.msra.mxu1 %v19661_v59  ;;  %12043 = vmatprep.subr.bf16.mxu0 %v19662_v4  ;;  %v19667_v59 = vld [vmem:[#allocation18_spill] sm:$0xff] }
 0x658   :  { %12065 = vmatprep.subr.bf16.mxu1 %v19663_v26  ;;  %v7135_v26 = vadd.f32 %v14009_v57, %v7127_v28  ;;  %v10452_v28 = vsel %vm6927_vm8, 1.0, %v19232_v44 }
 0x65a   :  { %12044 = vmatpush3.bf16.msra.mxu0 %v19664_v36  ;;  %v7137_v36 = vadd.f32 %v14013_v46, %v7129_v12 }
 0x65b   :  { %12066 = vmatpush3.bf16.msra.mxu1 %v19665_v3  ;;  %12045 = vmatprep.subr.bf16.mxu0 %v19666_v9 }
 0x65c   :  { %v11743_v33 = vpop.f32.mrb[96].mxu0  ;;  %12067 = vmatprep.subr.bf16.mxu1 %v19667_v59  ;;  %v7356_v59 = vadd.f32 %v19261_v13, %v7348_v18 }
 0x65d   :  { %v11765_v4 = vpop.f32.mrb[96].mxu1  ;;  %v11744_v11 = vpop.f32.mrb[97].mxu0 }
 0x65e   :  { %v11745_v34 = vadd.f32 %v11744_v11, %v11743_v33  ;;  %v11766_v6 = vpop.f32.mrb[97].mxu1  ;;  %v11746_v41 = vpop.f32.mrb[98].mxu0  ;;  %12046 = vmatpush3.bf16.msra.mxu0 %v16404_v30  ;;  %v7358_v33 = vadd.f32 %v19263_v0, %v7350_v25  ;;  %v19677_v25 = vld [vmem:[#allocation28_spill] sm:$0xff] }
 0x65f   :  { %v11767_v29 = vadd.f32 %v11766_v6, %v11765_v4  ;;  %v11768_v3 = vpop.f32.mrb[98].mxu1  ;;  %12068 = vmatpush3.bf16.msra.mxu1 %v16408_v58  ;;  %v11747_v9 = vpop.f32.mrb[99].mxu0  ;;  %12047 = vmatprep.subr.bf16.mxu0 %v16411_v38  ;;  %v10454_v6 = vsel %vm6929_vm11, 1.0, %v19232_v44  ;;  %v10475_v4 = vsel %vm7148_vm14, 1.0, %v19232_v44 }
 0x660   :  { %v6542_v11 = vadd.f32 %v16605_v1, %v11745_v34  ;;  %v11769_v41 = vpop.f32.mrb[99].mxu1  ;;  %12069 = vmatprep.subr.bf16.mxu1 %v16419_v54  ;;  %v16786_v9 = vsub.f32 %v7135_v26, %v10452_v28  ;;  %v16794_v48 = vsub.f32 %v7137_v36, %v10454_v6  ;;  %v10477_v34 = vsel %vm7150_vm15, 1.0, %v19232_v44 }
 0x661   :  { %v16801_v20 = vsub.f32 %v7356_v59, %v10475_v4  ;;  %v16804_v2 = vsub.f32 %v7358_v33, %v10477_v34  ;;  %v10474_v34 = vsel %vm7147_vm5, 1.0, %v19232_v44  ;;  %vm6446_vm5 = vcmp.gt.f32.partialorder %v16718_v61, 1.0 }
 0x662   :  { %v16791_v12 = vadd.f32 %v11767_v29, %v6542_v11  ;;  %12048 = vmatpush3.bf16.msra.mxu0 %v16433_v47  ;;  %vm7151_vm8 = vcmp.gt.f32.partialorder %v16786_v9, 1.0  ;;  %vm7153_vm11 = vcmp.gt.f32.partialorder %v16794_v48, 1.0 }
 0x663   :  { %12070 = vmatpush3.bf16.msra.mxu1 %v16441_v8  ;;  %12049 = vmatprep.subr.bf16.mxu0 %v16444_v19  ;;  %vm7372_vm14 = vcmp.gt.f32.partialorder %v16801_v20, 1.0  ;;  %vm10492_vm15 = vmpackc.low %vm7151_vm8, %vm7151_vm8  ;;  %vm7374_vm0 = vcmp.gt.f32.partialorder %v16804_v2, 1.0 }
 0x664   :  { %12071 = vmatprep.subr.bf16.mxu1 %v16449_v21  ;;  %vm10496_vm1 = vmpackc.low %vm7153_vm11, %vm7153_vm11 }
 0x665   :  { %vm10508_vm2 = vmpackc.low %vm7372_vm14, %vm7372_vm14 }
 0x666   :  { %12050 = vmatpush3.bf16.msra.mxu0 %v16455_v62  ;;  %vm10512_vm4 = vmpackc.low %vm7374_vm0, %vm7374_vm0 }
 0x667   :  { %12072 = vmatpush3.bf16.msra.mxu1 %v16459_v10  ;;  %12079 = vmatprep.subr.bf16.mxu0 %v16159_v23  ;;  %v19668_v23 = vld [vmem:[#allocation30_spill] sm:$0xff] }
 0x668   :  { %12101 = vmatprep.subr.bf16.mxu1 %v16166_v63  ;;  %v19669_v63 = vld [vmem:[#allocation31_spill] sm:$0xff] }
 0x669   :  { %10493 = vmatmul.mubr.msk.bf16.vlgmr.msra.gmra.mrb[124].mxu0 %vm10492_vm15, %v19212_v14 }
 0x66a   :  { %10497 = vmatmul.mubr.msk.bf16.vlgmr.msra.gmra.mrb[124].mxu1 %vm10496_vm1, %v19212_v14  ;;  %12080 = vmatpush3.bf16.msra.mxu0 %v16175_v45  ;;  %v19670_v45 = vld [vmem:[#allocation32_spill] sm:$0xff] }
 0x66b   :  { %10509 = vmatprep.mubr.msk.bf16.mxu0 %vm10508_vm2, %v19212_v14  ;;  %12102 = vmatpush3.bf16.msra.mxu1 %v16182_v24  ;;  %v19671_v24 = vld [vmem:[#allocation33_spill] sm:$0xff] }
 0x66c   :  { %10513 = vmatprep.mubr.msk.bf16.mxu1 %vm10512_vm4, %v19212_v14  ;;  %12081 = vmatprep.subr.bf16.mxu0 %v16189_v42  ;;  %v19672_v42 = vld [vmem:[#allocation34_spill] sm:$0xff] }
 0x66d   :  { %12103 = vmatprep.subr.bf16.mxu1 %v16192_v52  ;;  %v19673_v52 = vld [vmem:[#allocation35_spill] sm:$0xff] }
 0x66e   :  { %12082 = vmatpush3.bf16.msra.mxu0 %v16195_v53  ;;  %v7347_v53 = vmul.f32 0.95, %v16696_v16  ;;  %v10479_v16 = vsel %vm7152_vm3, 1.0, %v19232_v44 }
 0x66f   :  { %12104 = vmatpush3.bf16.msra.mxu1 %v16198_v22  ;;  %12083 = vmatprep.subr.bf16.mxu0 %v16201_v27  ;;  %v7349_v22 = vmul.f32 0.95, %v16698_v56  ;;  %v19674_v27 = vld [vmem:[#allocation36_spill] sm:$0xff]  ;;  %v6667_v56 = vmul.f32 0.95, %v16718_v61  ;;  %v19680_v61 = vld [vmem:[#allocation42_spill] sm:$0xff] }
 0x670   :  { %12105 = vmatprep.subr.bf16.mxu1 %v16204_v43  ;;  %v7352_v43 = vmul.f32 0.95, %v16711_v17  ;;  %v7355_v36 = vadd.f32 %v13868_v50, %v7347_v53  ;;  %v19679_v17 = vld [vmem:[#allocation41_spill] sm:$0xff] }
 0x671   :  { %v7357_v3 = vadd.f32 %v13871_v51, %v7349_v22  ;;  %v10394_v22 = vsel %vm6446_vm5, 1.0, %v19232_v44 }
 0x672   :  { %12084 = vmatpush3.bf16.msra.mxu0 %v16207_v49  ;;  %v19675_v49 = vld [vmem:[#allocation37_spill] sm:$0xff]  ;;  %v7360_v4 = vadd.f32 %v19242_v15, %v7352_v43  ;;  %v19684_v43 = vld [vmem:[#allocation58_spill] sm:$0xff] }
 0x673   :  { %12106 = vmatpush3.bf16.msra.mxu1 %v16210_v55  ;;  %12085 = vmatprep.subr.bf16.mxu0 %v19668_v23  ;;  %v19676_v55 = vld [vmem:[#allocation38_spill] sm:$0xff]  ;;  %v10476_v23 = vsel %vm7149_vm6, 1.0, %v19232_v44 }
 0x674   :  { %12107 = vmatprep.subr.bf16.mxu1 %v19669_v63 }
 0x676   :  { %12086 = vmatpush3.bf16.msra.mxu0 %v19670_v45  ;;  %v16869_v45 = vsub.f32 %v7355_v36, %v10474_v34  ;;  %v19692_v36 = vld [vmem:[#allocation54_spill] sm:$0xff]  ;;  %v7353_v34 = vmul.f32 0.95, %v16794_v48 }
 0x677   :  { %12108 = vmatpush3.bf16.msra.mxu1 %v19671_v24  ;;  %12087 = vmatprep.subr.bf16.mxu0 %v19672_v42  ;;  %v16884_v42 = vsub.f32 %v7360_v4, %v10479_v16  ;;  %v7351_v4 = vmul.f32 0.95, %v16786_v9  ;;  %v7574_v16 = vmul.f32 0.95, %v16804_v2  ;;  %v17019_v2 = vld [vmem:[#allocation6 + $0x8] sm:$0xff]  }
 0x678   :  { %12109 = vmatprep.subr.bf16.mxu1 %v19673_v52  ;;  %vm7371_vm6 = vcmp.gt.f32.partialorder %v16869_v45, 1.0 }
 0x679   :  { %vm7376_vm7 = vcmp.gt.f32.partialorder %v16884_v42, 1.0 }
 0x67a   :  { %12088 = vmatpush3.bf16.msra.mxu0 %v19674_v27  ;;  %v19683_v27 = vld [vmem:[#allocation45_spill] sm:$0xff]  ;;  %vm10516_vm13 = vmpackc.low %vm7376_vm7, %vm7376_vm7 }
 0x67b   :  { %12110 = vmatpush3.bf16.msra.mxu1 %v19675_v49  ;;  %12089 = vmatprep.subr.bf16.mxu0 %v19676_v55  ;;  %v19685_v49 = vld [vmem:[#allocation57_spill] sm:$0xff]  ;;  %v19686_v55 = vld [vmem:[#allocation27_spill] sm:$0xff] }
 0x67c   :  { %v11787_v29 = vpop.f32.mrb[100].mxu0  ;;  %12111 = vmatprep.subr.bf16.mxu1 %v19677_v25  ;;  %v19689_v25 = vld [vmem:[#allocation51_spill] sm:$0xff] }
 0x67d   :  { %v11809_v59 = vpop.f32.mrb[100].mxu1  ;;  %v11788_v26 = vpop.f32.mrb[101].mxu0 }
 0x67e   :  { %v11789_v18 = vadd.f32 %v11788_v26, %v11787_v29  ;;  %v11810_v28 = vpop.f32.mrb[101].mxu1  ;;  %v11790_v11 = vpop.f32.mrb[102].mxu0  ;;  %12090 = vmatpush3.bf16.msra.mxu0 %v16249_v37  ;;  %v19688_v29 = vld [vmem:[#allocation50_spill] sm:$0xff]  ;;  %v19691_v26 = vld [vmem:[#allocation53_spill] sm:$0xff] }
 0x67f   :  { %v11811_v41 = vadd.f32 %v11810_v28, %v11809_v59  ;;  %v11812_v33 = vpop.f32.mrb[102].mxu1  ;;  %12112 = vmatpush3.bf16.msra.mxu1 %v16252_v39  ;;  %v11791_v6 = vpop.f32.mrb[103].mxu0  ;;  %12091 = vmatprep.subr.bf16.mxu0 %v16255_v40  ;;  %v7362_v39 = vadd.f32 %v19244_v31, %v7354_v35  ;;  %v16871_v40 = vsub.f32 %v7357_v3, %v10476_v23  ;;  %v19687_v35 = vld [vmem:[#allocation49_spill] sm:$0xff]  ;;  %v19690_v59 = vld [vmem:[#allocation52_spill] sm:$0xff]  ;;  %v19695_v28 = vld [vmem:[#allocation55_spill] sm:$0xff] }
 0x680   :  { %v6622_v63 = vadd.f32 %v11789_v18, %v16791_v12  ;;  %v11813_v37 = vpop.f32.mrb[103].mxu1  ;;  %12113 = vmatprep.subr.bf16.mxu1 %v16266_v60  ;;  %v10481_v60 = vsel %vm7154_vm9, 1.0, %v19232_v44  ;;  %v19678_v12 = vld [vmem:[#allocation40_spill] sm:$0xff]  ;;  %vm10510_vm9 = vmpackc.low %vm7371_vm6, %vm7371_vm6  ;;  %v19693_v3 = vld [vmem:[#allocation13_spill] sm:$0xff] }
 0x681   :  { %v16887_v53 = vsub.f32 %v7362_v39, %v10481_v60  ;;  %vm7373_vm3 = vcmp.gt.f32.partialorder %v16871_v40, 1.0  ;;  %v19694_v18 = vld [vmem:[#allocation15_spill] sm:$0xff]  ;;  %v19696_v11 = vld [vmem:[#allocation56_spill] sm:$0xff]  ;;  %v19700_v23 = vld [vmem:[#allocation14_spill] sm:$0xff] }
 0x682   :  { %v6662_v24 = vadd.f32 %v11811_v41, %v6622_v63  ;;  %12092 = vmatpush3.bf16.msra.mxu0 %v19605_v7  ;;  %vm10514_vm12 = vmpackc.low %vm7373_vm3, %vm7373_vm3  ;;  %v19697_v41 = vld [vmem:[#allocation47_spill] sm:$0xff]  ;;  %v19698_v33 = vld [vmem:[#allocation12_spill] sm:$0xff]  ;;  %v7572_v63 = vmul.f32 0.95, %v16801_v20 }
 0x683   :  { %12114 = vmatpush3.bf16.msra.mxu1 %v19641_v32  ;;  %12093 = vmatprep.subr.bf16.mxu0 %v19678_v12  ;;  %v19681_v32 = vld [vmem:[#allocation43_spill] sm:$0xff]  ;;  %vm7378_vm10 = vcmp.gt.f32.partialorder %v16887_v53, 1.0  ;;  %v19699_v6 = vld [vmem:[#allocation48_spill] sm:$0xff]  ;;  %v19702_v39 = vld [vmem:[#allocation17_spill] sm:$0xff] }
 0x684   :  { %v6668_v52 = vadd.f32 %v6667_v56, %v6662_v24  ;;  %12115 = vmatprep.subr.bf16.mxu1 %v19679_v17  ;;  %vm10520_vm15 = vmpackc.low %vm7378_vm10, %vm7378_vm10  ;;  %v19701_v37 = vld [vmem:[#allocation16_spill] sm:$0xff]  ;;  %v19703_v56 = vld [vmem:[#allocation18_spill] sm:$0xff] }
 0x686   :  { %v16891_v7 = vsub.f32 %v6668_v52, %v10394_v22  ;;  %12094 = vmatpush3.bf16.msra.mxu0 %v19680_v61  ;;  %v7359_v52 = vadd.f32 %v14009_v57, %v7351_v4  ;;  %v17049_v4 = vld [vmem:[#allocation6 + $0x60] sm:$0xff]  }
 0x687   :  { %12116 = vmatpush3.bf16.msra.mxu1 %v19681_v32  ;;  %12123 = vmatprep.subr.bf16.mxu0 %v19682_v5  ;;  %v7361_v32 = vadd.f32 %v14013_v46, %v7353_v34  ;;  %19708 = vst [vmem:[#allocation23_spill] sm:$0xff] %v17049_v4  ;;  %v17052_v34 = vld [vmem:[#allocation6 + $0xe0] sm:$0xff]  }
 0x688   :  { %10421 = vst [vmem:[%s18713_s5 + $0x58] sm:$0xff] %v16891_v7  ;;  %12145 = vmatprep.subr.bf16.mxu1 %v19683_v27  ;;  %19709 = vst [vmem:[#allocation24_spill] sm:$0xff] %v17052_v34 }
 0x689   :  { %10511 = vmatmul.mubr.msk.bf16.vlgmr.msra.gmra.mrb[128].mxu0 %vm10510_vm9, %v19212_v14 }
 0x68a   :  { %10515 = vmatmul.mubr.msk.bf16.vlgmr.msra.gmra.mrb[128].mxu1 %vm10514_vm12, %v19212_v14  ;;  %12124 = vmatpush3.bf16.msra.mxu0 %v19684_v43 }
 0x68b   :  { %10517 = vmatprep.mubr.msk.bf16.mxu0 %vm10516_vm13, %v19212_v14  ;;  %12146 = vmatpush3.bf16.msra.mxu1 %v19685_v49  ;;  %v7580_v49 = vadd.f32 %v19261_v13, %v7572_v63  ;;  %v7573_v63 = vmul.f32 0.95, %v16871_v40 }
 0x68c   :  { %10521 = vmatprep.mubr.msk.bf16.mxu1 %vm10520_vm15, %v19212_v14  ;;  %12125 = vmatprep.subr.bf16.mxu0 %v19686_v55  ;;  %v10478_v55 = vsel %vm7151_vm8, 1.0, %v19232_v44 }
 0x68d   :  { %12147 = vmatprep.subr.bf16.mxu1 %v19687_v35 }
 0x68e   :  { %12126 = vmatpush3.bf16.msra.mxu0 %v19688_v29 }
 0x68f   :  { %12148 = vmatpush3.bf16.msra.mxu1 %v19689_v25  ;;  %12127 = vmatprep.subr.bf16.mxu0 %v19690_v59  ;;  %v16959_v25 = vsub.f32 %v7359_v52, %v10478_v55 }
 0x690   :  { %12149 = vmatprep.subr.bf16.mxu1 %v19691_v26  ;;  %v17022_v26 = vld [vmem:[#allocation6 + $0x88] sm:$0xff]  }
 0x691   :  { %vm7375_vm8 = vcmp.gt.f32.partialorder %v16959_v25, 1.0 }
 0x692   :  { %12128 = vmatpush3.bf16.msra.mxu0 %v19692_v36  ;;  %v17025_v36 = vld [vmem:[#allocation6 + $0x50] sm:$0xff]  }
 0x693   :  { %12150 = vmatpush3.bf16.msra.mxu1 %v19693_v3  ;;  %12129 = vmatprep.subr.bf16.mxu0 %v19694_v18  ;;  %v17028_v3 = vld [vmem:[#allocation6 + $0xd0] sm:$0xff]  }
 0x694   :  { %12151 = vmatprep.subr.bf16.mxu1 %v19695_v28  ;;  %v17031_v18 = vld [vmem:[#allocation6 + $0x10] sm:$0xff]  }
 0x695   :  { %v17034_v28 = vld [vmem:[#allocation6 + $0x90] sm:$0xff]  }
 0x696   :  { %12130 = vmatpush3.bf16.msra.mxu0 %v19696_v11  ;;  %v17037_v11 = vld [vmem:[#allocation6 + $0x58] sm:$0xff]  }
 0x697   :  { %12152 = vmatpush3.bf16.msra.mxu1 %v19697_v41  ;;  %12131 = vmatprep.subr.bf16.mxu0 %v19698_v33  ;;  %19704 = vst [vmem:[#allocation19_spill] sm:$0xff] %v17037_v11  ;;  %v17040_v41 = vld [vmem:[#allocation6 + $0xd8] sm:$0xff]  }
 0x698   :  { %12153 = vmatprep.subr.bf16.mxu1 %v19699_v6  ;;  %19705 = vst [vmem:[#allocation20_spill] sm:$0xff] %v17040_v41  ;;  %v17043_v33 = vld [vmem:[#allocation6 + $0x18] sm:$0xff]  }
 0x699   :  { %19706 = vst [vmem:[#allocation21_spill] sm:$0xff] %v17043_v33  ;;  %v17046_v6 = vld [vmem:[#allocation6 + $0x98] sm:$0xff]  }
 0x69a   :  { %12132 = vmatpush3.bf16.msra.mxu0 %v19700_v23  ;;  %19707 = vst [vmem:[#allocation22_spill] sm:$0xff] %v17046_v6  ;;  %v7571_v23 = vmul.f32 0.95, %v16869_v45  ;;  %v10505_v45 = vsel %vm7376_vm7, 1.0, %v19232_v44 }
 0x69b   :  { %12154 = vmatpush3.bf16.msra.mxu1 %v19701_v37  ;;  %12133 = vmatprep.subr.bf16.mxu0 %v19702_v39  ;;  %v17057_v37 = vld [vmem:[#allocation6 + $0x20] sm:$0xff]   ;;  %v7576_v39 = vmul.f32 0.95, %v16884_v42 }
 0x69c   :  { %v11831_v24 = vpop.f32.mrb[104].mxu0  ;;  %12155 = vmatprep.subr.bf16.mxu1 %v19703_v56  ;;  %19710 = vst [vmem:[#allocation25_spill] sm:$0xff] %v17057_v37  ;;  %v7578_v56 = vmul.f32 0.95, %v16887_v53 }
 0x69d   :  { %v11853_v60 = vpop.f32.mrb[104].mxu1  ;;  %v11832_v12 = vpop.f32.mrb[105].mxu0 }
 0x69e   :  { %v11833_v17 = vadd.f32 %v11832_v12, %v11831_v24  ;;  %v11854_v22 = vpop.f32.mrb[105].mxu1  ;;  %v11834_v61 = vpop.f32.mrb[106].mxu0  ;;  %12134 = vmatpush3.bf16.msra.mxu0 %v16404_v30  ;;  %v7582_v30 = vadd.f32 %v19263_v0, %v7574_v16  ;;  %v17061_v16 = vld [vmem:[#allocation6 + $0xa0] sm:$0xff]   ;;  %v17064_v24 = vld [vmem:[#allocation6 + $0x68] sm:$0xff]  }
 0x69f   :  { %v11855_v5 = vadd.f32 %v11854_v22, %v11853_v60  ;;  %v11856_v27 = vpop.f32.mrb[106].mxu1  ;;  %12156 = vmatpush3.bf16.msra.mxu1 %v16408_v58  ;;  %v11835_v43 = vpop.f32.mrb[107].mxu0  ;;  %12135 = vmatprep.subr.bf16.mxu0 %v16411_v38  ;;  %v10480_v58 = vsel %vm7153_vm11, 1.0, %v19232_v44  ;;  %v10501_v38 = vsel %vm7372_vm14, 1.0, %v19232_v44  ;;  %19711 = vst [vmem:[#allocation26_spill] sm:$0xff] %v17061_v16  ;;  %19712 = vst [vmem:[#allocation29_spill] sm:$0xff] %v17064_v24 }
 0x6a0   :  { %v6766_v35 = vadd.f32 %v16605_v1, %v11833_v17  ;;  %v11857_v29 = vpop.f32.mrb[107].mxu1  ;;  %12157 = vmatprep.subr.bf16.mxu1 %v16419_v54  ;;  %v16967_v9 = vsub.f32 %v7361_v32, %v10480_v58  ;;  %v10503_v54 = vsel %vm7374_vm0, 1.0, %v19232_v44  ;;  %v16974_v48 = vsub.f32 %v7580_v49, %v10501_v38  ;;  %vm10518_vm0 = vmpackc.low %vm7375_vm8, %vm7375_vm8  ;;  %v17068_v12 = vld [vmem:[#allocation6 + $0xe8] sm:$0xff]  }
 0x6a1   :  { %v16977_v20 = vsub.f32 %v7582_v30, %v10503_v54  ;;  %19713 = vst [vmem:[#allocation46_spill] sm:$0xff] %v17068_v12  ;;  %v7579_v22 = vadd.f32 %v13868_v50, %v7571_v23  ;;  %v7581_v61 = vadd.f32 %v13871_v51, %v7573_v63  ;;  %v17073_v43 = vld [vmem:[#allocation6 + $0x28] sm:$0xff]   ;;  %v17079_v30 = vld [vmem:[#allocation6 + $0x70] sm:$0xff]   ;;  %v7584_v58 = vadd.f32 %v19242_v15, %v7576_v39 }
 0x6a2   :  { %v16964_v59 = vadd.f32 %v11855_v5, %v6766_v35  ;;  %12136 = vmatpush3.bf16.msra.mxu0 %v16433_v47  ;;  %vm7377_vm11 = vcmp.gt.f32.partialorder %v16967_v9, 1.0  ;;  %v16983_v47 = vld [vmem:[#allocation6 + $0x40] sm:$0xff]   ;;  %vm7596_vm14 = vcmp.gt.f32.partialorder %v16974_v48, 1.0  ;;  %v17076_v35 = vld [vmem:[#allocation6 + $0xa8] sm:$0xff]   ;;  %v10500_v38 = vsel %vm7371_vm6, 1.0, %v19232_v44 }
 0x6a3   :  { %12158 = vmatpush3.bf16.msra.mxu1 %v16441_v8  ;;  %12137 = vmatprep.subr.bf16.mxu0 %v16444_v19  ;;  %v16990_v8 = vld [vmem:[#allocation6 + $0xc0] sm:$0xff]   ;;  %vm7598_vm1 = vcmp.gt.f32.partialorder %v16977_v20, 1.0  ;;  %vm10522_vm2 = vmpackc.low %vm7377_vm11, %vm7377_vm11  ;;  %v10502_v54 = vsel %vm7373_vm3, 1.0, %v19232_v44  ;;  %vm6670_vm6 = vcmp.gt.f32.partialorder %v16891_v7, 1.0  ;;  %v17115_v42 = vsub.f32 %v7584_v58, %v10505_v45  ;;  %v17173_v45 = vld [vmem:[#allocation6 + $0x108] sm:$0xff]  }
 0x6a4   :  { %12159 = vmatprep.subr.bf16.mxu1 %v16449_v21  ;;  %v16999_v19 = vld [vmem:[#allocation6] sm:$0xff]   ;;  %vm10534_vm4 = vmpackc.low %vm7596_vm14, %vm7596_vm14  ;;  %v17096_v39 = vsub.f32 %v7581_v61, %v10502_v54  ;;  %v17112_v61 = vld [vmem:[#allocation6 + $0x78] sm:$0xff]   ;;  %v10420_v53 = vsel %vm6670_vm6, 1.0, %v19232_v44  ;;  %19726 = vst [vmem:[#allocation41_spill] sm:$0xff] %v17173_v45 }
 0x6a5   :  { %v17006_v21 = vld [vmem:[#allocation6 + $0x80] sm:$0xff]   ;;  %vm10538_vm5 = vmpackc.low %vm7598_vm1, %vm7598_vm1  ;;  %19716 = vst [vmem:[#allocation31_spill] sm:$0xff] %v17112_v61  ;;  %vm7600_vm9 = vcmp.gt.f32.partialorder %v17115_v42, 1.0 }
 0x6a6   :  { %12138 = vmatpush3.bf16.msra.mxu0 %v16455_v62  ;;  %v17013_v62 = vld [vmem:[#allocation6 + $0x48] sm:$0xff]   ;;  %vm7597_vm7 = vcmp.gt.f32.partialorder %v17096_v39, 1.0  ;;  %v17133_v58 = vld [vmem:[#allocation6 + $0x140] sm:$0xff]   ;;  %vm10542_vm15 = vmpackc.low %vm7600_vm9, %vm7600_vm9 }
 0x6a7   :  { %12160 = vmatpush3.bf16.msra.mxu1 %v16459_v10  ;;  %12167 = vmatprep.subr.bf16.mxu0 %v16983_v47  ;;  %v17016_v10 = vld [vmem:[#allocation6 + $0xc8] sm:$0xff]   ;;  %19720 = vst [vmem:[#allocation35_spill] sm:$0xff] %v17133_v58  ;;  %vm10540_vm13 = vmpackc.low %vm7597_vm7, %vm7597_vm7  ;;  %v17153_v54 = vld [vmem:[#allocation6 + $0x100] sm:$0xff]  }
 0x6a8   :  { %12189 = vmatprep.subr.bf16.mxu1 %v16990_v8  ;;  %19722 = vst [vmem:[#allocation37_spill] sm:$0xff] %v17153_v54 }
 0x6a9   :  { %10519 = vmatmul.mubr.msk.bf16.vlgmr.msra.gmra.mrb[132].mxu0 %vm10518_vm0, %v19212_v14 }
 0x6aa   :  { %10523 = vmatmul.mubr.msk.bf16.vlgmr.msra.gmra.mrb[132].mxu1 %vm10522_vm2, %v19212_v14  ;;  %12168 = vmatpush3.bf16.msra.mxu0 %v16999_v19 }
 0x6ab   :  { %10535 = vmatprep.mubr.msk.bf16.mxu0 %vm10534_vm4, %v19212_v14  ;;  %12190 = vmatpush3.bf16.msra.mxu1 %v17006_v21 }
 0x6ac   :  { %10539 = vmatprep.mubr.msk.bf16.mxu1 %vm10538_vm5, %v19212_v14  ;;  %12169 = vmatprep.subr.bf16.mxu0 %v17013_v62 }
 0x6ad   :  { %12191 = vmatprep.subr.bf16.mxu1 %v17016_v10 }
 0x6ae   :  { %12170 = vmatpush3.bf16.msra.mxu0 %v17019_v2 }
 0x6af   :  { %12192 = vmatpush3.bf16.msra.mxu1 %v17022_v26  ;;  %12171 = vmatprep.subr.bf16.mxu0 %v17025_v36 }
 0x6b0   :  { %12193 = vmatprep.subr.bf16.mxu1 %v17028_v3 }
 0x6b2   :  { %12172 = vmatpush3.bf16.msra.mxu0 %v17031_v18 }
 0x6b3   :  { %12194 = vmatpush3.bf16.msra.mxu1 %v17034_v28  ;;  %12173 = vmatprep.subr.bf16.mxu0 %v17037_v11 }
 0x6b4   :  { %12195 = vmatprep.subr.bf16.mxu1 %v17040_v41 }
 0x6b6   :  { %12174 = vmatpush3.bf16.msra.mxu0 %v17043_v33 }
 0x6b7   :  { %12196 = vmatpush3.bf16.msra.mxu1 %v17046_v6  ;;  %12175 = vmatprep.subr.bf16.mxu0 %v17049_v4 }
 0x6b8   :  { %12197 = vmatprep.subr.bf16.mxu1 %v17052_v34 }
 0x6ba   :  { %12176 = vmatpush3.bf16.msra.mxu0 %v17057_v37 }
 0x6bb   :  { %12198 = vmatpush3.bf16.msra.mxu1 %v17061_v16  ;;  %12177 = vmatprep.subr.bf16.mxu0 %v17064_v24 }
 0x6bc   :  { %v11875_v60 = vpop.f32.mrb[108].mxu0  ;;  %12199 = vmatprep.subr.bf16.mxu1 %v17068_v12 }
 0x6bd   :  { %v11897_v52 = vpop.f32.mrb[108].mxu1  ;;  %v11876_v17 = vpop.f32.mrb[109].mxu0 }
 0x6be   :  { %v11877_v32 = vadd.f32 %v11876_v17, %v11875_v60  ;;  %v11898_v5 = vpop.f32.mrb[109].mxu1  ;;  %v11878_v27 = vpop.f32.mrb[110].mxu0  ;;  %12178 = vmatpush3.bf16.msra.mxu0 %v17073_v43  ;;  %v17090_v60 = vld [vmem:[#allocation6 + $0xf0] sm:$0xff]   ;;  %v17094_v17 = vsub.f32 %v7579_v22, %v10500_v38  ;;  %v17144_v38 = vld [vmem:[#allocation6 + $0x1c0] sm:$0xff]  }
 0x6bf   :  { %v11899_v49 = vadd.f32 %v11898_v5, %v11897_v52  ;;  %v11900_v55 = vpop.f32.mrb[110].mxu1  ;;  %12200 = vmatpush3.bf16.msra.mxu1 %v17076_v35  ;;  %v11879_v29 = vpop.f32.mrb[111].mxu0  ;;  %12179 = vmatprep.subr.bf16.mxu0 %v17079_v30  ;;  %v7586_v52 = vadd.f32 %v19244_v31, %v7578_v56  ;;  %v10507_v56 = vsel %vm7378_vm10, 1.0, %v19232_v44  ;;  %v17109_v22 = vld [vmem:[#allocation6 + $0xb0] sm:$0xff]   ;;  %19721 = vst [vmem:[#allocation36_spill] sm:$0xff] %v17144_v38 }
 0x6c0   :  { %v6846_v23 = vadd.f32 %v11877_v32, %v16964_v59  ;;  %v11901_v63 = vpop.f32.mrb[111].mxu1  ;;  %12201 = vmatprep.subr.bf16.mxu1 %v17090_v60  ;;  %v6891_v59 = vmul.f32 0.95, %v16891_v7  ;;  %v17103_v32 = vld [vmem:[#allocation6 + $0x30] sm:$0xff]   ;;  %19715 = vst [vmem:[#allocation30_spill] sm:$0xff] %v17109_v22  ;;  %v17117_v7 = vld [vmem:[#allocation6 + $0xf8] sm:$0xff]  }
 0x6c1   :  { %19714 = vst [vmem:[#allocation39_spill] sm:$0xff] %v17103_v32  ;;  %19717 = vst [vmem:[#allocation32_spill] sm:$0xff] %v17117_v7  ;;  %v17120_v27 = vsub.f32 %v7586_v52, %v10507_v56  ;;  %vm7595_vm3 = vcmp.gt.f32.partialorder %v17094_v17, 1.0  ;;  %v17126_v55 = vld [vmem:[#allocation6 + $0x38] sm:$0xff]   ;;  %v17167_v63 = vld [vmem:[#allocation6 + $0x148] sm:$0xff]  }
 0x6c2   :  { %v6886_v40 = vadd.f32 %v11899_v49, %v6846_v23  ;;  %12180 = vmatpush3.bf16.msra.mxu0 %v17103_v32  ;;  %19718 = vst [vmem:[#allocation33_spill] sm:$0xff] %v17126_v55  ;;  %v17130_v29 = vld [vmem:[#allocation6 + $0xb8] sm:$0xff]   ;;  %vm10536_vm10 = vmpackc.low %vm7595_vm3, %vm7595_vm3  ;;  %v17160_v23 = vld [vmem:[#allocation6 + $0x180] sm:$0xff]  }
 0x6c3   :  { %12202 = vmatpush3.bf16.msra.mxu1 %v17109_v22  ;;  %12181 = vmatprep.subr.bf16.mxu0 %v17112_v61  ;;  %19719 = vst [vmem:[#allocation34_spill] sm:$0xff] %v17130_v29  ;;  %vm7602_vm12 = vcmp.gt.f32.partialorder %v17120_v27, 1.0  ;;  %19723 = vst [vmem:[#allocation38_spill] sm:$0xff] %v17160_v23  ;;  %v17170_v52 = vld [vmem:[#allocation6 + $0x1c8] sm:$0xff]   ;;  %v17182_v56 = vld [vmem:[#allocation6 + $0x1d0] sm:$0xff]  }
 0x6c4   :  { %v6892_v5 = vadd.f32 %v6891_v59, %v6886_v40  ;;  %12203 = vmatprep.subr.bf16.mxu1 %v17117_v7  ;;  %vm10546_vm0 = vmpackc.low %vm7602_vm12, %vm7602_vm12  ;;  %19724 = vst [vmem:[#allocation28_spill] sm:$0xff] %v17167_v63  ;;  %v17176_v40 = vld [vmem:[#allocation6 + $0x188] sm:$0xff]   ;;  %v17179_v59 = vld [vmem:[#allocation6 + $0x150] sm:$0xff]  }
 0x6c5   :  { %19725 = vst [vmem:[#allocation40_spill] sm:$0xff] %v17170_v52  ;;  %19727 = vst [vmem:[#allocation42_spill] sm:$0xff] %v17176_v40  ;;  %v17226_v7 = vld [vmem:[#allocation6 + $0x128] sm:$0xff]   ;;  %v17233_v32 = vld [vmem:[#allocation6 + $0x170] sm:$0xff]  }
 0x6c6   :  { %v17124_v49 = vsub.f32 %v6892_v5, %v10420_v53  ;;  %12182 = vmatpush3.bf16.msra.mxu0 %v17126_v55  ;;  %19728 = vst [vmem:[#allocation43_spill] sm:$0xff] %v17179_v59  ;;  %19729 = vst [vmem:[#allocation44_spill] sm:$0xff] %v17182_v56  ;;  %v17185_v5 = vld [vmem:[#allocation6 + $0x110] sm:$0xff]   ;;  %v17230_v22 = vld [vmem:[#allocation6 + $0x1a8] sm:$0xff]  }
 0x6c7   :  { %12204 = vmatpush3.bf16.msra.mxu1 %v17130_v29  ;;  %12211 = vmatprep.subr.bf16.mxu0 %v17133_v58  ;;  %19730 = vst [vmem:[#allocation45_spill] sm:$0xff] %v17185_v5  ;;  %v17188_v53 = vld [vmem:[#allocation6 + $0x190] sm:$0xff]  }
 0x6c8   :  { %10447 = vst [vmem:[%s18713_s5 + $0x60] sm:$0xff] %v17124_v49  ;;  %12233 = vmatprep.subr.bf16.mxu1 %v17144_v38  ;;  %19731 = vst [vmem:[#allocation58_spill] sm:$0xff] %v17188_v53 }
 0x6c9   :  { %10537 = vmatmul.mubr.msk.bf16.vlgmr.msra.gmra.mrb[136].mxu0 %vm10536_vm10, %v19212_v14 }
 0x6ca   :  { %10541 = vmatmul.mubr.msk.bf16.vlgmr.msra.gmra.mrb[136].mxu1 %vm10540_vm13, %v19212_v14  ;;  %12212 = vmatpush3.bf16.msra.mxu0 %v17153_v54 }
 0x6cb   :  { %10543 = vmatprep.mubr.msk.bf16.mxu0 %vm10542_vm15, %v19212_v14  ;;  %12234 = vmatpush3.bf16.msra.mxu1 %v17160_v23  ;;  %v17222_v23 = vld [vmem:[#allocation6 + $0x1e8] sm:$0xff]  }
 0x6cc   :  { %10547 = vmatprep.mubr.msk.bf16.mxu1 %vm10546_vm0, %v19212_v14  ;;  %12213 = vmatprep.subr.bf16.mxu0 %v17167_v63  ;;  %v17215_v63 = vld [vmem:[#allocation6 + $0x1a0] sm:$0xff]   ;;  %19741 = vst [vmem:[#allocation15_spill] sm:$0xff] %v17222_v23 }
 0x6cd   :  { %12235 = vmatprep.subr.bf16.mxu1 %v17170_v52  ;;  %v17211_v52 = vld [vmem:[#allocation6 + $0x120] sm:$0xff]   ;;  %19739 = vst [vmem:[#allocation54_spill] sm:$0xff] %v17215_v63 }
 0x6ce   :  { %12214 = vmatpush3.bf16.msra.mxu0 %v17173_v45  ;;  %v17191_v45 = vld [vmem:[#allocation6 + $0x158] sm:$0xff]   ;;  %19738 = vst [vmem:[#allocation53_spill] sm:$0xff] %v17211_v52 }
 0x6cf   :  { %12236 = vmatpush3.bf16.msra.mxu1 %v17176_v40  ;;  %12215 = vmatprep.subr.bf16.mxu0 %v17179_v59  ;;  %19732 = vst [vmem:[#allocation57_spill] sm:$0xff] %v17191_v45  ;;  %v17194_v40 = vld [vmem:[#allocation6 + $0x1d8] sm:$0xff]  }
 0x6d0   :  { %12237 = vmatprep.subr.bf16.mxu1 %v17182_v56  ;;  %19733 = vst [vmem:[#allocation27_spill] sm:$0xff] %v17194_v40  ;;  %v17197_v59 = vld [vmem:[#allocation6 + $0x118] sm:$0xff]  }
 0x6d1   :  { %19734 = vst [vmem:[#allocation49_spill] sm:$0xff] %v17197_v59  ;;  %v17200_v56 = vld [vmem:[#allocation6 + $0x198] sm:$0xff]  }
 0x6d2   :  { %12216 = vmatpush3.bf16.msra.mxu0 %v17185_v5  ;;  %19735 = vst [vmem:[#allocation50_spill] sm:$0xff] %v17200_v56  ;;  %v17203_v5 = vld [vmem:[#allocation6 + $0x160] sm:$0xff]  }
 0x6d3   :  { %12238 = vmatpush3.bf16.msra.mxu1 %v17188_v53  ;;  %12217 = vmatprep.subr.bf16.mxu0 %v17191_v45  ;;  %19736 = vst [vmem:[#allocation51_spill] sm:$0xff] %v17203_v5  ;;  %v17206_v53 = vld [vmem:[#allocation6 + $0x1e0] sm:$0xff]   ;;  %v7575_v45 = vmul.f32 0.95, %v16959_v25  ;;  %v10527_v25 = vsel %vm7596_vm14, 1.0, %v19232_v44 }
 0x6d4   :  { %12239 = vmatprep.subr.bf16.mxu1 %v17194_v40  ;;  %19737 = vst [vmem:[#allocation52_spill] sm:$0xff] %v17206_v53  ;;  %v7577_v40 = vmul.f32 0.95, %v16967_v9  ;;  %v17263_v9 = vld [vmem:[#allocation6 + $0x1b0] sm:$0xff]  }
 0x6d6   :  { %12218 = vmatpush3.bf16.msra.mxu0 %v17197_v59  ;;  %v7796_v59 = vmul.f32 0.95, %v16974_v48 }
 0x6d7   :  { %12240 = vmatpush3.bf16.msra.mxu1 %v17200_v56  ;;  %12219 = vmatprep.subr.bf16.mxu0 %v17203_v5  ;;  %v17218_v56 = vld [vmem:[#allocation6 + $0x168] sm:$0xff]  }
 0x6d8   :  { %12241 = vmatprep.subr.bf16.mxu1 %v17206_v53  ;;  %19740 = vst [vmem:[#allocation13_spill] sm:$0xff] %v17218_v56  ;;  %v7798_v53 = vmul.f32 0.95, %v16977_v20  ;;  %v17277_v20 = vld [vmem:[#allocation6 + $0x138] sm:$0xff]  }
 0x6da   :  { %12220 = vmatpush3.bf16.msra.mxu0 %v17211_v52  ;;  %v7583_v52 = vadd.f32 %v14009_v57, %v7575_v45 }
 0x6db   :  { %12242 = vmatpush3.bf16.msra.mxu1 %v17215_v63  ;;  %12221 = vmatprep.subr.bf16.mxu0 %v17218_v56  ;;  %v7585_v56 = vadd.f32 %v14013_v46, %v7577_v40 }
 0x6dc   :  { %v11919_v5 = vpop.f32.mrb[112].mxu0  ;;  %12243 = vmatprep.subr.bf16.mxu1 %v17222_v23 }
 0x6dd   :  { %v11941_v54 = vpop.f32.mrb[112].mxu1  ;;  %v11920_v38 = vpop.f32.mrb[113].mxu0 }
 0x6de   :  { %v11921_v58 = vadd.f32 %v11920_v38, %v11919_v5  ;;  %v11942_v29 = vpop.f32.mrb[113].mxu1  ;;  %v11922_v55 = vpop.f32.mrb[114].mxu0  ;;  %12222 = vmatpush3.bf16.msra.mxu0 %v17226_v7  ;;  %v7804_v38 = vadd.f32 %v19261_v13, %v7796_v59  ;;  %v10529_v5 = vsel %vm7598_vm1, 1.0, %v19232_v44 }
 0x6df   :  { %v11943_v63 = vadd.f32 %v11942_v29, %v11941_v54  ;;  %v11944_v61 = vpop.f32.mrb[114].mxu1  ;;  %12244 = vmatpush3.bf16.msra.mxu1 %v17230_v22  ;;  %v11923_v23 = vpop.f32.mrb[115].mxu0  ;;  %12223 = vmatprep.subr.bf16.mxu0 %v17233_v32  ;;  %v10504_v55 = vsel %vm7375_vm8, 1.0, %v19232_v44  ;;  %v17241_v29 = vld [vmem:[#allocation6 + $0x1f0] sm:$0xff]   ;;  %v10506_v54 = vsel %vm7377_vm11, 1.0, %v19232_v44 }
 0x6e0   :  { %v6990_v45 = vadd.f32 %v16605_v1, %v11921_v58  ;;  %v11945_v40 = vpop.f32.mrb[115].mxu1  ;;  %12245 = vmatprep.subr.bf16.mxu1 %v17241_v29  ;;  %v7806_v61 = vadd.f32 %v19263_v0, %v7798_v53  ;;  %v17248_v23 = vsub.f32 %v7583_v52, %v10504_v55  ;;  %v17255_v1 = vld [vmem:[#allocation6 + $0x130] sm:$0xff]   ;;  %v17258_v58 = vsub.f32 %v7585_v56, %v10506_v54  ;;  %v17266_v52 = vld [vmem:[#allocation6 + $0x178] sm:$0xff]  }
 0x6e1   :  { %v17269_v48 = vsub.f32 %v7804_v38, %v10527_v25  ;;  %v17281_v53 = vld [vmem:[#allocation6 + $0x1b8] sm:$0xff]   ;;  %v7795_v38 = vmul.f32 0.95, %v17094_v17  ;;  %v7797_v55 = vmul.f32 0.95, %v17096_v39  ;;  %v10531_v17 = vsel %vm7600_vm9, 1.0, %v19232_v44 }
 0x6e2   :  { %v17253_v59 = vadd.f32 %v11943_v63, %v6990_v45  ;;  %12224 = vmatpush3.bf16.msra.mxu0 %v17255_v1  ;;  %v17271_v63 = vld [vmem:[#allocation6 + $0x1f8] sm:$0xff]   ;;  %v17274_v56 = vsub.f32 %v7806_v61, %v10529_v5  ;;  %vm7599_vm8 = vcmp.gt.f32.partialorder %v17248_v23, 1.0  ;;  %vm7601_vm11 = vcmp.gt.f32.partialorder %v17258_v58, 1.0 }
 0x6e3   :  { %12246 = vmatpush3.bf16.msra.mxu1 %v17263_v9  ;;  %12225 = vmatprep.subr.bf16.mxu0 %v17266_v52  ;;  %vm7820_vm14 = vcmp.gt.f32.partialorder %v17269_v48, 1.0  ;;  %vm10544_vm1 = vmpackc.low %vm7599_vm8, %vm7599_vm8  ;;  %v7800_v45 = vmul.f32 0.95, %v17115_v42  ;;  %v7802_v40 = vmul.f32 0.95, %v17120_v27  ;;  %v7803_v5 = vadd.f32 %v13868_v50, %v7795_v38  ;;  %v19745_v42 = vld [vmem:[#allocation32_spill] sm:$0xff] }
 0x6e4   :  { %12247 = vmatprep.subr.bf16.mxu1 %v17271_v63  ;;  %vm7822_vm2 = vcmp.gt.f32.partialorder %v17274_v56, 1.0  ;;  %vm10548_vm4 = vmpackc.low %vm7601_vm11, %vm7601_vm11  ;;  %v10526_v38 = vsel %vm7595_vm3, 1.0, %v19232_v44  ;;  %vm6894_vm3 = vcmp.gt.f32.partialorder %v17124_v49, 1.0  ;;  %v7115_v39 = vmul.f32 0.95, %v17124_v49  ;;  %v19747_v27 = vld [vmem:[#allocation34_spill] sm:$0xff] }
 0x6e5   :  { %vm10560_vm5 = vmpackc.low %vm7820_vm14, %vm7820_vm14 }
 0x6e6   :  { %12226 = vmatpush3.bf16.msra.mxu0 %v17277_v20  ;;  %vm10564_vm6 = vmpackc.low %vm7822_vm2, %vm7822_vm2 }
 0x6e7   :  { %12248 = vmatpush3.bf16.msra.mxu1 %v17281_v53  ;;  %12255 = vmatprep.subr.bf16.mxu0 %v16983_v47 }
 0x6e8   :  { %12277 = vmatprep.subr.bf16.mxu1 %v16990_v8 }
 0x6e9   :  { %10545 = vmatmul.mubr.msk.bf16.vlgmr.msra.gmra.mrb[140].mxu0 %vm10544_vm1, %v19212_v14 }
 0x6ea   :  { %10549 = vmatmul.mubr.msk.bf16.vlgmr.msra.gmra.mrb[140].mxu1 %vm10548_vm4, %v19212_v14  ;;  %12256 = vmatpush3.bf16.msra.mxu0 %v16999_v19 }
 0x6eb   :  { %10561 = vmatprep.mubr.msk.bf16.mxu0 %vm10560_vm5, %v19212_v14  ;;  %12278 = vmatpush3.bf16.msra.mxu1 %v17006_v21 }
 0x6ec   :  { %10565 = vmatprep.mubr.msk.bf16.mxu1 %vm10564_vm6, %v19212_v14  ;;  %12257 = vmatprep.subr.bf16.mxu0 %v17013_v62 }
 0x6ed   :  { %12279 = vmatprep.subr.bf16.mxu1 %v17016_v10 }
 0x6ee   :  { %12258 = vmatpush3.bf16.msra.mxu0 %v17019_v2 }
 0x6ef   :  { %12280 = vmatpush3.bf16.msra.mxu1 %v17022_v26  ;;  %12259 = vmatprep.subr.bf16.mxu0 %v17025_v36 }
 0x6f0   :  { %12281 = vmatprep.subr.bf16.mxu1 %v17028_v3 }
 0x6f2   :  { %12260 = vmatpush3.bf16.msra.mxu0 %v17031_v18 }
 0x6f3   :  { %12282 = vmatpush3.bf16.msra.mxu1 %v17034_v28  ;;  %12261 = vmatprep.subr.bf16.mxu0 %v17037_v11 }
 0x6f4   :  { %12283 = vmatprep.subr.bf16.mxu1 %v17040_v41 }
 0x6f6   :  { %12262 = vmatpush3.bf16.msra.mxu0 %v17043_v33 }
 0x6f7   :  { %12284 = vmatpush3.bf16.msra.mxu1 %v17046_v6  ;;  %12263 = vmatprep.subr.bf16.mxu0 %v17049_v4 }
 0x6f8   :  { %12285 = vmatprep.subr.bf16.mxu1 %v17052_v34  ;;  %v7805_v34 = vadd.f32 %v13871_v51, %v7797_v55  ;;  %v10528_v55 = vsel %vm7597_vm7, 1.0, %v19232_v44 }
 0x6fa   :  { %12264 = vmatpush3.bf16.msra.mxu0 %v17057_v37 }
 0x6fb   :  { %12286 = vmatpush3.bf16.msra.mxu1 %v17061_v16  ;;  %12265 = vmatprep.subr.bf16.mxu0 %v17064_v24 }
 0x6fc   :  { %v11963_v61 = vpop.f32.mrb[116].mxu0  ;;  %12287 = vmatprep.subr.bf16.mxu1 %v17068_v12  ;;  %v7808_v12 = vadd.f32 %v19242_v15, %v7800_v45 }
 0x6fd   :  { %v11985_v54 = vpop.f32.mrb[116].mxu1  ;;  %v11964_v25 = vpop.f32.mrb[117].mxu0 }
 0x6fe   :  { %v11965_v4 = vadd.f32 %v11964_v25, %v11963_v61  ;;  %v11986_v6 = vpop.f32.mrb[117].mxu1  ;;  %v11966_v37 = vpop.f32.mrb[118].mxu0  ;;  %12266 = vmatpush3.bf16.msra.mxu0 %v17073_v43 }
 0x6ff   :  { %v11987_v33 = vadd.f32 %v11986_v6, %v11985_v54  ;;  %v11988_v16 = vpop.f32.mrb[118].mxu1  ;;  %12288 = vmatpush3.bf16.msra.mxu1 %v17076_v35  ;;  %v11967_v24 = vpop.f32.mrb[119].mxu0  ;;  %12267 = vmatprep.subr.bf16.mxu0 %v17079_v30  ;;  %v7810_v6 = vadd.f32 %v19244_v31, %v7802_v40  ;;  %v19742_v54 = vld [vmem:[#allocation39_spill] sm:$0xff] }
 0x700   :  { %v7070_v37 = vadd.f32 %v11965_v4, %v17253_v59  ;;  %v11989_v61 = vpop.f32.mrb[119].mxu1  ;;  %12289 = vmatprep.subr.bf16.mxu1 %v17090_v60  ;;  %v17343_v16 = vsub.f32 %v7803_v5, %v10526_v38  ;;  %v17345_v24 = vsub.f32 %v7805_v34, %v10528_v55  ;;  %v10533_v4 = vsel %vm7602_vm12, 1.0, %v19232_v44  ;;  %v19743_v59 = vld [vmem:[#allocation30_spill] sm:$0xff]  ;;  %v19744_v40 = vld [vmem:[#allocation31_spill] sm:$0xff]  ;;  %v19746_v38 = vld [vmem:[#allocation33_spill] sm:$0xff] }
 0x701   :  { %v17358_v34 = vsub.f32 %v7808_v12, %v10531_v17  ;;  %v17361_v5 = vsub.f32 %v7810_v6, %v10533_v4  ;;  %v19748_v55 = vld [vmem:[#allocation35_spill] sm:$0xff]  ;;  %v19749_v12 = vld [vmem:[#allocation36_spill] sm:$0xff]  ;;  %v19751_v61 = vld [vmem:[#allocation38_spill] sm:$0xff] }
 0x702   :  { %v7110_v45 = vadd.f32 %v11987_v33, %v7070_v37  ;;  %12268 = vmatpush3.bf16.msra.mxu0 %v19742_v54  ;;  %v10446_v33 = vsel %vm6894_vm3, 1.0, %v19232_v44  ;;  %vm7819_vm7 = vcmp.gt.f32.partialorder %v17343_v16, 1.0  ;;  %vm7821_vm9 = vcmp.gt.f32.partialorder %v17345_v24, 1.0  ;;  %v19750_v37 = vld [vmem:[#allocation37_spill] sm:$0xff]  ;;  %v19752_v6 = vld [vmem:[#allocation28_spill] sm:$0xff]  ;;  %v19756_v4 = vld [vmem:[#allocation43_spill] sm:$0xff] }
 0x703   :  { %12290 = vmatpush3.bf16.msra.mxu1 %v19743_v59  ;;  %12269 = vmatprep.subr.bf16.mxu0 %v19744_v40  ;;  %vm7824_vm10 = vcmp.gt.f32.partialorder %v17358_v34, 1.0  ;;  %vm10562_vm12 = vmpackc.low %vm7819_vm7, %vm7819_vm7  ;;  %vm7826_vm13 = vcmp.gt.f32.partialorder %v17361_v5, 1.0  ;;  %v19753_v17 = vld [vmem:[#allocation40_spill] sm:$0xff] }
 0x704   :  { %v7116_v25 = vadd.f32 %v7115_v39, %v7110_v45  ;;  %12291 = vmatprep.subr.bf16.mxu1 %v19745_v42  ;;  %vm10566_vm15 = vmpackc.low %vm7821_vm9, %vm7821_vm9  ;;  %v19754_v45 = vld [vmem:[#allocation41_spill] sm:$0xff]  ;;  %v19755_v39 = vld [vmem:[#allocation42_spill] sm:$0xff] }
 0x705   :  { %vm10568_vm0 = vmpackc.low %vm7824_vm10, %vm7824_vm10 }
 0x706   :  { %v17365_v49 = vsub.f32 %v7116_v25, %v10446_v33  ;;  %12270 = vmatpush3.bf16.msra.mxu0 %v19746_v38  ;;  %vm10572_vm1 = vmpackc.low %vm7826_vm13, %vm7826_vm13  ;;  %v19757_v25 = vld [vmem:[#allocation44_spill] sm:$0xff]  ;;  %v19758_v33 = vld [vmem:[#allocation45_spill] sm:$0xff] }
 0x707   :  { %12292 = vmatpush3.bf16.msra.mxu1 %v19747_v27  ;;  %12299 = vmatprep.subr.bf16.mxu0 %v19748_v55  ;;  %v19762_v55 = vld [vmem:[#allocation49_spill] sm:$0xff] }
 0x708   :  { %10473 = vst [vmem:[%s18713_s5 + $0x68] sm:$0xff] %v17365_v49  ;;  %12321 = vmatprep.subr.bf16.mxu1 %v19749_v12  ;;  %v19761_v12 = vld [vmem:[#allocation27_spill] sm:$0xff] }
 0x709   :  { %10563 = vmatmul.mubr.msk.bf16.vlgmr.msra.gmra.mrb[144].mxu0 %vm10562_vm12, %v19212_v14 }
 0x70a   :  { %10567 = vmatmul.mubr.msk.bf16.vlgmr.msra.gmra.mrb[144].mxu1 %vm10566_vm15, %v19212_v14  ;;  %12300 = vmatpush3.bf16.msra.mxu0 %v19750_v37  ;;  %v19760_v37 = vld [vmem:[#allocation57_spill] sm:$0xff] }
 0x70b   :  { %10569 = vmatprep.mubr.msk.bf16.mxu0 %vm10568_vm0, %v19212_v14  ;;  %12322 = vmatpush3.bf16.msra.mxu1 %v19751_v61  ;;  %v19759_v61 = vld [vmem:[#allocation58_spill] sm:$0xff] }
 0x70c   :  { %10573 = vmatprep.mubr.msk.bf16.mxu1 %vm10572_vm1, %v19212_v14  ;;  %12301 = vmatprep.subr.bf16.mxu0 %v19752_v6  ;;  %v19763_v6 = vld [vmem:[#allocation50_spill] sm:$0xff] }
 0x70d   :  { %12323 = vmatprep.subr.bf16.mxu1 %v19753_v17  ;;  %v19764_v17 = vld [vmem:[#allocation51_spill] sm:$0xff] }
 0x70e   :  { %12302 = vmatpush3.bf16.msra.mxu0 %v19754_v45  ;;  %v19765_v45 = vld [vmem:[#allocation52_spill] sm:$0xff] }
 0x70f   :  { %12324 = vmatpush3.bf16.msra.mxu1 %v19755_v39  ;;  %12303 = vmatprep.subr.bf16.mxu0 %v19756_v4  ;;  %v7799_v4 = vmul.f32 0.95, %v17248_v23  ;;  %v19766_v39 = vld [vmem:[#allocation53_spill] sm:$0xff]  ;;  %v10553_v23 = vsel %vm7820_vm14, 1.0, %v19232_v44 }
 0x710   :  { %12325 = vmatprep.subr.bf16.mxu1 %v19757_v25  ;;  %v7801_v25 = vmul.f32 0.95, %v17258_v58 }
 0x712   :  { %12304 = vmatpush3.bf16.msra.mxu0 %v19758_v33  ;;  %v19767_v33 = vld [vmem:[#allocation54_spill] sm:$0xff] }
 0x713   :  { %12326 = vmatpush3.bf16.msra.mxu1 %v19759_v61  ;;  %12305 = vmatprep.subr.bf16.mxu0 %v19760_v37  ;;  %v8020_v61 = vmul.f32 0.95, %v17269_v48  ;;  %v19768_v37 = vld [vmem:[#allocation13_spill] sm:$0xff] }
 0x714   :  { %12327 = vmatprep.subr.bf16.mxu1 %v19761_v12 }
 0x716   :  { %12306 = vmatpush3.bf16.msra.mxu0 %v19762_v55  ;;  %v8022_v55 = vmul.f32 0.95, %v17274_v56  ;;  %v19770_v56 = vld [vmem:[#allocation21_spill] sm:$0xff] }
 0x717   :  { %12328 = vmatpush3.bf16.msra.mxu1 %v19763_v6  ;;  %12307 = vmatprep.subr.bf16.mxu0 %v19764_v17  ;;  %v19769_v6 = vld [vmem:[#allocation15_spill] sm:$0xff] }
 0x718   :  { %12329 = vmatprep.subr.bf16.mxu1 %v19765_v45  ;;  %v7807_v45 = vadd.f32 %v14009_v57, %v7799_v4  ;;  %v10530_v4 = vsel %vm7599_vm8, 1.0, %v19232_v44 }
 0x71a   :  { %12308 = vmatpush3.bf16.msra.mxu0 %v19766_v39  ;;  %v7809_v39 = vadd.f32 %v14013_v46, %v7801_v25  ;;  %v8021_v25 = vmul.f32 0.95, %v17345_v24  ;;  %v7339_v24 = vmul.f32 0.95, %v17365_v49 }
 0x71b   :  { %12330 = vmatpush3.bf16.msra.mxu1 %v19767_v33  ;;  %12309 = vmatprep.subr.bf16.mxu0 %v19768_v37 }
 0x71c   :  { %v12007_v12 = vpop.f32.mrb[120].mxu0  ;;  %12331 = vmatprep.subr.bf16.mxu1 %v19769_v6  ;;  %v8028_v6 = vadd.f32 %v19261_v13, %v8020_v61 }
 0x71d   :  { %v12029_v17 = vpop.f32.mrb[120].mxu1  ;;  %v12008_v27 = vpop.f32.mrb[121].mxu0 }
 0x71e   :  { %v12009_v38 = vadd.f32 %v12008_v27, %v12007_v12  ;;  %v12030_v42 = vpop.f32.mrb[121].mxu1  ;;  %v12010_v40 = vpop.f32.mrb[122].mxu0  ;;  %12310 = vmatpush3.bf16.msra.mxu0 %v17226_v7  ;;  %v17427_v27 = vld [vmem:[#allocation7] ss:$0 sm:$0xff]  ;;  %v17450_v58 = vsub.f32 %v8028_v6, %v10553_v23  ;;  %v19777_v23 = vld [vmem:[#allocation46_spill] sm:$0xff] }
 0x71f   :  { %v12031_v59 = vadd.f32 %v12030_v42, %v12029_v17  ;;  %v12032_v33 = vpop.f32.mrb[122].mxu1  ;;  %12332 = vmatpush3.bf16.msra.mxu1 %v17230_v22  ;;  %v12011_v37 = vpop.f32.mrb[123].mxu0  ;;  %12311 = vmatprep.subr.bf16.mxu0 %v17233_v32  ;;  %v8030_v42 = vadd.f32 %v19263_v0, %v8022_v55  ;;  %v17435_v17 = vsub.f32 %v7807_v45, %v10530_v4  ;;  %v10555_v55 = vsel %vm7822_vm2, 1.0, %v19232_v44  ;;  %v19772_v6 = vld [vmem:[#allocation23_spill] sm:$0xff]  ;;  %v19773_v45 = vld [vmem:[#allocation24_spill] sm:$0xff] }
 0x720   :  { %v7214_v40 = vadd.f32 %v17427_v27, %v12009_v38  ;;  %v12033_v12 = vpop.f32.mrb[123].mxu1  ;;  %12333 = vmatprep.subr.bf16.mxu1 %v17241_v29  ;;  %v10532_v37 = vsel %vm7601_vm11, 1.0, %v19232_v44  ;;  %vm8044_vm14 = vcmp.gt.f32.partialorder %v17450_v58, 1.0  ;;  %v19774_v33 = vld [vmem:[#allocation25_spill] sm:$0xff]  ;;  %v8024_v4 = vmul.f32 0.95, %v17358_v34 }
 0x721   :  { %v17443_v38 = vsub.f32 %v7809_v39, %v10532_v37  ;;  %v17453_v48 = vsub.f32 %v8030_v42, %v10555_v55  ;;  %vm7823_vm8 = vcmp.gt.f32.partialorder %v17435_v17, 1.0  ;;  %vm10586_vm6 = vmpackc.low %vm8044_vm14, %vm8044_vm14  ;;  %v8019_v39 = vmul.f32 0.95, %v17343_v16  ;;  %v19776_v12 = vld [vmem:[#allocation29_spill] sm:$0xff]  ;;  %v19780_v34 = vld [vmem:[#allocation32_spill] sm:$0xff] }
 0x722   :  { %v17440_v61 = vadd.f32 %v12031_v59, %v7214_v40  ;;  %12312 = vmatpush3.bf16.msra.mxu0 %v17255_v1  ;;  %vm10570_vm2 = vmpackc.low %vm7823_vm8, %vm7823_vm8  ;;  %v19771_v59 = vld [vmem:[#allocation22_spill] sm:$0xff]  ;;  %v8026_v42 = vmul.f32 0.95, %v17361_v5  ;;  %v10557_v16 = vsel %vm7824_vm10, 1.0, %v19232_v44 }
 0x723   :  { %12334 = vmatpush3.bf16.msra.mxu1 %v17263_v9  ;;  %12313 = vmatprep.subr.bf16.mxu0 %v17266_v52  ;;  %vm7825_vm11 = vcmp.gt.f32.partialorder %v17443_v38, 1.0  ;;  %vm8046_vm4 = vcmp.gt.f32.partialorder %v17453_v48, 1.0  ;;  %v19775_v40 = vld [vmem:[#allocation26_spill] sm:$0xff] }
 0x724   :  { %12335 = vmatprep.subr.bf16.mxu1 %v17271_v63  ;;  %vm10574_vm5 = vmpackc.low %vm7825_vm11, %vm7825_vm11  ;;  %v19782_v5 = vld [vmem:[#allocation34_spill] sm:$0xff] }
 0x725   :  { %vm10590_vm3 = vmpackc.low %vm8046_vm4, %vm8046_vm4 }
 0x726   :  { %12314 = vmatpush3.bf16.msra.mxu0 %v17277_v20 }
 0x727   :  { %12336 = vmatpush3.bf16.msra.mxu1 %v17281_v53  ;;  %12343 = vmatprep.subr.bf16.mxu0 %v16983_v47 }
 0x728   :  { %12365 = vmatprep.subr.bf16.mxu1 %v16990_v8 }
 0x729   :  { %10571 = vmatmul.mubr.msk.bf16.vlgmr.msra.gmra.mrb[148].mxu0 %vm10570_vm2, %v19212_v14 }
 0x72a   :  { %10575 = vmatmul.mubr.msk.bf16.vlgmr.msra.gmra.mrb[148].mxu1 %vm10574_vm5, %v19212_v14  ;;  %12344 = vmatpush3.bf16.msra.mxu0 %v16999_v19 }
 0x72b   :  { %10587 = vmatprep.mubr.msk.bf16.mxu0 %vm10586_vm6, %v19212_v14  ;;  %12366 = vmatpush3.bf16.msra.mxu1 %v17006_v21 }
 0x72c   :  { %10591 = vmatprep.mubr.msk.bf16.mxu1 %vm10590_vm3, %v19212_v14  ;;  %12345 = vmatprep.subr.bf16.mxu0 %v17013_v62 }
 0x72d   :  { %12367 = vmatprep.subr.bf16.mxu1 %v17016_v10 }
 0x72e   :  { %12346 = vmatpush3.bf16.msra.mxu0 %v17019_v2 }
 0x72f   :  { %12368 = vmatpush3.bf16.msra.mxu1 %v17022_v26  ;;  %12347 = vmatprep.subr.bf16.mxu0 %v17025_v36 }
 0x730   :  { %12369 = vmatprep.subr.bf16.mxu1 %v17028_v3 }
 0x732   :  { %12348 = vmatpush3.bf16.msra.mxu0 %v17031_v18 }
 0x733   :  { %12370 = vmatpush3.bf16.msra.mxu1 %v17034_v28  ;;  %12349 = vmatprep.subr.bf16.mxu0 %v17037_v11 }
 0x734   :  { %12371 = vmatprep.subr.bf16.mxu1 %v17040_v41 }
 0x736   :  { %12350 = vmatpush3.bf16.msra.mxu0 %v19770_v56 }
 0x737   :  { %12372 = vmatpush3.bf16.msra.mxu1 %v19771_v59  ;;  %12351 = vmatprep.subr.bf16.mxu0 %v19772_v6  ;;  %v8029_v59 = vadd.f32 %v13871_v51, %v8021_v25 }
 0x738   :  { %12373 = vmatprep.subr.bf16.mxu1 %v19773_v45  ;;  %v8027_v45 = vadd.f32 %v13868_v50, %v8019_v39  ;;  %v10552_v39 = vsel %vm7819_vm7, 1.0, %v19232_v44  ;;  %vm7118_vm7 = vcmp.gt.f32.partialorder %v17365_v49, 1.0 }
 0x73a   :  { %12352 = vmatpush3.bf16.msra.mxu0 %v19774_v33 }
 0x73b   :  { %12374 = vmatpush3.bf16.msra.mxu1 %v19775_v40  ;;  %12353 = vmatprep.subr.bf16.mxu0 %v19776_v12 }
 0x73c   :  { %v12051_v37 = vpop.f32.mrb[124].mxu0  ;;  %12375 = vmatprep.subr.bf16.mxu1 %v19777_v23  ;;  %v8032_v23 = vadd.f32 %v19242_v15, %v8024_v4 }
 0x73d   :  { %v12073_v55 = vpop.f32.mrb[124].mxu1  ;;  %v12052_v6 = vpop.f32.mrb[125].mxu0 }
 0x73e   :  { %v12053_v56 = vadd.f32 %v12052_v6, %v12051_v37  ;;  %v12074_v41 = vpop.f32.mrb[125].mxu1  ;;  %v12054_v33 = vpop.f32.mrb[126].mxu0  ;;  %12354 = vmatpush3.bf16.msra.mxu0 %v17073_v43  ;;  %v10554_v6 = vsel %vm7821_vm9, 1.0, %v19232_v44 }
 0x73f   :  { %v12075_v11 = vadd.f32 %v12074_v41, %v12073_v55  ;;  %v12076_v40 = vpop.f32.mrb[126].mxu1  ;;  %12376 = vmatpush3.bf16.msra.mxu1 %v17076_v35  ;;  %v12055_v12 = vpop.f32.mrb[127].mxu0  ;;  %12355 = vmatprep.subr.bf16.mxu0 %v17079_v30  ;;  %v8034_v41 = vadd.f32 %v19244_v31, %v8026_v42  ;;  %v19781_v55 = vld [vmem:[#allocation33_spill] sm:$0xff] }
 0x740   :  { %v7294_v25 = vadd.f32 %v12053_v56, %v17440_v61  ;;  %v12077_v33 = vpop.f32.mrb[127].mxu1  ;;  %12377 = vmatprep.subr.bf16.mxu1 %v17090_v60  ;;  %v17518_v40 = vsub.f32 %v8027_v45, %v10552_v39  ;;  %v17520_v12 = vsub.f32 %v8029_v59, %v10554_v6  ;;  %v10559_v61 = vsel %vm7826_vm13, 1.0, %v19232_v44  ;;  %v19778_v56 = vld [vmem:[#allocation30_spill] sm:$0xff]  ;;  %v19779_v45 = vld [vmem:[#allocation31_spill] sm:$0xff]  ;;  %v19785_v6 = vld [vmem:[#allocation37_spill] sm:$0xff] }
 0x741   :  { %v17533_v59 = vsub.f32 %v8032_v23, %v10557_v16  ;;  %v17536_v37 = vsub.f32 %v8034_v41, %v10559_v61  ;;  %v19783_v39 = vld [vmem:[#allocation35_spill] sm:$0xff]  ;;  %v19784_v23 = vld [vmem:[#allocation36_spill] sm:$0xff]  ;;  %v19789_v16 = vld [vmem:[#allocation41_spill] sm:$0xff] }
 0x742   :  { %v7334_v4 = vadd.f32 %v12075_v11, %v7294_v25  ;;  %12356 = vmatpush3.bf16.msra.mxu0 %v19742_v54  ;;  %v10472_v11 = vsel %vm7118_vm7, 1.0, %v19232_v44  ;;  %vm8043_vm9 = vcmp.gt.f32.partialorder %v17518_v40, 1.0  ;;  %vm8045_vm10 = vcmp.gt.f32.partialorder %v17520_v12, 1.0  ;;  %v19786_v25 = vld [vmem:[#allocation38_spill] sm:$0xff]  ;;  %v19787_v33 = vld [vmem:[#allocation28_spill] sm:$0xff] }
 0x743   :  { %12378 = vmatpush3.bf16.msra.mxu1 %v19778_v56  ;;  %12357 = vmatprep.subr.bf16.mxu0 %v19779_v45  ;;  %vm8048_vm12 = vcmp.gt.f32.partialorder %v17533_v59, 1.0  ;;  %vm10588_vm13 = vmpackc.low %vm8043_vm9, %vm8043_vm9  ;;  %vm8050_vm15 = vcmp.gt.f32.partialorder %v17536_v37, 1.0  ;;  %v19788_v41 = vld [vmem:[#allocation40_spill] sm:$0xff] }
 0x744   :  { %v7340_v42 = vadd.f32 %v7339_v24, %v7334_v4  ;;  %12379 = vmatprep.subr.bf16.mxu1 %v19780_v34  ;;  %vm10592_vm0 = vmpackc.low %vm8045_vm10, %vm8045_vm10  ;;  %v19790_v4 = vld [vmem:[#allocation42_spill] sm:$0xff]  ;;  %v19791_v24 = vld [vmem:[#allocation43_spill] sm:$0xff] }
 0x745   :  { %vm10594_vm1 = vmpackc.low %vm8048_vm12, %vm8048_vm12  ;;  %v19792_v61 = vld [vmem:[#allocation44_spill] sm:$0xff] }
 0x746   :  { %v17540_v49 = vsub.f32 %v7340_v42, %v10472_v11  ;;  %12358 = vmatpush3.bf16.msra.mxu0 %v19781_v55  ;;  %vm10598_vm2 = vmpackc.low %vm8050_vm15, %vm8050_vm15  ;;  %v19793_v42 = vld [vmem:[#allocation45_spill] sm:$0xff]  ;;  %v19794_v11 = vld [vmem:[#allocation58_spill] sm:$0xff] }
 0x747   :  { %12380 = vmatpush3.bf16.msra.mxu1 %v19782_v5  ;;  %12387 = vmatprep.subr.bf16.mxu0 %v19783_v39 }
 0x748   :  { %10499 = vst [vmem:[%s18713_s5 + $0x70] sm:$0xff] %v17540_v49  ;;  %12409 = vmatprep.subr.bf16.mxu1 %v19784_v23  ;;  %v19797_v23 = vld [vmem:[#allocation49_spill] sm:$0xff] }
 0x749   :  { %10589 = vmatmul.mubr.msk.bf16.vlgmr.msra.gmra.mrb[152].mxu0 %vm10588_vm13, %v19212_v14 }
 0x74a   :  { %10593 = vmatmul.mubr.msk.bf16.vlgmr.msra.gmra.mrb[152].mxu1 %vm10592_vm0, %v19212_v14  ;;  %12388 = vmatpush3.bf16.msra.mxu0 %v19785_v6  ;;  %v19796_v6 = vld [vmem:[#allocation27_spill] sm:$0xff] }
 0x74b   :  { %10595 = vmatprep.mubr.msk.bf16.mxu0 %vm10594_vm1, %v19212_v14  ;;  %12410 = vmatpush3.bf16.msra.mxu1 %v19786_v25  ;;  %v19795_v25 = vld [vmem:[#allocation57_spill] sm:$0xff] }
 0x74c   :  { %10599 = vmatprep.mubr.msk.bf16.mxu1 %vm10598_vm2, %v19212_v14  ;;  %12389 = vmatprep.subr.bf16.mxu0 %v19787_v33  ;;  %v19798_v33 = vld [vmem:[#allocation50_spill] sm:$0xff] }
 0x74d   :  { %12411 = vmatprep.subr.bf16.mxu1 %v19788_v41  ;;  %v19799_v41 = vld [vmem:[#allocation51_spill] sm:$0xff] }
 0x74e   :  { %12390 = vmatpush3.bf16.msra.mxu0 %v19789_v16  ;;  %v19800_v16 = vld [vmem:[#allocation52_spill] sm:$0xff] }
 0x74f   :  { %12412 = vmatpush3.bf16.msra.mxu1 %v19790_v4  ;;  %12391 = vmatprep.subr.bf16.mxu0 %v19791_v24  ;;  %v8023_v24 = vmul.f32 0.95, %v17435_v17  ;;  %v19801_v4 = vld [vmem:[#allocation53_spill] sm:$0xff] }
 0x750   :  { %12413 = vmatprep.subr.bf16.mxu1 %v19792_v61  ;;  %v8025_v61 = vmul.f32 0.95, %v17443_v38 }
 0x752   :  { %12392 = vmatpush3.bf16.msra.mxu0 %v19793_v42  ;;  %v19802_v42 = vld [vmem:[#allocation54_spill] sm:$0xff] }
 0x753   :  { %12414 = vmatpush3.bf16.msra.mxu1 %v19794_v11  ;;  %12393 = vmatprep.subr.bf16.mxu0 %v19795_v25  ;;  %v8244_v11 = vmul.f32 0.95, %v17450_v58  ;;  %v19803_v25 = vld [vmem:[#allocation13_spill] sm:$0xff] }
 0x754   :  { %12415 = vmatprep.subr.bf16.mxu1 %v19796_v6 }
 0x756   :  { %12394 = vmatpush3.bf16.msra.mxu0 %v19797_v23  ;;  %v8246_v23 = vmul.f32 0.95, %v17453_v48  ;;  %v8250_v48 = vmul.f32 0.95, %v17536_v37  ;;  %v19819_v37 = vld [vmem:[#allocation35_spill] sm:$0xff] }
 0x757   :  { %12416 = vmatpush3.bf16.msra.mxu1 %v19798_v33  ;;  %12395 = vmatprep.subr.bf16.mxu0 %v19799_v41  ;;  %v19804_v33 = vld [vmem:[#allocation15_spill] sm:$0xff] }
 0x758   :  { %12417 = vmatprep.subr.bf16.mxu1 %v19800_v16  ;;  %v8031_v16 = vadd.f32 %v14009_v57, %v8023_v24  ;;  %v10556_v24 = vsel %vm7823_vm8, 1.0, %v19232_v44 }
 0x75a   :  { %12396 = vmatpush3.bf16.msra.mxu0 %v19801_v4  ;;  %v8033_v4 = vadd.f32 %v14013_v46, %v8025_v61 }
 0x75b   :  { %12418 = vmatpush3.bf16.msra.mxu1 %v19802_v42  ;;  %12397 = vmatprep.subr.bf16.mxu0 %v19803_v25 }
 0x75c   :  { %v12095_v6 = vpop.f32.mrb[128].mxu0  ;;  %12419 = vmatprep.subr.bf16.mxu1 %v19804_v33  ;;  %v8252_v33 = vadd.f32 %v19261_v13, %v8244_v11 }
 0x75d   :  { %v12117_v41 = vpop.f32.mrb[128].mxu1  ;;  %v12096_v39 = vpop.f32.mrb[129].mxu0 }
 0x75e   :  { %v12097_v5 = vadd.f32 %v12096_v39, %v12095_v6  ;;  %v12118_v55 = vpop.f32.mrb[129].mxu1  ;;  %v12098_v34 = vpop.f32.mrb[130].mxu0  ;;  %12398 = vmatpush3.bf16.msra.mxu0 %v17226_v7  ;;  %v8254_v6 = vadd.f32 %v19263_v0, %v8246_v23  ;;  %v19814_v23 = vld [vmem:[#allocation46_spill] sm:$0xff] }
 0x75f   :  { %v12119_v45 = vadd.f32 %v12118_v55, %v12117_v41  ;;  %v12120_v42 = vpop.f32.mrb[130].mxu1  ;;  %12420 = vmatpush3.bf16.msra.mxu1 %v17230_v22  ;;  %v12099_v25 = vpop.f32.mrb[131].mxu0  ;;  %12399 = vmatprep.subr.bf16.mxu0 %v17233_v32  ;;  %v10558_v55 = vsel %vm7825_vm11, 1.0, %v19232_v44  ;;  %v10579_v41 = vsel %vm8044_vm14, 1.0, %v19232_v44 }
 0x760   :  { %v7438_v39 = vadd.f32 %v17427_v27, %v12097_v5  ;;  %v12121_v34 = vpop.f32.mrb[131].mxu1  ;;  %12421 = vmatprep.subr.bf16.mxu1 %v17241_v29  ;;  %v17608_v25 = vsub.f32 %v8031_v16, %v10556_v24  ;;  %v17616_v17 = vsub.f32 %v8033_v4, %v10558_v55  ;;  %v10581_v5 = vsel %vm8046_vm4, 1.0, %v19232_v44 }
 0x761   :  { %v17623_v38 = vsub.f32 %v8252_v33, %v10579_v41  ;;  %v17626_v58 = vsub.f32 %v8254_v6, %v10581_v5  ;;  %v10578_v5 = vsel %vm8043_vm9, 1.0, %v19232_v44  ;;  %vm7342_vm9 = vcmp.gt.f32.partialorder %v17540_v49, 1.0 }
 0x762   :  { %v17613_v61 = vadd.f32 %v12119_v45, %v7438_v39  ;;  %12400 = vmatpush3.bf16.msra.mxu0 %v17255_v1  ;;  %vm8047_vm8 = vcmp.gt.f32.partialorder %v17608_v25, 1.0  ;;  %vm8049_vm11 = vcmp.gt.f32.partialorder %v17616_v17, 1.0 }
 0x763   :  { %12422 = vmatpush3.bf16.msra.mxu1 %v17263_v9  ;;  %12401 = vmatprep.subr.bf16.mxu0 %v17266_v52  ;;  %vm8268_vm14 = vcmp.gt.f32.partialorder %v17623_v38, 1.0  ;;  %vm10596_vm4 = vmpackc.low %vm8047_vm8, %vm8047_vm8  ;;  %vm8270_vm5 = vcmp.gt.f32.partialorder %v17626_v58, 1.0 }
 0x764   :  { %12423 = vmatprep.subr.bf16.mxu1 %v17271_v63  ;;  %vm10600_vm6 = vmpackc.low %vm8049_vm11, %vm8049_vm11 }
 0x765   :  { %vm10612_vm3 = vmpackc.low %vm8268_vm14, %vm8268_vm14 }
 0x766   :  { %12402 = vmatpush3.bf16.msra.mxu0 %v17277_v20  ;;  %vm10616_vm7 = vmpackc.low %vm8270_vm5, %vm8270_vm5 }
 0x767   :  { %12424 = vmatpush3.bf16.msra.mxu1 %v17281_v53  ;;  %12431 = vmatprep.subr.bf16.mxu0 %v16983_v47  ;;  %v19805_v47 = vld [vmem:[#allocation19_spill] sm:$0xff] }
 0x768   :  { %12453 = vmatprep.subr.bf16.mxu1 %v16990_v8  ;;  %v19806_v8 = vld [vmem:[#allocation20_spill] sm:$0xff] }
 0x769   :  { %10597 = vmatmul.mubr.msk.bf16.vlgmr.msra.gmra.mrb[156].mxu0 %vm10596_vm4, %v19212_v14 }
 0x76a   :  { %10601 = vmatmul.mubr.msk.bf16.vlgmr.msra.gmra.mrb[156].mxu1 %vm10600_vm6, %v19212_v14  ;;  %12432 = vmatpush3.bf16.msra.mxu0 %v16999_v19  ;;  %v19807_v19 = vld [vmem:[#allocation21_spill] sm:$0xff] }
 0x76b   :  { %10613 = vmatprep.mubr.msk.bf16.mxu0 %vm10612_vm3, %v19212_v14  ;;  %12454 = vmatpush3.bf16.msra.mxu1 %v17006_v21  ;;  %v19808_v21 = vld [vmem:[#allocation22_spill] sm:$0xff] }
 0x76c   :  { %10617 = vmatprep.mubr.msk.bf16.mxu1 %vm10616_vm7, %v19212_v14  ;;  %12433 = vmatprep.subr.bf16.mxu0 %v17013_v62  ;;  %v19809_v62 = vld [vmem:[#allocation23_spill] sm:$0xff] }
 0x76d   :  { %12455 = vmatprep.subr.bf16.mxu1 %v17016_v10  ;;  %v19810_v10 = vld [vmem:[#allocation24_spill] sm:$0xff] }
 0x76e   :  { %12434 = vmatpush3.bf16.msra.mxu0 %v17019_v2  ;;  %v8243_v2 = vmul.f32 0.95, %v17518_v40  ;;  %v10583_v40 = vsel %vm8048_vm12, 1.0, %v19232_v44 }
 0x76f   :  { %12456 = vmatpush3.bf16.msra.mxu1 %v17022_v26  ;;  %12435 = vmatprep.subr.bf16.mxu0 %v17025_v36  ;;  %v8245_v26 = vmul.f32 0.95, %v17520_v12  ;;  %v19811_v36 = vld [vmem:[#allocation25_spill] sm:$0xff]  ;;  %v7563_v12 = vmul.f32 0.95, %v17540_v49 }
 0x770   :  { %12457 = vmatprep.subr.bf16.mxu1 %v17028_v3  ;;  %v8248_v3 = vmul.f32 0.95, %v17533_v59  ;;  %v8251_v4 = vadd.f32 %v13868_v50, %v8243_v2  ;;  %v19816_v59 = vld [vmem:[#allocation32_spill] sm:$0xff]  ;;  %v19817_v49 = vld [vmem:[#allocation33_spill] sm:$0xff] }
 0x771   :  { %v8253_v42 = vadd.f32 %v13871_v51, %v8245_v26  ;;  %v10498_v26 = vsel %vm7342_vm9, 1.0, %v19232_v44 }
 0x772   :  { %12436 = vmatpush3.bf16.msra.mxu0 %v17031_v18  ;;  %v19812_v18 = vld [vmem:[#allocation26_spill] sm:$0xff]  ;;  %v8256_v41 = vadd.f32 %v19242_v15, %v8248_v3  ;;  %v19821_v3 = vld [vmem:[#allocation37_spill] sm:$0xff] }
 0x773   :  { %12458 = vmatpush3.bf16.msra.mxu1 %v17034_v28  ;;  %12437 = vmatprep.subr.bf16.mxu0 %v19805_v47  ;;  %v19813_v28 = vld [vmem:[#allocation29_spill] sm:$0xff]  ;;  %v10580_v47 = vsel %vm8045_vm10, 1.0, %v19232_v44 }
 0x774   :  { %12459 = vmatprep.subr.bf16.mxu1 %v19806_v8 }
 0x776   :  { %12438 = vmatpush3.bf16.msra.mxu0 %v19807_v19  ;;  %v17691_v19 = vsub.f32 %v8251_v4, %v10578_v5  ;;  %v19829_v4 = vld [vmem:[#allocation45_spill] sm:$0xff]  ;;  %v8249_v5 = vmul.f32 0.95, %v17616_v17 }
 0x777   :  { %12460 = vmatpush3.bf16.msra.mxu1 %v19808_v21  ;;  %12439 = vmatprep.subr.bf16.mxu0 %v19809_v62  ;;  %v17706_v62 = vsub.f32 %v8256_v41, %v10583_v40  ;;  %v8247_v41 = vmul.f32 0.95, %v17608_v25  ;;  %v8470_v40 = vmul.f32 0.95, %v17626_v58  ;;  %v17841_v58 = vld [vmem:[#allocation6 + $0x8] sm:$0xff]  }
 0x778   :  { %12461 = vmatprep.subr.bf16.mxu1 %v19810_v10  ;;  %vm8267_vm10 = vcmp.gt.f32.partialorder %v17691_v19, 1.0 }
 0x779   :  { %vm8272_vm13 = vcmp.gt.f32.partialorder %v17706_v62, 1.0 }
 0x77a   :  { %12440 = vmatpush3.bf16.msra.mxu0 %v19811_v36  ;;  %v19820_v36 = vld [vmem:[#allocation36_spill] sm:$0xff]  ;;  %vm10620_vm2 = vmpackc.low %vm8272_vm13, %vm8272_vm13 }
 0x77b   :  { %12462 = vmatpush3.bf16.msra.mxu1 %v19812_v18  ;;  %12441 = vmatprep.subr.bf16.mxu0 %v19813_v28  ;;  %v19822_v18 = vld [vmem:[#allocation38_spill] sm:$0xff]  ;;  %v19823_v28 = vld [vmem:[#allocation28_spill] sm:$0xff] }
 0x77c   :  { %v12139_v45 = vpop.f32.mrb[132].mxu0  ;;  %12463 = vmatprep.subr.bf16.mxu1 %v19814_v23  ;;  %v19826_v23 = vld [vmem:[#allocation42_spill] sm:$0xff] }
 0x77d   :  { %v12161_v33 = vpop.f32.mrb[132].mxu1  ;;  %v12140_v16 = vpop.f32.mrb[133].mxu0 }
 0x77e   :  { %v12141_v11 = vadd.f32 %v12140_v16, %v12139_v45  ;;  %v12162_v24 = vpop.f32.mrb[133].mxu1  ;;  %v12142_v39 = vpop.f32.mrb[134].mxu0  ;;  %12442 = vmatpush3.bf16.msra.mxu0 %v17073_v43  ;;  %v19825_v45 = vld [vmem:[#allocation41_spill] sm:$0xff]  ;;  %v19828_v16 = vld [vmem:[#allocation44_spill] sm:$0xff] }
 0x77f   :  { %v12163_v34 = vadd.f32 %v12162_v24, %v12161_v33  ;;  %v12164_v6 = vpop.f32.mrb[134].mxu1  ;;  %12464 = vmatpush3.bf16.msra.mxu1 %v17076_v35  ;;  %v12143_v55 = vpop.f32.mrb[135].mxu0  ;;  %12443 = vmatprep.subr.bf16.mxu0 %v17079_v30  ;;  %v8258_v35 = vadd.f32 %v19244_v31, %v8250_v48  ;;  %v17693_v30 = vsub.f32 %v8253_v42, %v10580_v47  ;;  %v19824_v48 = vld [vmem:[#allocation40_spill] sm:$0xff]  ;;  %v19827_v33 = vld [vmem:[#allocation43_spill] sm:$0xff]  ;;  %v19830_v42 = vld [vmem:[#allocation58_spill] sm:$0xff] }
 0x780   :  { %v7518_v8 = vadd.f32 %v12141_v11, %v17613_v61  ;;  %v12165_v43 = vpop.f32.mrb[135].mxu1  ;;  %12465 = vmatprep.subr.bf16.mxu1 %v17090_v60  ;;  %v10585_v60 = vsel %vm8050_vm15, 1.0, %v19232_v44  ;;  %v19815_v61 = vld [vmem:[#allocation31_spill] sm:$0xff]  ;;  %vm10614_vm15 = vmpackc.low %vm8267_vm10, %vm8267_vm10  ;;  %v19831_v11 = vld [vmem:[#allocation57_spill] sm:$0xff] }
 0x781   :  { %v17709_v2 = vsub.f32 %v8258_v35, %v10585_v60  ;;  %vm8269_vm12 = vcmp.gt.f32.partialorder %v17693_v30, 1.0  ;;  %v19832_v24 = vld [vmem:[#allocation27_spill] sm:$0xff]  ;;  %v19833_v39 = vld [vmem:[#allocation49_spill] sm:$0xff]  ;;  %v19836_v55 = vld [vmem:[#allocation52_spill] sm:$0xff] }
 0x782   :  { %v7558_v21 = vadd.f32 %v12163_v34, %v7518_v8  ;;  %12444 = vmatpush3.bf16.msra.mxu0 %v19742_v54  ;;  %vm10618_vm1 = vmpackc.low %vm8269_vm12, %vm8269_vm12  ;;  %v19834_v34 = vld [vmem:[#allocation50_spill] sm:$0xff]  ;;  %v19835_v6 = vld [vmem:[#allocation51_spill] sm:$0xff]  ;;  %v8468_v8 = vmul.f32 0.95, %v17623_v38 }
 0x783   :  { %12466 = vmatpush3.bf16.msra.mxu1 %v19778_v56  ;;  %12445 = vmatprep.subr.bf16.mxu0 %v19815_v61  ;;  %v19818_v56 = vld [vmem:[#allocation34_spill] sm:$0xff]  ;;  %vm8274_vm0 = vcmp.gt.f32.partialorder %v17709_v2, 1.0  ;;  %v19837_v47 = vld [vmem:[#allocation53_spill] sm:$0xff] }
 0x784   :  { %v7564_v10 = vadd.f32 %v7563_v12, %v7558_v21  ;;  %12467 = vmatprep.subr.bf16.mxu1 %v19816_v59  ;;  %vm10624_vm4 = vmpackc.low %vm8274_vm0, %vm8274_vm0  ;;  %v19838_v43 = vld [vmem:[#allocation54_spill] sm:$0xff]  ;;  %v19839_v35 = vld [vmem:[#allocation13_spill] sm:$0xff] }
 0x785   :  { %v19840_v12 = vld [vmem:[#allocation15_spill] sm:$0xff] }
 0x786   :  { %v17713_v54 = vsub.f32 %v7564_v10, %v10498_v26  ;;  %12446 = vmatpush3.bf16.msra.mxu0 %v19817_v49  ;;  %v8255_v10 = vadd.f32 %v14009_v57, %v8247_v41  ;;  %v17871_v41 = vld [vmem:[#allocation6 + $0x60] sm:$0xff]  }
 0x787   :  { %12468 = vmatpush3.bf16.msra.mxu1 %v19818_v56  ;;  %12475 = vmatprep.subr.bf16.mxu0 %v19819_v37  ;;  %v8257_v56 = vadd.f32 %v14013_v46, %v8249_v5  ;;  %19845 = vst [vmem:[#allocation48_spill] sm:$0xff] %v17871_v41  ;;  %v17874_v5 = vld [vmem:[#allocation6 + $0xe0] sm:$0xff]  }
 0x788   :  { %10525 = vst [vmem:[%s18713_s5 + $0x78] sm:$0xff] %v17713_v54  ;;  %12497 = vmatprep.subr.bf16.mxu1 %v19820_v36  ;;  %19846 = vst [vmem:[#allocation14_spill] sm:$0xff] %v17874_v5 }
 0x789   :  { %10615 = vmatmul.mubr.msk.bf16.vlgmr.msra.gmra.mrb[160].mxu0 %vm10614_vm15, %v19212_v14 }
 0x78a   :  { %10619 = vmatmul.mubr.msk.bf16.vlgmr.msra.gmra.mrb[160].mxu1 %vm10618_vm1, %v19212_v14  ;;  %12476 = vmatpush3.bf16.msra.mxu0 %v19821_v3 }
 0x78b   :  { %10621 = vmatprep.mubr.msk.bf16.mxu0 %vm10620_vm2, %v19212_v14  ;;  %12498 = vmatpush3.bf16.msra.mxu1 %v19822_v18  ;;  %v8476_v18 = vadd.f32 %v19261_v13, %v8468_v8  ;;  %v8469_v8 = vmul.f32 0.95, %v17693_v30 }
 0x78c   :  { %10625 = vmatprep.mubr.msk.bf16.mxu1 %vm10624_vm4, %v19212_v14  ;;  %12477 = vmatprep.subr.bf16.mxu0 %v19823_v28  ;;  %v10582_v28 = vsel %vm8047_vm8, 1.0, %v19232_v44 }
 0x78d   :  { %12499 = vmatprep.subr.bf16.mxu1 %v19824_v48 }
 0x78e   :  { %12478 = vmatpush3.bf16.msra.mxu0 %v19825_v45 }
 0x78f   :  { %12500 = vmatpush3.bf16.msra.mxu1 %v19826_v23  ;;  %12479 = vmatprep.subr.bf16.mxu0 %v19827_v33  ;;  %v17781_v23 = vsub.f32 %v8255_v10, %v10582_v28 }
 0x790   :  { %12501 = vmatprep.subr.bf16.mxu1 %v19828_v16  ;;  %v17844_v16 = vld [vmem:[#allocation6 + $0x88] sm:$0xff]  }
 0x791   :  { %vm8271_vm8 = vcmp.gt.f32.partialorder %v17781_v23, 1.0 }
 0x792   :  { %12480 = vmatpush3.bf16.msra.mxu0 %v19829_v4  ;;  %v17847_v4 = vld [vmem:[#allocation6 + $0x50] sm:$0xff]  }
 0x793   :  { %12502 = vmatpush3.bf16.msra.mxu1 %v19830_v42  ;;  %12481 = vmatprep.subr.bf16.mxu0 %v19831_v11  ;;  %v17850_v42 = vld [vmem:[#allocation6 + $0xd0] sm:$0xff]  }
 0x794   :  { %12503 = vmatprep.subr.bf16.mxu1 %v19832_v24  ;;  %v17853_v11 = vld [vmem:[#allocation6 + $0x10] sm:$0xff]  }
 0x795   :  { %v17856_v24 = vld [vmem:[#allocation6 + $0x90] sm:$0xff]  }
 0x796   :  { %12482 = vmatpush3.bf16.msra.mxu0 %v19833_v39  ;;  %v17859_v39 = vld [vmem:[#allocation6 + $0x58] sm:$0xff]  }
 0x797   :  { %12504 = vmatpush3.bf16.msra.mxu1 %v19834_v34  ;;  %12483 = vmatprep.subr.bf16.mxu0 %v19835_v6  ;;  %19841 = vst [vmem:[#allocation55_spill] sm:$0xff] %v17859_v39  ;;  %v17862_v34 = vld [vmem:[#allocation6 + $0xd8] sm:$0xff]  }
 0x798   :  { %12505 = vmatprep.subr.bf16.mxu1 %v19836_v55  ;;  %19842 = vst [vmem:[#allocation56_spill] sm:$0xff] %v17862_v34  ;;  %v17865_v6 = vld [vmem:[#allocation6 + $0x18] sm:$0xff]  }
 0x799   :  { %19843 = vst [vmem:[#allocation47_spill] sm:$0xff] %v17865_v6  ;;  %v17868_v55 = vld [vmem:[#allocation6 + $0x98] sm:$0xff]  }
 0x79a   :  { %12484 = vmatpush3.bf16.msra.mxu0 %v19837_v47  ;;  %19844 = vst [vmem:[#allocation12_spill] sm:$0xff] %v17868_v55  ;;  %v8467_v47 = vmul.f32 0.95, %v17691_v19  ;;  %v10609_v19 = vsel %vm8272_vm13, 1.0, %v19232_v44 }
 0x79b   :  { %12506 = vmatpush3.bf16.msra.mxu1 %v19838_v43  ;;  %12485 = vmatprep.subr.bf16.mxu0 %v19839_v35  ;;  %v17879_v43 = vld [vmem:[#allocation6 + $0x20] sm:$0xff]   ;;  %v8472_v35 = vmul.f32 0.95, %v17706_v62 }
 0x79c   :  { %v12183_v21 = vpop.f32.mrb[136].mxu0  ;;  %12507 = vmatprep.subr.bf16.mxu1 %v19840_v12  ;;  %19847 = vst [vmem:[#allocation16_spill] sm:$0xff] %v17879_v43  ;;  %v8474_v12 = vmul.f32 0.95, %v17709_v2 }
 0x79d   :  { %v12205_v60 = vpop.f32.mrb[136].mxu1  ;;  %v12184_v61 = vpop.f32.mrb[137].mxu0 }
 0x79e   :  { %v12185_v59 = vadd.f32 %v12184_v61, %v12183_v21  ;;  %v12206_v26 = vpop.f32.mrb[137].mxu1  ;;  %v12186_v49 = vpop.f32.mrb[138].mxu0  ;;  %12486 = vmatpush3.bf16.msra.mxu0 %v17226_v7  ;;  %v8478_v7 = vadd.f32 %v19263_v0, %v8470_v40  ;;  %v17883_v40 = vld [vmem:[#allocation6 + $0xa0] sm:$0xff]   ;;  %v17886_v21 = vld [vmem:[#allocation6 + $0x68] sm:$0xff]  }
 0x79f   :  { %v12207_v37 = vadd.f32 %v12206_v26, %v12205_v60  ;;  %v12208_v36 = vpop.f32.mrb[138].mxu1  ;;  %12508 = vmatpush3.bf16.msra.mxu1 %v17230_v22  ;;  %v12187_v3 = vpop.f32.mrb[139].mxu0  ;;  %12487 = vmatprep.subr.bf16.mxu0 %v17233_v32  ;;  %v10584_v22 = vsel %vm8049_vm11, 1.0, %v19232_v44  ;;  %v10605_v32 = vsel %vm8268_vm14, 1.0, %v19232_v44  ;;  %19848 = vst [vmem:[#allocation17_spill] sm:$0xff] %v17883_v40  ;;  %19849 = vst [vmem:[#allocation18_spill] sm:$0xff] %v17886_v21 }
 0x7a0   :  { %v7662_v48 = vadd.f32 %v17427_v27, %v12185_v59  ;;  %v12209_v45 = vpop.f32.mrb[139].mxu1  ;;  %12509 = vmatprep.subr.bf16.mxu1 %v17241_v29  ;;  %v17789_v25 = vsub.f32 %v8257_v56, %v10584_v22  ;;  %v10607_v29 = vsel %vm8270_vm5, 1.0, %v19232_v44  ;;  %v17796_v17 = vsub.f32 %v8476_v18, %v10605_v32  ;;  %vm10622_vm5 = vmpackc.low %vm8271_vm8, %vm8271_vm8  ;;  %v17890_v61 = vld [vmem:[#allocation6 + $0xe8] sm:$0xff]  }
 0x7a1   :  { %v17799_v38 = vsub.f32 %v8478_v7, %v10607_v29  ;;  %19850 = vst [vmem:[#allocation39_spill] sm:$0xff] %v17890_v61  ;;  %v8475_v26 = vadd.f32 %v13868_v50, %v8467_v47  ;;  %v8477_v49 = vadd.f32 %v13871_v51, %v8469_v8  ;;  %v17895_v3 = vld [vmem:[#allocation6 + $0x28] sm:$0xff]   ;;  %v17901_v7 = vld [vmem:[#allocation6 + $0x70] sm:$0xff]   ;;  %v8480_v22 = vadd.f32 %v19242_v15, %v8472_v35 }
 0x7a2   :  { %v17786_v33 = vadd.f32 %v12207_v37, %v7662_v48  ;;  %12488 = vmatpush3.bf16.msra.mxu0 %v17255_v1  ;;  %vm8273_vm11 = vcmp.gt.f32.partialorder %v17789_v25, 1.0  ;;  %v17805_v1 = vld [vmem:[#allocation6 + $0x40] sm:$0xff]   ;;  %vm8492_vm14 = vcmp.gt.f32.partialorder %v17796_v17, 1.0  ;;  %v17898_v48 = vld [vmem:[#allocation6 + $0xa8] sm:$0xff]   ;;  %v10604_v32 = vsel %vm8267_vm10, 1.0, %v19232_v44 }
 0x7a3   :  { %12510 = vmatpush3.bf16.msra.mxu1 %v17263_v9  ;;  %12489 = vmatprep.subr.bf16.mxu0 %v17266_v52  ;;  %v17812_v9 = vld [vmem:[#allocation6 + $0xc0] sm:$0xff]   ;;  %vm8494_vm6 = vcmp.gt.f32.partialorder %v17799_v38, 1.0  ;;  %vm10626_vm3 = vmpackc.low %vm8273_vm11, %vm8273_vm11  ;;  %v10606_v29 = vsel %vm8269_vm12, 1.0, %v19232_v44  ;;  %vm7566_vm10 = vcmp.gt.f32.partialorder %v17713_v54, 1.0  ;;  %v17937_v62 = vsub.f32 %v8480_v22, %v10609_v19  ;;  %v17995_v19 = vld [vmem:[#allocation6 + $0x108] sm:$0xff]  }
 0x7a4   :  { %12511 = vmatprep.subr.bf16.mxu1 %v17271_v63  ;;  %v17821_v52 = vld [vmem:[#allocation6] sm:$0xff]   ;;  %vm10638_vm7 = vmpackc.low %vm8492_vm14, %vm8492_vm14  ;;  %v17918_v35 = vsub.f32 %v8477_v49, %v10606_v29  ;;  %v17934_v49 = vld [vmem:[#allocation6 + $0x78] sm:$0xff]   ;;  %v10524_v2 = vsel %vm7566_vm10, 1.0, %v19232_v44  ;;  %19863 = vst [vmem:[#allocation32_spill] sm:$0xff] %v17995_v19 }
 0x7a5   :  { %v17828_v63 = vld [vmem:[#allocation6 + $0x80] sm:$0xff]   ;;  %vm10642_vm9 = vmpackc.low %vm8494_vm6, %vm8494_vm6  ;;  %19853 = vst [vmem:[#allocation20_spill] sm:$0xff] %v17934_v49  ;;  %vm8496_vm15 = vcmp.gt.f32.partialorder %v17937_v62, 1.0 }
 0x7a6   :  { %12490 = vmatpush3.bf16.msra.mxu0 %v17277_v20  ;;  %v17835_v20 = vld [vmem:[#allocation6 + $0x48] sm:$0xff]   ;;  %vm8493_vm13 = vcmp.gt.f32.partialorder %v17918_v35, 1.0  ;;  %v17955_v22 = vld [vmem:[#allocation6 + $0x140] sm:$0xff]   ;;  %vm10646_vm4 = vmpackc.low %vm8496_vm15, %vm8496_vm15 }
 0x7a7   :  { %12512 = vmatpush3.bf16.msra.mxu1 %v17281_v53  ;;  %12519 = vmatprep.subr.bf16.mxu0 %v17805_v1  ;;  %v17838_v53 = vld [vmem:[#allocation6 + $0xc8] sm:$0xff]   ;;  %19857 = vst [vmem:[#allocation24_spill] sm:$0xff] %v17955_v22  ;;  %vm10644_vm2 = vmpackc.low %vm8493_vm13, %vm8493_vm13  ;;  %v17975_v29 = vld [vmem:[#allocation6 + $0x100] sm:$0xff]  }
 0x7a8   :  { %12541 = vmatprep.subr.bf16.mxu1 %v17812_v9  ;;  %19859 = vst [vmem:[#allocation26_spill] sm:$0xff] %v17975_v29 }
 0x7a9   :  { %10623 = vmatmul.mubr.msk.bf16.vlgmr.msra.gmra.mrb[164].mxu0 %vm10622_vm5, %v19212_v14 }
 0x7aa   :  { %10627 = vmatmul.mubr.msk.bf16.vlgmr.msra.gmra.mrb[164].mxu1 %vm10626_vm3, %v19212_v14  ;;  %12520 = vmatpush3.bf16.msra.mxu0 %v17821_v52 }
 0x7ab   :  { %10639 = vmatprep.mubr.msk.bf16.mxu0 %vm10638_vm7, %v19212_v14  ;;  %12542 = vmatpush3.bf16.msra.mxu1 %v17828_v63 }
 0x7ac   :  { %10643 = vmatprep.mubr.msk.bf16.mxu1 %vm10642_vm9, %v19212_v14  ;;  %12521 = vmatprep.subr.bf16.mxu0 %v17835_v20 }
 0x7ad   :  { %12543 = vmatprep.subr.bf16.mxu1 %v17838_v53 }
 0x7ae   :  { %12522 = vmatpush3.bf16.msra.mxu0 %v17841_v58 }
 0x7af   :  { %12544 = vmatpush3.bf16.msra.mxu1 %v17844_v16  ;;  %12523 = vmatprep.subr.bf16.mxu0 %v17847_v4 }
 0x7b0   :  { %12545 = vmatprep.subr.bf16.mxu1 %v17850_v42 }
 0x7b2   :  { %12524 = vmatpush3.bf16.msra.mxu0 %v17853_v11 }
 0x7b3   :  { %12546 = vmatpush3.bf16.msra.mxu1 %v17856_v24  ;;  %12525 = vmatprep.subr.bf16.mxu0 %v17859_v39 }
 0x7b4   :  { %12547 = vmatprep.subr.bf16.mxu1 %v17862_v34 }
 0x7b6   :  { %12526 = vmatpush3.bf16.msra.mxu0 %v17865_v6 }
 0x7b7   :  { %12548 = vmatpush3.bf16.msra.mxu1 %v17868_v55  ;;  %12527 = vmatprep.subr.bf16.mxu0 %v17871_v41 }
 0x7b8   :  { %12549 = vmatprep.subr.bf16.mxu1 %v17874_v5 }
 0x7ba   :  { %12528 = vmatpush3.bf16.msra.mxu0 %v17879_v43 }
 0x7bb   :  { %12550 = vmatpush3.bf16.msra.mxu1 %v17883_v40  ;;  %12529 = vmatprep.subr.bf16.mxu0 %v17886_v21 }
 0x7bc   :  { %v12227_v60 = vpop.f32.mrb[140].mxu0  ;;  %12551 = vmatprep.subr.bf16.mxu1 %v17890_v61 }
 0x7bd   :  { %v12249_v10 = vpop.f32.mrb[140].mxu1  ;;  %v12228_v59 = vpop.f32.mrb[141].mxu0 }
 0x7be   :  { %v12229_v56 = vadd.f32 %v12228_v59, %v12227_v60  ;;  %v12250_v37 = vpop.f32.mrb[141].mxu1  ;;  %v12230_v36 = vpop.f32.mrb[142].mxu0  ;;  %12530 = vmatpush3.bf16.msra.mxu0 %v17895_v3  ;;  %v17912_v60 = vld [vmem:[#allocation6 + $0xf0] sm:$0xff]   ;;  %v17916_v59 = vsub.f32 %v8475_v26, %v10604_v32  ;;  %v17966_v32 = vld [vmem:[#allocation6 + $0x1c0] sm:$0xff]  }
 0x7bf   :  { %v12251_v18 = vadd.f32 %v12250_v37, %v12249_v10  ;;  %v12252_v28 = vpop.f32.mrb[142].mxu1  ;;  %12552 = vmatpush3.bf16.msra.mxu1 %v17898_v48  ;;  %v12231_v45 = vpop.f32.mrb[143].mxu0  ;;  %12531 = vmatprep.subr.bf16.mxu0 %v17901_v7  ;;  %v8482_v10 = vadd.f32 %v19244_v31, %v8474_v12  ;;  %v10611_v12 = vsel %vm8274_vm0, 1.0, %v19232_v44  ;;  %v17931_v26 = vld [vmem:[#allocation6 + $0xb0] sm:$0xff]   ;;  %19858 = vst [vmem:[#allocation25_spill] sm:$0xff] %v17966_v32 }
 0x7c0   :  { %v7742_v47 = vadd.f32 %v12229_v56, %v17786_v33  ;;  %v12253_v8 = vpop.f32.mrb[143].mxu1  ;;  %12553 = vmatprep.subr.bf16.mxu1 %v17912_v60  ;;  %v7787_v33 = vmul.f32 0.95, %v17713_v54  ;;  %v17925_v56 = vld [vmem:[#allocation6 + $0x30] sm:$0xff]   ;;  %19852 = vst [vmem:[#allocation19_spill] sm:$0xff] %v17931_v26  ;;  %v17939_v54 = vld [vmem:[#allocation6 + $0xf8] sm:$0xff]  }
 0x7c1   :  { %19851 = vst [vmem:[#allocation30_spill] sm:$0xff] %v17925_v56  ;;  %19854 = vst [vmem:[#allocation21_spill] sm:$0xff] %v17939_v54  ;;  %v17942_v36 = vsub.f32 %v8482_v10, %v10611_v12  ;;  %vm8491_vm12 = vcmp.gt.f32.partialorder %v17916_v59, 1.0  ;;  %v17948_v28 = vld [vmem:[#allocation6 + $0x38] sm:$0xff]   ;;  %v17989_v8 = vld [vmem:[#allocation6 + $0x148] sm:$0xff]  }
 0x7c2   :  { %v7782_v30 = vadd.f32 %v12251_v18, %v7742_v47  ;;  %12532 = vmatpush3.bf16.msra.mxu0 %v17925_v56  ;;  %19855 = vst [vmem:[#allocation22_spill] sm:$0xff] %v17948_v28  ;;  %v17952_v45 = vld [vmem:[#allocation6 + $0xb8] sm:$0xff]   ;;  %vm10640_vm0 = vmpackc.low %vm8491_vm12, %vm8491_vm12  ;;  %v17982_v47 = vld [vmem:[#allocation6 + $0x180] sm:$0xff]  }
 0x7c3   :  { %12554 = vmatpush3.bf16.msra.mxu1 %v17931_v26  ;;  %12533 = vmatprep.subr.bf16.mxu0 %v17934_v49  ;;  %19856 = vst [vmem:[#allocation23_spill] sm:$0xff] %v17952_v45  ;;  %vm8498_vm1 = vcmp.gt.f32.partialorder %v17942_v36, 1.0  ;;  %19860 = vst [vmem:[#allocation29_spill] sm:$0xff] %v17982_v47  ;;  %v17992_v10 = vld [vmem:[#allocation6 + $0x1c8] sm:$0xff]   ;;  %v18004_v12 = vld [vmem:[#allocation6 + $0x1d0] sm:$0xff]  }
 0x7c4   :  { %v7788_v37 = vadd.f32 %v7787_v33, %v7782_v30  ;;  %12555 = vmatprep.subr.bf16.mxu1 %v17939_v54  ;;  %vm10650_vm5 = vmpackc.low %vm8498_vm1, %vm8498_vm1  ;;  %19861 = vst [vmem:[#allocation46_spill] sm:$0xff] %v17989_v8  ;;  %v17998_v30 = vld [vmem:[#allocation6 + $0x188] sm:$0xff]   ;;  %v18001_v33 = vld [vmem:[#allocation6 + $0x150] sm:$0xff]  }
 0x7c5   :  { %19862 = vst [vmem:[#allocation31_spill] sm:$0xff] %v17992_v10  ;;  %19864 = vst [vmem:[#allocation33_spill] sm:$0xff] %v17998_v30  ;;  %v18048_v54 = vld [vmem:[#allocation6 + $0x128] sm:$0xff]   ;;  %v18055_v56 = vld [vmem:[#allocation6 + $0x170] sm:$0xff]  }
 0x7c6   :  { %v17946_v18 = vsub.f32 %v7788_v37, %v10524_v2  ;;  %12534 = vmatpush3.bf16.msra.mxu0 %v17948_v28  ;;  %19865 = vst [vmem:[#allocation34_spill] sm:$0xff] %v18001_v33  ;;  %19866 = vst [vmem:[#allocation35_spill] sm:$0xff] %v18004_v12  ;;  %v18007_v37 = vld [vmem:[#allocation6 + $0x110] sm:$0xff]   ;;  %v18052_v26 = vld [vmem:[#allocation6 + $0x1a8] sm:$0xff]  }
 0x7c7   :  { %12556 = vmatpush3.bf16.msra.mxu1 %v17952_v45  ;;  %12563 = vmatprep.subr.bf16.mxu0 %v17955_v22  ;;  %19867 = vst [vmem:[#allocation36_spill] sm:$0xff] %v18007_v37  ;;  %v18010_v2 = vld [vmem:[#allocation6 + $0x190] sm:$0xff]  }
 0x7c8   :  { %10551 = vst [vmem:[%s18713_s5 + $0x80] sm:$0xff] %v17946_v18  ;;  %12585 = vmatprep.subr.bf16.mxu1 %v17966_v32  ;;  %19868 = vst [vmem:[#allocation37_spill] sm:$0xff] %v18010_v2 }
 0x7c9   :  { %10641 = vmatmul.mubr.msk.bf16.vlgmr.msra.gmra.mrb[168].mxu0 %vm10640_vm0, %v19212_v14 }
 0x7ca   :  { %10645 = vmatmul.mubr.msk.bf16.vlgmr.msra.gmra.mrb[168].mxu1 %vm10644_vm2, %v19212_v14  ;;  %12564 = vmatpush3.bf16.msra.mxu0 %v17975_v29 }
 0x7cb   :  { %10647 = vmatprep.mubr.msk.bf16.mxu0 %vm10646_vm4, %v19212_v14  ;;  %12586 = vmatpush3.bf16.msra.mxu1 %v17982_v47  ;;  %v18044_v47 = vld [vmem:[#allocation6 + $0x1e8] sm:$0xff]  }
 0x7cc   :  { %10651 = vmatprep.mubr.msk.bf16.mxu1 %vm10650_vm5, %v19212_v14  ;;  %12565 = vmatprep.subr.bf16.mxu0 %v17989_v8  ;;  %v18037_v8 = vld [vmem:[#allocation6 + $0x1a0] sm:$0xff]   ;;  %19878 = vst [vmem:[#allocation57_spill] sm:$0xff] %v18044_v47 }
 0x7cd   :  { %12587 = vmatprep.subr.bf16.mxu1 %v17992_v10  ;;  %v18033_v10 = vld [vmem:[#allocation6 + $0x120] sm:$0xff]   ;;  %19876 = vst [vmem:[#allocation45_spill] sm:$0xff] %v18037_v8 }
 0x7ce   :  { %12566 = vmatpush3.bf16.msra.mxu0 %v17995_v19  ;;  %v18013_v19 = vld [vmem:[#allocation6 + $0x158] sm:$0xff]   ;;  %19875 = vst [vmem:[#allocation44_spill] sm:$0xff] %v18033_v10 }
 0x7cf   :  { %12588 = vmatpush3.bf16.msra.mxu1 %v17998_v30  ;;  %12567 = vmatprep.subr.bf16.mxu0 %v18001_v33  ;;  %19869 = vst [vmem:[#allocation38_spill] sm:$0xff] %v18013_v19  ;;  %v18016_v30 = vld [vmem:[#allocation6 + $0x1d8] sm:$0xff]  }
 0x7d0   :  { %12589 = vmatprep.subr.bf16.mxu1 %v18004_v12  ;;  %19870 = vst [vmem:[#allocation28_spill] sm:$0xff] %v18016_v30  ;;  %v18019_v33 = vld [vmem:[#allocation6 + $0x118] sm:$0xff]  }
 0x7d1   :  { %19871 = vst [vmem:[#allocation40_spill] sm:$0xff] %v18019_v33  ;;  %v18022_v12 = vld [vmem:[#allocation6 + $0x198] sm:$0xff]  }
 0x7d2   :  { %12568 = vmatpush3.bf16.msra.mxu0 %v18007_v37  ;;  %19872 = vst [vmem:[#allocation41_spill] sm:$0xff] %v18022_v12  ;;  %v18025_v37 = vld [vmem:[#allocation6 + $0x160] sm:$0xff]  }
 0x7d3   :  { %12590 = vmatpush3.bf16.msra.mxu1 %v18010_v2  ;;  %12569 = vmatprep.subr.bf16.mxu0 %v18013_v19  ;;  %19873 = vst [vmem:[#allocation42_spill] sm:$0xff] %v18025_v37  ;;  %v18028_v2 = vld [vmem:[#allocation6 + $0x1e0] sm:$0xff]   ;;  %v8471_v19 = vmul.f32 0.95, %v17781_v23  ;;  %v10631_v23 = vsel %vm8492_vm14, 1.0, %v19232_v44 }
 0x7d4   :  { %12591 = vmatprep.subr.bf16.mxu1 %v18016_v30  ;;  %19874 = vst [vmem:[#allocation43_spill] sm:$0xff] %v18028_v2  ;;  %v8473_v30 = vmul.f32 0.95, %v17789_v25  ;;  %v18085_v25 = vld [vmem:[#allocation6 + $0x1b0] sm:$0xff]  }
 0x7d6   :  { %12570 = vmatpush3.bf16.msra.mxu0 %v18019_v33  ;;  %v8692_v33 = vmul.f32 0.95, %v17796_v17 }
 0x7d7   :  { %12592 = vmatpush3.bf16.msra.mxu1 %v18022_v12  ;;  %12571 = vmatprep.subr.bf16.mxu0 %v18025_v37  ;;  %v18040_v12 = vld [vmem:[#allocation6 + $0x168] sm:$0xff]  }
 0x7d8   :  { %12593 = vmatprep.subr.bf16.mxu1 %v18028_v2  ;;  %19877 = vst [vmem:[#allocation58_spill] sm:$0xff] %v18040_v12  ;;  %v8694_v2 = vmul.f32 0.95, %v17799_v38  ;;  %v18099_v38 = vld [vmem:[#allocation6 + $0x138] sm:$0xff]  }
 0x7da   :  { %12572 = vmatpush3.bf16.msra.mxu0 %v18033_v10  ;;  %v8479_v10 = vadd.f32 %v14009_v57, %v8471_v19 }
 0x7db   :  { %12594 = vmatpush3.bf16.msra.mxu1 %v18037_v8  ;;  %12573 = vmatprep.subr.bf16.mxu0 %v18040_v12  ;;  %v8481_v12 = vadd.f32 %v14013_v46, %v8473_v30 }
 0x7dc   :  { %v12271_v37 = vpop.f32.mrb[144].mxu0  ;;  %12595 = vmatprep.subr.bf16.mxu1 %v18044_v47 }
 0x7dd   :  { %v12293_v29 = vpop.f32.mrb[144].mxu1  ;;  %v12272_v32 = vpop.f32.mrb[145].mxu0 }
 0x7de   :  { %v12273_v22 = vadd.f32 %v12272_v32, %v12271_v37  ;;  %v12294_v45 = vpop.f32.mrb[145].mxu1  ;;  %v12274_v28 = vpop.f32.mrb[146].mxu0  ;;  %12574 = vmatpush3.bf16.msra.mxu0 %v18048_v54  ;;  %v8700_v32 = vadd.f32 %v19261_v13, %v8692_v33  ;;  %v10633_v37 = vsel %vm8494_vm6, 1.0, %v19232_v44 }
 0x7df   :  { %v12295_v8 = vadd.f32 %v12294_v45, %v12293_v29  ;;  %v12296_v49 = vpop.f32.mrb[146].mxu1  ;;  %12596 = vmatpush3.bf16.msra.mxu1 %v18052_v26  ;;  %v12275_v47 = vpop.f32.mrb[147].mxu0  ;;  %12575 = vmatprep.subr.bf16.mxu0 %v18055_v56  ;;  %v10608_v28 = vsel %vm8271_vm8, 1.0, %v19232_v44  ;;  %v18063_v45 = vld [vmem:[#allocation6 + $0x1f0] sm:$0xff]   ;;  %v10610_v29 = vsel %vm8273_vm11, 1.0, %v19232_v44 }
 0x7e0   :  { %v7886_v19 = vadd.f32 %v17427_v27, %v12273_v22  ;;  %v12297_v30 = vpop.f32.mrb[147].mxu1  ;;  %12597 = vmatprep.subr.bf16.mxu1 %v18063_v45  ;;  %v8702_v49 = vadd.f32 %v19263_v0, %v8694_v2  ;;  %v18070_v47 = vsub.f32 %v8479_v10, %v10608_v28  ;;  %v18077_v27 = vld [vmem:[#allocation6 + $0x130] sm:$0xff]   ;;  %v18080_v22 = vsub.f32 %v8481_v12, %v10610_v29  ;;  %v18088_v10 = vld [vmem:[#allocation6 + $0x178] sm:$0xff]  }
 0x7e1   :  { %v18091_v17 = vsub.f32 %v8700_v32, %v10631_v23  ;;  %v18103_v2 = vld [vmem:[#allocation6 + $0x1b8] sm:$0xff]   ;;  %v8691_v32 = vmul.f32 0.95, %v17916_v59  ;;  %v8693_v28 = vmul.f32 0.95, %v17918_v35  ;;  %v10635_v59 = vsel %vm8496_vm15, 1.0, %v19232_v44 }
 0x7e2   :  { %v18075_v33 = vadd.f32 %v12295_v8, %v7886_v19  ;;  %12576 = vmatpush3.bf16.msra.mxu0 %v18077_v27  ;;  %v18093_v8 = vld [vmem:[#allocation6 + $0x1f8] sm:$0xff]   ;;  %v18096_v12 = vsub.f32 %v8702_v49, %v10633_v37  ;;  %vm8495_vm8 = vcmp.gt.f32.partialorder %v18070_v47, 1.0  ;;  %vm8497_vm11 = vcmp.gt.f32.partialorder %v18080_v22, 1.0 }
 0x7e3   :  { %12598 = vmatpush3.bf16.msra.mxu1 %v18085_v25  ;;  %12577 = vmatprep.subr.bf16.mxu0 %v18088_v10  ;;  %vm8716_vm14 = vcmp.gt.f32.partialorder %v18091_v17, 1.0  ;;  %vm10648_vm6 = vmpackc.low %vm8495_vm8, %vm8495_vm8  ;;  %v8696_v19 = vmul.f32 0.95, %v17937_v62  ;;  %v8698_v30 = vmul.f32 0.95, %v17942_v36  ;;  %v8699_v37 = vadd.f32 %v13868_v50, %v8691_v32  ;;  %v19882_v62 = vld [vmem:[#allocation21_spill] sm:$0xff] }
 0x7e4   :  { %12599 = vmatprep.subr.bf16.mxu1 %v18093_v8  ;;  %vm8718_vm3 = vcmp.gt.f32.partialorder %v18096_v12, 1.0  ;;  %vm10652_vm7 = vmpackc.low %vm8497_vm11, %vm8497_vm11  ;;  %v10630_v32 = vsel %vm8491_vm12, 1.0, %v19232_v44  ;;  %vm7790_vm12 = vcmp.gt.f32.partialorder %v17946_v18, 1.0  ;;  %v8011_v35 = vmul.f32 0.95, %v17946_v18  ;;  %v19884_v36 = vld [vmem:[#allocation23_spill] sm:$0xff] }
 0x7e5   :  { %vm10664_vm9 = vmpackc.low %vm8716_vm14, %vm8716_vm14 }
 0x7e6   :  { %12578 = vmatpush3.bf16.msra.mxu0 %v18099_v38  ;;  %vm10668_vm10 = vmpackc.low %vm8718_vm3, %vm8718_vm3 }
 0x7e7   :  { %12600 = vmatpush3.bf16.msra.mxu1 %v18103_v2  ;;  %12607 = vmatprep.subr.bf16.mxu0 %v17805_v1 }
 0x7e8   :  { %12629 = vmatprep.subr.bf16.mxu1 %v17812_v9 }
 0x7e9   :  { %10649 = vmatmul.mubr.msk.bf16.vlgmr.msra.gmra.mrb[172].mxu0 %vm10648_vm6, %v19212_v14 }
 0x7ea   :  { %10653 = vmatmul.mubr.msk.bf16.vlgmr.msra.gmra.mrb[172].mxu1 %vm10652_vm7, %v19212_v14  ;;  %12608 = vmatpush3.bf16.msra.mxu0 %v17821_v52 }
 0x7eb   :  { %10665 = vmatprep.mubr.msk.bf16.mxu0 %vm10664_vm9, %v19212_v14  ;;  %12630 = vmatpush3.bf16.msra.mxu1 %v17828_v63 }
 0x7ec   :  { %10669 = vmatprep.mubr.msk.bf16.mxu1 %vm10668_vm10, %v19212_v14  ;;  %12609 = vmatprep.subr.bf16.mxu0 %v17835_v20 }
 0x7ed   :  { %12631 = vmatprep.subr.bf16.mxu1 %v17838_v53 }
 0x7ee   :  { %12610 = vmatpush3.bf16.msra.mxu0 %v17841_v58 }
 0x7ef   :  { %12632 = vmatpush3.bf16.msra.mxu1 %v17844_v16  ;;  %12611 = vmatprep.subr.bf16.mxu0 %v17847_v4 }
 0x7f0   :  { %12633 = vmatprep.subr.bf16.mxu1 %v17850_v42 }
 0x7f2   :  { %12612 = vmatpush3.bf16.msra.mxu0 %v17853_v11 }
 0x7f3   :  { %12634 = vmatpush3.bf16.msra.mxu1 %v17856_v24  ;;  %12613 = vmatprep.subr.bf16.mxu0 %v17859_v39 }
 0x7f4   :  { %12635 = vmatprep.subr.bf16.mxu1 %v17862_v34 }
 0x7f6   :  { %12614 = vmatpush3.bf16.msra.mxu0 %v17865_v6 }
 0x7f7   :  { %12636 = vmatpush3.bf16.msra.mxu1 %v17868_v55  ;;  %12615 = vmatprep.subr.bf16.mxu0 %v17871_v41 }
 0x7f8   :  { %12637 = vmatprep.subr.bf16.mxu1 %v17874_v5  ;;  %v8701_v5 = vadd.f32 %v13871_v51, %v8693_v28  ;;  %v10632_v28 = vsel %vm8493_vm13, 1.0, %v19232_v44 }
 0x7fa   :  { %12616 = vmatpush3.bf16.msra.mxu0 %v17879_v43 }
 0x7fb   :  { %12638 = vmatpush3.bf16.msra.mxu1 %v17883_v40  ;;  %12617 = vmatprep.subr.bf16.mxu0 %v17886_v21 }
 0x7fc   :  { %v12315_v49 = vpop.f32.mrb[148].mxu0  ;;  %12639 = vmatprep.subr.bf16.mxu1 %v17890_v61  ;;  %v8704_v61 = vadd.f32 %v19242_v15, %v8696_v19 }
 0x7fd   :  { %v12337_v29 = vpop.f32.mrb[148].mxu1  ;;  %v12316_v23 = vpop.f32.mrb[149].mxu0 }
 0x7fe   :  { %v12317_v41 = vadd.f32 %v12316_v23, %v12315_v49  ;;  %v12338_v55 = vpop.f32.mrb[149].mxu1  ;;  %v12318_v43 = vpop.f32.mrb[150].mxu0  ;;  %12618 = vmatpush3.bf16.msra.mxu0 %v17895_v3 }
 0x7ff   :  { %v12339_v6 = vadd.f32 %v12338_v55, %v12337_v29  ;;  %v12340_v40 = vpop.f32.mrb[150].mxu1  ;;  %12640 = vmatpush3.bf16.msra.mxu1 %v17898_v48  ;;  %v12319_v21 = vpop.f32.mrb[151].mxu0  ;;  %12619 = vmatprep.subr.bf16.mxu0 %v17901_v7  ;;  %v8706_v55 = vadd.f32 %v19244_v31, %v8698_v30  ;;  %v19879_v29 = vld [vmem:[#allocation30_spill] sm:$0xff]  ;;  %v19881_v30 = vld [vmem:[#allocation20_spill] sm:$0xff] }
 0x800   :  { %v7966_v43 = vadd.f32 %v12317_v41, %v18075_v33  ;;  %v12341_v49 = vpop.f32.mrb[151].mxu1  ;;  %12641 = vmatprep.subr.bf16.mxu1 %v17912_v60  ;;  %v18165_v40 = vsub.f32 %v8699_v37, %v10630_v32  ;;  %v18167_v21 = vsub.f32 %v8701_v5, %v10632_v28  ;;  %v10637_v41 = vsel %vm8498_vm1, 1.0, %v19232_v44  ;;  %v19880_v33 = vld [vmem:[#allocation19_spill] sm:$0xff]  ;;  %v19883_v32 = vld [vmem:[#allocation22_spill] sm:$0xff]  ;;  %v19885_v28 = vld [vmem:[#allocation24_spill] sm:$0xff] }
 0x801   :  { %v18180_v5 = vsub.f32 %v8704_v61, %v10635_v59  ;;  %v18183_v37 = vsub.f32 %v8706_v55, %v10637_v41  ;;  %v19886_v61 = vld [vmem:[#allocation25_spill] sm:$0xff]  ;;  %v19889_v55 = vld [vmem:[#allocation46_spill] sm:$0xff]  ;;  %v19890_v59 = vld [vmem:[#allocation31_spill] sm:$0xff] }
 0x802   :  { %v8006_v19 = vadd.f32 %v12339_v6, %v7966_v43  ;;  %12620 = vmatpush3.bf16.msra.mxu0 %v19879_v29  ;;  %v10550_v6 = vsel %vm7790_vm12, 1.0, %v19232_v44  ;;  %vm8715_vm13 = vcmp.gt.f32.partialorder %v18165_v40, 1.0  ;;  %vm8717_vm15 = vcmp.gt.f32.partialorder %v18167_v21, 1.0  ;;  %v19887_v43 = vld [vmem:[#allocation26_spill] sm:$0xff]  ;;  %v19888_v49 = vld [vmem:[#allocation29_spill] sm:$0xff] }
 0x803   :  { %12642 = vmatpush3.bf16.msra.mxu1 %v19880_v33  ;;  %12621 = vmatprep.subr.bf16.mxu0 %v19881_v30  ;;  %vm8720_vm0 = vcmp.gt.f32.partialorder %v18180_v5, 1.0  ;;  %vm10666_vm1 = vmpackc.low %vm8715_vm13, %vm8715_vm13  ;;  %vm8722_vm2 = vcmp.gt.f32.partialorder %v18183_v37, 1.0  ;;  %v19893_v41 = vld [vmem:[#allocation34_spill] sm:$0xff] }
 0x804   :  { %v8012_v23 = vadd.f32 %v8011_v35, %v8006_v19  ;;  %12643 = vmatprep.subr.bf16.mxu1 %v19882_v62  ;;  %vm10670_vm4 = vmpackc.low %vm8717_vm15, %vm8717_vm15  ;;  %v19891_v19 = vld [vmem:[#allocation32_spill] sm:$0xff]  ;;  %v19892_v35 = vld [vmem:[#allocation33_spill] sm:$0xff] }
 0x805   :  { %vm10672_vm5 = vmpackc.low %vm8720_vm0, %vm8720_vm0 }
 0x806   :  { %v18187_v18 = vsub.f32 %v8012_v23, %v10550_v6  ;;  %12622 = vmatpush3.bf16.msra.mxu0 %v19883_v32  ;;  %vm10676_vm6 = vmpackc.low %vm8722_vm2, %vm8722_vm2  ;;  %v19894_v23 = vld [vmem:[#allocation35_spill] sm:$0xff]  ;;  %v19895_v6 = vld [vmem:[#allocation36_spill] sm:$0xff] }
 0x807   :  { %12644 = vmatpush3.bf16.msra.mxu1 %v19884_v36  ;;  %12651 = vmatprep.subr.bf16.mxu0 %v19885_v28  ;;  %v19899_v28 = vld [vmem:[#allocation40_spill] sm:$0xff] }
 0x808   :  { %10577 = vst [vmem:[%s18713_s5 + $0x88] sm:$0xff] %v18187_v18  ;;  %12673 = vmatprep.subr.bf16.mxu1 %v19886_v61  ;;  %v19898_v61 = vld [vmem:[#allocation28_spill] sm:$0xff] }
 0x809   :  { %10667 = vmatmul.mubr.msk.bf16.vlgmr.msra.gmra.mrb[176].mxu0 %vm10666_vm1, %v19212_v14 }
 0x80a   :  { %10671 = vmatmul.mubr.msk.bf16.vlgmr.msra.gmra.mrb[176].mxu1 %vm10670_vm4, %v19212_v14  ;;  %12652 = vmatpush3.bf16.msra.mxu0 %v19887_v43  ;;  %v19897_v43 = vld [vmem:[#allocation38_spill] sm:$0xff] }
 0x80b   :  { %10673 = vmatprep.mubr.msk.bf16.mxu0 %vm10672_vm5, %v19212_v14  ;;  %12674 = vmatpush3.bf16.msra.mxu1 %v19888_v49  ;;  %v19896_v49 = vld [vmem:[#allocation37_spill] sm:$0xff] }
 0x80c   :  { %10677 = vmatprep.mubr.msk.bf16.mxu1 %vm10676_vm6, %v19212_v14  ;;  %12653 = vmatprep.subr.bf16.mxu0 %v19889_v55  ;;  %v19900_v55 = vld [vmem:[#allocation41_spill] sm:$0xff] }
 0x80d   :  { %12675 = vmatprep.subr.bf16.mxu1 %v19890_v59  ;;  %v19901_v59 = vld [vmem:[#allocation42_spill] sm:$0xff] }
 0x80e   :  { %12654 = vmatpush3.bf16.msra.mxu0 %v19891_v19  ;;  %v19902_v19 = vld [vmem:[#allocation43_spill] sm:$0xff] }
 0x80f   :  { %12676 = vmatpush3.bf16.msra.mxu1 %v19892_v35  ;;  %12655 = vmatprep.subr.bf16.mxu0 %v19893_v41  ;;  %v8695_v41 = vmul.f32 0.95, %v18070_v47  ;;  %v19903_v35 = vld [vmem:[#allocation44_spill] sm:$0xff]  ;;  %v10657_v47 = vsel %vm8716_vm14, 1.0, %v19232_v44 }
 0x810   :  { %12677 = vmatprep.subr.bf16.mxu1 %v19894_v23  ;;  %v8697_v23 = vmul.f32 0.95, %v18080_v22 }
 0x812   :  { %12656 = vmatpush3.bf16.msra.mxu0 %v19895_v6  ;;  %v19904_v6 = vld [vmem:[#allocation45_spill] sm:$0xff] }
 0x813   :  { %12678 = vmatpush3.bf16.msra.mxu1 %v19896_v49  ;;  %12657 = vmatprep.subr.bf16.mxu0 %v19897_v43  ;;  %v8916_v49 = vmul.f32 0.95, %v18091_v17  ;;  %v19905_v43 = vld [vmem:[#allocation58_spill] sm:$0xff] }
 0x814   :  { %12679 = vmatprep.subr.bf16.mxu1 %v19898_v61 }
 0x816   :  { %12658 = vmatpush3.bf16.msra.mxu0 %v19899_v28  ;;  %v8918_v28 = vmul.f32 0.95, %v18096_v12  ;;  %v19907_v12 = vld [vmem:[#allocation47_spill] sm:$0xff] }
 0x817   :  { %12680 = vmatpush3.bf16.msra.mxu1 %v19900_v55  ;;  %12659 = vmatprep.subr.bf16.mxu0 %v19901_v59  ;;  %v19906_v55 = vld [vmem:[#allocation57_spill] sm:$0xff] }
 0x818   :  { %12681 = vmatprep.subr.bf16.mxu1 %v19902_v19  ;;  %v8703_v19 = vadd.f32 %v14009_v57, %v8695_v41  ;;  %v10634_v41 = vsel %vm8495_vm8, 1.0, %v19232_v44 }
 0x81a   :  { %12660 = vmatpush3.bf16.msra.mxu0 %v19903_v35  ;;  %v8705_v35 = vadd.f32 %v14013_v46, %v8697_v23  ;;  %v8917_v23 = vmul.f32 0.95, %v18167_v21  ;;  %v8235_v21 = vmul.f32 0.95, %v18187_v18 }
 0x81b   :  { %12682 = vmatpush3.bf16.msra.mxu1 %v19904_v6  ;;  %12661 = vmatprep.subr.bf16.mxu0 %v19905_v43 }
 0x81c   :  { %v12359_v61 = vpop.f32.mrb[152].mxu0  ;;  %12683 = vmatprep.subr.bf16.mxu1 %v19906_v55  ;;  %v8924_v55 = vadd.f32 %v19261_v13, %v8916_v49 }
 0x81d   :  { %v12381_v59 = vpop.f32.mrb[152].mxu1  ;;  %v12360_v36 = vpop.f32.mrb[153].mxu0 }
 0x81e   :  { %v12361_v32 = vadd.f32 %v12360_v36, %v12359_v61  ;;  %v12382_v62 = vpop.f32.mrb[153].mxu1  ;;  %v12362_v30 = vpop.f32.mrb[154].mxu0  ;;  %12662 = vmatpush3.bf16.msra.mxu0 %v18048_v54  ;;  %v18249_v36 = vld [vmem:[#allocation7] ss:$0 sm:$0xff]  ;;  %v18272_v22 = vsub.f32 %v8924_v55, %v10657_v47  ;;  %v19909_v55 = vld [vmem:[#allocation48_spill] sm:$0xff] }
 0x81f   :  { %v12383_v33 = vadd.f32 %v12382_v62, %v12381_v59  ;;  %v12384_v6 = vpop.f32.mrb[154].mxu1  ;;  %12684 = vmatpush3.bf16.msra.mxu1 %v18052_v26  ;;  %v12363_v43 = vpop.f32.mrb[155].mxu0  ;;  %12663 = vmatprep.subr.bf16.mxu0 %v18055_v56  ;;  %v8926_v62 = vadd.f32 %v19263_v0, %v8918_v28  ;;  %v18257_v59 = vsub.f32 %v8703_v19, %v10634_v41  ;;  %v10659_v28 = vsel %vm8718_vm3, 1.0, %v19232_v44  ;;  %v19910_v19 = vld [vmem:[#allocation14_spill] sm:$0xff]  ;;  %v19914_v47 = vld [vmem:[#allocation39_spill] sm:$0xff] }
 0x820   :  { %v8110_v30 = vadd.f32 %v18249_v36, %v12361_v32  ;;  %v12385_v61 = vpop.f32.mrb[155].mxu1  ;;  %12685 = vmatprep.subr.bf16.mxu1 %v18063_v45  ;;  %v10636_v43 = vsel %vm8497_vm11, 1.0, %v19232_v44  ;;  %vm8940_vm14 = vcmp.gt.f32.partialorder %v18272_v22, 1.0  ;;  %v19911_v6 = vld [vmem:[#allocation16_spill] sm:$0xff]  ;;  %v8920_v41 = vmul.f32 0.95, %v18180_v5 }
 0x821   :  { %v18265_v32 = vsub.f32 %v8705_v35, %v10636_v43  ;;  %v18275_v17 = vsub.f32 %v8926_v62, %v10659_v28  ;;  %vm8719_vm8 = vcmp.gt.f32.partialorder %v18257_v59, 1.0  ;;  %vm10690_vm10 = vmpackc.low %vm8940_vm14, %vm8940_vm14  ;;  %v8915_v35 = vmul.f32 0.95, %v18165_v40  ;;  %v19913_v61 = vld [vmem:[#allocation18_spill] sm:$0xff]  ;;  %v19917_v5 = vld [vmem:[#allocation21_spill] sm:$0xff] }
 0x822   :  { %v18262_v49 = vadd.f32 %v12383_v33, %v8110_v30  ;;  %12664 = vmatpush3.bf16.msra.mxu0 %v18077_v27  ;;  %vm10674_vm3 = vmpackc.low %vm8719_vm8, %vm8719_vm8  ;;  %v19908_v33 = vld [vmem:[#allocation12_spill] sm:$0xff]  ;;  %v19912_v30 = vld [vmem:[#allocation17_spill] sm:$0xff]  ;;  %v8922_v62 = vmul.f32 0.95, %v18183_v37  ;;  %v10661_v40 = vsel %vm8720_vm0, 1.0, %v19232_v44 }
 0x823   :  { %12686 = vmatpush3.bf16.msra.mxu1 %v18085_v25  ;;  %12665 = vmatprep.subr.bf16.mxu0 %v18088_v10  ;;  %vm8721_vm11 = vcmp.gt.f32.partialorder %v18265_v32, 1.0  ;;  %vm8942_vm7 = vcmp.gt.f32.partialorder %v18275_v17, 1.0  ;;  %v19919_v37 = vld [vmem:[#allocation23_spill] sm:$0xff] }
 0x824   :  { %12687 = vmatprep.subr.bf16.mxu1 %v18093_v8  ;;  %vm10678_vm9 = vmpackc.low %vm8721_vm11, %vm8721_vm11 }
 0x825   :  { %vm10694_vm12 = vmpackc.low %vm8942_vm7, %vm8942_vm7 }
 0x826   :  { %12666 = vmatpush3.bf16.msra.mxu0 %v18099_v38 }
 0x827   :  { %12688 = vmatpush3.bf16.msra.mxu1 %v18103_v2  ;;  %12695 = vmatprep.subr.bf16.mxu0 %v17805_v1 }
 0x828   :  { %12717 = vmatprep.subr.bf16.mxu1 %v17812_v9 }
 0x829   :  { %10675 = vmatmul.mubr.msk.bf16.vlgmr.msra.gmra.mrb[180].mxu0 %vm10674_vm3, %v19212_v14 }
 0x82a   :  { %10679 = vmatmul.mubr.msk.bf16.vlgmr.msra.gmra.mrb[180].mxu1 %vm10678_vm9, %v19212_v14  ;;  %12696 = vmatpush3.bf16.msra.mxu0 %v17821_v52 }
 0x82b   :  { %10691 = vmatprep.mubr.msk.bf16.mxu0 %vm10690_vm10, %v19212_v14  ;;  %12718 = vmatpush3.bf16.msra.mxu1 %v17828_v63 }
 0x82c   :  { %10695 = vmatprep.mubr.msk.bf16.mxu1 %vm10694_vm12, %v19212_v14  ;;  %12697 = vmatprep.subr.bf16.mxu0 %v17835_v20 }
 0x82d   :  { %12719 = vmatprep.subr.bf16.mxu1 %v17838_v53 }
 0x82e   :  { %12698 = vmatpush3.bf16.msra.mxu0 %v17841_v58 }
 0x82f   :  { %12720 = vmatpush3.bf16.msra.mxu1 %v17844_v16  ;;  %12699 = vmatprep.subr.bf16.mxu0 %v17847_v4 }
 0x830   :  { %12721 = vmatprep.subr.bf16.mxu1 %v17850_v42 }
 0x832   :  { %12700 = vmatpush3.bf16.msra.mxu0 %v17853_v11 }
 0x833   :  { %12722 = vmatpush3.bf16.msra.mxu1 %v17856_v24  ;;  %12701 = vmatprep.subr.bf16.mxu0 %v17859_v39 }
 0x834   :  { %12723 = vmatprep.subr.bf16.mxu1 %v17862_v34 }
 0x836   :  { %12702 = vmatpush3.bf16.msra.mxu0 %v19907_v12 }
 0x837   :  { %12724 = vmatpush3.bf16.msra.mxu1 %v19908_v33  ;;  %12703 = vmatprep.subr.bf16.mxu0 %v19909_v55  ;;  %v8925_v33 = vadd.f32 %v13871_v51, %v8917_v23 }
 0x838   :  { %12725 = vmatprep.subr.bf16.mxu1 %v19910_v19  ;;  %v8923_v19 = vadd.f32 %v13868_v50, %v8915_v35  ;;  %v10656_v35 = vsel %vm8715_vm13, 1.0, %v19232_v44  ;;  %vm8014_vm13 = vcmp.gt.f32.partialorder %v18187_v18, 1.0 }
 0x83a   :  { %12704 = vmatpush3.bf16.msra.mxu0 %v19911_v6 }
 0x83b   :  { %12726 = vmatpush3.bf16.msra.mxu1 %v19912_v30  ;;  %12705 = vmatprep.subr.bf16.mxu0 %v19913_v61 }
 0x83c   :  { %v12403_v43 = vpop.f32.mrb[156].mxu0  ;;  %12727 = vmatprep.subr.bf16.mxu1 %v19914_v47  ;;  %v8928_v47 = vadd.f32 %v19242_v15, %v8920_v41 }
 0x83d   :  { %v12425_v28 = vpop.f32.mrb[156].mxu1  ;;  %v12404_v55 = vpop.f32.mrb[157].mxu0 }
 0x83e   :  { %v12405_v12 = vadd.f32 %v12404_v55, %v12403_v43  ;;  %v12426_v34 = vpop.f32.mrb[157].mxu1  ;;  %v12406_v6 = vpop.f32.mrb[158].mxu0  ;;  %12706 = vmatpush3.bf16.msra.mxu0 %v17895_v3  ;;  %v10658_v55 = vsel %vm8717_vm15, 1.0, %v19232_v44 }
 0x83f   :  { %v12427_v39 = vadd.f32 %v12426_v34, %v12425_v28  ;;  %v12428_v30 = vpop.f32.mrb[158].mxu1  ;;  %12728 = vmatpush3.bf16.msra.mxu1 %v17898_v48  ;;  %v12407_v61 = vpop.f32.mrb[159].mxu0  ;;  %12707 = vmatprep.subr.bf16.mxu0 %v17901_v7  ;;  %v8930_v34 = vadd.f32 %v19244_v31, %v8922_v62  ;;  %v19918_v28 = vld [vmem:[#allocation22_spill] sm:$0xff] }
 0x840   :  { %v8190_v23 = vadd.f32 %v12405_v12, %v18262_v49  ;;  %v12429_v6 = vpop.f32.mrb[159].mxu1  ;;  %12729 = vmatprep.subr.bf16.mxu1 %v17912_v60  ;;  %v18340_v30 = vsub.f32 %v8923_v19, %v10656_v35  ;;  %v18342_v61 = vsub.f32 %v8925_v33, %v10658_v55  ;;  %v10663_v49 = vsel %vm8722_vm2, 1.0, %v19232_v44  ;;  %v19915_v12 = vld [vmem:[#allocation19_spill] sm:$0xff]  ;;  %v19916_v19 = vld [vmem:[#allocation20_spill] sm:$0xff]  ;;  %v19922_v55 = vld [vmem:[#allocation26_spill] sm:$0xff] }
 0x841   :  { %v18355_v33 = vsub.f32 %v8928_v47, %v10661_v40  ;;  %v18358_v43 = vsub.f32 %v8930_v34, %v10663_v49  ;;  %v19920_v35 = vld [vmem:[#allocation24_spill] sm:$0xff]  ;;  %v19921_v47 = vld [vmem:[#allocation25_spill] sm:$0xff]  ;;  %v19924_v6 = vld [vmem:[#allocation46_spill] sm:$0xff] }
 0x842   :  { %v8230_v41 = vadd.f32 %v12427_v39, %v8190_v23  ;;  %12708 = vmatpush3.bf16.msra.mxu0 %v19879_v29  ;;  %v10576_v39 = vsel %vm8014_vm13, 1.0, %v19232_v44  ;;  %vm8939_vm15 = vcmp.gt.f32.partialorder %v18340_v30, 1.0  ;;  %vm8941_vm0 = vcmp.gt.f32.partialorder %v18342_v61, 1.0  ;;  %v19923_v23 = vld [vmem:[#allocation29_spill] sm:$0xff]  ;;  %v19925_v34 = vld [vmem:[#allocation31_spill] sm:$0xff]  ;;  %v19926_v40 = vld [vmem:[#allocation32_spill] sm:$0xff] }
 0x843   :  { %12730 = vmatpush3.bf16.msra.mxu1 %v19915_v12  ;;  %12709 = vmatprep.subr.bf16.mxu0 %v19916_v19  ;;  %vm8944_vm1 = vcmp.gt.f32.partialorder %v18355_v33, 1.0  ;;  %vm10692_vm2 = vmpackc.low %vm8939_vm15, %vm8939_vm15  ;;  %vm8946_vm4 = vcmp.gt.f32.partialorder %v18358_v43, 1.0  ;;  %v19929_v49 = vld [vmem:[#allocation35_spill] sm:$0xff] }
 0x844   :  { %v8236_v62 = vadd.f32 %v8235_v21, %v8230_v41  ;;  %12731 = vmatprep.subr.bf16.mxu1 %v19917_v5  ;;  %vm10696_vm5 = vmpackc.low %vm8941_vm0, %vm8941_vm0  ;;  %v19927_v41 = vld [vmem:[#allocation33_spill] sm:$0xff]  ;;  %v19928_v21 = vld [vmem:[#allocation34_spill] sm:$0xff] }
 0x845   :  { %vm10698_vm6 = vmpackc.low %vm8944_vm1, %vm8944_vm1 }
 0x846   :  { %v18362_v18 = vsub.f32 %v8236_v62, %v10576_v39  ;;  %12710 = vmatpush3.bf16.msra.mxu0 %v19918_v28  ;;  %vm10702_vm3 = vmpackc.low %vm8946_vm4, %vm8946_vm4  ;;  %v19930_v62 = vld [vmem:[#allocation36_spill] sm:$0xff]  ;;  %v19931_v39 = vld [vmem:[#allocation37_spill] sm:$0xff] }
 0x847   :  { %12732 = vmatpush3.bf16.msra.mxu1 %v19919_v37  ;;  %12739 = vmatprep.subr.bf16.mxu0 %v19920_v35 }
 0x848   :  { %10603 = vst [vmem:[%s18713_s5 + $0x90] sm:$0xff] %v18362_v18  ;;  %12761 = vmatprep.subr.bf16.mxu1 %v19921_v47  ;;  %v19934_v47 = vld [vmem:[#allocation40_spill] sm:$0xff] }
 0x849   :  { %10693 = vmatmul.mubr.msk.bf16.vlgmr.msra.gmra.mrb[184].mxu0 %vm10692_vm2, %v19212_v14 }
 0x84a   :  { %10697 = vmatmul.mubr.msk.bf16.vlgmr.msra.gmra.mrb[184].mxu1 %vm10696_vm5, %v19212_v14  ;;  %12740 = vmatpush3.bf16.msra.mxu0 %v19922_v55  ;;  %v19933_v55 = vld [vmem:[#allocation28_spill] sm:$0xff] }
 0x84b   :  { %10699 = vmatprep.mubr.msk.bf16.mxu0 %vm10698_vm6, %v19212_v14  ;;  %12762 = vmatpush3.bf16.msra.mxu1 %v19923_v23  ;;  %v19932_v23 = vld [vmem:[#allocation38_spill] sm:$0xff] }
 0x84c   :  { %10703 = vmatprep.mubr.msk.bf16.mxu1 %vm10702_vm3, %v19212_v14  ;;  %12741 = vmatprep.subr.bf16.mxu0 %v19924_v6  ;;  %v19935_v6 = vld [vmem:[#allocation41_spill] sm:$0xff] }
 0x84d   :  { %12763 = vmatprep.subr.bf16.mxu1 %v19925_v34  ;;  %v19936_v34 = vld [vmem:[#allocation42_spill] sm:$0xff] }
 0x84e   :  { %12742 = vmatpush3.bf16.msra.mxu0 %v19926_v40  ;;  %v19937_v40 = vld [vmem:[#allocation43_spill] sm:$0xff] }
 0x84f   :  { %12764 = vmatpush3.bf16.msra.mxu1 %v19927_v41  ;;  %12743 = vmatprep.subr.bf16.mxu0 %v19928_v21  ;;  %v8919_v21 = vmul.f32 0.95, %v18257_v59  ;;  %v19938_v41 = vld [vmem:[#allocation44_spill] sm:$0xff] }
 0x850   :  { %12765 = vmatprep.subr.bf16.mxu1 %v19929_v49  ;;  %v8921_v49 = vmul.f32 0.95, %v18265_v32 }
 0x852   :  { %12744 = vmatpush3.bf16.msra.mxu0 %v19930_v62  ;;  %v19939_v62 = vld [vmem:[#allocation45_spill] sm:$0xff] }
 0x853   :  { %12766 = vmatpush3.bf16.msra.mxu1 %v19931_v39  ;;  %12745 = vmatprep.subr.bf16.mxu0 %v19932_v23  ;;  %v9140_v39 = vmul.f32 0.95, %v18272_v22  ;;  %v19940_v23 = vld [vmem:[#allocation58_spill] sm:$0xff] }
 0x854   :  { %12767 = vmatprep.subr.bf16.mxu1 %v19933_v55 }
 0x856   :  { %12746 = vmatpush3.bf16.msra.mxu0 %v19934_v47  ;;  %v9142_v47 = vmul.f32 0.95, %v18275_v17  ;;  %v9146_v17 = vmul.f32 0.95, %v18358_v43  ;;  %v19956_v43 = vld [vmem:[#allocation24_spill] sm:$0xff] }
 0x857   :  { %12768 = vmatpush3.bf16.msra.mxu1 %v19935_v6  ;;  %12747 = vmatprep.subr.bf16.mxu0 %v19936_v34  ;;  %v19941_v6 = vld [vmem:[#allocation57_spill] sm:$0xff] }
 0x858   :  { %12769 = vmatprep.subr.bf16.mxu1 %v19937_v40  ;;  %v8927_v40 = vadd.f32 %v14009_v57, %v8919_v21  ;;  %v10660_v21 = vsel %vm8719_vm8, 1.0, %v19232_v44 }
 0x85a   :  { %12748 = vmatpush3.bf16.msra.mxu0 %v19938_v41  ;;  %v8929_v41 = vadd.f32 %v14013_v46, %v8921_v49 }
 0x85b   :  { %12770 = vmatpush3.bf16.msra.mxu1 %v19939_v62  ;;  %12749 = vmatprep.subr.bf16.mxu0 %v19940_v23 }
 0x85c   :  { %v12447_v55 = vpop.f32.mrb[160].mxu0  ;;  %12771 = vmatprep.subr.bf16.mxu1 %v19941_v6  ;;  %v9148_v6 = vadd.f32 %v19261_v13, %v9140_v39 }
 0x85d   :  { %v12469_v34 = vpop.f32.mrb[160].mxu1  ;;  %v12448_v35 = vpop.f32.mrb[161].mxu0 }
 0x85e   :  { %v12449_v37 = vadd.f32 %v12448_v35, %v12447_v55  ;;  %v12470_v28 = vpop.f32.mrb[161].mxu1  ;;  %v12450_v5 = vpop.f32.mrb[162].mxu0  ;;  %12750 = vmatpush3.bf16.msra.mxu0 %v18048_v54  ;;  %v9150_v55 = vadd.f32 %v19263_v0, %v9142_v47  ;;  %v19951_v47 = vld [vmem:[#allocation39_spill] sm:$0xff] }
 0x85f   :  { %v12471_v19 = vadd.f32 %v12470_v28, %v12469_v34  ;;  %v12472_v62 = vpop.f32.mrb[162].mxu1  ;;  %12772 = vmatpush3.bf16.msra.mxu1 %v18052_v26  ;;  %v12451_v23 = vpop.f32.mrb[163].mxu0  ;;  %12751 = vmatprep.subr.bf16.mxu0 %v18055_v56  ;;  %v10662_v28 = vsel %vm8721_vm11, 1.0, %v19232_v44  ;;  %v10683_v34 = vsel %vm8940_vm14, 1.0, %v19232_v44 }
 0x860   :  { %v8334_v35 = vadd.f32 %v18249_v36, %v12449_v37  ;;  %v12473_v5 = vpop.f32.mrb[163].mxu1  ;;  %12773 = vmatprep.subr.bf16.mxu1 %v18063_v45  ;;  %v18430_v23 = vsub.f32 %v8927_v40, %v10660_v21  ;;  %v18438_v59 = vsub.f32 %v8929_v41, %v10662_v28  ;;  %v10685_v37 = vsel %vm8942_vm7, 1.0, %v19232_v44 }
 0x861   :  { %v18445_v32 = vsub.f32 %v9148_v6, %v10683_v34  ;;  %v18448_v22 = vsub.f32 %v9150_v55, %v10685_v37  ;;  %v10682_v37 = vsel %vm8939_vm15, 1.0, %v19232_v44  ;;  %vm8238_vm15 = vcmp.gt.f32.partialorder %v18362_v18, 1.0 }
 0x862   :  { %v18435_v49 = vadd.f32 %v12471_v19, %v8334_v35  ;;  %12752 = vmatpush3.bf16.msra.mxu0 %v18077_v27  ;;  %vm8943_vm8 = vcmp.gt.f32.partialorder %v18430_v23, 1.0  ;;  %vm8945_vm11 = vcmp.gt.f32.partialorder %v18438_v59, 1.0 }
 0x863   :  { %12774 = vmatpush3.bf16.msra.mxu1 %v18085_v25  ;;  %12753 = vmatprep.subr.bf16.mxu0 %v18088_v10  ;;  %vm9164_vm14 = vcmp.gt.f32.partialorder %v18445_v32, 1.0  ;;  %vm10700_vm7 = vmpackc.low %vm8943_vm8, %vm8943_vm8  ;;  %vm9166_vm9 = vcmp.gt.f32.partialorder %v18448_v22, 1.0 }
 0x864   :  { %12775 = vmatprep.subr.bf16.mxu1 %v18093_v8  ;;  %vm10704_vm10 = vmpackc.low %vm8945_vm11, %vm8945_vm11 }
 0x865   :  { %vm10716_vm12 = vmpackc.low %vm9164_vm14, %vm9164_vm14 }
 0x866   :  { %12754 = vmatpush3.bf16.msra.mxu0 %v18099_v38  ;;  %vm10720_vm13 = vmpackc.low %vm9166_vm9, %vm9166_vm9 }
 0x867   :  { %12776 = vmatpush3.bf16.msra.mxu1 %v18103_v2  ;;  %12783 = vmatprep.subr.bf16.mxu0 %v17805_v1  ;;  %v19942_v1 = vld [vmem:[#allocation55_spill] sm:$0xff] }
 0x868   :  { %12805 = vmatprep.subr.bf16.mxu1 %v17812_v9  ;;  %v19943_v9 = vld [vmem:[#allocation56_spill] sm:$0xff] }
 0x869   :  { %10701 = vmatmul.mubr.msk.bf16.vlgmr.msra.gmra.mrb[188].mxu0 %vm10700_vm7, %v19212_v14 }
 0x86a   :  { %10705 = vmatmul.mubr.msk.bf16.vlgmr.msra.gmra.mrb[188].mxu1 %vm10704_vm10, %v19212_v14  ;;  %12784 = vmatpush3.bf16.msra.mxu0 %v17821_v52  ;;  %v19944_v52 = vld [vmem:[#allocation47_spill] sm:$0xff] }
 0x86b   :  { %10717 = vmatprep.mubr.msk.bf16.mxu0 %vm10716_vm12, %v19212_v14  ;;  %12806 = vmatpush3.bf16.msra.mxu1 %v17828_v63  ;;  %v19945_v63 = vld [vmem:[#allocation12_spill] sm:$0xff] }
 0x86c   :  { %10721 = vmatprep.mubr.msk.bf16.mxu1 %vm10720_vm13, %v19212_v14  ;;  %12785 = vmatprep.subr.bf16.mxu0 %v17835_v20  ;;  %v19946_v20 = vld [vmem:[#allocation48_spill] sm:$0xff] }
 0x86d   :  { %12807 = vmatprep.subr.bf16.mxu1 %v17838_v53  ;;  %v19947_v53 = vld [vmem:[#allocation14_spill] sm:$0xff] }
 0x86e   :  { %12786 = vmatpush3.bf16.msra.mxu0 %v17841_v58  ;;  %v9139_v58 = vmul.f32 0.95, %v18340_v30  ;;  %v10687_v30 = vsel %vm8944_vm1, 1.0, %v19232_v44 }
 0x86f   :  { %12808 = vmatpush3.bf16.msra.mxu1 %v17844_v16  ;;  %12787 = vmatprep.subr.bf16.mxu0 %v17847_v4  ;;  %v9141_v16 = vmul.f32 0.95, %v18342_v61  ;;  %v19948_v4 = vld [vmem:[#allocation16_spill] sm:$0xff]  ;;  %v8459_v61 = vmul.f32 0.95, %v18362_v18  ;;  %v19954_v18 = vld [vmem:[#allocation22_spill] sm:$0xff] }
 0x870   :  { %12809 = vmatprep.subr.bf16.mxu1 %v17850_v42  ;;  %v9144_v42 = vmul.f32 0.95, %v18355_v33  ;;  %v9147_v41 = vadd.f32 %v13868_v50, %v9139_v58  ;;  %v19953_v33 = vld [vmem:[#allocation21_spill] sm:$0xff] }
 0x871   :  { %v9149_v62 = vadd.f32 %v13871_v51, %v9141_v16  ;;  %v10602_v16 = vsel %vm8238_vm15, 1.0, %v19232_v44 }
 0x872   :  { %12788 = vmatpush3.bf16.msra.mxu0 %v17853_v11  ;;  %v19949_v11 = vld [vmem:[#allocation17_spill] sm:$0xff]  ;;  %v9152_v34 = vadd.f32 %v19242_v15, %v9144_v42  ;;  %v19958_v42 = vld [vmem:[#allocation26_spill] sm:$0xff] }
 0x873   :  { %12810 = vmatpush3.bf16.msra.mxu1 %v17856_v24  ;;  %12789 = vmatprep.subr.bf16.mxu0 %v19942_v1  ;;  %v19950_v24 = vld [vmem:[#allocation18_spill] sm:$0xff]  ;;  %v10684_v1 = vsel %vm8941_vm0, 1.0, %v19232_v44 }
 0x874   :  { %12811 = vmatprep.subr.bf16.mxu1 %v19943_v9 }
 0x876   :  { %12790 = vmatpush3.bf16.msra.mxu0 %v19944_v52  ;;  %v18513_v52 = vsub.f32 %v9147_v41, %v10682_v37  ;;  %v19966_v41 = vld [vmem:[#allocation36_spill] sm:$0xff]  ;;  %v9145_v37 = vmul.f32 0.95, %v18438_v59 }
 0x877   :  { %12812 = vmatpush3.bf16.msra.mxu1 %v19945_v63  ;;  %12791 = vmatprep.subr.bf16.mxu0 %v19946_v20  ;;  %v18528_v20 = vsub.f32 %v9152_v34, %v10687_v30  ;;  %v9143_v34 = vmul.f32 0.95, %v18430_v23  ;;  %v10709_v23 = vsel %vm9164_vm14, 1.0, %v19232_v44 }
 0x878   :  { %12813 = vmatprep.subr.bf16.mxu1 %v19947_v53  ;;  %vm9163_vm0 = vcmp.gt.f32.partialorder %v18513_v52, 1.0 }
 0x879   :  { %vm9168_vm2 = vcmp.gt.f32.partialorder %v18528_v20, 1.0 }
 0x87a   :  { %12792 = vmatpush3.bf16.msra.mxu0 %v19948_v4  ;;  %v19957_v4 = vld [vmem:[#allocation25_spill] sm:$0xff]  ;;  %vm10724_vm3 = vmpackc.low %vm9168_vm2, %vm9168_vm2 }
 0x87b   :  { %12814 = vmatpush3.bf16.msra.mxu1 %v19949_v11  ;;  %12793 = vmatprep.subr.bf16.mxu0 %v19950_v24  ;;  %v19959_v11 = vld [vmem:[#allocation29_spill] sm:$0xff]  ;;  %v19960_v24 = vld [vmem:[#allocation46_spill] sm:$0xff] }
 0x87c   :  { %v12491_v19 = vpop.f32.mrb[164].mxu0  ;;  %12815 = vmatprep.subr.bf16.mxu1 %v19951_v47  ;;  %v19963_v47 = vld [vmem:[#allocation33_spill] sm:$0xff] }
 0x87d   :  { %v12513_v6 = vpop.f32.mrb[164].mxu1  ;;  %v12492_v40 = vpop.f32.mrb[165].mxu0 }
 0x87e   :  { %v12493_v39 = vadd.f32 %v12492_v40, %v12491_v19  ;;  %v12514_v21 = vpop.f32.mrb[165].mxu1  ;;  %v12494_v35 = vpop.f32.mrb[166].mxu0  ;;  %12794 = vmatpush3.bf16.msra.mxu0 %v17895_v3  ;;  %v19962_v19 = vld [vmem:[#allocation32_spill] sm:$0xff]  ;;  %v19965_v40 = vld [vmem:[#allocation35_spill] sm:$0xff] }
 0x87f   :  { %v12515_v5 = vadd.f32 %v12514_v21, %v12513_v6  ;;  %v12516_v55 = vpop.f32.mrb[166].mxu1  ;;  %12816 = vmatpush3.bf16.msra.mxu1 %v17898_v48  ;;  %v12495_v28 = vpop.f32.mrb[167].mxu0  ;;  %12795 = vmatprep.subr.bf16.mxu0 %v17901_v7  ;;  %v9154_v48 = vadd.f32 %v19244_v31, %v9146_v17  ;;  %v18515_v7 = vsub.f32 %v9149_v62, %v10684_v1  ;;  %v19961_v17 = vld [vmem:[#allocation31_spill] sm:$0xff]  ;;  %v19964_v6 = vld [vmem:[#allocation34_spill] sm:$0xff]  ;;  %v19967_v62 = vld [vmem:[#allocation37_spill] sm:$0xff] }
 0x880   :  { %v8414_v9 = vadd.f32 %v12493_v39, %v18435_v49  ;;  %v12517_v3 = vpop.f32.mrb[167].mxu1  ;;  %12817 = vmatprep.subr.bf16.mxu1 %v17912_v60  ;;  %v10689_v60 = vsel %vm8946_vm4, 1.0, %v19232_v44  ;;  %v19952_v49 = vld [vmem:[#allocation20_spill] sm:$0xff]  ;;  %vm10718_vm4 = vmpackc.low %vm9163_vm0, %vm9163_vm0  ;;  %v19968_v39 = vld [vmem:[#allocation38_spill] sm:$0xff] }
 0x881   :  { %v18531_v58 = vsub.f32 %v9154_v48, %v10689_v60  ;;  %vm9165_vm1 = vcmp.gt.f32.partialorder %v18515_v7, 1.0  ;;  %v19969_v21 = vld [vmem:[#allocation28_spill] sm:$0xff]  ;;  %v19972_v55 = vld [vmem:[#allocation42_spill] sm:$0xff]  ;;  %v19973_v28 = vld [vmem:[#allocation43_spill] sm:$0xff]  ;;  %v9364_v48 = vmul.f32 0.95, %v18445_v32 }
 0x882   :  { %v8454_v63 = vadd.f32 %v12515_v5, %v8414_v9  ;;  %12796 = vmatpush3.bf16.msra.mxu0 %v19879_v29  ;;  %vm10722_vm6 = vmpackc.low %vm9165_vm1, %vm9165_vm1  ;;  %v19970_v35 = vld [vmem:[#allocation40_spill] sm:$0xff]  ;;  %v19971_v5 = vld [vmem:[#allocation41_spill] sm:$0xff] }
 0x883   :  { %12818 = vmatpush3.bf16.msra.mxu1 %v19915_v12  ;;  %12797 = vmatprep.subr.bf16.mxu0 %v19952_v49  ;;  %v19955_v12 = vld [vmem:[#allocation23_spill] sm:$0xff]  ;;  %vm9170_vm5 = vcmp.gt.f32.partialorder %v18531_v58, 1.0  ;;  %v19974_v1 = vld [vmem:[#allocation44_spill] sm:$0xff]  ;;  %v19975_v9 = vld [vmem:[#allocation45_spill] sm:$0xff] }
 0x884   :  { %v8460_v53 = vadd.f32 %v8459_v61, %v8454_v63  ;;  %12819 = vmatprep.subr.bf16.mxu1 %v19953_v33  ;;  %vm10728_vm7 = vmpackc.low %vm9170_vm5, %vm9170_vm5  ;;  %v19976_v3 = vld [vmem:[#allocation58_spill] sm:$0xff]  ;;  %v19977_v63 = vld [vmem:[#allocation57_spill] sm:$0xff]  ;;  %v9366_v61 = vmul.f32 0.95, %v18448_v22 }
 0x885   :  { %v13429_v32 = vld [vmem:[#allocation6 + $0x8] sm:$0xff]  }
 0x886   :  { %v18535_v29 = vsub.f32 %v8460_v53, %v10602_v16  ;;  %12798 = vmatpush3.bf16.msra.mxu0 %v19954_v18  ;;  %v9151_v53 = vadd.f32 %v14009_v57, %v9143_v34  ;;  %v13430_v22 = vld [vmem:[#allocation6 + $0x88] sm:$0xff]   ;;  %v9363_v34 = vmul.f32 0.95, %v18513_v52  ;;  %v10713_v52 = vsel %vm9168_vm2, 1.0, %v19232_v44 }
 0x887   :  { %12820 = vmatpush3.bf16.msra.mxu1 %v19955_v12  ;;  %12827 = vmatprep.subr.bf16.mxu0 %v19956_v43  ;;  %v9153_v12 = vadd.f32 %v14013_v46, %v9145_v37  ;;  %v9365_v37 = vmul.f32 0.95, %v18515_v7 }
 0x888   :  { %10629 = vst [vmem:[%s18713_s5 + $0x98] sm:$0xff] %v18535_v29  ;;  %12849 = vmatprep.subr.bf16.mxu1 %v19957_v4 }
 0x889   :  { %10719 = vmatmul.mubr.msk.bf16.vlgmr.msra.gmra.mrb[192].mxu0 %vm10718_vm4, %v19212_v14  ;;  %vm8462_vm4 = vcmp.gt.f32.partialorder %v18535_v29, 1.0 }
 0x88a   :  { %10723 = vmatmul.mubr.msk.bf16.vlgmr.msra.gmra.mrb[192].mxu1 %vm10722_vm6, %v19212_v14  ;;  %12828 = vmatpush3.bf16.msra.mxu0 %v19958_v42 }
 0x88b   :  { %10725 = vmatprep.mubr.msk.bf16.mxu0 %vm10724_vm3, %v19212_v14  ;;  %12850 = vmatpush3.bf16.msra.mxu1 %v19959_v11  ;;  %v9372_v11 = vadd.f32 %v19261_v13, %v9364_v48  ;;  %v9368_v48 = vmul.f32 0.95, %v18528_v20 }
 0x88c   :  { %10729 = vmatprep.mubr.msk.bf16.mxu1 %vm10728_vm7, %v19212_v14  ;;  %12829 = vmatprep.subr.bf16.mxu0 %v19960_v24  ;;  %v10686_v24 = vsel %vm8943_vm8, 1.0, %v19232_v44 }
 0x88d   :  { %12851 = vmatprep.subr.bf16.mxu1 %v19961_v17 }
 0x88e   :  { %12830 = vmatpush3.bf16.msra.mxu0 %v19962_v19 }
 0x88f   :  { %12852 = vmatpush3.bf16.msra.mxu1 %v19963_v47  ;;  %12831 = vmatprep.subr.bf16.mxu0 %v19964_v6  ;;  %v18603_v47 = vsub.f32 %v9151_v53, %v10686_v24  ;;  %v13431_v6 = vld [vmem:[#allocation6 + $0x50] sm:$0xff]   ;;  %v9371_v53 = vadd.f32 %v13868_v50, %v9363_v34 }
 0x890   :  { %12853 = vmatprep.subr.bf16.mxu1 %v19965_v40  ;;  %v13432_v40 = vld [vmem:[#allocation6 + $0xd0] sm:$0xff]  }
 0x891   :  { %vm9167_vm8 = vcmp.gt.f32.partialorder %v18603_v47, 1.0  ;;  %v13448_v50 = vld [vmem:[#allocation6 + $0xf0] sm:$0xff]  }
 0x892   :  { %12832 = vmatpush3.bf16.msra.mxu0 %v19966_v41  ;;  %vm10726_vm10 = vmpackc.low %vm9167_vm8, %vm9167_vm8  ;;  %v13433_v41 = vld [vmem:[#allocation6 + $0x10] sm:$0xff]  }
 0x893   :  { %12854 = vmatpush3.bf16.msra.mxu1 %v19967_v62  ;;  %12833 = vmatprep.subr.bf16.mxu0 %v19968_v39  ;;  %v13434_v62 = vld [vmem:[#allocation6 + $0x90] sm:$0xff]   ;;  %v13435_v39 = vld [vmem:[#allocation6 + $0x58] sm:$0xff]  }
 0x894   :  { %12855 = vmatprep.subr.bf16.mxu1 %v19969_v21  ;;  %v13436_v21 = vld [vmem:[#allocation6 + $0xd8] sm:$0xff]   ;;  %v13465_v34 = vld [vmem:[#allocation6 + $0x110] sm:$0xff]  }
 0x896   :  { %12834 = vmatpush3.bf16.msra.mxu0 %v19970_v35  ;;  %v13437_v35 = vld [vmem:[#allocation6 + $0x18] sm:$0xff]  }
 0x897   :  { %12856 = vmatpush3.bf16.msra.mxu1 %v19971_v5  ;;  %12835 = vmatprep.subr.bf16.mxu0 %v19972_v55  ;;  %v13438_v5 = vld [vmem:[#allocation6 + $0x98] sm:$0xff]   ;;  %v13439_v55 = vld [vmem:[#allocation6 + $0x60] sm:$0xff]  }
 0x898   :  { %12857 = vmatprep.subr.bf16.mxu1 %v19973_v28  ;;  %v13440_v28 = vld [vmem:[#allocation6 + $0xe0] sm:$0xff]  }
 0x89a   :  { %12836 = vmatpush3.bf16.msra.mxu0 %v19974_v1  ;;  %v13441_v1 = vld [vmem:[#allocation6 + $0x20] sm:$0xff]  }
 0x89b   :  { %12858 = vmatpush3.bf16.msra.mxu1 %v19975_v9  ;;  %12837 = vmatprep.subr.bf16.mxu0 %v19976_v3  ;;  %v13442_v9 = vld [vmem:[#allocation6 + $0xa0] sm:$0xff]   ;;  %v13443_v3 = vld [vmem:[#allocation6 + $0x68] sm:$0xff]  }
 0x89c   :  { %v12535_v30 = vpop.f32.mrb[168].mxu0  ;;  %12859 = vmatprep.subr.bf16.mxu1 %v19977_v63  ;;  %v13444_v63 = vld [vmem:[#allocation6 + $0xe8] sm:$0xff]  }
 0x89d   :  { %v12557_v60 = vpop.f32.mrb[168].mxu1  ;;  %v12536_v49 = vpop.f32.mrb[169].mxu0 }
 0x89e   :  { %v12537_v33 = vadd.f32 %v12536_v49, %v12535_v30  ;;  %v12558_v16 = vpop.f32.mrb[169].mxu1  ;;  %v12538_v18 = vpop.f32.mrb[170].mxu0  ;;  %12838 = vmatpush3.bf16.msra.mxu0 %v18048_v54  ;;  %v9374_v54 = vadd.f32 %v19263_v0, %v9366_v61  ;;  %v9380_v0 = vsub.f32 %v9372_v11, %v10709_v23  ;;  %v9370_v61 = vmul.f32 0.95, %v18531_v58  ;;  %v13446_v11 = vld [vmem:[#allocation6 + $0xa8] sm:$0xff]   ;;  %v13455_v58 = vld [vmem:[#allocation6 + $0x140] sm:$0xff]  }
 0x89f   :  { %v12559_v43 = vadd.f32 %v12558_v16, %v12557_v60  ;;  %v12560_v4 = vpop.f32.mrb[170].mxu1  ;;  %12860 = vmatpush3.bf16.msra.mxu1 %v18052_v26  ;;  %v12539_v42 = vpop.f32.mrb[171].mxu0  ;;  %12839 = vmatprep.subr.bf16.mxu0 %v18055_v56  ;;  %v10688_v26 = vsel %vm8945_vm11, 1.0, %v19232_v44  ;;  %v10710_v23 = vsel %vm9165_vm1, 1.0, %v19232_v44 }
 0x8a0   :  { %v8558_v17 = vadd.f32 %v18249_v36, %v12537_v33  ;;  %v12561_v19 = vpop.f32.mrb[171].mxu1  ;;  %12861 = vmatprep.subr.bf16.mxu1 %v18063_v45  ;;  %v18608_v13 = vsub.f32 %v9153_v12, %v10688_v26  ;;  %v10711_v45 = vsel %vm9166_vm9, 1.0, %v19232_v44  ;;  %vm9388_vm14 = vcmp.gt.f32.partialorder %v9380_v0, 1.0 }
 0x8a1   :  { %v9382_v59 = vsub.f32 %v9374_v54, %v10711_v45  ;;  %vm10742_vm13 = vmpackc.low %vm9388_vm14, %vm9388_vm14  ;;  %v9373_v33 = vadd.f32 %v13871_v51, %v9365_v37  ;;  %v9376_v19 = vadd.f32 %v19242_v15, %v9368_v48  ;;  %v10708_v51 = vsel %vm9163_vm0, 1.0, %v19232_v44  ;;  %v13466_v37 = vld [vmem:[#allocation6 + $0x190] sm:$0xff]   ;;  %v13470_v48 = vld [vmem:[#allocation6 + $0x198] sm:$0xff]  }
 0x8a2   :  { %v18605_v56 = vadd.f32 %v12559_v43, %v8558_v17  ;;  %12840 = vmatpush3.bf16.msra.mxu0 %v18077_v27  ;;  %vm9169_vm11 = vcmp.gt.f32.partialorder %v18608_v13, 1.0  ;;  %v13423_v27 = vld [vmem:[#allocation6 + $0x40] sm:$0xff]   ;;  %v13445_v43 = vld [vmem:[#allocation6 + $0x28] sm:$0xff]   ;;  %v13447_v17 = vld [vmem:[#allocation6 + $0x70] sm:$0xff]   ;;  %v9378_v0 = vadd.f32 %v19244_v31, %v9370_v61  ;;  %v9379_v45 = vsub.f32 %v9371_v53, %v10708_v51 }
 0x8a3   :  { %12862 = vmatpush3.bf16.msra.mxu1 %v18085_v25  ;;  %12841 = vmatprep.subr.bf16.mxu0 %v18088_v10  ;;  %v13424_v25 = vld [vmem:[#allocation6 + $0xc0] sm:$0xff]   ;;  %vm9390_vm9 = vcmp.gt.f32.partialorder %v9382_v59, 1.0  ;;  %vm10730_vm12 = vmpackc.low %vm9169_vm11, %vm9169_vm11  ;;  %v9381_v59 = vsub.f32 %v9373_v33, %v10710_v23  ;;  %v9384_v7 = vsub.f32 %v9376_v19, %v10713_v52  ;;  %v10715_v31 = vsel %vm9170_vm5, 1.0, %v19232_v44  ;;  %v13475_v33 = vld [vmem:[#allocation6 + $0x168] sm:$0xff]  }
 0x8a4   :  { %12863 = vmatprep.subr.bf16.mxu1 %v18093_v8  ;;  %v13425_v10 = vld [vmem:[#allocation6] sm:$0xff]   ;;  %vm10746_vm15 = vmpackc.low %vm9390_vm9, %vm9390_vm9  ;;  %vm18659_vm0 = vcmp.gt.f32.partialorder %v9379_v45, 1.0  ;;  %v9367_v61 = vmul.f32 0.95, %v18603_v47  ;;  %v13479_v23 = vld [vmem:[#allocation6 + $0x170] sm:$0xff]  }
 0x8a5   :  { %v13426_v8 = vld [vmem:[#allocation6 + $0x80] sm:$0xff]   ;;  %vm9389_vm1 = vcmp.gt.f32.partialorder %v9381_v59, 1.0  ;;  %vm9392_vm2 = vcmp.gt.f32.partialorder %v9384_v7, 1.0  ;;  %vm10744_vm5 = vmpackc.low %vm18659_vm0, %vm18659_vm0  ;;  %v13480_v59 = vld [vmem:[#allocation6 + $0x1f0] sm:$0xff]  }
 0x8a6   :  { %12842 = vmatpush3.bf16.msra.mxu0 %v18099_v38  ;;  %v13427_v38 = vld [vmem:[#allocation6 + $0x48] sm:$0xff]   ;;  %vm10748_vm3 = vmpackc.low %vm9389_vm1, %vm9389_vm1  ;;  %v13474_v53 = vld [vmem:[#allocation6 + $0x1a0] sm:$0xff]  }
 0x8a7   :  { %12864 = vmatpush3.bf16.msra.mxu1 %v18103_v2  ;;  %12871 = vmatprep.subr.bf16.mxu0 %v13423_v27  ;;  %v13428_v2 = vld [vmem:[#allocation6 + $0xc8] sm:$0xff]   ;;  %v13449_v27 = vld [vmem:[#allocation6 + $0x30] sm:$0xff]   ;;  %vm10750_vm7 = vmpackc.low %vm9392_vm2, %vm9392_vm2 }
 0x8a8   :  { %12893 = vmatprep.subr.bf16.mxu1 %v13424_v25  ;;  %v13450_v25 = vld [vmem:[#allocation6 + $0xb0] sm:$0xff]   ;;  %v13484_v7 = vld [vmem:[#allocation6 + $0x1f8] sm:$0xff]  }
 0x8a9   :  { %10727 = vmatmul.mubr.msk.bf16.vlgmr.msra.gmra.mrb[196].mxu0 %vm10726_vm10, %v19212_v14  ;;  %v13486_v47 = vld [vmem:[#allocation6 + $0x1b8] sm:$0xff]  }
 0x8aa   :  { %10731 = vmatmul.mubr.msk.bf16.vlgmr.msra.gmra.mrb[196].mxu1 %vm10730_vm12, %v19212_v14  ;;  %12872 = vmatpush3.bf16.msra.mxu0 %v13425_v10  ;;  %v13451_v10 = vld [vmem:[#allocation6 + $0x78] sm:$0xff]  }
 0x8ab   :  { %10743 = vmatprep.mubr.msk.bf16.mxu0 %vm10742_vm13, %v19212_v14  ;;  %12894 = vmatpush3.bf16.msra.mxu1 %v13426_v8 }
 0x8ac   :  { %10747 = vmatprep.mubr.msk.bf16.mxu1 %vm10746_vm15, %v19212_v14  ;;  %12873 = vmatprep.subr.bf16.mxu0 %v13427_v38  ;;  %v13452_v38 = vld [vmem:[#allocation6 + $0xf8] sm:$0xff]  }
 0x8ad   :  { %12895 = vmatprep.subr.bf16.mxu1 %v13428_v2  ;;  %v9386_v2 = vsub.f32 %v9378_v0, %v10715_v31  ;;  %v13485_v31 = vld [vmem:[#allocation6 + $0x138] sm:$0xff]  }
 0x8ae   :  { %12874 = vmatpush3.bf16.msra.mxu0 %v13429_v32  ;;  %v10628_v32 = vsel %vm8462_vm4, 1.0, %v19232_v44 }
 0x8af   :  { %12896 = vmatpush3.bf16.msra.mxu1 %v13430_v22  ;;  %12875 = vmatprep.subr.bf16.mxu0 %v13431_v6  ;;  %v13453_v6 = vld [vmem:[#allocation6 + $0x38] sm:$0xff]   ;;  %vm9394_vm6 = vcmp.gt.f32.partialorder %v9386_v2, 1.0 }
 0x8b0   :  { %12897 = vmatprep.subr.bf16.mxu1 %v13432_v40  ;;  %v13454_v40 = vld [vmem:[#allocation6 + $0xb8] sm:$0xff]   ;;  %vm10754_vm14 = vmpackc.low %vm9394_vm6, %vm9394_vm6 }
 0x8b2   :  { %12876 = vmatpush3.bf16.msra.mxu0 %v13433_v41  ;;  %v13457_v41 = vld [vmem:[#allocation6 + $0x100] sm:$0xff]  }
 0x8b3   :  { %12898 = vmatpush3.bf16.msra.mxu1 %v13434_v62  ;;  %12877 = vmatprep.subr.bf16.mxu0 %v13435_v39  ;;  %v13458_v62 = vld [vmem:[#allocation6 + $0x180] sm:$0xff]   ;;  %v13459_v39 = vld [vmem:[#allocation6 + $0x148] sm:$0xff]  }
 0x8b4   :  { %12899 = vmatprep.subr.bf16.mxu1 %v13436_v21  ;;  %v13460_v21 = vld [vmem:[#allocation6 + $0x1c8] sm:$0xff]  }
 0x8b6   :  { %12878 = vmatpush3.bf16.msra.mxu0 %v13437_v35  ;;  %v13461_v35 = vld [vmem:[#allocation6 + $0x108] sm:$0xff]  }
 0x8b7   :  { %12900 = vmatpush3.bf16.msra.mxu1 %v13438_v5  ;;  %12879 = vmatprep.subr.bf16.mxu0 %v13439_v55  ;;  %v13462_v5 = vld [vmem:[#allocation6 + $0x188] sm:$0xff]   ;;  %v13463_v55 = vld [vmem:[#allocation6 + $0x150] sm:$0xff]  }
 0x8b8   :  { %12901 = vmatprep.subr.bf16.mxu1 %v13440_v28  ;;  %v13464_v28 = vld [vmem:[#allocation6 + $0x1d0] sm:$0xff]  }
 0x8ba   :  { %12880 = vmatpush3.bf16.msra.mxu0 %v13441_v1  ;;  %v13467_v1 = vld [vmem:[#allocation6 + $0x158] sm:$0xff]  }
 0x8bb   :  { %12902 = vmatpush3.bf16.msra.mxu1 %v13442_v9  ;;  %12881 = vmatprep.subr.bf16.mxu0 %v13443_v3  ;;  %v13468_v9 = vld [vmem:[#allocation6 + $0x1d8] sm:$0xff]  }
 0x8bc   :  { %v12579_v30 = vpop.f32.mrb[172].mxu0  ;;  %12903 = vmatprep.subr.bf16.mxu1 %v13444_v63  ;;  %v13469_v3 = vld [vmem:[#allocation6 + $0x118] sm:$0xff]   ;;  %v13472_v63 = vld [vmem:[#allocation6 + $0x1e0] sm:$0xff]  }
 0x8bd   :  { %v12601_v60 = vpop.f32.mrb[172].mxu1  ;;  %v12580_v49 = vpop.f32.mrb[173].mxu0 }
 0x8be   :  { %v12581_v16 = vadd.f32 %v12580_v49, %v12579_v30  ;;  %v12602_v18 = vpop.f32.mrb[173].mxu1  ;;  %v12582_v12 = vpop.f32.mrb[174].mxu0  ;;  %12882 = vmatpush3.bf16.msra.mxu0 %v13445_v43  ;;  %v13471_v30 = vld [vmem:[#allocation6 + $0x160] sm:$0xff]   ;;  %v9369_v49 = vmul.f32 0.95, %v18608_v13 }
 0x8bf   :  { %v12603_v4 = vadd.f32 %v12602_v18, %v12601_v60  ;;  %v12604_v42 = vpop.f32.mrb[174].mxu1  ;;  %12904 = vmatpush3.bf16.msra.mxu1 %v13446_v11  ;;  %v12583_v24 = vpop.f32.mrb[175].mxu0  ;;  %12883 = vmatprep.subr.bf16.mxu0 %v13447_v17  ;;  %v13473_v60 = vld [vmem:[#allocation6 + $0x120] sm:$0xff]   ;;  %v13476_v18 = vld [vmem:[#allocation6 + $0x1e8] sm:$0xff]  }
 0x8c0   :  { %v8638_v54 = vadd.f32 %v12581_v16, %v18605_v56  ;;  %v12605_v26 = vpop.f32.mrb[175].mxu1  ;;  %12905 = vmatprep.subr.bf16.mxu1 %v13448_v50  ;;  %v8683_v56 = vmul.f32 0.95, %v18535_v29  ;;  %v13456_v29 = vld [vmem:[#allocation6 + $0x1c0] sm:$0xff]   ;;  %v13477_v17 = vld [vmem:[#allocation6 + $0x128] sm:$0xff]   ;;  %v9377_v19 = vadd.f32 %v14013_v46, %v9369_v49  ;;  %v10714_v46 = vsel %vm9169_vm11, 1.0, %v19232_v44 }
 0x8c1   :  { %v13478_v50 = vld [vmem:[#allocation6 + $0x1a8] sm:$0xff]  }
 0x8c2   :  { %v8678_v15 = vadd.f32 %v12603_v4, %v8638_v54  ;;  %12884 = vmatpush3.bf16.msra.mxu0 %v13449_v27  ;;  %v9375_v4 = vadd.f32 %v14009_v57, %v9367_v61  ;;  %v10712_v57 = vsel %vm9167_vm8, 1.0, %v19232_v44  ;;  %v13481_v27 = vld [vmem:[#allocation6 + $0x130] sm:$0xff]   ;;  %v9385_v52 = vsub.f32 %v9377_v19, %v10714_v46 }
 0x8c3   :  { %12906 = vmatpush3.bf16.msra.mxu1 %v13450_v25  ;;  %12885 = vmatprep.subr.bf16.mxu0 %v13451_v10  ;;  %v13482_v25 = vld [vmem:[#allocation6 + $0x1b0] sm:$0xff]   ;;  %v13483_v10 = vld [vmem:[#allocation6 + $0x178] sm:$0xff]  }
 0x8c4   :  { %v8684_v8 = vadd.f32 %v8683_v56, %v8678_v15  ;;  %12907 = vmatprep.subr.bf16.mxu1 %v13452_v38  ;;  %v9383_v15 = vsub.f32 %v9375_v4, %v10712_v57  ;;  %vm9393_vm9 = vcmp.gt.f32.partialorder %v9385_v52, 1.0 }
 0x8c5   :  { %vm10756_vm11 = vmpackc.low %vm9393_vm9, %vm9393_vm9 }
 0x8c6   :  { %v18663_v22 = vsub.f32 %v8684_v8, %v10628_v32  ;;  %12886 = vmatpush3.bf16.msra.mxu0 %v13453_v6  ;;  %vm9391_vm10 = vcmp.gt.f32.partialorder %v9383_v15, 1.0  ;;  %v13487_v15 = vld [vmem:[#allocation7] ss:$0 sm:$0xff] }
 0x8c7   :  { %12908 = vmatpush3.bf16.msra.mxu1 %v13454_v40  ;;  %12915 = vmatprep.subr.bf16.mxu0 %v13455_v58  ;;  %vm10752_vm8 = vmpackc.low %vm9391_vm10, %vm9391_vm10 }
 0x8c8   :  { %10655 = vst [vmem:[%s18713_s5 + $0xa0] sm:$0xff] %v18663_v22  ;;  %12937 = vmatprep.subr.bf16.mxu1 %v13456_v29  ;;  %vm8686_vm12 = vcmp.gt.f32.partialorder %v18663_v22, 1.0 }
 0x8c9   :  { %10745 = vmatmul.mubr.msk.bf16.vlgmr.msra.gmra.mrb[200].mxu0 %vm10744_vm5, %v19212_v14 }
 0x8ca   :  { %10749 = vmatmul.mubr.msk.bf16.vlgmr.msra.gmra.mrb[200].mxu1 %vm10748_vm3, %v19212_v14  ;;  %12916 = vmatpush3.bf16.msra.mxu0 %v13457_v41 }
 0x8cb   :  { %10751 = vmatprep.mubr.msk.bf16.mxu0 %vm10750_vm7, %v19212_v14  ;;  %12938 = vmatpush3.bf16.msra.mxu1 %v13458_v62 }
 0x8cc   :  { %10755 = vmatprep.mubr.msk.bf16.mxu1 %vm10754_vm14, %v19212_v14  ;;  %12917 = vmatprep.subr.bf16.mxu0 %v13459_v39  ;;  %v8907_v39 = vmul.f32 0.95, %v18663_v22 }
 0x8cd   :  { %12939 = vmatprep.subr.bf16.mxu1 %v13460_v21 }
 0x8ce   :  { %12918 = vmatpush3.bf16.msra.mxu0 %v13461_v35  ;;  %v10654_v35 = vsel %vm8686_vm12, 1.0, %v19232_v44 }
 0x8cf   :  { %12940 = vmatpush3.bf16.msra.mxu1 %v13462_v5  ;;  %12919 = vmatprep.subr.bf16.mxu0 %v13463_v55 }
 0x8d0   :  { %12941 = vmatprep.subr.bf16.mxu1 %v13464_v28 }
 0x8d2   :  { %12920 = vmatpush3.bf16.msra.mxu0 %v13465_v34 }
 0x8d3   :  { %12942 = vmatpush3.bf16.msra.mxu1 %v13466_v37  ;;  %12921 = vmatprep.subr.bf16.mxu0 %v13467_v1 }
 0x8d4   :  { %12943 = vmatprep.subr.bf16.mxu1 %v13468_v9 }
 0x8d6   :  { %12922 = vmatpush3.bf16.msra.mxu0 %v13469_v3 }
 0x8d7   :  { %12944 = vmatpush3.bf16.msra.mxu1 %v13470_v48  ;;  %12923 = vmatprep.subr.bf16.mxu0 %v13471_v30 }
 0x8d8   :  { %12945 = vmatprep.subr.bf16.mxu1 %v13472_v63 }
 0x8da   :  { %12924 = vmatpush3.bf16.msra.mxu0 %v13473_v60 }
 0x8db   :  { %12946 = vmatpush3.bf16.msra.mxu1 %v13474_v53  ;;  %12925 = vmatprep.subr.bf16.mxu0 %v13475_v33 }
 0x8dc   :  { %v12623_v16 = vpop.f32.mrb[176].mxu0  ;;  %12947 = vmatprep.subr.bf16.mxu1 %v13476_v18 }
 0x8dd   :  { %v12645_v12 = vpop.f32.mrb[176].mxu1  ;;  %v12624_v43 = vpop.f32.mrb[177].mxu0 }
 0x8de   :  { %v12625_v42 = vadd.f32 %v12624_v43, %v12623_v16  ;;  %v12646_v11 = vpop.f32.mrb[177].mxu1  ;;  %v12626_v24 = vpop.f32.mrb[178].mxu0  ;;  %12926 = vmatpush3.bf16.msra.mxu0 %v13477_v17 }
 0x8df   :  { %v12647_v54 = vadd.f32 %v12646_v11, %v12645_v12  ;;  %v12648_v26 = vpop.f32.mrb[178].mxu1  ;;  %12948 = vmatpush3.bf16.msra.mxu1 %v13478_v50  ;;  %v12627_v51 = vpop.f32.mrb[179].mxu0  ;;  %12927 = vmatprep.subr.bf16.mxu0 %v13479_v23 }
 0x8e0   :  { %v8782_v0 = vadd.f32 %v18249_v36, %v12625_v42  ;;  %v12649_v45 = vpop.f32.mrb[179].mxu1  ;;  %12949 = vmatprep.subr.bf16.mxu1 %v13480_v59 }
 0x8e2   :  { %v8822_v56 = vadd.f32 %v12647_v54, %v8782_v0  ;;  %12928 = vmatpush3.bf16.msra.mxu0 %v13481_v27 }
 0x8e3   :  { %12950 = vmatpush3.bf16.msra.mxu1 %v13482_v25  ;;  %12929 = vmatprep.subr.bf16.mxu0 %v13483_v10 }
 0x8e4   :  { %12951 = vmatprep.subr.bf16.mxu1 %v13484_v7 }
 0x8e6   :  { %12930 = vmatpush3.bf16.msra.mxu0 %v13485_v31 }
 0x8e7   :  { %12952 = vmatpush3.bf16.msra.mxu1 %v13486_v47 }
 0x8e9   :  { %10753 = vmatmul.mubr.msk.bf16.vlgmr.msra.gmra.mrb[204].mxu0 %vm10752_vm8, %v19212_v14 }
 0x8ea   :  { %10757 = vmatmul.mubr.msk.bf16.vlgmr.msra.gmra.mrb[204].mxu1 %vm10756_vm11, %v19212_v14 }
 0x8fc   :  { %v12667_v13 = vpop.f32.mrb[180].mxu0 }
 0x8fd   :  { %v12689_v8 = vpop.f32.mrb[180].mxu1  ;;  %v12668_v38 = vpop.f32.mrb[181].mxu0 }
 0x8fe   :  { %v12669_v2 = vadd.f32 %v12668_v38, %v12667_v13  ;;  %v12690_v32 = vpop.f32.mrb[181].mxu1  ;;  %v12670_v20 = vpop.f32.mrb[182].mxu0 }
 0x8ff   :  { %v12691_v6 = vadd.f32 %v12690_v32, %v12689_v8  ;;  %v12692_v40 = vpop.f32.mrb[182].mxu1  ;;  %v12671_v58 = vpop.f32.mrb[183].mxu0 }
 0x900   :  { %v8862_v29 = vadd.f32 %v12669_v2, %v8822_v56  ;;  %v12693_v41 = vpop.f32.mrb[183].mxu1 }
 0x902   :  { %v8902_v62 = vadd.f32 %v12691_v6, %v8862_v29 }
 0x904   :  { %v8908_v21 = vadd.f32 %v8907_v39, %v8902_v62 }
 0x906   :  { %v8909_v14 = vsub.f32 %v8908_v21, %v10654_v35 }
 0x908   :  { %10681 = vst [vmem:[%s18713_s5 + $0xa8] sm:$0xff] %v8909_v14  ;;  %vm8910_vm13 = vcmp.gt.f32.partialorder %v8909_v14, 1.0  ;;  %v9131_v24 = vmul.f32 0.95, %v8909_v14 }
 0x909   :  { %v10680_v19 = vsel %vm8910_vm13, 1.0, %v19232_v44 }
 0x91c   :  { %v12711_v5 = vpop.f32.mrb[184].mxu0 }
 0x91d   :  { %v12733_v55 = vpop.f32.mrb[184].mxu1  ;;  %v12712_v28 = vpop.f32.mrb[185].mxu0 }
 0x91e   :  { %v12713_v34 = vadd.f32 %v12712_v28, %v12711_v5  ;;  %v12734_v37 = vpop.f32.mrb[185].mxu1  ;;  %v12714_v1 = vpop.f32.mrb[186].mxu0 }
 0x91f   :  { %v12735_v9 = vadd.f32 %v12734_v37, %v12733_v55  ;;  %v12736_v3 = vpop.f32.mrb[186].mxu1  ;;  %v12715_v48 = vpop.f32.mrb[187].mxu0 }
 0x920   :  { %v9006_v30 = vadd.f32 %v18249_v36, %v12713_v34  ;;  %v12737_v22 = vpop.f32.mrb[187].mxu1 }
 0x922   :  { %v9046_v63 = vadd.f32 %v12735_v9, %v9006_v30 }
 0x93c   :  { %v12755_v61 = vpop.f32.mrb[188].mxu0 }
 0x93d   :  { %v12777_v60 = vpop.f32.mrb[188].mxu1  ;;  %v12756_v49 = vpop.f32.mrb[189].mxu0 }
 0x93e   :  { %v12757_v53 = vadd.f32 %v12756_v49, %v12755_v61  ;;  %v12778_v33 = vpop.f32.mrb[189].mxu1  ;;  %v12758_v16 = vpop.f32.mrb[190].mxu0 }
 0x93f   :  { %v12779_v18 = vadd.f32 %v12778_v33, %v12777_v60  ;;  %v12780_v12 = vpop.f32.mrb[190].mxu1  ;;  %v12759_v43 = vpop.f32.mrb[191].mxu0 }
 0x940   :  { %v9086_v4 = vadd.f32 %v12757_v53, %v9046_v63  ;;  %v12781_v42 = vpop.f32.mrb[191].mxu1 }
 0x942   :  { %v9126_v11 = vadd.f32 %v12779_v18, %v9086_v4 }
 0x944   :  { %v9132_v17 = vadd.f32 %v9131_v24, %v9126_v11 }
 0x946   :  { %v9133_v36 = vsub.f32 %v9132_v17, %v10680_v19 }
 0x948   :  { %10707 = vst [vmem:[%s18713_s5 + $0xb0] sm:$0xff] %v9133_v36  ;;  %vm9134_vm15 = vcmp.gt.f32.partialorder %v9133_v36, 1.0  ;;  %v9355_v6 = vmul.f32 0.95, %v9133_v36 }
 0x949   :  { %v10706_v58 = vsel %vm9134_vm15, 1.0, %v19232_v44 }
 0x95c   :  { %v12799_v54 = vpop.f32.mrb[192].mxu0 }
 0x95d   :  { %v12821_v26 = vpop.f32.mrb[192].mxu1  ;;  %v12800_v50 = vpop.f32.mrb[193].mxu0 }
 0x95e   :  { %v12801_v51 = vadd.f32 %v12800_v50, %v12799_v54  ;;  %v12822_v23 = vpop.f32.mrb[193].mxu1  ;;  %v12802_v0 = vpop.f32.mrb[194].mxu0 }
 0x95f   :  { %v12823_v45 = vadd.f32 %v12822_v23, %v12821_v26  ;;  %v12824_v59 = vpop.f32.mrb[194].mxu1  ;;  %v12803_v57 = vpop.f32.mrb[195].mxu0 }
 0x960   :  { %v9230_v46 = vadd.f32 %v13487_v15, %v12801_v51  ;;  %v12825_v56 = vpop.f32.mrb[195].mxu1 }
 0x962   :  { %v9270_v27 = vadd.f32 %v12823_v45, %v9230_v46 }
 0x97c   :  { %v12843_v52 = vpop.f32.mrb[196].mxu0 }
 0x97d   :  { %v12865_v25 = vpop.f32.mrb[196].mxu1  ;;  %v12844_v10 = vpop.f32.mrb[197].mxu0 }
 0x97e   :  { %v12845_v7 = vadd.f32 %v12844_v10, %v12843_v52  ;;  %v12866_v31 = vpop.f32.mrb[197].mxu1  ;;  %v12846_v47 = vpop.f32.mrb[198].mxu0 }
 0x97f   :  { %v12867_v13 = vadd.f32 %v12866_v31, %v12865_v25  ;;  %v12868_v8 = vpop.f32.mrb[198].mxu1  ;;  %v12847_v38 = vpop.f32.mrb[199].mxu0 }
 0x980   :  { %v9310_v2 = vadd.f32 %v12845_v7, %v9270_v27  ;;  %v12869_v32 = vpop.f32.mrb[199].mxu1 }
 0x982   :  { %v9350_v20 = vadd.f32 %v12867_v13, %v9310_v2 }
 0x984   :  { %v9356_v40 = vadd.f32 %v9355_v6, %v9350_v20 }
 0x986   :  { %v9357_v29 = vsub.f32 %v9356_v40, %v10706_v58 }
 0x988   :  { %10733 = vst [vmem:[%s18713_s5 + $0xb8] sm:$0xff] %v9357_v29  ;;  %vm9358_vm4 = vcmp.gt.f32.partialorder %v9357_v29, 1.0  ;;  %v9579_v18 = vmul.f32 0.95, %v9357_v29 }
 0x989   :  { %v10732_v43 = vsel %vm9358_vm4, 1.0, %v19232_v44 }
 0x99c   :  { %v12887_v41 = vpop.f32.mrb[200].mxu0 }
 0x99d   :  { %v12909_v62 = vpop.f32.mrb[200].mxu1  ;;  %v12888_v39 = vpop.f32.mrb[201].mxu0 }
 0x99e   :  { %v12889_v21 = vadd.f32 %v12888_v39, %v12887_v41  ;;  %v12910_v35 = vpop.f32.mrb[201].mxu1  ;;  %v12890_v14 = vpop.f32.mrb[202].mxu0 }
 0x99f   :  { %v12911_v5 = vadd.f32 %v12910_v35, %v12909_v62  ;;  %v12912_v55 = vpop.f32.mrb[202].mxu1  ;;  %v12891_v28 = vpop.f32.mrb[203].mxu0 }
 0x9a0   :  { %v9454_v34 = vadd.f32 %v13487_v15, %v12889_v21  ;;  %v12913_v37 = vpop.f32.mrb[203].mxu1 }
 0x9a2   :  { %v9494_v1 = vadd.f32 %v12911_v5, %v9454_v34 }
 0x9bc   :  { %v12931_v9 = vpop.f32.mrb[204].mxu0 }
 0x9bd   :  { %v12953_v3 = vpop.f32.mrb[204].mxu1  ;;  %v12932_v48 = vpop.f32.mrb[205].mxu0 }
 0x9be   :  { %v12933_v30 = vadd.f32 %v12932_v48, %v12931_v9  ;;  %v12954_v22 = vpop.f32.mrb[205].mxu1  ;;  %v12934_v63 = vpop.f32.mrb[206].mxu0 }
 0x9bf   :  { %v12955_v61 = vadd.f32 %v12954_v22, %v12953_v3  ;;  %v12956_v60 = vpop.f32.mrb[206].mxu1  ;;  %v12935_v49 = vpop.f32.mrb[207].mxu0 }
 0x9c0   :  { %v9534_v53 = vadd.f32 %v12933_v30, %v9494_v1  ;;  %v12957_v33 = vpop.f32.mrb[207].mxu1 }
 0x9c2   :  { %v9574_v16 = vadd.f32 %v12955_v61, %v9534_v53 }
 0x9c4   :  { %v9580_v12 = vadd.f32 %v9579_v18, %v9574_v16 }
 0x9c6   :  { %v9581_v4 = vsub.f32 %v9580_v12, %v10732_v43 }
 0x9c8   :  { %10758 = vst [vmem:[%s18713_s5 + $0xc0] sm:$0xff] %v9581_v4 }
 0x9c9   :  { %9588 = vsyncpa [#allocation3], 1 }
 0x9ca   :  { %9589 = vsyncpa [#allocation5], 1 }
 0x9cb   :  { %9590 = vsyncpa [#allocation8], 1 }

</bundles_post_ra>
